<compile_context>
chip_gen: v6e
topology: v6e:2x2x1
jax: 0.10.0
libtpu: 0.0.40
codegen_flags: <defaults>
</compile_context>

<pallas_src>
import math

import numpy as np
import jax
import jax.numpy as jnp
from jax import lax
from jax.experimental import pallas as pl
from jax.experimental.pallas import tpu as pltpu

# ----------------------------------------------------------------------------------
# configuration (mirrors the PyTorch __init__ with TPU-friendly small sizes;
# ndf must be divisible by the 8 attention heads)
# ----------------------------------------------------------------------------------
INPUT_NC = 3
NDF = 64            # embed_dim of the two MultiheadAttention blocks
PATCH_SIZE = 16
GRAM_DIM = 16       # gram_matrix_dim
NUM_CLASSES = 10
NUM_HEADS = 8
HEAD_DIM = NDF // NUM_HEADS
KSIZE = 4
PAD = 1
POOL_OUT = 4
EPS = 1e-5


def build_conv_config(input_nc, ndf, patch_size):
    """Reproduce the layer-construction loop of the PyTorch __init__."""
    convs = []
    num_filters = ndf
    in_ch = input_nc
    rf = float(patch_size)
    while rf > 4 and num_filters <= 512:
        convs.append((in_ch, num_filters, 2))     # conv{i}: k=4, s=2, p=1 (+ norm + relu)
        in_ch = num_filters
        num_filters *= 2
        rf /= 2.0
    convs.append((in_ch, num_filters, 1))         # final_conv: k=4, s=1, p=1 (+ norm + relu)
    convs.append((num_filters, ndf, 1))           # final_conv_ndf: k=4, s=1, p=1
    return convs


CONV_CFG = build_conv_config(INPUT_NC, NDF, PATCH_SIZE)   # [(3,64,2),(64,128,2),(128,256,1),(256,64,1)]
LSEQ = len(CONV_CFG)                                      # 4 conv layers == attention sequence length


def _conv_out(h, stride):
    return (h + 2 * PAD - KSIZE) // stride + 1


def _round_up(v, m):
    return -(-v // m) * m


SPATIAL = []            # (in_spatial, out_spatial) per layer
_h = PATCH_SIZE
for (_ci, _co, _s) in CONV_CFG:
    _ho = _conv_out(_h, _s)
    SPATIAL.append((_h, _ho))
    _h = _ho                                           # 16->8->4->3->2

HWI = [hin * hin for (hin, _ho) in SPATIAL]            # [256, 64, 16, 9]
HWO = [ho * ho for (_hi, ho) in SPATIAL]               # [64, 16, 9, 4]
HWO_PAD = [_round_up(h, 8) for h in HWO]               # [64, 16, 16, 8]  (sublane-aligned tap blocks)
COUT = [c for (_ci, c, _s) in CONV_CFG]                # [64, 128, 256, 64]
# Channels as STORED (layers feeding a later gather are padded up to a lane multiple):
COUT_STORE = [_round_up(c, 128) if i < LSEQ - 1 else c for i, c in enumerate(COUT)]  # [128,128,256,64]

PATCH_SCRATCH_SHAPE = (max(HWO_PAD[1:]), KSIZE * KSIZE * max(COUT_STORE[:-1]))       # (16, 4096)


# ----------------------------------------------------------------------------------
# constant matrices: stacked im2col gather (zero padding folded in) + adaptive pooling
# ----------------------------------------------------------------------------------
def build_gather_stacked(hin, hout, hout_flat_pad, stride):
    """S[t*hout_flat_pad + (ho*hout+wo), hi*hin+wi] = 1 where tap t reads that pixel."""
    hwi = hin * hin
    S = np.zeros((KSIZE * KSIZE * hout_flat_pad, hwi), dtype=np.float32)
    for ki in range(KSIZE):
        for kj in range(KSIZE):
            t = ki * KSIZE + kj
            for ho in range(hout):
                hi = stride * ho + ki - PAD
                if hi < 0 or hi >= hin:
                    continue
                for wo in range(hout):
                    wi = stride * wo + kj - PAD
                    if wi < 0 or wi >= hin:
                        continue
                    S[t * hout_flat_pad + ho * hout + wo, hi * hin + wi] = 1.0
    return S


def build_pool(hin, out=POOL_OUT):
    """P[(a*out+b), h*hin+w] averaging matrix replicating F.adaptive_avg_pool2d."""
    Ph = np.zeros((out, hin), np.float32)
    for i in range(out):
        start = (i * hin) // out
        end = -((-(i + 1) * hin) // out)          # ceil((i+1)*hin/out)
        Ph[i, start:end] = 1.0 / float(end - start)
    P = np.einsum("ah,bw->abhw", Ph, Ph).reshape(out * out, hin * hin)
    return P.astype(np.float32)


# ----------------------------------------------------------------------------------
# in-kernel helpers
# ----------------------------------------------------------------------------------
def _layer_norm_2d(x, eps=EPS):
    """Normalize over ALL elements of a 2-D block (F.layer_norm over non-batch dims)."""
    n = float(x.shape[0] * x.shape[1])
    mu = jnp.sum(jnp.sum(x, axis=1, keepdims=True), axis=0, keepdims=True) / n
    d = x - mu
    var = jnp.sum(jnp.sum(d * d, axis=1, keepdims=True), axis=0, keepdims=True) / n
    return d * lax.rsqrt(var + eps)


def _const_spec(arr):
    rank = arr.ndim
    return pl.BlockSpec(tuple(arr.shape), lambda n, _r=rank: (0,) * _r)


# ----------------------------------------------------------------------------------
# single fused kernel: 4 conv blocks (conv + InstanceNorm + ReLU + gram branch)
#                      + feature_projection + 2x MultiheadAttention + mean + classifier
# ----------------------------------------------------------------------------------
def _fused_kernel(*refs):
    pos = 0
    x_ref = refs[pos]
    pos += 1
    layer_refs = []
    for i in range(LSEQ):
        n = 5 if i == 0 else 6
        layer_refs.append(refs[pos:pos + n])
        pos += n
    (selb_ref, dmask_ref, hmask_ref, replq_ref, coll_ref,
     fw_ref, fb_ref,
     a1w_ref, a1b_ref, o1w_ref, o1b_ref,
     a2w_ref, a2b_ref, o2w_ref, o2b_ref,
     cw_ref, cb_ref) = refs[pos:pos + 17]
    pos += 17
    emb_ref, out_ref = refs[pos], refs[pos + 1]
    patch_ref, gstack_ref = refs[pos + 2], refs[pos + 3]

    # ---------------- feature extractor (4 conv layers, all in VMEM) ----------------
    y_bf16 = x_ref[0]                                     # layer-0 im2col patches (64, 48) bf16
    for i in range(LSEQ):
        hwo = HWO[i]
        if i == 0:
            w_ref, b_ref, pw_ref, pb_ref, pool_ref = layer_refs[0]
            patches = y_bf16                              # im2col done once in the wrapper
        else:
            s_ref, w_ref, b_ref, pw_ref, pb_ref, pool_ref = layer_refs[i]
            hwo_pad = HWO_PAD[i]
            cs = COUT_STORE[i - 1]                        # stored in-channels (lane aligned)
            # one stacked gather matmul for all 16 taps (padding baked into the 0/1 matrix)
            g = jnp.dot(s_ref[...], y_bf16, preferred_element_type=jnp.float32)
            g = g.astype(jnp.bfloat16)                    # (16*hwo_pad, cs)
            # assemble (hwo_pad, 16*cs) im2col patches via aligned scratch stores
            for t in range(KSIZE * KSIZE):
                patch_ref[0:hwo_pad, t * cs:(t + 1) * cs] = g[t * hwo_pad:(t + 1) * hwo_pad, :]
            patches = patch_ref[0:hwo_pad, 0:KSIZE * KSIZE * cs]
        # single big-K conv matmul (bf16 x bf16, f32 accumulation)
        yraw = jnp.dot(patches, w_ref[...], preferred_element_type=jnp.float32)
        yraw = yraw[0:hwo, :] + b_ref[...]                # raw conv output (hwo, cout_store)

        # ---- gram branch (uses the RAW conv output, like the PyTorch module) ----
        p = jnp.dot(yraw.astype(jnp.bfloat16), pw_ref[...],
                    preferred_element_type=jnp.float32) + pb_ref[...]       # (hwo, 16)
        p = _layer_norm_2d(p)                                               # LN over (G,H,W)
        pooled = jnp.dot(pool_ref[...], p, preferred_element_type=jnp.float32)   # (16, 16)
        pooled = _layer_norm_2d(pooled)                                     # LN over (G,4,4)
        gram = jnp.dot(pooled.T, pooled, preferred_element_type=jnp.float32)     # (G, G)
        gram = gram * (1.0 / (float(POOL_OUT * POOL_OUT) + 1e-6))
        # lane-dense flatten of the gram matrix via constant 0/1 select + mask + row-sum
        gwide = jnp.dot(gram, selb_ref[...], preferred_element_type=jnp.float32)  # (16, 256)
        gstack_ref[i:i + 1, :] = jnp.sum(gwide * dmask_ref[...], axis=0, keepdims=True)

        # ---- main path: InstanceNorm2d(affine=False) + ReLU (all but the last conv) ----
        if i < LSEQ - 1:
            mu = jnp.mean(yraw, axis=0, keepdims=True)
            var = jnp.mean(jnp.square(yraw - mu), axis=0, keepdims=True)
            y_bf16 = jnp.maximum((yraw - mu) * lax.rsqrt(var + EPS), 0.0).astype(jnp.bfloat16)

    # ---------------- head: feature_projection + 2x MHA + mean + classifier ----------------
    gall = gstack_ref[...]                                                  # (L, 256)
    xh = jnp.dot(gall, fw_ref[...], preferred_element_type=jnp.float32) + fb_ref[...]   # (L, E)

    hmask = hmask_ref[...]            # (H*L, E): lane d active for row (h, i) iff d//HEAD_DIM == h
    replq = replq_ref[...]            # (H*L, L): replicates the L query rows for every head
    coll = coll_ref[...]              # (L, H*L): sums the per-head (masked) outputs back to (L, E)
    scale = 1.0 / math.sqrt(float(HEAD_DIM))

    def mha(xin, wqkv_ref, bqkv_ref, wout_ref, bout_ref):
        qkv = jnp.dot(xin, wqkv_ref[...], preferred_element_type=jnp.float32) + bqkv_ref[...]
        q = qkv[:, :NDF] * scale
        k = qkv[:, NDF:2 * NDF]
        v = qkv[:, 2 * NDF:]
        # all heads at once: masked replication of q -> per-head scores in one matmul
        q_rep = jnp.dot(replq, q, preferred_element_type=jnp.float32) * hmask          # (H*L, E)
        s = lax.dot_general(q_rep, k, (((1,), (1,)), ((), ())),
                            preferred_element_type=jnp.float32)                        # (H*L, L)
        s = s - jnp.max(s, axis=-1, keepdims=True)
        e = jnp.exp(s)
        attn = e / jnp.sum(e, axis=-1, keepdims=True)
        av = jnp.dot(attn, v, preferred_element_type=jnp.float32) * hmask               # (H*L, E)
        o = jnp.dot(coll, av, preferred_element_type=jnp.float32)                       # (L, E)
        return jnp.dot(o, wout_ref[...], preferred_element_type=jnp.float32) + bout_ref[...]

    xh = mha(xh, a1w_ref, a1b_ref, o1w_ref, o1b_ref)      # attention_per_layer
    xh = mha(xh, a2w_ref, a2b_ref, o2w_ref, o2b_ref)      # attention_per_patch
    agg = jnp.mean(xh, axis=0, keepdims=True)             # mean over layers -> (1, E)
    emb_ref[0] = agg
    out_ref[0] = jnp.dot(agg, cw_ref[...], preferred_element_type=jnp.float32) + cb_ref[...]


# ----------------------------------------------------------------------------------
# forward pass (mirrors VariablePatchesNLayerDiscriminator_test.forward)
# ----------------------------------------------------------------------------------
def _im2col_first_layer(x):
    """NCHW (N,3,16,16) -> (N, 64, 48) bf16 im2col patches of conv0 (k=4, s=2, p=1)."""
    n = x.shape[0]
    hout = SPATIAL[0][1]
    stride = CONV_CFG[0][2]
    x_nhwc = jnp.transpose(x, (0, 2, 3, 1))
    xp = jnp.pad(x_nhwc, ((0, 0), (PAD, PAD), (PAD, PAD), (0, 0)))
    cols = []
    for ki in range(KSIZE):
        for kj in range(KSIZE):
            cols.append(xp[:,
                           ki:ki + stride * (hout - 1) + 1:stride,
                           kj:kj + stride * (hout - 1) + 1:stride, :])
    patches = jnp.concatenate(cols, axis=-1)              # (N, 8, 8, 16*3)
    return patches.reshape(n, hout * hout, KSIZE * KSIZE * INPUT_NC).astype(jnp.bfloat16)


def forward(params, x):
    n = x.shape[0]
    patches0 = _im2col_first_layer(x)

    ins = [patches0]
    in_specs = [pl.BlockSpec((1, HWO[0], KSIZE * KSIZE * INPUT_NC), lambda b: (b, 0, 0))]
    for i in range(LSEQ):
        names = ([f"conv{i}_w", f"conv{i}_b", f"proj{i}_w", f"proj{i}_b", f"P{i}"] if i == 0 else
                 [f"S{i}", f"conv{i}_w", f"conv{i}_b", f"proj{i}_w", f"proj{i}_b", f"P{i}"])
        for nm in names:
            ins.append(params[nm])
            in_specs.append(_const_spec(params[nm]))
    for nm in ("selb", "dmask", "headmask", "replq", "collapse",
               "fproj_w", "fproj_b",
               "attn_layer_in_w", "attn_layer_in_b", "attn_layer_out_w", "attn_layer_out_b",
               "attn_patch_in_w", "attn_patch_in_b", "attn_patch_out_w", "attn_patch_out_b",
               "cls_w", "cls_b"):
        ins.append(params[nm])
        in_specs.append(_const_spec(params[nm]))

    emb, logits = pl.pallas_call(
        _fused_kernel,
        out_shape=(jax.ShapeDtypeStruct((n, 1, NDF), jnp.float32),
                   jax.ShapeDtypeStruct((n, 1, NUM_CLASSES), jnp.float32)),
        grid=(n,),
        in_specs=in_specs,
        out_specs=(pl.BlockSpec((1, 1, NDF), lambda b: (b, 0, 0)),
                   pl.BlockSpec((1, 1, NUM_CLASSES), lambda b: (b, 0, 0))),
        scratch_shapes=[pltpu.VMEM(PATCH_SCRATCH_SHAPE, jnp.bfloat16),            # im2col patches
                        pltpu.VMEM((LSEQ, GRAM_DIM * GRAM_DIM), jnp.float32)],    # stacked flat grams
        compiler_params=pltpu.CompilerParams(
            dimension_semantics=("parallel",),            # batch split across TCs on v7x
            vmem_limit_bytes=32 * 1024 * 1024),
    )(*ins)
    # TODO(synk): NaN-detection prints / conditional nan_to_num diagnostics are skipped;
    #             self.gram_norms side-state (get_gram_norms) is not part of the returned outputs.
    return emb.reshape(n, NDF), logits.reshape(n, NUM_CLASSES)


# ----------------------------------------------------------------------------------
# deterministic parameter init (weights stored in kernel-friendly layouts)
# ----------------------------------------------------------------------------------
def init_params(key):
    params = {}
    keys = iter(jax.random.split(key, 64))
    for i, (cin, cout, stride) in enumerate(CONV_CFG):
        hin, hout = SPATIAL[i]
        cout_store = COUT_STORE[i]
        cin_tap = INPUT_NC if i == 0 else COUT_STORE[i - 1]    # stored per-tap in-channels
        bound = 1.0 / math.sqrt(cin * KSIZE * KSIZE)
        w_real = np.asarray(jax.random.uniform(next(keys), (KSIZE * KSIZE, cin, cout),
                                               jnp.float32, -bound, bound))
        w = np.zeros((KSIZE * KSIZE * cin_tap, cout_store), np.float32)
        for t in range(KSIZE * KSIZE):
            w[t * cin_tap:t * cin_tap + cin, :cout] = w_real[t]
        params[f"conv{i}_w"] = jnp.asarray(w, jnp.bfloat16)
        b = np.zeros((1, cout_store), np.float32)
        b[0, :cout] = np.asarray(jax.random.uniform(next(keys), (cout,), jnp.float32, -bound, bound))
        params[f"conv{i}_b"] = jnp.asarray(b)
        pbound = 1.0 / math.sqrt(cout)
        pw = np.zeros((cout_store, GRAM_DIM), np.float32)
        pw[:cout, :] = np.asarray(jax.random.uniform(next(keys), (cout, GRAM_DIM),
                                                     jnp.float32, -pbound, pbound))
        params[f"proj{i}_w"] = jnp.asarray(pw, jnp.bfloat16)
        params[f"proj{i}_b"] = jax.random.uniform(next(keys), (1, GRAM_DIM), jnp.float32,
                                                  -pbound, pbound)
        params[f"P{i}"] = jnp.asarray(build_pool(hout), jnp.float32)
        if i > 0:
            params[f"S{i}"] = jnp.asarray(
                build_gather_stacked(hin, hout, HWO_PAD[i], stride), jnp.bfloat16)

    for name in ("attn_layer", "attn_patch"):
        abound = 1.0 / math.sqrt(NDF)
        params[f"{name}_in_w"] = jax.random.uniform(next(keys), (NDF, 3 * NDF), jnp.float32,
                                                    -abound, abound)
        params[f"{name}_in_b"] = jax.random.uniform(next(keys), (1, 3 * NDF), jnp.float32,
                                                    -abound, abound)
        params[f"{name}_out_w"] = jax.random.uniform(next(keys), (NDF, NDF), jnp.float32,
                                                     -abound, abound)
        params[f"{name}_out_b"] = jax.random.uniform(next(keys), (1, NDF), jnp.float32,
                                                     -abound, abound)
    fbound = 1.0 / math.sqrt(GRAM_DIM * GRAM_DIM)
    params["fproj_w"] = jax.random.uniform(next(keys), (GRAM_DIM * GRAM_DIM, NDF), jnp.float32,
                                           -fbound, fbound)
    params["fproj_b"] = jax.random.uniform(next(keys), (1, NDF), jnp.float32, -fbound, fbound)
    cbound = 1.0 / math.sqrt(NDF)
    params["cls_w"] = jax.random.uniform(next(keys), (NDF, NUM_CLASSES), jnp.float32,
                                         -cbound, cbound)
    params["cls_b"] = jax.random.uniform(next(keys), (1, NUM_CLASSES), jnp.float32,
                                         -cbound, cbound)

    # constant 0/1 structural matrices (gram flatten + attention head bookkeeping)
    j = np.arange(GRAM_DIM * GRAM_DIM)
    a = np.arange(GRAM_DIM)
    params["selb"] = jnp.asarray((j[None, :] % GRAM_DIM == a[:, None]).astype(np.float32))
    params["dmask"] = jnp.asarray((j[None, :] // GRAM_DIM == a[:, None]).astype(np.float32))
    rows = np.arange(NUM_HEADS * LSEQ)
    d = np.arange(NDF)
    params["headmask"] = jnp.asarray(
        ((d[None, :] // HEAD_DIM) == (rows[:, None] // LSEQ)).astype(np.float32))
    params["replq"] = jnp.asarray(
        (rows[:, None] % LSEQ == np.arange(LSEQ)[None, :]).astype(np.float32))
    params["collapse"] = jnp.asarray(
        (np.arange(LSEQ)[:, None] == rows[None, :] % LSEQ).astype(np.float32))
    return params


# ----------------------------------------------------------------------------------
if __name__ == "__main__":
    key = jax.random.PRNGKey(0)
    pkey, xkey = jax.random.split(key)
    params = init_params(pkey)
    x = jax.random.normal(xkey, (2, INPUT_NC, PATCH_SIZE, PATCH_SIZE), jnp.float32)   # NCHW

    fwd = jax.jit(forward)
    embeddings, output = fwd(params, x)
    jax.block_until_ready((embeddings, output))

    assert embeddings.shape == (2, NDF), embeddings.shape
    assert output.shape == (2, NUM_CLASSES), output.shape
    assert bool(jnp.all(jnp.isfinite(embeddings))) and bool(jnp.all(jnp.isfinite(output)))
    print("KERNEL_OK")
</pallas_src>

<mosaic_0001>
module attributes {stable_mosaic.version = 11 : i64} {
  func.func @_fused_kernel(%arg0: i32, %arg1: memref<1x64x48xbf16, #tpu.memory_space<vmem>>, %arg2: memref<48x128xbf16, #tpu.memory_space<vmem>>, %arg3: memref<1x128xf32, #tpu.memory_space<vmem>>, %arg4: memref<128x16xbf16, #tpu.memory_space<vmem>>, %arg5: memref<1x16xf32, #tpu.memory_space<vmem>>, %arg6: memref<16x64xf32, #tpu.memory_space<vmem>>, %arg7: memref<256x64xbf16, #tpu.memory_space<vmem>>, %arg8: memref<2048x128xbf16, #tpu.memory_space<vmem>>, %arg9: memref<1x128xf32, #tpu.memory_space<vmem>>, %arg10: memref<128x16xbf16, #tpu.memory_space<vmem>>, %arg11: memref<1x16xf32, #tpu.memory_space<vmem>>, %arg12: memref<16x16xf32, #tpu.memory_space<vmem>>, %arg13: memref<256x16xbf16, #tpu.memory_space<vmem>>, %arg14: memref<2048x256xbf16, #tpu.memory_space<vmem>>, %arg15: memref<1x256xf32, #tpu.memory_space<vmem>>, %arg16: memref<256x16xbf16, #tpu.memory_space<vmem>>, %arg17: memref<1x16xf32, #tpu.memory_space<vmem>>, %arg18: memref<16x9xf32, #tpu.memory_space<vmem>>, %arg19: memref<128x9xbf16, #tpu.memory_space<vmem>>, %arg20: memref<4096x64xbf16, #tpu.memory_space<vmem>>, %arg21: memref<1x64xf32, #tpu.memory_space<vmem>>, %arg22: memref<64x16xbf16, #tpu.memory_space<vmem>>, %arg23: memref<1x16xf32, #tpu.memory_space<vmem>>, %arg24: memref<16x4xf32, #tpu.memory_space<vmem>>, %arg25: memref<16x256xf32, #tpu.memory_space<vmem>>, %arg26: memref<16x256xf32, #tpu.memory_space<vmem>>, %arg27: memref<32x64xf32, #tpu.memory_space<vmem>>, %arg28: memref<32x4xf32, #tpu.memory_space<vmem>>, %arg29: memref<4x32xf32, #tpu.memory_space<vmem>>, %arg30: memref<256x64xf32, #tpu.memory_space<vmem>>, %arg31: memref<1x64xf32, #tpu.memory_space<vmem>>, %arg32: memref<64x192xf32, #tpu.memory_space<vmem>>, %arg33: memref<1x192xf32, #tpu.memory_space<vmem>>, %arg34: memref<64x64xf32, #tpu.memory_space<vmem>>, %arg35: memref<1x64xf32, #tpu.memory_space<vmem>>, %arg36: memref<64x192xf32, #tpu.memory_space<vmem>>, %arg37: memref<1x192xf32, #tpu.memory_space<vmem>>, %arg38: memref<64x64xf32, #tpu.memory_space<vmem>>, %arg39: memref<1x64xf32, #tpu.memory_space<vmem>>, %arg40: memref<64x10xf32, #tpu.memory_space<vmem>>, %arg41: memref<1x10xf32, #tpu.memory_space<vmem>>, %arg42: memref<1x1x64xf32, #tpu.memory_space<vmem>>, %arg43: memref<1x1x10xf32, #tpu.memory_space<vmem>>, %arg44: memref<16x4096xbf16, #tpu.memory_space<vmem>>, %arg45: memref<4x256xf32, #tpu.memory_space<vmem>>) attributes {dimension_semantics = [#tpu.dimension_semantics<parallel>], iteration_bounds = array<i64: 2>, scalar_prefetch = 0 : i64, scratch_operands = 2 : i64, tpu.core_type = #tpu.core_type<tc>, window_params = [{transform_indices = @transform_0, window_bounds = array<i64: 1, 64, 48>}, {pipeline_mode = #tpu.pipeline_mode<synchronous>, transform_indices = @transform_1, window_bounds = array<i64: 48, 128>}, {pipeline_mode = #tpu.pipeline_mode<synchronous>, transform_indices = @transform_2, window_bounds = array<i64: 1, 128>}, {pipeline_mode = #tpu.pipeline_mode<synchronous>, transform_indices = @transform_3, window_bounds = array<i64: 128, 16>}, {pipeline_mode = #tpu.pipeline_mode<synchronous>, transform_indices = @transform_4, window_bounds = array<i64: 1, 16>}, {pipeline_mode = #tpu.pipeline_mode<synchronous>, transform_indices = @transform_5, window_bounds = array<i64: 16, 64>}, {pipeline_mode = #tpu.pipeline_mode<synchronous>, transform_indices = @transform_6, window_bounds = array<i64: 256, 64>}, {pipeline_mode = #tpu.pipeline_mode<synchronous>, transform_indices = @transform_7, window_bounds = array<i64: 2048, 128>}, {pipeline_mode = #tpu.pipeline_mode<synchronous>, transform_indices = @transform_8, window_bounds = array<i64: 1, 128>}, {pipeline_mode = #tpu.pipeline_mode<synchronous>, transform_indices = @transform_9, window_bounds = array<i64: 128, 16>}, {pipeline_mode = #tpu.pipeline_mode<synchronous>, transform_indices = @transform_10, window_bounds = array<i64: 1, 16>}, {pipeline_mode = #tpu.pipeline_mode<synchronous>, transform_indices = @transform_11, window_bounds = array<i64: 16, 16>}, {pipeline_mode = #tpu.pipeline_mode<synchronous>, transform_indices = @transform_12, window_bounds = array<i64: 256, 16>}, {pipeline_mode = #tpu.pipeline_mode<synchronous>, transform_indices = @transform_13, window_bounds = array<i64: 2048, 256>}, {pipeline_mode = #tpu.pipeline_mode<synchronous>, transform_indices = @transform_14, window_bounds = array<i64: 1, 256>}, {pipeline_mode = #tpu.pipeline_mode<synchronous>, transform_indices = @transform_15, window_bounds = array<i64: 256, 16>}, {pipeline_mode = #tpu.pipeline_mode<synchronous>, transform_indices = @transform_16, window_bounds = array<i64: 1, 16>}, {pipeline_mode = #tpu.pipeline_mode<synchronous>, transform_indices = @transform_17, window_bounds = array<i64: 16, 9>}, {pipeline_mode = #tpu.pipeline_mode<synchronous>, transform_indices = @transform_18, window_bounds = array<i64: 128, 9>}, {pipeline_mode = #tpu.pipeline_mode<synchronous>, transform_indices = @transform_19, window_bounds = array<i64: 4096, 64>}, {pipeline_mode = #tpu.pipeline_mode<synchronous>, transform_indices = @transform_20, window_bounds = array<i64: 1, 64>}, {pipeline_mode = #tpu.pipeline_mode<synchronous>, transform_indices = @transform_21, window_bounds = array<i64: 64, 16>}, {pipeline_mode = #tpu.pipeline_mode<synchronous>, transform_indices = @transform_22, window_bounds = array<i64: 1, 16>}, {pipeline_mode = #tpu.pipeline_mode<synchronous>, transform_indices = @transform_23, window_bounds = array<i64: 16, 4>}, {pipeline_mode = #tpu.pipeline_mode<synchronous>, transform_indices = @transform_24, window_bounds = array<i64: 16, 256>}, {pipeline_mode = #tpu.pipeline_mode<synchronous>, transform_indices = @transform_25, window_bounds = array<i64: 16, 256>}, {pipeline_mode = #tpu.pipeline_mode<synchronous>, transform_indices = @transform_26, window_bounds = array<i64: 32, 64>}, {pipeline_mode = #tpu.pipeline_mode<synchronous>, transform_indices = @transform_27, window_bounds = array<i64: 32, 4>}, {pipeline_mode = #tpu.pipeline_mode<synchronous>, transform_indices = @transform_28, window_bounds = array<i64: 4, 32>}, {pipeline_mode = #tpu.pipeline_mode<synchronous>, transform_indices = @transform_29, window_bounds = array<i64: 256, 64>}, {pipeline_mode = #tpu.pipeline_mode<synchronous>, transform_indices = @transform_30, window_bounds = array<i64: 1, 64>}, {pipeline_mode = #tpu.pipeline_mode<synchronous>, transform_indices = @transform_31, window_bounds = array<i64: 64, 192>}, {pipeline_mode = #tpu.pipeline_mode<synchronous>, transform_indices = @transform_32, window_bounds = array<i64: 1, 192>}, {pipeline_mode = #tpu.pipeline_mode<synchronous>, transform_indices = @transform_33, window_bounds = array<i64: 64, 64>}, {pipeline_mode = #tpu.pipeline_mode<synchronous>, transform_indices = @transform_34, window_bounds = array<i64: 1, 64>}, {pipeline_mode = #tpu.pipeline_mode<synchronous>, transform_indices = @transform_35, window_bounds = array<i64: 64, 192>}, {pipeline_mode = #tpu.pipeline_mode<synchronous>, transform_indices = @transform_36, window_bounds = array<i64: 1, 192>}, {pipeline_mode = #tpu.pipeline_mode<synchronous>, transform_indices = @transform_37, window_bounds = array<i64: 64, 64>}, {pipeline_mode = #tpu.pipeline_mode<synchronous>, transform_indices = @transform_38, window_bounds = array<i64: 1, 64>}, {pipeline_mode = #tpu.pipeline_mode<synchronous>, transform_indices = @transform_39, window_bounds = array<i64: 64, 10>}, {pipeline_mode = #tpu.pipeline_mode<synchronous>, transform_indices = @transform_40, window_bounds = array<i64: 1, 10>}, {transform_indices = @transform_41, window_bounds = array<i64: 1, 1, 64>}, {transform_indices = @transform_42, window_bounds = array<i64: 1, 1, 10>}]} {
    %c0 = arith.constant 0 : index
    %c0_0 = arith.constant 0 : index
    %c0_1 = arith.constant 0 : index
    %0 = vector.load %arg1[%c0, %c0_0, %c0_1] : memref<1x64x48xbf16, #tpu.memory_space<vmem>>, vector<1x64x48xbf16>
    %1 = vector.shape_cast %0 : vector<1x64x48xbf16> to vector<64x48xbf16>
    %c0_2 = arith.constant 0 : index
    %c0_3 = arith.constant 0 : index
    %2 = vector.load %arg2[%c0_2, %c0_3] : memref<48x128xbf16, #tpu.memory_space<vmem>>, vector<48x128xbf16>
    %cst = arith.constant dense<0.000000e+00> : vector<64x128xf32>
    %3 = tpu.matmul %1, %2, %cst {dimension_numbers = #tpu.dot_dimension_numbers<[1], [0], [0], [1], [0, 0, 1, 1], [], []>} : vector<64x48xbf16>, vector<48x128xbf16>, vector<64x128xf32> -> vector<64x128xf32>
    %c0_4 = arith.constant 0 : index
    %c0_5 = arith.constant 0 : index
    %4 = vector.load %arg3[%c0_4, %c0_5] : memref<1x128xf32, #tpu.memory_space<vmem>>, vector<1x128xf32>
    %5 = vector.broadcast %4 : vector<1x128xf32> to vector<64x128xf32>
    %6 = arith.addf %3, %5 : vector<64x128xf32>
    %7 = arith.truncf %6 : vector<64x128xf32> to vector<64x128xbf16>
    %c0_6 = arith.constant 0 : index
    %c0_7 = arith.constant 0 : index
    %8 = vector.load %arg4[%c0_6, %c0_7] : memref<128x16xbf16, #tpu.memory_space<vmem>>, vector<128x16xbf16>
    %cst_8 = arith.constant dense<0.000000e+00> : vector<64x16xf32>
    %9 = tpu.matmul %7, %8, %cst_8 {dimension_numbers = #tpu.dot_dimension_numbers<[1], [0], [0], [1], [0, 0, 1, 1], [], []>} : vector<64x128xbf16>, vector<128x16xbf16>, vector<64x16xf32> -> vector<64x16xf32>
    %c0_9 = arith.constant 0 : index
    %c0_10 = arith.constant 0 : index
    %10 = vector.load %arg5[%c0_9, %c0_10] : memref<1x16xf32, #tpu.memory_space<vmem>>, vector<1x16xf32>
    %11 = vector.broadcast %10 : vector<1x16xf32> to vector<64x16xf32>
    %12 = arith.addf %9, %11 : vector<64x16xf32>
    %cst_11 = arith.constant dense<0.000000e+00> : vector<64xf32>
    %13 = vector.multi_reduction <add>, %12, %cst_11 [1] : vector<64x16xf32> to vector<64xf32>
    %14 = vector.shape_cast %13 : vector<64xf32> to vector<64x1xf32>
    %cst_12 = arith.constant dense<0.000000e+00> : vector<1xf32>
    %15 = vector.multi_reduction <add>, %14, %cst_12 [0] : vector<64x1xf32> to vector<1xf32>
    %16 = vector.shape_cast %15 : vector<1xf32> to vector<1x1xf32>
    %cst_13 = arith.constant 1.024000e+03 : f32
    %17 = vector.broadcast %cst_13 : f32 to vector<1x1xf32>
    %18 = arith.divf %16, %17 : vector<1x1xf32>
    %19 = vector.broadcast %18 : vector<1x1xf32> to vector<64x16xf32>
    %20 = arith.subf %12, %19 : vector<64x16xf32>
    %21 = arith.mulf %20, %20 : vector<64x16xf32>
    %cst_14 = arith.constant dense<0.000000e+00> : vector<64xf32>
    %22 = vector.multi_reduction <add>, %21, %cst_14 [1] : vector<64x16xf32> to vector<64xf32>
    %23 = vector.shape_cast %22 : vector<64xf32> to vector<64x1xf32>
    %cst_15 = arith.constant dense<0.000000e+00> : vector<1xf32>
    %24 = vector.multi_reduction <add>, %23, %cst_15 [0] : vector<64x1xf32> to vector<1xf32>
    %25 = vector.shape_cast %24 : vector<1xf32> to vector<1x1xf32>
    %cst_16 = arith.constant 1.024000e+03 : f32
    %26 = vector.broadcast %cst_16 : f32 to vector<1x1xf32>
    %27 = arith.divf %25, %26 : vector<1x1xf32>
    %cst_17 = arith.constant 9.99999974E-6 : f32
    %28 = vector.broadcast %cst_17 : f32 to vector<1x1xf32>
    %29 = arith.addf %27, %28 : vector<1x1xf32>
    %30 = math.rsqrt %29 : vector<1x1xf32>
    %31 = vector.broadcast %30 : vector<1x1xf32> to vector<64x16xf32>
    %32 = arith.mulf %20, %31 : vector<64x16xf32>
    %c0_18 = arith.constant 0 : index
    %c0_19 = arith.constant 0 : index
    %33 = vector.load %arg6[%c0_18, %c0_19] : memref<16x64xf32, #tpu.memory_space<vmem>>, vector<16x64xf32>
    %cst_20 = arith.constant dense<0.000000e+00> : vector<16x16xf32>
    %34 = tpu.matmul %33, %32, %cst_20 {dimension_numbers = #tpu.dot_dimension_numbers<[1], [0], [0], [1], [0, 0, 1, 1], [], []>} : vector<16x64xf32>, vector<64x16xf32>, vector<16x16xf32> -> vector<16x16xf32>
    %cst_21 = arith.constant dense<0.000000e+00> : vector<16xf32>
    %35 = vector.multi_reduction <add>, %34, %cst_21 [1] : vector<16x16xf32> to vector<16xf32>
    %36 = vector.shape_cast %35 : vector<16xf32> to vector<16x1xf32>
    %cst_22 = arith.constant dense<0.000000e+00> : vector<1xf32>
    %37 = vector.multi_reduction <add>, %36, %cst_22 [0] : vector<16x1xf32> to vector<1xf32>
    %38 = vector.shape_cast %37 : vector<1xf32> to vector<1x1xf32>
    %cst_23 = arith.constant 2.560000e+02 : f32
    %39 = vector.broadcast %cst_23 : f32 to vector<1x1xf32>
    %40 = arith.divf %38, %39 : vector<1x1xf32>
    %41 = vector.broadcast %40 : vector<1x1xf32> to vector<16x16xf32>
    %42 = arith.subf %34, %41 : vector<16x16xf32>
    %43 = arith.mulf %42, %42 : vector<16x16xf32>
    %cst_24 = arith.constant dense<0.000000e+00> : vector<16xf32>
    %44 = vector.multi_reduction <add>, %43, %cst_24 [1] : vector<16x16xf32> to vector<16xf32>
    %45 = vector.shape_cast %44 : vector<16xf32> to vector<16x1xf32>
    %cst_25 = arith.constant dense<0.000000e+00> : vector<1xf32>
    %46 = vector.multi_reduction <add>, %45, %cst_25 [0] : vector<16x1xf32> to vector<1xf32>
    %47 = vector.shape_cast %46 : vector<1xf32> to vector<1x1xf32>
    %cst_26 = arith.constant 2.560000e+02 : f32
    %48 = vector.broadcast %cst_26 : f32 to vector<1x1xf32>
    %49 = arith.divf %47, %48 : vector<1x1xf32>
    %cst_27 = arith.constant 9.99999974E-6 : f32
    %50 = vector.broadcast %cst_27 : f32 to vector<1x1xf32>
    %51 = arith.addf %49, %50 : vector<1x1xf32>
    %52 = math.rsqrt %51 : vector<1x1xf32>
    %53 = vector.broadcast %52 : vector<1x1xf32> to vector<16x16xf32>
    %54 = arith.mulf %42, %53 : vector<16x16xf32>
    %55 = tpu.transpose %54, [1, 0] : vector<16x16xf32> -> vector<16x16xf32>
    %cst_28 = arith.constant dense<0.000000e+00> : vector<16x16xf32>
    %56 = tpu.matmul %55, %54, %cst_28 {dimension_numbers = #tpu.dot_dimension_numbers<[1], [0], [0], [1], [0, 0, 1, 1], [], []>} : vector<16x16xf32>, vector<16x16xf32>, vector<16x16xf32> -> vector<16x16xf32>
    %cst_29 = arith.constant 0.0624999962 : f32
    %57 = vector.broadcast %cst_29 : f32 to vector<16x16xf32>
    %58 = arith.mulf %56, %57 : vector<16x16xf32>
    %c0_30 = arith.constant 0 : index
    %c0_31 = arith.constant 0 : index
    %59 = vector.load %arg25[%c0_30, %c0_31] : memref<16x256xf32, #tpu.memory_space<vmem>>, vector<16x256xf32>
    %cst_32 = arith.constant dense<0.000000e+00> : vector<16x256xf32>
    %60 = tpu.matmul %58, %59, %cst_32 {dimension_numbers = #tpu.dot_dimension_numbers<[1], [0], [0], [1], [0, 0, 1, 1], [], []>} : vector<16x16xf32>, vector<16x256xf32>, vector<16x256xf32> -> vector<16x256xf32>
    %c0_33 = arith.constant 0 : index
    %c0_34 = arith.constant 0 : index
    %61 = vector.load %arg26[%c0_33, %c0_34] : memref<16x256xf32, #tpu.memory_space<vmem>>, vector<16x256xf32>
    %62 = arith.mulf %60, %61 : vector<16x256xf32>
    %cst_35 = arith.constant dense<0.000000e+00> : vector<256xf32>
    %63 = vector.multi_reduction <add>, %62, %cst_35 [0] : vector<16x256xf32> to vector<256xf32>
    %64 = vector.shape_cast %63 : vector<256xf32> to vector<1x256xf32>
    %c0_36 = arith.constant 0 : index
    %c0_37 = arith.constant 0 : index
    %65 = vector.load %arg45[%c0_36, %c0_37] : memref<4x256xf32, #tpu.memory_space<vmem>>, vector<1x256xf32>
    tpu.vector_store %arg45[%c0_36, %c0_37], %64 {strides = array<i32>} : memref<4x256xf32, #tpu.memory_space<vmem>>, vector<1x256xf32>,
    %cst_38 = arith.constant dense<0.000000e+00> : vector<128xf32>
    %66 = vector.multi_reduction <add>, %6, %cst_38 [0] : vector<64x128xf32> to vector<128xf32>
    %67 = vector.shape_cast %66 : vector<128xf32> to vector<1x128xf32>
    %cst_39 = arith.constant 6.400000e+01 : f32
    %68 = vector.broadcast %cst_39 : f32 to vector<1x128xf32>
    %69 = arith.divf %67, %68 : vector<1x128xf32>
    %70 = vector.broadcast %69 : vector<1x128xf32> to vector<64x128xf32>
    %71 = arith.subf %6, %70 : vector<64x128xf32>
    %72 = arith.mulf %71, %71 : vector<64x128xf32>
    %cst_40 = arith.constant dense<0.000000e+00> : vector<128xf32>
    %73 = vector.multi_reduction <add>, %72, %cst_40 [0] : vector<64x128xf32> to vector<128xf32>
    %74 = vector.shape_cast %73 : vector<128xf32> to vector<1x128xf32>
    %cst_41 = arith.constant 6.400000e+01 : f32
    %75 = vector.broadcast %cst_41 : f32 to vector<1x128xf32>
    %76 = arith.divf %74, %75 : vector<1x128xf32>
    %77 = vector.broadcast %69 : vector<1x128xf32> to vector<64x128xf32>
    %78 = arith.subf %6, %77 : vector<64x128xf32>
    %cst_42 = arith.constant 9.99999974E-6 : f32
    %79 = vector.broadcast %cst_42 : f32 to vector<1x128xf32>
    %80 = arith.addf %76, %79 : vector<1x128xf32>
    %81 = math.rsqrt %80 : vector<1x128xf32>
    %82 = vector.broadcast %81 : vector<1x128xf32> to vector<64x128xf32>
    %83 = arith.mulf %78, %82 : vector<64x128xf32>
    %cst_43 = arith.constant 0.000000e+00 : f32
    %84 = vector.broadcast %cst_43 : f32 to vector<64x128xf32>
    %85 = arith.maximumf %83, %84 : vector<64x128xf32>
    %86 = arith.truncf %85 : vector<64x128xf32> to vector<64x128xbf16>
    %c0_44 = arith.constant 0 : index
    %c0_45 = arith.constant 0 : index
    %87 = vector.load %arg7[%c0_44, %c0_45] : memref<256x64xbf16, #tpu.memory_space<vmem>>, vector<256x64xbf16>
    %cst_46 = arith.constant dense<0.000000e+00> : vector<256x128xf32>
    %88 = tpu.matmul %87, %86, %cst_46 {dimension_numbers = #tpu.dot_dimension_numbers<[1], [0], [0], [1], [0, 0, 1, 1], [], []>} : vector<256x64xbf16>, vector<64x128xbf16>, vector<256x128xf32> -> vector<256x128xf32>
    %89 = arith.truncf %88 : vector<256x128xf32> to vector<256x128xbf16>
    %90 = vector.extract_strided_slice %89 {offsets = [0, 0], sizes = [16, 128], strides = [1, 1]} : vector<256x128xbf16> to vector<16x128xbf16>
    %c0_47 = arith.constant 0 : index
    %c0_48 = arith.constant 0 : index
    %91 = vector.load %arg44[%c0_47, %c0_48] : memref<16x4096xbf16, #tpu.memory_space<vmem>>, vector<16x128xbf16>
    tpu.vector_store %arg44[%c0_47, %c0_48], %90 {strides = array<i32>} : memref<16x4096xbf16, #tpu.memory_space<vmem>>, vector<16x128xbf16>,
    %92 = vector.extract_strided_slice %89 {offsets = [16, 0], sizes = [16, 128], strides = [1, 1]} : vector<256x128xbf16> to vector<16x128xbf16>
    %c0_49 = arith.constant 0 : index
    %c128 = arith.constant 128 : index
    %93 = vector.load %arg44[%c0_49, %c128] : memref<16x4096xbf16, #tpu.memory_space<vmem>>, vector<16x128xbf16>
    tpu.vector_store %arg44[%c0_49, %c128], %92 {strides = array<i32>} : memref<16x4096xbf16, #tpu.memory_space<vmem>>, vector<16x128xbf16>,
    %94 = vector.extract_strided_slice %89 {offsets = [32, 0], sizes = [16, 128], strides = [1, 1]} : vector<256x128xbf16> to vector<16x128xbf16>
    %c0_50 = arith.constant 0 : index
    %c256 = arith.constant 256 : index
    %95 = vector.load %arg44[%c0_50, %c256] : memref<16x4096xbf16, #tpu.memory_space<vmem>>, vector<16x128xbf16>
    tpu.vector_store %arg44[%c0_50, %c256], %94 {strides = array<i32>} : memref<16x4096xbf16, #tpu.memory_space<vmem>>, vector<16x128xbf16>,
    %96 = vector.extract_strided_slice %89 {offsets = [48, 0], sizes = [16, 128], strides = [1, 1]} : vector<256x128xbf16> to vector<16x128xbf16>
    %c0_51 = arith.constant 0 : index
    %c384 = arith.constant 384 : index
    %97 = vector.load %arg44[%c0_51, %c384] : memref<16x4096xbf16, #tpu.memory_space<vmem>>, vector<16x128xbf16>
    tpu.vector_store %arg44[%c0_51, %c384], %96 {strides = array<i32>} : memref<16x4096xbf16, #tpu.memory_space<vmem>>, vector<16x128xbf16>,
    %98 = vector.extract_strided_slice %89 {offsets = [64, 0], sizes = [16, 128], strides = [1, 1]} : vector<256x128xbf16> to vector<16x128xbf16>
    %c0_52 = arith.constant 0 : index
    %c512 = arith.constant 512 : index
    %99 = vector.load %arg44[%c0_52, %c512] : memref<16x4096xbf16, #tpu.memory_space<vmem>>, vector<16x128xbf16>
    tpu.vector_store %arg44[%c0_52, %c512], %98 {strides = array<i32>} : memref<16x4096xbf16, #tpu.memory_space<vmem>>, vector<16x128xbf16>,
    %100 = vector.extract_strided_slice %89 {offsets = [80, 0], sizes = [16, 128], strides = [1, 1]} : vector<256x128xbf16> to vector<16x128xbf16>
    %c0_53 = arith.constant 0 : index
    %c640 = arith.constant 640 : index
    %101 = vector.load %arg44[%c0_53, %c640] : memref<16x4096xbf16, #tpu.memory_space<vmem>>, vector<16x128xbf16>
    tpu.vector_store %arg44[%c0_53, %c640], %100 {strides = array<i32>} : memref<16x4096xbf16, #tpu.memory_space<vmem>>, vector<16x128xbf16>,
    %102 = vector.extract_strided_slice %89 {offsets = [96, 0], sizes = [16, 128], strides = [1, 1]} : vector<256x128xbf16> to vector<16x128xbf16>
    %c0_54 = arith.constant 0 : index
    %c768 = arith.constant 768 : index
    %103 = vector.load %arg44[%c0_54, %c768] : memref<16x4096xbf16, #tpu.memory_space<vmem>>, vector<16x128xbf16>
    tpu.vector_store %arg44[%c0_54, %c768], %102 {strides = array<i32>} : memref<16x4096xbf16, #tpu.memory_space<vmem>>, vector<16x128xbf16>,
    %104 = vector.extract_strided_slice %89 {offsets = [112, 0], sizes = [16, 128], strides = [1, 1]} : vector<256x128xbf16> to vector<16x128xbf16>
    %c0_55 = arith.constant 0 : index
    %c896 = arith.constant 896 : index
    %105 = vector.load %arg44[%c0_55, %c896] : memref<16x4096xbf16, #tpu.memory_space<vmem>>, vector<16x128xbf16>
    tpu.vector_store %arg44[%c0_55, %c896], %104 {strides = array<i32>} : memref<16x4096xbf16, #tpu.memory_space<vmem>>, vector<16x128xbf16>,
    %106 = vector.extract_strided_slice %89 {offsets = [128, 0], sizes = [16, 128], strides = [1, 1]} : vector<256x128xbf16> to vector<16x128xbf16>
    %c0_56 = arith.constant 0 : index
    %c1024 = arith.constant 1024 : index
    %107 = vector.load %arg44[%c0_56, %c1024] : memref<16x4096xbf16, #tpu.memory_space<vmem>>, vector<16x128xbf16>
    tpu.vector_store %arg44[%c0_56, %c1024], %106 {strides = array<i32>} : memref<16x4096xbf16, #tpu.memory_space<vmem>>, vector<16x128xbf16>,
    %108 = vector.extract_strided_slice %89 {offsets = [144, 0], sizes = [16, 128], strides = [1, 1]} : vector<256x128xbf16> to vector<16x128xbf16>
    %c0_57 = arith.constant 0 : index
    %c1152 = arith.constant 1152 : index
    %109 = vector.load %arg44[%c0_57, %c1152] : memref<16x4096xbf16, #tpu.memory_space<vmem>>, vector<16x128xbf16>
    tpu.vector_store %arg44[%c0_57, %c1152], %108 {strides = array<i32>} : memref<16x4096xbf16, #tpu.memory_space<vmem>>, vector<16x128xbf16>,
    %110 = vector.extract_strided_slice %89 {offsets = [160, 0], sizes = [16, 128], strides = [1, 1]} : vector<256x128xbf16> to vector<16x128xbf16>
    %c0_58 = arith.constant 0 : index
    %c1280 = arith.constant 1280 : index
    %111 = vector.load %arg44[%c0_58, %c1280] : memref<16x4096xbf16, #tpu.memory_space<vmem>>, vector<16x128xbf16>
    tpu.vector_store %arg44[%c0_58, %c1280], %110 {strides = array<i32>} : memref<16x4096xbf16, #tpu.memory_space<vmem>>, vector<16x128xbf16>,
    %112 = vector.extract_strided_slice %89 {offsets = [176, 0], sizes = [16, 128], strides = [1, 1]} : vector<256x128xbf16> to vector<16x128xbf16>
    %c0_59 = arith.constant 0 : index
    %c1408 = arith.constant 1408 : index
    %113 = vector.load %arg44[%c0_59, %c1408] : memref<16x4096xbf16, #tpu.memory_space<vmem>>, vector<16x128xbf16>
    tpu.vector_store %arg44[%c0_59, %c1408], %112 {strides = array<i32>} : memref<16x4096xbf16, #tpu.memory_space<vmem>>, vector<16x128xbf16>,
    %114 = vector.extract_strided_slice %89 {offsets = [192, 0], sizes = [16, 128], strides = [1, 1]} : vector<256x128xbf16> to vector<16x128xbf16>
    %c0_60 = arith.constant 0 : index
    %c1536 = arith.constant 1536 : index
    %115 = vector.load %arg44[%c0_60, %c1536] : memref<16x4096xbf16, #tpu.memory_space<vmem>>, vector<16x128xbf16>
    tpu.vector_store %arg44[%c0_60, %c1536], %114 {strides = array<i32>} : memref<16x4096xbf16, #tpu.memory_space<vmem>>, vector<16x128xbf16>,
    %116 = vector.extract_strided_slice %89 {offsets = [208, 0], sizes = [16, 128], strides = [1, 1]} : vector<256x128xbf16> to vector<16x128xbf16>
    %c0_61 = arith.constant 0 : index
    %c1664 = arith.constant 1664 : index
    %117 = vector.load %arg44[%c0_61, %c1664] : memref<16x4096xbf16, #tpu.memory_space<vmem>>, vector<16x128xbf16>
    tpu.vector_store %arg44[%c0_61, %c1664], %116 {strides = array<i32>} : memref<16x4096xbf16, #tpu.memory_space<vmem>>, vector<16x128xbf16>,
    %118 = vector.extract_strided_slice %89 {offsets = [224, 0], sizes = [16, 128], strides = [1, 1]} : vector<256x128xbf16> to vector<16x128xbf16>
    %c0_62 = arith.constant 0 : index
    %c1792 = arith.constant 1792 : index
    %119 = vector.load %arg44[%c0_62, %c1792] : memref<16x4096xbf16, #tpu.memory_space<vmem>>, vector<16x128xbf16>
    tpu.vector_store %arg44[%c0_62, %c1792], %118 {strides = array<i32>} : memref<16x4096xbf16, #tpu.memory_space<vmem>>, vector<16x128xbf16>,
    %120 = vector.extract_strided_slice %89 {offsets = [240, 0], sizes = [16, 128], strides = [1, 1]} : vector<256x128xbf16> to vector<16x128xbf16>
    %c0_63 = arith.constant 0 : index
    %c1920 = arith.constant 1920 : index
    %121 = vector.load %arg44[%c0_63, %c1920] : memref<16x4096xbf16, #tpu.memory_space<vmem>>, vector<16x128xbf16>
    tpu.vector_store %arg44[%c0_63, %c1920], %120 {strides = array<i32>} : memref<16x4096xbf16, #tpu.memory_space<vmem>>, vector<16x128xbf16>,
    %c0_64 = arith.constant 0 : index
    %c0_65 = arith.constant 0 : index
    %122 = vector.load %arg44[%c0_64, %c0_65] : memref<16x4096xbf16, #tpu.memory_space<vmem>>, vector<16x2048xbf16>
    %c0_66 = arith.constant 0 : index
    %c0_67 = arith.constant 0 : index
    %123 = vector.load %arg8[%c0_66, %c0_67] : memref<2048x128xbf16, #tpu.memory_space<vmem>>, vector<2048x128xbf16>
    %cst_68 = arith.constant dense<0.000000e+00> : vector<16x128xf32>
    %124 = tpu.matmul %122, %123, %cst_68 {dimension_numbers = #tpu.dot_dimension_numbers<[1], [0], [0], [1], [0, 0, 1, 1], [], []>} : vector<16x2048xbf16>, vector<2048x128xbf16>, vector<16x128xf32> -> vector<16x128xf32>
    %c0_69 = arith.constant 0 : index
    %c0_70 = arith.constant 0 : index
    %125 = vector.load %arg9[%c0_69, %c0_70] : memref<1x128xf32, #tpu.memory_space<vmem>>, vector<1x128xf32>
    %126 = vector.broadcast %125 : vector<1x128xf32> to vector<16x128xf32>
    %127 = arith.addf %124, %126 : vector<16x128xf32>
    %128 = arith.truncf %127 : vector<16x128xf32> to vector<16x128xbf16>
    %c0_71 = arith.constant 0 : index
    %c0_72 = arith.constant 0 : index
    %129 = vector.load %arg10[%c0_71, %c0_72] : memref<128x16xbf16, #tpu.memory_space<vmem>>, vector<128x16xbf16>
    %cst_73 = arith.constant dense<0.000000e+00> : vector<16x16xf32>
    %130 = tpu.matmul %128, %129, %cst_73 {dimension_numbers = #tpu.dot_dimension_numbers<[1], [0], [0], [1], [0, 0, 1, 1], [], []>} : vector<16x128xbf16>, vector<128x16xbf16>, vector<16x16xf32> -> vector<16x16xf32>
    %c0_74 = arith.constant 0 : index
    %c0_75 = arith.constant 0 : index
    %131 = vector.load %arg11[%c0_74, %c0_75] : memref<1x16xf32, #tpu.memory_space<vmem>>, vector<1x16xf32>
    %132 = vector.broadcast %131 : vector<1x16xf32> to vector<16x16xf32>
    %133 = arith.addf %130, %132 : vector<16x16xf32>
    %cst_76 = arith.constant dense<0.000000e+00> : vector<16xf32>
    %134 = vector.multi_reduction <add>, %133, %cst_76 [1] : vector<16x16xf32> to vector<16xf32>
    %135 = vector.shape_cast %134 : vector<16xf32> to vector<16x1xf32>
    %cst_77 = arith.constant dense<0.000000e+00> : vector<1xf32>
    %136 = vector.multi_reduction <add>, %135, %cst_77 [0] : vector<16x1xf32> to vector<1xf32>
    %137 = vector.shape_cast %136 : vector<1xf32> to vector<1x1xf32>
    %cst_78 = arith.constant 2.560000e+02 : f32
    %138 = vector.broadcast %cst_78 : f32 to vector<1x1xf32>
    %139 = arith.divf %137, %138 : vector<1x1xf32>
    %140 = vector.broadcast %139 : vector<1x1xf32> to vector<16x16xf32>
    %141 = arith.subf %133, %140 : vector<16x16xf32>
    %142 = arith.mulf %141, %141 : vector<16x16xf32>
    %cst_79 = arith.constant dense<0.000000e+00> : vector<16xf32>
    %143 = vector.multi_reduction <add>, %142, %cst_79 [1] : vector<16x16xf32> to vector<16xf32>
    %144 = vector.shape_cast %143 : vector<16xf32> to vector<16x1xf32>
    %cst_80 = arith.constant dense<0.000000e+00> : vector<1xf32>
    %145 = vector.multi_reduction <add>, %144, %cst_80 [0] : vector<16x1xf32> to vector<1xf32>
    %146 = vector.shape_cast %145 : vector<1xf32> to vector<1x1xf32>
    %cst_81 = arith.constant 2.560000e+02 : f32
    %147 = vector.broadcast %cst_81 : f32 to vector<1x1xf32>
    %148 = arith.divf %146, %147 : vector<1x1xf32>
    %cst_82 = arith.constant 9.99999974E-6 : f32
    %149 = vector.broadcast %cst_82 : f32 to vector<1x1xf32>
    %150 = arith.addf %148, %149 : vector<1x1xf32>
    %151 = math.rsqrt %150 : vector<1x1xf32>
    %152 = vector.broadcast %151 : vector<1x1xf32> to vector<16x16xf32>
    %153 = arith.mulf %141, %152 : vector<16x16xf32>
    %c0_83 = arith.constant 0 : index
    %c0_84 = arith.constant 0 : index
    %154 = vector.load %arg12[%c0_83, %c0_84] : memref<16x16xf32, #tpu.memory_space<vmem>>, vector<16x16xf32>
    %cst_85 = arith.constant dense<0.000000e+00> : vector<16x16xf32>
    %155 = tpu.matmul %154, %153, %cst_85 {dimension_numbers = #tpu.dot_dimension_numbers<[1], [0], [0], [1], [0, 0, 1, 1], [], []>} : vector<16x16xf32>, vector<16x16xf32>, vector<16x16xf32> -> vector<16x16xf32>
    %cst_86 = arith.constant dense<0.000000e+00> : vector<16xf32>
    %156 = vector.multi_reduction <add>, %155, %cst_86 [1] : vector<16x16xf32> to vector<16xf32>
    %157 = vector.shape_cast %156 : vector<16xf32> to vector<16x1xf32>
    %cst_87 = arith.constant dense<0.000000e+00> : vector<1xf32>
    %158 = vector.multi_reduction <add>, %157, %cst_87 [0] : vector<16x1xf32> to vector<1xf32>
    %159 = vector.shape_cast %158 : vector<1xf32> to vector<1x1xf32>
    %cst_88 = arith.constant 2.560000e+02 : f32
    %160 = vector.broadcast %cst_88 : f32 to vector<1x1xf32>
    %161 = arith.divf %159, %160 : vector<1x1xf32>
    %162 = vector.broadcast %161 : vector<1x1xf32> to vector<16x16xf32>
    %163 = arith.subf %155, %162 : vector<16x16xf32>
    %164 = arith.mulf %163, %163 : vector<16x16xf32>
    %cst_89 = arith.constant dense<0.000000e+00> : vector<16xf32>
    %165 = vector.multi_reduction <add>, %164, %cst_89 [1] : vector<16x16xf32> to vector<16xf32>
    %166 = vector.shape_cast %165 : vector<16xf32> to vector<16x1xf32>
    %cst_90 = arith.constant dense<0.000000e+00> : vector<1xf32>
    %167 = vector.multi_reduction <add>, %166, %cst_90 [0] : vector<16x1xf32> to vector<1xf32>
    %168 = vector.shape_cast %167 : vector<1xf32> to vector<1x1xf32>
    %cst_91 = arith.constant 2.560000e+02 : f32
    %169 = vector.broadcast %cst_91 : f32 to vector<1x1xf32>
    %170 = arith.divf %168, %169 : vector<1x1xf32>
    %cst_92 = arith.constant 9.99999974E-6 : f32
    %171 = vector.broadcast %cst_92 : f32 to vector<1x1xf32>
    %172 = arith.addf %170, %171 : vector<1x1xf32>
    %173 = math.rsqrt %172 : vector<1x1xf32>
    %174 = vector.broadcast %173 : vector<1x1xf32> to vector<16x16xf32>
    %175 = arith.mulf %163, %174 : vector<16x16xf32>
    %176 = tpu.transpose %175, [1, 0] : vector<16x16xf32> -> vector<16x16xf32>
    %cst_93 = arith.constant dense<0.000000e+00> : vector<16x16xf32>
    %177 = tpu.matmul %176, %175, %cst_93 {dimension_numbers = #tpu.dot_dimension_numbers<[1], [0], [0], [1], [0, 0, 1, 1], [], []>} : vector<16x16xf32>, vector<16x16xf32>, vector<16x16xf32> -> vector<16x16xf32>
    %cst_94 = arith.constant 0.0624999962 : f32
    %178 = vector.broadcast %cst_94 : f32 to vector<16x16xf32>
    %179 = arith.mulf %177, %178 : vector<16x16xf32>
    %c0_95 = arith.constant 0 : index
    %c0_96 = arith.constant 0 : index
    %180 = vector.load %arg25[%c0_95, %c0_96] : memref<16x256xf32, #tpu.memory_space<vmem>>, vector<16x256xf32>
    %cst_97 = arith.constant dense<0.000000e+00> : vector<16x256xf32>
    %181 = tpu.matmul %179, %180, %cst_97 {dimension_numbers = #tpu.dot_dimension_numbers<[1], [0], [0], [1], [0, 0, 1, 1], [], []>} : vector<16x16xf32>, vector<16x256xf32>, vector<16x256xf32> -> vector<16x256xf32>
    %c0_98 = arith.constant 0 : index
    %c0_99 = arith.constant 0 : index
    %182 = vector.load %arg26[%c0_98, %c0_99] : memref<16x256xf32, #tpu.memory_space<vmem>>, vector<16x256xf32>
    %183 = arith.mulf %181, %182 : vector<16x256xf32>
    %cst_100 = arith.constant dense<0.000000e+00> : vector<256xf32>
    %184 = vector.multi_reduction <add>, %183, %cst_100 [0] : vector<16x256xf32> to vector<256xf32>
    %185 = vector.shape_cast %184 : vector<256xf32> to vector<1x256xf32>
    %c1 = arith.constant 1 : index
    %c0_101 = arith.constant 0 : index
    %186 = vector.load %arg45[%c1, %c0_101] : memref<4x256xf32, #tpu.memory_space<vmem>>, vector<1x256xf32>
    tpu.vector_store %arg45[%c1, %c0_101], %185 {strides = array<i32>} : memref<4x256xf32, #tpu.memory_space<vmem>>, vector<1x256xf32>,
    %cst_102 = arith.constant dense<0.000000e+00> : vector<128xf32>
    %187 = vector.multi_reduction <add>, %127, %cst_102 [0] : vector<16x128xf32> to vector<128xf32>
    %188 = vector.shape_cast %187 : vector<128xf32> to vector<1x128xf32>
    %cst_103 = arith.constant 1.600000e+01 : f32
    %189 = vector.broadcast %cst_103 : f32 to vector<1x128xf32>
    %190 = arith.divf %188, %189 : vector<1x128xf32>
    %191 = vector.broadcast %190 : vector<1x128xf32> to vector<16x128xf32>
    %192 = arith.subf %127, %191 : vector<16x128xf32>
    %193 = arith.mulf %192, %192 : vector<16x128xf32>
    %cst_104 = arith.constant dense<0.000000e+00> : vector<128xf32>
    %194 = vector.multi_reduction <add>, %193, %cst_104 [0] : vector<16x128xf32> to vector<128xf32>
    %195 = vector.shape_cast %194 : vector<128xf32> to vector<1x128xf32>
    %cst_105 = arith.constant 1.600000e+01 : f32
    %196 = vector.broadcast %cst_105 : f32 to vector<1x128xf32>
    %197 = arith.divf %195, %196 : vector<1x128xf32>
    %198 = vector.broadcast %190 : vector<1x128xf32> to vector<16x128xf32>
    %199 = arith.subf %127, %198 : vector<16x128xf32>
    %cst_106 = arith.constant 9.99999974E-6 : f32
    %200 = vector.broadcast %cst_106 : f32 to vector<1x128xf32>
    %201 = arith.addf %197, %200 : vector<1x128xf32>
    %202 = math.rsqrt %201 : vector<1x128xf32>
    %203 = vector.broadcast %202 : vector<1x128xf32> to vector<16x128xf32>
    %204 = arith.mulf %199, %203 : vector<16x128xf32>
    %cst_107 = arith.constant 0.000000e+00 : f32
    %205 = vector.broadcast %cst_107 : f32 to vector<16x128xf32>
    %206 = arith.maximumf %204, %205 : vector<16x128xf32>
    %207 = arith.truncf %206 : vector<16x128xf32> to vector<16x128xbf16>
    %c0_108 = arith.constant 0 : index
    %c0_109 = arith.constant 0 : index
    %208 = vector.load %arg13[%c0_108, %c0_109] : memref<256x16xbf16, #tpu.memory_space<vmem>>, vector<256x16xbf16>
    %cst_110 = arith.constant dense<0.000000e+00> : vector<256x128xf32>
    %209 = tpu.matmul %208, %207, %cst_110 {dimension_numbers = #tpu.dot_dimension_numbers<[1], [0], [0], [1], [0, 0, 1, 1], [], []>} : vector<256x16xbf16>, vector<16x128xbf16>, vector<256x128xf32> -> vector<256x128xf32>
    %210 = arith.truncf %209 : vector<256x128xf32> to vector<256x128xbf16>
    %211 = vector.extract_strided_slice %210 {offsets = [0, 0], sizes = [16, 128], strides = [1, 1]} : vector<256x128xbf16> to vector<16x128xbf16>
    %c0_111 = arith.constant 0 : index
    %c0_112 = arith.constant 0 : index
    %212 = vector.load %arg44[%c0_111, %c0_112] : memref<16x4096xbf16, #tpu.memory_space<vmem>>, vector<16x128xbf16>
    tpu.vector_store %arg44[%c0_111, %c0_112], %211 {strides = array<i32>} : memref<16x4096xbf16, #tpu.memory_space<vmem>>, vector<16x128xbf16>,
    %213 = vector.extract_strided_slice %210 {offsets = [16, 0], sizes = [16, 128], strides = [1, 1]} : vector<256x128xbf16> to vector<16x128xbf16>
    %c0_113 = arith.constant 0 : index
    %c128_114 = arith.constant 128 : index
    %214 = vector.load %arg44[%c0_113, %c128_114] : memref<16x4096xbf16, #tpu.memory_space<vmem>>, vector<16x128xbf16>
    tpu.vector_store %arg44[%c0_113, %c128_114], %213 {strides = array<i32>} : memref<16x4096xbf16, #tpu.memory_space<vmem>>, vector<16x128xbf16>,
    %215 = vector.extract_strided_slice %210 {offsets = [32, 0], sizes = [16, 128], strides = [1, 1]} : vector<256x128xbf16> to vector<16x128xbf16>
    %c0_115 = arith.constant 0 : index
    %c256_116 = arith.constant 256 : index
    %216 = vector.load %arg44[%c0_115, %c256_116] : memref<16x4096xbf16, #tpu.memory_space<vmem>>, vector<16x128xbf16>
    tpu.vector_store %arg44[%c0_115, %c256_116], %215 {strides = array<i32>} : memref<16x4096xbf16, #tpu.memory_space<vmem>>, vector<16x128xbf16>,
    %217 = vector.extract_strided_slice %210 {offsets = [48, 0], sizes = [16, 128], strides = [1, 1]} : vector<256x128xbf16> to vector<16x128xbf16>
    %c0_117 = arith.constant 0 : index
    %c384_118 = arith.constant 384 : index
    %218 = vector.load %arg44[%c0_117, %c384_118] : memref<16x4096xbf16, #tpu.memory_space<vmem>>, vector<16x128xbf16>
    tpu.vector_store %arg44[%c0_117, %c384_118], %217 {strides = array<i32>} : memref<16x4096xbf16, #tpu.memory_space<vmem>>, vector<16x128xbf16>,
    %219 = vector.extract_strided_slice %210 {offsets = [64, 0], sizes = [16, 128], strides = [1, 1]} : vector<256x128xbf16> to vector<16x128xbf16>
    %c0_119 = arith.constant 0 : index
    %c512_120 = arith.constant 512 : index
    %220 = vector.load %arg44[%c0_119, %c512_120] : memref<16x4096xbf16, #tpu.memory_space<vmem>>, vector<16x128xbf16>
    tpu.vector_store %arg44[%c0_119, %c512_120], %219 {strides = array<i32>} : memref<16x4096xbf16, #tpu.memory_space<vmem>>, vector<16x128xbf16>,
    %221 = vector.extract_strided_slice %210 {offsets = [80, 0], sizes = [16, 128], strides = [1, 1]} : vector<256x128xbf16> to vector<16x128xbf16>
    %c0_121 = arith.constant 0 : index
    %c640_122 = arith.constant 640 : index
    %222 = vector.load %arg44[%c0_121, %c640_122] : memref<16x4096xbf16, #tpu.memory_space<vmem>>, vector<16x128xbf16>
    tpu.vector_store %arg44[%c0_121, %c640_122], %221 {strides = array<i32>} : memref<16x4096xbf16, #tpu.memory_space<vmem>>, vector<16x128xbf16>,
    %223 = vector.extract_strided_slice %210 {offsets = [96, 0], sizes = [16, 128], strides = [1, 1]} : vector<256x128xbf16> to vector<16x128xbf16>
    %c0_123 = arith.constant 0 : index
    %c768_124 = arith.constant 768 : index
    %224 = vector.load %arg44[%c0_123, %c768_124] : memref<16x4096xbf16, #tpu.memory_space<vmem>>, vector<16x128xbf16>
    tpu.vector_store %arg44[%c0_123, %c768_124], %223 {strides = array<i32>} : memref<16x4096xbf16, #tpu.memory_space<vmem>>, vector<16x128xbf16>,
    %225 = vector.extract_strided_slice %210 {offsets = [112, 0], sizes = [16, 128], strides = [1, 1]} : vector<256x128xbf16> to vector<16x128xbf16>
    %c0_125 = arith.constant 0 : index
    %c896_126 = arith.constant 896 : index
    %226 = vector.load %arg44[%c0_125, %c896_126] : memref<16x4096xbf16, #tpu.memory_space<vmem>>, vector<16x128xbf16>
    tpu.vector_store %arg44[%c0_125, %c896_126], %225 {strides = array<i32>} : memref<16x4096xbf16, #tpu.memory_space<vmem>>, vector<16x128xbf16>,
    %227 = vector.extract_strided_slice %210 {offsets = [128, 0], sizes = [16, 128], strides = [1, 1]} : vector<256x128xbf16> to vector<16x128xbf16>
    %c0_127 = arith.constant 0 : index
    %c1024_128 = arith.constant 1024 : index
    %228 = vector.load %arg44[%c0_127, %c1024_128] : memref<16x4096xbf16, #tpu.memory_space<vmem>>, vector<16x128xbf16>
    tpu.vector_store %arg44[%c0_127, %c1024_128], %227 {strides = array<i32>} : memref<16x4096xbf16, #tpu.memory_space<vmem>>, vector<16x128xbf16>,
    %229 = vector.extract_strided_slice %210 {offsets = [144, 0], sizes = [16, 128], strides = [1, 1]} : vector<256x128xbf16> to vector<16x128xbf16>
    %c0_129 = arith.constant 0 : index
    %c1152_130 = arith.constant 1152 : index
    %230 = vector.load %arg44[%c0_129, %c1152_130] : memref<16x4096xbf16, #tpu.memory_space<vmem>>, vector<16x128xbf16>
    tpu.vector_store %arg44[%c0_129, %c1152_130], %229 {strides = array<i32>} : memref<16x4096xbf16, #tpu.memory_space<vmem>>, vector<16x128xbf16>,
    %231 = vector.extract_strided_slice %210 {offsets = [160, 0], sizes = [16, 128], strides = [1, 1]} : vector<256x128xbf16> to vector<16x128xbf16>
    %c0_131 = arith.constant 0 : index
    %c1280_132 = arith.constant 1280 : index
    %232 = vector.load %arg44[%c0_131, %c1280_132] : memref<16x4096xbf16, #tpu.memory_space<vmem>>, vector<16x128xbf16>
    tpu.vector_store %arg44[%c0_131, %c1280_132], %231 {strides = array<i32>} : memref<16x4096xbf16, #tpu.memory_space<vmem>>, vector<16x128xbf16>,
    %233 = vector.extract_strided_slice %210 {offsets = [176, 0], sizes = [16, 128], strides = [1, 1]} : vector<256x128xbf16> to vector<16x128xbf16>
    %c0_133 = arith.constant 0 : index
    %c1408_134 = arith.constant 1408 : index
    %234 = vector.load %arg44[%c0_133, %c1408_134] : memref<16x4096xbf16, #tpu.memory_space<vmem>>, vector<16x128xbf16>
    tpu.vector_store %arg44[%c0_133, %c1408_134], %233 {strides = array<i32>} : memref<16x4096xbf16, #tpu.memory_space<vmem>>, vector<16x128xbf16>,
    %235 = vector.extract_strided_slice %210 {offsets = [192, 0], sizes = [16, 128], strides = [1, 1]} : vector<256x128xbf16> to vector<16x128xbf16>
    %c0_135 = arith.constant 0 : index
    %c1536_136 = arith.constant 1536 : index
    %236 = vector.load %arg44[%c0_135, %c1536_136] : memref<16x4096xbf16, #tpu.memory_space<vmem>>, vector<16x128xbf16>
    tpu.vector_store %arg44[%c0_135, %c1536_136], %235 {strides = array<i32>} : memref<16x4096xbf16, #tpu.memory_space<vmem>>, vector<16x128xbf16>,
    %237 = vector.extract_strided_slice %210 {offsets = [208, 0], sizes = [16, 128], strides = [1, 1]} : vector<256x128xbf16> to vector<16x128xbf16>
    %c0_137 = arith.constant 0 : index
    %c1664_138 = arith.constant 1664 : index
    %238 = vector.load %arg44[%c0_137, %c1664_138] : memref<16x4096xbf16, #tpu.memory_space<vmem>>, vector<16x128xbf16>
    tpu.vector_store %arg44[%c0_137, %c1664_138], %237 {strides = array<i32>} : memref<16x4096xbf16, #tpu.memory_space<vmem>>, vector<16x128xbf16>,
    %239 = vector.extract_strided_slice %210 {offsets = [224, 0], sizes = [16, 128], strides = [1, 1]} : vector<256x128xbf16> to vector<16x128xbf16>
    %c0_139 = arith.constant 0 : index
    %c1792_140 = arith.constant 1792 : index
    %240 = vector.load %arg44[%c0_139, %c1792_140] : memref<16x4096xbf16, #tpu.memory_space<vmem>>, vector<16x128xbf16>
    tpu.vector_store %arg44[%c0_139, %c1792_140], %239 {strides = array<i32>} : memref<16x4096xbf16, #tpu.memory_space<vmem>>, vector<16x128xbf16>,
    %241 = vector.extract_strided_slice %210 {offsets = [240, 0], sizes = [16, 128], strides = [1, 1]} : vector<256x128xbf16> to vector<16x128xbf16>
    %c0_141 = arith.constant 0 : index
    %c1920_142 = arith.constant 1920 : index
    %242 = vector.load %arg44[%c0_141, %c1920_142] : memref<16x4096xbf16, #tpu.memory_space<vmem>>, vector<16x128xbf16>
    tpu.vector_store %arg44[%c0_141, %c1920_142], %241 {strides = array<i32>} : memref<16x4096xbf16, #tpu.memory_space<vmem>>, vector<16x128xbf16>,
    %c0_143 = arith.constant 0 : index
    %c0_144 = arith.constant 0 : index
    %243 = vector.load %arg44[%c0_143, %c0_144] : memref<16x4096xbf16, #tpu.memory_space<vmem>>, vector<16x2048xbf16>
    %c0_145 = arith.constant 0 : index
    %c0_146 = arith.constant 0 : index
    %244 = vector.load %arg14[%c0_145, %c0_146] : memref<2048x256xbf16, #tpu.memory_space<vmem>>, vector<2048x256xbf16>
    %cst_147 = arith.constant dense<0.000000e+00> : vector<16x256xf32>
    %245 = tpu.matmul %243, %244, %cst_147 {dimension_numbers = #tpu.dot_dimension_numbers<[1], [0], [0], [1], [0, 0, 1, 1], [], []>} : vector<16x2048xbf16>, vector<2048x256xbf16>, vector<16x256xf32> -> vector<16x256xf32>
    %246 = vector.extract_strided_slice %245 {offsets = [0, 0], sizes = [9, 256], strides = [1, 1]} : vector<16x256xf32> to vector<9x256xf32>
    %c0_148 = arith.constant 0 : index
    %c0_149 = arith.constant 0 : index
    %247 = vector.load %arg15[%c0_148, %c0_149] : memref<1x256xf32, #tpu.memory_space<vmem>>, vector<1x256xf32>
    %248 = vector.broadcast %247 : vector<1x256xf32> to vector<9x256xf32>
    %249 = arith.addf %246, %248 : vector<9x256xf32>
    %250 = arith.truncf %249 : vector<9x256xf32> to vector<9x256xbf16>
    %c0_150 = arith.constant 0 : index
    %c0_151 = arith.constant 0 : index
    %251 = vector.load %arg16[%c0_150, %c0_151] : memref<256x16xbf16, #tpu.memory_space<vmem>>, vector<256x16xbf16>
    %cst_152 = arith.constant dense<0.000000e+00> : vector<9x16xf32>
    %252 = tpu.matmul %250, %251, %cst_152 {dimension_numbers = #tpu.dot_dimension_numbers<[1], [0], [0], [1], [0, 0, 1, 1], [], []>} : vector<9x256xbf16>, vector<256x16xbf16>, vector<9x16xf32> -> vector<9x16xf32>
    %c0_153 = arith.constant 0 : index
    %c0_154 = arith.constant 0 : index
    %253 = vector.load %arg17[%c0_153, %c0_154] : memref<1x16xf32, #tpu.memory_space<vmem>>, vector<1x16xf32>
    %254 = vector.broadcast %253 : vector<1x16xf32> to vector<9x16xf32>
    %255 = arith.addf %252, %254 : vector<9x16xf32>
    %cst_155 = arith.constant dense<0.000000e+00> : vector<9xf32>
    %256 = vector.multi_reduction <add>, %255, %cst_155 [1] : vector<9x16xf32> to vector<9xf32>
    %257 = vector.shape_cast %256 : vector<9xf32> to vector<9x1xf32>
    %cst_156 = arith.constant dense<0.000000e+00> : vector<1xf32>
    %258 = vector.multi_reduction <add>, %257, %cst_156 [0] : vector<9x1xf32> to vector<1xf32>
    %259 = vector.shape_cast %258 : vector<1xf32> to vector<1x1xf32>
    %cst_157 = arith.constant 1.440000e+02 : f32
    %260 = vector.broadcast %cst_157 : f32 to vector<1x1xf32>
    %261 = arith.divf %259, %260 : vector<1x1xf32>
    %262 = vector.broadcast %261 : vector<1x1xf32> to vector<9x16xf32>
    %263 = arith.subf %255, %262 : vector<9x16xf32>
    %264 = arith.mulf %263, %263 : vector<9x16xf32>
    %cst_158 = arith.constant dense<0.000000e+00> : vector<9xf32>
    %265 = vector.multi_reduction <add>, %264, %cst_158 [1] : vector<9x16xf32> to vector<9xf32>
    %266 = vector.shape_cast %265 : vector<9xf32> to vector<9x1xf32>
    %cst_159 = arith.constant dense<0.000000e+00> : vector<1xf32>
    %267 = vector.multi_reduction <add>, %266, %cst_159 [0] : vector<9x1xf32> to vector<1xf32>
    %268 = vector.shape_cast %267 : vector<1xf32> to vector<1x1xf32>
    %cst_160 = arith.constant 1.440000e+02 : f32
    %269 = vector.broadcast %cst_160 : f32 to vector<1x1xf32>
    %270 = arith.divf %268, %269 : vector<1x1xf32>
    %cst_161 = arith.constant 9.99999974E-6 : f32
    %271 = vector.broadcast %cst_161 : f32 to vector<1x1xf32>
    %272 = arith.addf %270, %271 : vector<1x1xf32>
    %273 = math.rsqrt %272 : vector<1x1xf32>
    %274 = vector.broadcast %273 : vector<1x1xf32> to vector<9x16xf32>
    %275 = arith.mulf %263, %274 : vector<9x16xf32>
    %c0_162 = arith.constant 0 : index
    %c0_163 = arith.constant 0 : index
    %276 = vector.load %arg18[%c0_162, %c0_163] : memref<16x9xf32, #tpu.memory_space<vmem>>, vector<16x9xf32>
    %cst_164 = arith.constant dense<0.000000e+00> : vector<16x16xf32>
    %277 = tpu.matmul %276, %275, %cst_164 {dimension_numbers = #tpu.dot_dimension_numbers<[1], [0], [0], [1], [0, 0, 1, 1], [], []>} : vector<16x9xf32>, vector<9x16xf32>, vector<16x16xf32> -> vector<16x16xf32>
    %cst_165 = arith.constant dense<0.000000e+00> : vector<16xf32>
    %278 = vector.multi_reduction <add>, %277, %cst_165 [1] : vector<16x16xf32> to vector<16xf32>
    %279 = vector.shape_cast %278 : vector<16xf32> to vector<16x1xf32>
    %cst_166 = arith.constant dense<0.000000e+00> : vector<1xf32>
    %280 = vector.multi_reduction <add>, %279, %cst_166 [0] : vector<16x1xf32> to vector<1xf32>
    %281 = vector.shape_cast %280 : vector<1xf32> to vector<1x1xf32>
    %cst_167 = arith.constant 2.560000e+02 : f32
    %282 = vector.broadcast %cst_167 : f32 to vector<1x1xf32>
    %283 = arith.divf %281, %282 : vector<1x1xf32>
    %284 = vector.broadcast %283 : vector<1x1xf32> to vector<16x16xf32>
    %285 = arith.subf %277, %284 : vector<16x16xf32>
    %286 = arith.mulf %285, %285 : vector<16x16xf32>
    %cst_168 = arith.constant dense<0.000000e+00> : vector<16xf32>
    %287 = vector.multi_reduction <add>, %286, %cst_168 [1] : vector<16x16xf32> to vector<16xf32>
    %288 = vector.shape_cast %287 : vector<16xf32> to vector<16x1xf32>
    %cst_169 = arith.constant dense<0.000000e+00> : vector<1xf32>
    %289 = vector.multi_reduction <add>, %288, %cst_169 [0] : vector<16x1xf32> to vector<1xf32>
    %290 = vector.shape_cast %289 : vector<1xf32> to vector<1x1xf32>
    %cst_170 = arith.constant 2.560000e+02 : f32
    %291 = vector.broadcast %cst_170 : f32 to vector<1x1xf32>
    %292 = arith.divf %290, %291 : vector<1x1xf32>
    %cst_171 = arith.constant 9.99999974E-6 : f32
    %293 = vector.broadcast %cst_171 : f32 to vector<1x1xf32>
    %294 = arith.addf %292, %293 : vector<1x1xf32>
    %295 = math.rsqrt %294 : vector<1x1xf32>
    %296 = vector.broadcast %295 : vector<1x1xf32> to vector<16x16xf32>
    %297 = arith.mulf %285, %296 : vector<16x16xf32>
    %298 = tpu.transpose %297, [1, 0] : vector<16x16xf32> -> vector<16x16xf32>
    %cst_172 = arith.constant dense<0.000000e+00> : vector<16x16xf32>
    %299 = tpu.matmul %298, %297, %cst_172 {dimension_numbers = #tpu.dot_dimension_numbers<[1], [0], [0], [1], [0, 0, 1, 1], [], []>} : vector<16x16xf32>, vector<16x16xf32>, vector<16x16xf32> -> vector<16x16xf32>
    %cst_173 = arith.constant 0.0624999962 : f32
    %300 = vector.broadcast %cst_173 : f32 to vector<16x16xf32>
    %301 = arith.mulf %299, %300 : vector<16x16xf32>
    %c0_174 = arith.constant 0 : index
    %c0_175 = arith.constant 0 : index
    %302 = vector.load %arg25[%c0_174, %c0_175] : memref<16x256xf32, #tpu.memory_space<vmem>>, vector<16x256xf32>
    %cst_176 = arith.constant dense<0.000000e+00> : vector<16x256xf32>
    %303 = tpu.matmul %301, %302, %cst_176 {dimension_numbers = #tpu.dot_dimension_numbers<[1], [0], [0], [1], [0, 0, 1, 1], [], []>} : vector<16x16xf32>, vector<16x256xf32>, vector<16x256xf32> -> vector<16x256xf32>
    %c0_177 = arith.constant 0 : index
    %c0_178 = arith.constant 0 : index
    %304 = vector.load %arg26[%c0_177, %c0_178] : memref<16x256xf32, #tpu.memory_space<vmem>>, vector<16x256xf32>
    %305 = arith.mulf %303, %304 : vector<16x256xf32>
    %cst_179 = arith.constant dense<0.000000e+00> : vector<256xf32>
    %306 = vector.multi_reduction <add>, %305, %cst_179 [0] : vector<16x256xf32> to vector<256xf32>
    %307 = vector.shape_cast %306 : vector<256xf32> to vector<1x256xf32>
    %c2 = arith.constant 2 : index
    %c0_180 = arith.constant 0 : index
    %308 = vector.load %arg45[%c2, %c0_180] : memref<4x256xf32, #tpu.memory_space<vmem>>, vector<1x256xf32>
    tpu.vector_store %arg45[%c2, %c0_180], %307 {strides = array<i32>} : memref<4x256xf32, #tpu.memory_space<vmem>>, vector<1x256xf32>,
    %cst_181 = arith.constant dense<0.000000e+00> : vector<256xf32>
    %309 = vector.multi_reduction <add>, %249, %cst_181 [0] : vector<9x256xf32> to vector<256xf32>
    %310 = vector.shape_cast %309 : vector<256xf32> to vector<1x256xf32>
    %cst_182 = arith.constant 9.000000e+00 : f32
    %311 = vector.broadcast %cst_182 : f32 to vector<1x256xf32>
    %312 = arith.divf %310, %311 : vector<1x256xf32>
    %313 = vector.broadcast %312 : vector<1x256xf32> to vector<9x256xf32>
    %314 = arith.subf %249, %313 : vector<9x256xf32>
    %315 = arith.mulf %314, %314 : vector<9x256xf32>
    %cst_183 = arith.constant dense<0.000000e+00> : vector<256xf32>
    %316 = vector.multi_reduction <add>, %315, %cst_183 [0] : vector<9x256xf32> to vector<256xf32>
    %317 = vector.shape_cast %316 : vector<256xf32> to vector<1x256xf32>
    %cst_184 = arith.constant 9.000000e+00 : f32
    %318 = vector.broadcast %cst_184 : f32 to vector<1x256xf32>
    %319 = arith.divf %317, %318 : vector<1x256xf32>
    %320 = vector.broadcast %312 : vector<1x256xf32> to vector<9x256xf32>
    %321 = arith.subf %249, %320 : vector<9x256xf32>
    %cst_185 = arith.constant 9.99999974E-6 : f32
    %322 = vector.broadcast %cst_185 : f32 to vector<1x256xf32>
    %323 = arith.addf %319, %322 : vector<1x256xf32>
    %324 = math.rsqrt %323 : vector<1x256xf32>
    %325 = vector.broadcast %324 : vector<1x256xf32> to vector<9x256xf32>
    %326 = arith.mulf %321, %325 : vector<9x256xf32>
    %cst_186 = arith.constant 0.000000e+00 : f32
    %327 = vector.broadcast %cst_186 : f32 to vector<9x256xf32>
    %328 = arith.maximumf %326, %327 : vector<9x256xf32>
    %329 = arith.truncf %328 : vector<9x256xf32> to vector<9x256xbf16>
    %c0_187 = arith.constant 0 : index
    %c0_188 = arith.constant 0 : index
    %330 = vector.load %arg19[%c0_187, %c0_188] : memref<128x9xbf16, #tpu.memory_space<vmem>>, vector<128x9xbf16>
    %cst_189 = arith.constant dense<0.000000e+00> : vector<128x256xf32>
    %331 = tpu.matmul %330, %329, %cst_189 {dimension_numbers = #tpu.dot_dimension_numbers<[1], [0], [0], [1], [0, 0, 1, 1], [], []>} : vector<128x9xbf16>, vector<9x256xbf16>, vector<128x256xf32> -> vector<128x256xf32>
    %332 = arith.truncf %331 : vector<128x256xf32> to vector<128x256xbf16>
    %333 = vector.extract_strided_slice %332 {offsets = [0, 0], sizes = [8, 256], strides = [1, 1]} : vector<128x256xbf16> to vector<8x256xbf16>
    %c0_190 = arith.constant 0 : index
    %c0_191 = arith.constant 0 : index
    %334 = vector.load %arg44[%c0_190, %c0_191] : memref<16x4096xbf16, #tpu.memory_space<vmem>>, vector<8x256xbf16>
    tpu.vector_store %arg44[%c0_190, %c0_191], %333 {strides = array<i32>} : memref<16x4096xbf16, #tpu.memory_space<vmem>>, vector<8x256xbf16>,
    %335 = vector.extract_strided_slice %332 {offsets = [8, 0], sizes = [8, 256], strides = [1, 1]} : vector<128x256xbf16> to vector<8x256xbf16>
    %c0_192 = arith.constant 0 : index
    %c256_193 = arith.constant 256 : index
    %336 = vector.load %arg44[%c0_192, %c256_193] : memref<16x4096xbf16, #tpu.memory_space<vmem>>, vector<8x256xbf16>
    tpu.vector_store %arg44[%c0_192, %c256_193], %335 {strides = array<i32>} : memref<16x4096xbf16, #tpu.memory_space<vmem>>, vector<8x256xbf16>,
    %337 = vector.extract_strided_slice %332 {offsets = [16, 0], sizes = [8, 256], strides = [1, 1]} : vector<128x256xbf16> to vector<8x256xbf16>
    %c0_194 = arith.constant 0 : index
    %c512_195 = arith.constant 512 : index
    %338 = vector.load %arg44[%c0_194, %c512_195] : memref<16x4096xbf16, #tpu.memory_space<vmem>>, vector<8x256xbf16>
    tpu.vector_store %arg44[%c0_194, %c512_195], %337 {strides = array<i32>} : memref<16x4096xbf16, #tpu.memory_space<vmem>>, vector<8x256xbf16>,
    %339 = vector.extract_strided_slice %332 {offsets = [24, 0], sizes = [8, 256], strides = [1, 1]} : vector<128x256xbf16> to vector<8x256xbf16>
    %c0_196 = arith.constant 0 : index
    %c768_197 = arith.constant 768 : index
    %340 = vector.load %arg44[%c0_196, %c768_197] : memref<16x4096xbf16, #tpu.memory_space<vmem>>, vector<8x256xbf16>
    tpu.vector_store %arg44[%c0_196, %c768_197], %339 {strides = array<i32>} : memref<16x4096xbf16, #tpu.memory_space<vmem>>, vector<8x256xbf16>,
    %341 = vector.extract_strided_slice %332 {offsets = [32, 0], sizes = [8, 256], strides = [1, 1]} : vector<128x256xbf16> to vector<8x256xbf16>
    %c0_198 = arith.constant 0 : index
    %c1024_199 = arith.constant 1024 : index
    %342 = vector.load %arg44[%c0_198, %c1024_199] : memref<16x4096xbf16, #tpu.memory_space<vmem>>, vector<8x256xbf16>
    tpu.vector_store %arg44[%c0_198, %c1024_199], %341 {strides = array<i32>} : memref<16x4096xbf16, #tpu.memory_space<vmem>>, vector<8x256xbf16>,
    %343 = vector.extract_strided_slice %332 {offsets = [40, 0], sizes = [8, 256], strides = [1, 1]} : vector<128x256xbf16> to vector<8x256xbf16>
    %c0_200 = arith.constant 0 : index
    %c1280_201 = arith.constant 1280 : index
    %344 = vector.load %arg44[%c0_200, %c1280_201] : memref<16x4096xbf16, #tpu.memory_space<vmem>>, vector<8x256xbf16>
    tpu.vector_store %arg44[%c0_200, %c1280_201], %343 {strides = array<i32>} : memref<16x4096xbf16, #tpu.memory_space<vmem>>, vector<8x256xbf16>,
    %345 = vector.extract_strided_slice %332 {offsets = [48, 0], sizes = [8, 256], strides = [1, 1]} : vector<128x256xbf16> to vector<8x256xbf16>
    %c0_202 = arith.constant 0 : index
    %c1536_203 = arith.constant 1536 : index
    %346 = vector.load %arg44[%c0_202, %c1536_203] : memref<16x4096xbf16, #tpu.memory_space<vmem>>, vector<8x256xbf16>
    tpu.vector_store %arg44[%c0_202, %c1536_203], %345 {strides = array<i32>} : memref<16x4096xbf16, #tpu.memory_space<vmem>>, vector<8x256xbf16>,
    %347 = vector.extract_strided_slice %332 {offsets = [56, 0], sizes = [8, 256], strides = [1, 1]} : vector<128x256xbf16> to vector<8x256xbf16>
    %c0_204 = arith.constant 0 : index
    %c1792_205 = arith.constant 1792 : index
    %348 = vector.load %arg44[%c0_204, %c1792_205] : memref<16x4096xbf16, #tpu.memory_space<vmem>>, vector<8x256xbf16>
    tpu.vector_store %arg44[%c0_204, %c1792_205], %347 {strides = array<i32>} : memref<16x4096xbf16, #tpu.memory_space<vmem>>, vector<8x256xbf16>,
    %349 = vector.extract_strided_slice %332 {offsets = [64, 0], sizes = [8, 256], strides = [1, 1]} : vector<128x256xbf16> to vector<8x256xbf16>
    %c0_206 = arith.constant 0 : index
    %c2048 = arith.constant 2048 : index
    %350 = vector.load %arg44[%c0_206, %c2048] : memref<16x4096xbf16, #tpu.memory_space<vmem>>, vector<8x256xbf16>
    tpu.vector_store %arg44[%c0_206, %c2048], %349 {strides = array<i32>} : memref<16x4096xbf16, #tpu.memory_space<vmem>>, vector<8x256xbf16>,
    %351 = vector.extract_strided_slice %332 {offsets = [72, 0], sizes = [8, 256], strides = [1, 1]} : vector<128x256xbf16> to vector<8x256xbf16>
    %c0_207 = arith.constant 0 : index
    %c2304 = arith.constant 2304 : index
    %352 = vector.load %arg44[%c0_207, %c2304] : memref<16x4096xbf16, #tpu.memory_space<vmem>>, vector<8x256xbf16>
    tpu.vector_store %arg44[%c0_207, %c2304], %351 {strides = array<i32>} : memref<16x4096xbf16, #tpu.memory_space<vmem>>, vector<8x256xbf16>,
    %353 = vector.extract_strided_slice %332 {offsets = [80, 0], sizes = [8, 256], strides = [1, 1]} : vector<128x256xbf16> to vector<8x256xbf16>
    %c0_208 = arith.constant 0 : index
    %c2560 = arith.constant 2560 : index
    %354 = vector.load %arg44[%c0_208, %c2560] : memref<16x4096xbf16, #tpu.memory_space<vmem>>, vector<8x256xbf16>
    tpu.vector_store %arg44[%c0_208, %c2560], %353 {strides = array<i32>} : memref<16x4096xbf16, #tpu.memory_space<vmem>>, vector<8x256xbf16>,
    %355 = vector.extract_strided_slice %332 {offsets = [88, 0], sizes = [8, 256], strides = [1, 1]} : vector<128x256xbf16> to vector<8x256xbf16>
    %c0_209 = arith.constant 0 : index
    %c2816 = arith.constant 2816 : index
    %356 = vector.load %arg44[%c0_209, %c2816] : memref<16x4096xbf16, #tpu.memory_space<vmem>>, vector<8x256xbf16>
    tpu.vector_store %arg44[%c0_209, %c2816], %355 {strides = array<i32>} : memref<16x4096xbf16, #tpu.memory_space<vmem>>, vector<8x256xbf16>,
    %357 = vector.extract_strided_slice %332 {offsets = [96, 0], sizes = [8, 256], strides = [1, 1]} : vector<128x256xbf16> to vector<8x256xbf16>
    %c0_210 = arith.constant 0 : index
    %c3072 = arith.constant 3072 : index
    %358 = vector.load %arg44[%c0_210, %c3072] : memref<16x4096xbf16, #tpu.memory_space<vmem>>, vector<8x256xbf16>
    tpu.vector_store %arg44[%c0_210, %c3072], %357 {strides = array<i32>} : memref<16x4096xbf16, #tpu.memory_space<vmem>>, vector<8x256xbf16>,
    %359 = vector.extract_strided_slice %332 {offsets = [104, 0], sizes = [8, 256], strides = [1, 1]} : vector<128x256xbf16> to vector<8x256xbf16>
    %c0_211 = arith.constant 0 : index
    %c3328 = arith.constant 3328 : index
    %360 = vector.load %arg44[%c0_211, %c3328] : memref<16x4096xbf16, #tpu.memory_space<vmem>>, vector<8x256xbf16>
    tpu.vector_store %arg44[%c0_211, %c3328], %359 {strides = array<i32>} : memref<16x4096xbf16, #tpu.memory_space<vmem>>, vector<8x256xbf16>,
    %361 = vector.extract_strided_slice %332 {offsets = [112, 0], sizes = [8, 256], strides = [1, 1]} : vector<128x256xbf16> to vector<8x256xbf16>
    %c0_212 = arith.constant 0 : index
    %c3584 = arith.constant 3584 : index
    %362 = vector.load %arg44[%c0_212, %c3584] : memref<16x4096xbf16, #tpu.memory_space<vmem>>, vector<8x256xbf16>
    tpu.vector_store %arg44[%c0_212, %c3584], %361 {strides = array<i32>} : memref<16x4096xbf16, #tpu.memory_space<vmem>>, vector<8x256xbf16>,
    %363 = vector.extract_strided_slice %332 {offsets = [120, 0], sizes = [8, 256], strides = [1, 1]} : vector<128x256xbf16> to vector<8x256xbf16>
    %c0_213 = arith.constant 0 : index
    %c3840 = arith.constant 3840 : index
    %364 = vector.load %arg44[%c0_213, %c3840] : memref<16x4096xbf16, #tpu.memory_space<vmem>>, vector<8x256xbf16>
    tpu.vector_store %arg44[%c0_213, %c3840], %363 {strides = array<i32>} : memref<16x4096xbf16, #tpu.memory_space<vmem>>, vector<8x256xbf16>,
    %c0_214 = arith.constant 0 : index
    %c0_215 = arith.constant 0 : index
    %365 = vector.load %arg44[%c0_214, %c0_215] : memref<16x4096xbf16, #tpu.memory_space<vmem>>, vector<8x4096xbf16>
    %c0_216 = arith.constant 0 : index
    %c0_217 = arith.constant 0 : index
    %366 = vector.load %arg20[%c0_216, %c0_217] : memref<4096x64xbf16, #tpu.memory_space<vmem>>, vector<4096x64xbf16>
    %cst_218 = arith.constant dense<0.000000e+00> : vector<8x64xf32>
    %367 = tpu.matmul %365, %366, %cst_218 {dimension_numbers = #tpu.dot_dimension_numbers<[1], [0], [0], [1], [0, 0, 1, 1], [], []>} : vector<8x4096xbf16>, vector<4096x64xbf16>, vector<8x64xf32> -> vector<8x64xf32>
    %368 = vector.extract_strided_slice %367 {offsets = [0, 0], sizes = [4, 64], strides = [1, 1]} : vector<8x64xf32> to vector<4x64xf32>
    %c0_219 = arith.constant 0 : index
    %c0_220 = arith.constant 0 : index
    %369 = vector.load %arg21[%c0_219, %c0_220] : memref<1x64xf32, #tpu.memory_space<vmem>>, vector<1x64xf32>
    %370 = vector.broadcast %369 : vector<1x64xf32> to vector<4x64xf32>
    %371 = arith.addf %368, %370 : vector<4x64xf32>
    %372 = arith.truncf %371 : vector<4x64xf32> to vector<4x64xbf16>
    %c0_221 = arith.constant 0 : index
    %c0_222 = arith.constant 0 : index
    %373 = vector.load %arg22[%c0_221, %c0_222] : memref<64x16xbf16, #tpu.memory_space<vmem>>, vector<64x16xbf16>
    %cst_223 = arith.constant dense<0.000000e+00> : vector<4x16xf32>
    %374 = tpu.matmul %372, %373, %cst_223 {dimension_numbers = #tpu.dot_dimension_numbers<[1], [0], [0], [1], [0, 0, 1, 1], [], []>} : vector<4x64xbf16>, vector<64x16xbf16>, vector<4x16xf32> -> vector<4x16xf32>
    %c0_224 = arith.constant 0 : index
    %c0_225 = arith.constant 0 : index
    %375 = vector.load %arg23[%c0_224, %c0_225] : memref<1x16xf32, #tpu.memory_space<vmem>>, vector<1x16xf32>
    %376 = vector.broadcast %375 : vector<1x16xf32> to vector<4x16xf32>
    %377 = arith.addf %374, %376 : vector<4x16xf32>
    %cst_226 = arith.constant dense<0.000000e+00> : vector<4xf32>
    %378 = vector.multi_reduction <add>, %377, %cst_226 [1] : vector<4x16xf32> to vector<4xf32>
    %379 = vector.shape_cast %378 : vector<4xf32> to vector<4x1xf32>
    %cst_227 = arith.constant dense<0.000000e+00> : vector<1xf32>
    %380 = vector.multi_reduction <add>, %379, %cst_227 [0] : vector<4x1xf32> to vector<1xf32>
    %381 = vector.shape_cast %380 : vector<1xf32> to vector<1x1xf32>
    %cst_228 = arith.constant 6.400000e+01 : f32
    %382 = vector.broadcast %cst_228 : f32 to vector<1x1xf32>
    %383 = arith.divf %381, %382 : vector<1x1xf32>
    %384 = vector.broadcast %383 : vector<1x1xf32> to vector<4x16xf32>
    %385 = arith.subf %377, %384 : vector<4x16xf32>
    %386 = arith.mulf %385, %385 : vector<4x16xf32>
    %cst_229 = arith.constant dense<0.000000e+00> : vector<4xf32>
    %387 = vector.multi_reduction <add>, %386, %cst_229 [1] : vector<4x16xf32> to vector<4xf32>
    %388 = vector.shape_cast %387 : vector<4xf32> to vector<4x1xf32>
    %cst_230 = arith.constant dense<0.000000e+00> : vector<1xf32>
    %389 = vector.multi_reduction <add>, %388, %cst_230 [0] : vector<4x1xf32> to vector<1xf32>
    %390 = vector.shape_cast %389 : vector<1xf32> to vector<1x1xf32>
    %cst_231 = arith.constant 6.400000e+01 : f32
    %391 = vector.broadcast %cst_231 : f32 to vector<1x1xf32>
    %392 = arith.divf %390, %391 : vector<1x1xf32>
    %cst_232 = arith.constant 9.99999974E-6 : f32
    %393 = vector.broadcast %cst_232 : f32 to vector<1x1xf32>
    %394 = arith.addf %392, %393 : vector<1x1xf32>
    %395 = math.rsqrt %394 : vector<1x1xf32>
    %396 = vector.broadcast %395 : vector<1x1xf32> to vector<4x16xf32>
    %397 = arith.mulf %385, %396 : vector<4x16xf32>
    %c0_233 = arith.constant 0 : index
    %c0_234 = arith.constant 0 : index
    %398 = vector.load %arg24[%c0_233, %c0_234] : memref<16x4xf32, #tpu.memory_space<vmem>>, vector<16x4xf32>
    %cst_235 = arith.constant dense<0.000000e+00> : vector<16x16xf32>
    %399 = tpu.matmul %398, %397, %cst_235 {dimension_numbers = #tpu.dot_dimension_numbers<[1], [0], [0], [1], [0, 0, 1, 1], [], []>} : vector<16x4xf32>, vector<4x16xf32>, vector<16x16xf32> -> vector<16x16xf32>
    %cst_236 = arith.constant dense<0.000000e+00> : vector<16xf32>
    %400 = vector.multi_reduction <add>, %399, %cst_236 [1] : vector<16x16xf32> to vector<16xf32>
    %401 = vector.shape_cast %400 : vector<16xf32> to vector<16x1xf32>
    %cst_237 = arith.constant dense<0.000000e+00> : vector<1xf32>
    %402 = vector.multi_reduction <add>, %401, %cst_237 [0] : vector<16x1xf32> to vector<1xf32>
    %403 = vector.shape_cast %402 : vector<1xf32> to vector<1x1xf32>
    %cst_238 = arith.constant 2.560000e+02 : f32
    %404 = vector.broadcast %cst_238 : f32 to vector<1x1xf32>
    %405 = arith.divf %403, %404 : vector<1x1xf32>
    %406 = vector.broadcast %405 : vector<1x1xf32> to vector<16x16xf32>
    %407 = arith.subf %399, %406 : vector<16x16xf32>
    %408 = arith.mulf %407, %407 : vector<16x16xf32>
    %cst_239 = arith.constant dense<0.000000e+00> : vector<16xf32>
    %409 = vector.multi_reduction <add>, %408, %cst_239 [1] : vector<16x16xf32> to vector<16xf32>
    %410 = vector.shape_cast %409 : vector<16xf32> to vector<16x1xf32>
    %cst_240 = arith.constant dense<0.000000e+00> : vector<1xf32>
    %411 = vector.multi_reduction <add>, %410, %cst_240 [0] : vector<16x1xf32> to vector<1xf32>
    %412 = vector.shape_cast %411 : vector<1xf32> to vector<1x1xf32>
    %cst_241 = arith.constant 2.560000e+02 : f32
    %413 = vector.broadcast %cst_241 : f32 to vector<1x1xf32>
    %414 = arith.divf %412, %413 : vector<1x1xf32>
    %cst_242 = arith.constant 9.99999974E-6 : f32
    %415 = vector.broadcast %cst_242 : f32 to vector<1x1xf32>
    %416 = arith.addf %414, %415 : vector<1x1xf32>
    %417 = math.rsqrt %416 : vector<1x1xf32>
    %418 = vector.broadcast %417 : vector<1x1xf32> to vector<16x16xf32>
    %419 = arith.mulf %407, %418 : vector<16x16xf32>
    %420 = tpu.transpose %419, [1, 0] : vector<16x16xf32> -> vector<16x16xf32>
    %cst_243 = arith.constant dense<0.000000e+00> : vector<16x16xf32>
    %421 = tpu.matmul %420, %419, %cst_243 {dimension_numbers = #tpu.dot_dimension_numbers<[1], [0], [0], [1], [0, 0, 1, 1], [], []>} : vector<16x16xf32>, vector<16x16xf32>, vector<16x16xf32> -> vector<16x16xf32>
    %cst_244 = arith.constant 0.0624999962 : f32
    %422 = vector.broadcast %cst_244 : f32 to vector<16x16xf32>
    %423 = arith.mulf %421, %422 : vector<16x16xf32>
    %c0_245 = arith.constant 0 : index
    %c0_246 = arith.constant 0 : index
    %424 = vector.load %arg25[%c0_245, %c0_246] : memref<16x256xf32, #tpu.memory_space<vmem>>, vector<16x256xf32>
    %cst_247 = arith.constant dense<0.000000e+00> : vector<16x256xf32>
    %425 = tpu.matmul %423, %424, %cst_247 {dimension_numbers = #tpu.dot_dimension_numbers<[1], [0], [0], [1], [0, 0, 1, 1], [], []>} : vector<16x16xf32>, vector<16x256xf32>, vector<16x256xf32> -> vector<16x256xf32>
    %c0_248 = arith.constant 0 : index
    %c0_249 = arith.constant 0 : index
    %426 = vector.load %arg26[%c0_248, %c0_249] : memref<16x256xf32, #tpu.memory_space<vmem>>, vector<16x256xf32>
    %427 = arith.mulf %425, %426 : vector<16x256xf32>
    %cst_250 = arith.constant dense<0.000000e+00> : vector<256xf32>
    %428 = vector.multi_reduction <add>, %427, %cst_250 [0] : vector<16x256xf32> to vector<256xf32>
    %429 = vector.shape_cast %428 : vector<256xf32> to vector<1x256xf32>
    %c3 = arith.constant 3 : index
    %c0_251 = arith.constant 0 : index
    %430 = vector.load %arg45[%c3, %c0_251] : memref<4x256xf32, #tpu.memory_space<vmem>>, vector<1x256xf32>
    tpu.vector_store %arg45[%c3, %c0_251], %429 {strides = array<i32>} : memref<4x256xf32, #tpu.memory_space<vmem>>, vector<1x256xf32>,
    %c0_252 = arith.constant 0 : index
    %c0_253 = arith.constant 0 : index
    %431 = vector.load %arg45[%c0_252, %c0_253] : memref<4x256xf32, #tpu.memory_space<vmem>>, vector<4x256xf32>
    %c0_254 = arith.constant 0 : index
    %c0_255 = arith.constant 0 : index
    %432 = vector.load %arg30[%c0_254, %c0_255] : memref<256x64xf32, #tpu.memory_space<vmem>>, vector<256x64xf32>
    %cst_256 = arith.constant dense<0.000000e+00> : vector<4x64xf32>
    %433 = tpu.matmul %431, %432, %cst_256 {dimension_numbers = #tpu.dot_dimension_numbers<[1], [0], [0], [1], [0, 0, 1, 1], [], []>} : vector<4x256xf32>, vector<256x64xf32>, vector<4x64xf32> -> vector<4x64xf32>
    %c0_257 = arith.constant 0 : index
    %c0_258 = arith.constant 0 : index
    %434 = vector.load %arg31[%c0_257, %c0_258] : memref<1x64xf32, #tpu.memory_space<vmem>>, vector<1x64xf32>
    %435 = vector.broadcast %434 : vector<1x64xf32> to vector<4x64xf32>
    %436 = arith.addf %433, %435 : vector<4x64xf32>
    %c0_259 = arith.constant 0 : index
    %c0_260 = arith.constant 0 : index
    %437 = vector.load %arg27[%c0_259, %c0_260] : memref<32x64xf32, #tpu.memory_space<vmem>>, vector<32x64xf32>
    %c0_261 = arith.constant 0 : index
    %c0_262 = arith.constant 0 : index
    %438 = vector.load %arg28[%c0_261, %c0_262] : memref<32x4xf32, #tpu.memory_space<vmem>>, vector<32x4xf32>
    %c0_263 = arith.constant 0 : index
    %c0_264 = arith.constant 0 : index
    %439 = vector.load %arg29[%c0_263, %c0_264] : memref<4x32xf32, #tpu.memory_space<vmem>>, vector<4x32xf32>
    %c0_265 = arith.constant 0 : index
    %c0_266 = arith.constant 0 : index
    %440 = vector.load %arg32[%c0_265, %c0_266] : memref<64x192xf32, #tpu.memory_space<vmem>>, vector<64x192xf32>
    %cst_267 = arith.constant dense<0.000000e+00> : vector<4x192xf32>
    %441 = tpu.matmul %436, %440, %cst_267 {dimension_numbers = #tpu.dot_dimension_numbers<[1], [0], [0], [1], [0, 0, 1, 1], [], []>} : vector<4x64xf32>, vector<64x192xf32>, vector<4x192xf32> -> vector<4x192xf32>
    %c0_268 = arith.constant 0 : index
    %c0_269 = arith.constant 0 : index
    %442 = vector.load %arg33[%c0_268, %c0_269] : memref<1x192xf32, #tpu.memory_space<vmem>>, vector<1x192xf32>
    %443 = vector.broadcast %442 : vector<1x192xf32> to vector<4x192xf32>
    %444 = arith.addf %441, %443 : vector<4x192xf32>
    %445 = vector.extract_strided_slice %444 {offsets = [0, 0], sizes = [4, 64], strides = [1, 1]} : vector<4x192xf32> to vector<4x64xf32>
    %cst_270 = arith.constant 0.353553385 : f32
    %446 = vector.broadcast %cst_270 : f32 to vector<4x64xf32>
    %447 = arith.mulf %445, %446 : vector<4x64xf32>
    %448 = vector.extract_strided_slice %444 {offsets = [0, 64], sizes = [4, 64], strides = [1, 1]} : vector<4x192xf32> to vector<4x64xf32>
    %449 = vector.extract_strided_slice %444 {offsets = [0, 128], sizes = [4, 64], strides = [1, 1]} : vector<4x192xf32> to vector<4x64xf32>
    %cst_271 = arith.constant dense<0.000000e+00> : vector<32x64xf32>
    %450 = tpu.matmul %438, %447, %cst_271 {dimension_numbers = #tpu.dot_dimension_numbers<[1], [0], [0], [1], [0, 0, 1, 1], [], []>} : vector<32x4xf32>, vector<4x64xf32>, vector<32x64xf32> -> vector<32x64xf32>
    %451 = arith.mulf %450, %437 : vector<32x64xf32>
    %cst_272 = arith.constant dense<0.000000e+00> : vector<32x4xf32>
    %452 = tpu.matmul %451, %448, %cst_272 {dimension_numbers = #tpu.dot_dimension_numbers<[1], [1], [0], [0], [0, 0, 1, 0], [], []>} : vector<32x64xf32>, vector<4x64xf32>, vector<32x4xf32> -> vector<32x4xf32>
    %cst_273 = arith.constant dense<0xFF800000> : vector<32xf32>
    %453 = vector.multi_reduction <maximumf>, %452, %cst_273 [1] : vector<32x4xf32> to vector<32xf32>
    %454 = vector.shape_cast %453 : vector<32xf32> to vector<32x1xf32>
    %455 = vector.broadcast %454 : vector<32x1xf32> to vector<32x4xf32>
    %456 = arith.subf %452, %455 : vector<32x4xf32>
    %457 = math.exp %456 : vector<32x4xf32>
    %cst_274 = arith.constant dense<0.000000e+00> : vector<32xf32>
    %458 = vector.multi_reduction <add>, %457, %cst_274 [1] : vector<32x4xf32> to vector<32xf32>
    %459 = vector.shape_cast %458 : vector<32xf32> to vector<32x1xf32>
    %460 = vector.broadcast %459 : vector<32x1xf32> to vector<32x4xf32>
    %461 = arith.divf %457, %460 : vector<32x4xf32>
    %cst_275 = arith.constant dense<0.000000e+00> : vector<32x64xf32>
    %462 = tpu.matmul %461, %449, %cst_275 {dimension_numbers = #tpu.dot_dimension_numbers<[1], [0], [0], [1], [0, 0, 1, 1], [], []>} : vector<32x4xf32>, vector<4x64xf32>, vector<32x64xf32> -> vector<32x64xf32>
    %463 = arith.mulf %462, %437 : vector<32x64xf32>
    %cst_276 = arith.constant dense<0.000000e+00> : vector<4x64xf32>
    %464 = tpu.matmul %439, %463, %cst_276 {dimension_numbers = #tpu.dot_dimension_numbers<[1], [0], [0], [1], [0, 0, 1, 1], [], []>} : vector<4x32xf32>, vector<32x64xf32>, vector<4x64xf32> -> vector<4x64xf32>
    %c0_277 = arith.constant 0 : index
    %c0_278 = arith.constant 0 : index
    %465 = vector.load %arg34[%c0_277, %c0_278] : memref<64x64xf32, #tpu.memory_space<vmem>>, vector<64x64xf32>
    %cst_279 = arith.constant dense<0.000000e+00> : vector<4x64xf32>
    %466 = tpu.matmul %464, %465, %cst_279 {dimension_numbers = #tpu.dot_dimension_numbers<[1], [0], [0], [1], [0, 0, 1, 1], [], []>} : vector<4x64xf32>, vector<64x64xf32>, vector<4x64xf32> -> vector<4x64xf32>
    %c0_280 = arith.constant 0 : index
    %c0_281 = arith.constant 0 : index
    %467 = vector.load %arg35[%c0_280, %c0_281] : memref<1x64xf32, #tpu.memory_space<vmem>>, vector<1x64xf32>
    %468 = vector.broadcast %467 : vector<1x64xf32> to vector<4x64xf32>
    %469 = arith.addf %466, %468 : vector<4x64xf32>
    %c0_282 = arith.constant 0 : index
    %c0_283 = arith.constant 0 : index
    %470 = vector.load %arg36[%c0_282, %c0_283] : memref<64x192xf32, #tpu.memory_space<vmem>>, vector<64x192xf32>
    %cst_284 = arith.constant dense<0.000000e+00> : vector<4x192xf32>
    %471 = tpu.matmul %469, %470, %cst_284 {dimension_numbers = #tpu.dot_dimension_numbers<[1], [0], [0], [1], [0, 0, 1, 1], [], []>} : vector<4x64xf32>, vector<64x192xf32>, vector<4x192xf32> -> vector<4x192xf32>
    %c0_285 = arith.constant 0 : index
    %c0_286 = arith.constant 0 : index
    %472 = vector.load %arg37[%c0_285, %c0_286] : memref<1x192xf32, #tpu.memory_space<vmem>>, vector<1x192xf32>
    %473 = vector.broadcast %472 : vector<1x192xf32> to vector<4x192xf32>
    %474 = arith.addf %471, %473 : vector<4x192xf32>
    %475 = vector.extract_strided_slice %474 {offsets = [0, 0], sizes = [4, 64], strides = [1, 1]} : vector<4x192xf32> to vector<4x64xf32>
    %cst_287 = arith.constant 0.353553385 : f32
    %476 = vector.broadcast %cst_287 : f32 to vector<4x64xf32>
    %477 = arith.mulf %475, %476 : vector<4x64xf32>
    %478 = vector.extract_strided_slice %474 {offsets = [0, 64], sizes = [4, 64], strides = [1, 1]} : vector<4x192xf32> to vector<4x64xf32>
    %479 = vector.extract_strided_slice %474 {offsets = [0, 128], sizes = [4, 64], strides = [1, 1]} : vector<4x192xf32> to vector<4x64xf32>
    %cst_288 = arith.constant dense<0.000000e+00> : vector<32x64xf32>
    %480 = tpu.matmul %438, %477, %cst_288 {dimension_numbers = #tpu.dot_dimension_numbers<[1], [0], [0], [1], [0, 0, 1, 1], [], []>} : vector<32x4xf32>, vector<4x64xf32>, vector<32x64xf32> -> vector<32x64xf32>
    %481 = arith.mulf %480, %437 : vector<32x64xf32>
    %cst_289 = arith.constant dense<0.000000e+00> : vector<32x4xf32>
    %482 = tpu.matmul %481, %478, %cst_289 {dimension_numbers = #tpu.dot_dimension_numbers<[1], [1], [0], [0], [0, 0, 1, 0], [], []>} : vector<32x64xf32>, vector<4x64xf32>, vector<32x4xf32> -> vector<32x4xf32>
    %cst_290 = arith.constant dense<0xFF800000> : vector<32xf32>
    %483 = vector.multi_reduction <maximumf>, %482, %cst_290 [1] : vector<32x4xf32> to vector<32xf32>
    %484 = vector.shape_cast %483 : vector<32xf32> to vector<32x1xf32>
    %485 = vector.broadcast %484 : vector<32x1xf32> to vector<32x4xf32>
    %486 = arith.subf %482, %485 : vector<32x4xf32>
    %487 = math.exp %486 : vector<32x4xf32>
    %cst_291 = arith.constant dense<0.000000e+00> : vector<32xf32>
    %488 = vector.multi_reduction <add>, %487, %cst_291 [1] : vector<32x4xf32> to vector<32xf32>
    %489 = vector.shape_cast %488 : vector<32xf32> to vector<32x1xf32>
    %490 = vector.broadcast %489 : vector<32x1xf32> to vector<32x4xf32>
    %491 = arith.divf %487, %490 : vector<32x4xf32>
    %cst_292 = arith.constant dense<0.000000e+00> : vector<32x64xf32>
    %492 = tpu.matmul %491, %479, %cst_292 {dimension_numbers = #tpu.dot_dimension_numbers<[1], [0], [0], [1], [0, 0, 1, 1], [], []>} : vector<32x4xf32>, vector<4x64xf32>, vector<32x64xf32> -> vector<32x64xf32>
    %493 = arith.mulf %492, %437 : vector<32x64xf32>
    %cst_293 = arith.constant dense<0.000000e+00> : vector<4x64xf32>
    %494 = tpu.matmul %439, %493, %cst_293 {dimension_numbers = #tpu.dot_dimension_numbers<[1], [0], [0], [1], [0, 0, 1, 1], [], []>} : vector<4x32xf32>, vector<32x64xf32>, vector<4x64xf32> -> vector<4x64xf32>
    %c0_294 = arith.constant 0 : index
    %c0_295 = arith.constant 0 : index
    %495 = vector.load %arg38[%c0_294, %c0_295] : memref<64x64xf32, #tpu.memory_space<vmem>>, vector<64x64xf32>
    %cst_296 = arith.constant dense<0.000000e+00> : vector<4x64xf32>
    %496 = tpu.matmul %494, %495, %cst_296 {dimension_numbers = #tpu.dot_dimension_numbers<[1], [0], [0], [1], [0, 0, 1, 1], [], []>} : vector<4x64xf32>, vector<64x64xf32>, vector<4x64xf32> -> vector<4x64xf32>
    %c0_297 = arith.constant 0 : index
    %c0_298 = arith.constant 0 : index
    %497 = vector.load %arg39[%c0_297, %c0_298] : memref<1x64xf32, #tpu.memory_space<vmem>>, vector<1x64xf32>
    %498 = vector.broadcast %497 : vector<1x64xf32> to vector<4x64xf32>
    %499 = arith.addf %496, %498 : vector<4x64xf32>
    %cst_299 = arith.constant dense<0.000000e+00> : vector<64xf32>
    %500 = vector.multi_reduction <add>, %499, %cst_299 [0] : vector<4x64xf32> to vector<64xf32>
    %501 = vector.shape_cast %500 : vector<64xf32> to vector<1x64xf32>
    %cst_300 = arith.constant 4.000000e+00 : f32
    %502 = vector.broadcast %cst_300 : f32 to vector<1x64xf32>
    %503 = arith.divf %501, %502 : vector<1x64xf32>
    %c0_301 = arith.constant 0 : index
    %c0_302 = arith.constant 0 : index
    %c0_303 = arith.constant 0 : index
    %504 = vector.load %arg42[%c0_301, %c0_302, %c0_303] : memref<1x1x64xf32, #tpu.memory_space<vmem>>, vector<1x1x64xf32>
    %505 = vector.shape_cast %504 : vector<1x1x64xf32> to vector<1x64xf32>
    %506 = vector.shape_cast %503 : vector<1x64xf32> to vector<1x1x64xf32>
    tpu.vector_store %arg42[%c0_301, %c0_302, %c0_303], %506 {strides = array<i32>} : memref<1x1x64xf32, #tpu.memory_space<vmem>>, vector<1x1x64xf32>,
    %c0_304 = arith.constant 0 : index
    %c0_305 = arith.constant 0 : index
    %507 = vector.load %arg40[%c0_304, %c0_305] : memref<64x10xf32, #tpu.memory_space<vmem>>, vector<64x10xf32>
    %cst_306 = arith.constant dense<0.000000e+00> : vector<1x10xf32>
    %508 = tpu.matmul %503, %507, %cst_306 {dimension_numbers = #tpu.dot_dimension_numbers<[1], [0], [0], [1], [0, 0, 1, 1], [], []>} : vector<1x64xf32>, vector<64x10xf32>, vector<1x10xf32> -> vector<1x10xf32>
    %c0_307 = arith.constant 0 : index
    %c0_308 = arith.constant 0 : index
    %509 = vector.load %arg41[%c0_307, %c0_308] : memref<1x10xf32, #tpu.memory_space<vmem>>, vector<1x10xf32>
    %510 = arith.addf %508, %509 : vector<1x10xf32>
    %c0_309 = arith.constant 0 : index
    %c0_310 = arith.constant 0 : index
    %c0_311 = arith.constant 0 : index
    %511 = vector.load %arg43[%c0_309, %c0_310, %c0_311] : memref<1x1x10xf32, #tpu.memory_space<vmem>>, vector<1x1x10xf32>
    %512 = vector.shape_cast %511 : vector<1x1x10xf32> to vector<1x10xf32>
    %513 = vector.shape_cast %510 : vector<1x10xf32> to vector<1x1x10xf32>
    tpu.vector_store %arg43[%c0_309, %c0_310, %c0_311], %513 {strides = array<i32>} : memref<1x1x10xf32, #tpu.memory_space<vmem>>, vector<1x1x10xf32>,
    return
  }
  func.func @transform_0(%arg0: i32) -> (i32, i32, i32) {
    %c0_i32 = arith.constant 0 : i32
    %c0_i32_0 = arith.constant 0 : i32
    %c0_i32_1 = arith.constant 0 : i32
    return %arg0, %c0_i32, %c0_i32_0 : i32, i32, i32
  }
  func.func @transform_1(%arg0: i32) -> (i32, i32) {
    %c0_i32 = arith.constant 0 : i32
    %c0_i32_0 = arith.constant 0 : i32
    %c0_i32_1 = arith.constant 0 : i32
    return %c0_i32, %c0_i32_0 : i32, i32
  }
  func.func @transform_2(%arg0: i32) -> (i32, i32) {
    %c0_i32 = arith.constant 0 : i32
    %c0_i32_0 = arith.constant 0 : i32
    %c0_i32_1 = arith.constant 0 : i32
    return %c0_i32, %c0_i32_0 : i32, i32
  }
  func.func @transform_3(%arg0: i32) -> (i32, i32) {
    %c0_i32 = arith.constant 0 : i32
    %c0_i32_0 = arith.constant 0 : i32
    %c0_i32_1 = arith.constant 0 : i32
    return %c0_i32, %c0_i32_0 : i32, i32
  }
  func.func @transform_4(%arg0: i32) -> (i32, i32) {
    %c0_i32 = arith.constant 0 : i32
    %c0_i32_0 = arith.constant 0 : i32
    %c0_i32_1 = arith.constant 0 : i32
    return %c0_i32, %c0_i32_0 : i32, i32
  }
  func.func @transform_5(%arg0: i32) -> (i32, i32) {
    %c0_i32 = arith.constant 0 : i32
    %c0_i32_0 = arith.constant 0 : i32
    %c0_i32_1 = arith.constant 0 : i32
    return %c0_i32, %c0_i32_0 : i32, i32
  }
  func.func @transform_6(%arg0: i32) -> (i32, i32) {
    %c0_i32 = arith.constant 0 : i32
    %c0_i32_0 = arith.constant 0 : i32
    %c0_i32_1 = arith.constant 0 : i32
    return %c0_i32, %c0_i32_0 : i32, i32
  }
  func.func @transform_7(%arg0: i32) -> (i32, i32) {
    %c0_i32 = arith.constant 0 : i32
    %c0_i32_0 = arith.constant 0 : i32
    %c0_i32_1 = arith.constant 0 : i32
    return %c0_i32, %c0_i32_0 : i32, i32
  }
  func.func @transform_8(%arg0: i32) -> (i32, i32) {
    %c0_i32 = arith.constant 0 : i32
    %c0_i32_0 = arith.constant 0 : i32
    %c0_i32_1 = arith.constant 0 : i32
    return %c0_i32, %c0_i32_0 : i32, i32
  }
  func.func @transform_9(%arg0: i32) -> (i32, i32) {
    %c0_i32 = arith.constant 0 : i32
    %c0_i32_0 = arith.constant 0 : i32
    %c0_i32_1 = arith.constant 0 : i32
    return %c0_i32, %c0_i32_0 : i32, i32
  }
  func.func @transform_10(%arg0: i32) -> (i32, i32) {
    %c0_i32 = arith.constant 0 : i32
    %c0_i32_0 = arith.constant 0 : i32
    %c0_i32_1 = arith.constant 0 : i32
    return %c0_i32, %c0_i32_0 : i32, i32
  }
  func.func @transform_11(%arg0: i32) -> (i32, i32) {
    %c0_i32 = arith.constant 0 : i32
    %c0_i32_0 = arith.constant 0 : i32
    %c0_i32_1 = arith.constant 0 : i32
    return %c0_i32, %c0_i32_0 : i32, i32
  }
  func.func @transform_12(%arg0: i32) -> (i32, i32) {
    %c0_i32 = arith.constant 0 : i32
    %c0_i32_0 = arith.constant 0 : i32
    %c0_i32_1 = arith.constant 0 : i32
    return %c0_i32, %c0_i32_0 : i32, i32
  }
  func.func @transform_13(%arg0: i32) -> (i32, i32) {
    %c0_i32 = arith.constant 0 : i32
    %c0_i32_0 = arith.constant 0 : i32
    %c0_i32_1 = arith.constant 0 : i32
    return %c0_i32, %c0_i32_0 : i32, i32
  }
  func.func @transform_14(%arg0: i32) -> (i32, i32) {
    %c0_i32 = arith.constant 0 : i32
    %c0_i32_0 = arith.constant 0 : i32
    %c0_i32_1 = arith.constant 0 : i32
    return %c0_i32, %c0_i32_0 : i32, i32
  }
  func.func @transform_15(%arg0: i32) -> (i32, i32) {
    %c0_i32 = arith.constant 0 : i32
    %c0_i32_0 = arith.constant 0 : i32
    %c0_i32_1 = arith.constant 0 : i32
    return %c0_i32, %c0_i32_0 : i32, i32
  }
  func.func @transform_16(%arg0: i32) -> (i32, i32) {
    %c0_i32 = arith.constant 0 : i32
    %c0_i32_0 = arith.constant 0 : i32
    %c0_i32_1 = arith.constant 0 : i32
    return %c0_i32, %c0_i32_0 : i32, i32
  }
  func.func @transform_17(%arg0: i32) -> (i32, i32) {
    %c0_i32 = arith.constant 0 : i32
    %c0_i32_0 = arith.constant 0 : i32
    %c0_i32_1 = arith.constant 0 : i32
    return %c0_i32, %c0_i32_0 : i32, i32
  }
  func.func @transform_18(%arg0: i32) -> (i32, i32) {
    %c0_i32 = arith.constant 0 : i32
    %c0_i32_0 = arith.constant 0 : i32
    %c0_i32_1 = arith.constant 0 : i32
    return %c0_i32, %c0_i32_0 : i32, i32
  }
  func.func @transform_19(%arg0: i32) -> (i32, i32) {
    %c0_i32 = arith.constant 0 : i32
    %c0_i32_0 = arith.constant 0 : i32
    %c0_i32_1 = arith.constant 0 : i32
    return %c0_i32, %c0_i32_0 : i32, i32
  }
  func.func @transform_20(%arg0: i32) -> (i32, i32) {
    %c0_i32 = arith.constant 0 : i32
    %c0_i32_0 = arith.constant 0 : i32
    %c0_i32_1 = arith.constant 0 : i32
    return %c0_i32, %c0_i32_0 : i32, i32
  }
  func.func @transform_21(%arg0: i32) -> (i32, i32) {
    %c0_i32 = arith.constant 0 : i32
    %c0_i32_0 = arith.constant 0 : i32
    %c0_i32_1 = arith.constant 0 : i32
    return %c0_i32, %c0_i32_0 : i32, i32
  }
  func.func @transform_22(%arg0: i32) -> (i32, i32) {
    %c0_i32 = arith.constant 0 : i32
    %c0_i32_0 = arith.constant 0 : i32
    %c0_i32_1 = arith.constant 0 : i32
    return %c0_i32, %c0_i32_0 : i32, i32
  }
  func.func @transform_23(%arg0: i32) -> (i32, i32) {
    %c0_i32 = arith.constant 0 : i32
    %c0_i32_0 = arith.constant 0 : i32
    %c0_i32_1 = arith.constant 0 : i32
    return %c0_i32, %c0_i32_0 : i32, i32
  }
  func.func @transform_24(%arg0: i32) -> (i32, i32) {
    %c0_i32 = arith.constant 0 : i32
    %c0_i32_0 = arith.constant 0 : i32
    %c0_i32_1 = arith.constant 0 : i32
    return %c0_i32, %c0_i32_0 : i32, i32
  }
  func.func @transform_25(%arg0: i32) -> (i32, i32) {
    %c0_i32 = arith.constant 0 : i32
    %c0_i32_0 = arith.constant 0 : i32
    %c0_i32_1 = arith.constant 0 : i32
    return %c0_i32, %c0_i32_0 : i32, i32
  }
  func.func @transform_26(%arg0: i32) -> (i32, i32) {
    %c0_i32 = arith.constant 0 : i32
    %c0_i32_0 = arith.constant 0 : i32
    %c0_i32_1 = arith.constant 0 : i32
    return %c0_i32, %c0_i32_0 : i32, i32
  }
  func.func @transform_27(%arg0: i32) -> (i32, i32) {
    %c0_i32 = arith.constant 0 : i32
    %c0_i32_0 = arith.constant 0 : i32
    %c0_i32_1 = arith.constant 0 : i32
    return %c0_i32, %c0_i32_0 : i32, i32
  }
  func.func @transform_28(%arg0: i32) -> (i32, i32) {
    %c0_i32 = arith.constant 0 : i32
    %c0_i32_0 = arith.constant 0 : i32
    %c0_i32_1 = arith.constant 0 : i32
    return %c0_i32, %c0_i32_0 : i32, i32
  }
  func.func @transform_29(%arg0: i32) -> (i32, i32) {
    %c0_i32 = arith.constant 0 : i32
    %c0_i32_0 = arith.constant 0 : i32
    %c0_i32_1 = arith.constant 0 : i32
    return %c0_i32, %c0_i32_0 : i32, i32
  }
  func.func @transform_30(%arg0: i32) -> (i32, i32) {
    %c0_i32 = arith.constant 0 : i32
    %c0_i32_0 = arith.constant 0 : i32
    %c0_i32_1 = arith.constant 0 : i32
    return %c0_i32, %c0_i32_0 : i32, i32
  }
  func.func @transform_31(%arg0: i32) -> (i32, i32) {
    %c0_i32 = arith.constant 0 : i32
    %c0_i32_0 = arith.constant 0 : i32
    %c0_i32_1 = arith.constant 0 : i32
    return %c0_i32, %c0_i32_0 : i32, i32
  }
  func.func @transform_32(%arg0: i32) -> (i32, i32) {
    %c0_i32 = arith.constant 0 : i32
    %c0_i32_0 = arith.constant 0 : i32
    %c0_i32_1 = arith.constant 0 : i32
    return %c0_i32, %c0_i32_0 : i32, i32
  }
  func.func @transform_33(%arg0: i32) -> (i32, i32) {
    %c0_i32 = arith.constant 0 : i32
    %c0_i32_0 = arith.constant 0 : i32
    %c0_i32_1 = arith.constant 0 : i32
    return %c0_i32, %c0_i32_0 : i32, i32
  }
  func.func @transform_34(%arg0: i32) -> (i32, i32) {
    %c0_i32 = arith.constant 0 : i32
    %c0_i32_0 = arith.constant 0 : i32
    %c0_i32_1 = arith.constant 0 : i32
    return %c0_i32, %c0_i32_0 : i32, i32
  }
  func.func @transform_35(%arg0: i32) -> (i32, i32) {
    %c0_i32 = arith.constant 0 : i32
    %c0_i32_0 = arith.constant 0 : i32
    %c0_i32_1 = arith.constant 0 : i32
    return %c0_i32, %c0_i32_0 : i32, i32
  }
  func.func @transform_36(%arg0: i32) -> (i32, i32) {
    %c0_i32 = arith.constant 0 : i32
    %c0_i32_0 = arith.constant 0 : i32
    %c0_i32_1 = arith.constant 0 : i32
    return %c0_i32, %c0_i32_0 : i32, i32
  }
  func.func @transform_37(%arg0: i32) -> (i32, i32) {
    %c0_i32 = arith.constant 0 : i32
    %c0_i32_0 = arith.constant 0 : i32
    %c0_i32_1 = arith.constant 0 : i32
    return %c0_i32, %c0_i32_0 : i32, i32
  }
  func.func @transform_38(%arg0: i32) -> (i32, i32) {
    %c0_i32 = arith.constant 0 : i32
    %c0_i32_0 = arith.constant 0 : i32
    %c0_i32_1 = arith.constant 0 : i32
    return %c0_i32, %c0_i32_0 : i32, i32
  }
  func.func @transform_39(%arg0: i32) -> (i32, i32) {
    %c0_i32 = arith.constant 0 : i32
    %c0_i32_0 = arith.constant 0 : i32
    %c0_i32_1 = arith.constant 0 : i32
    return %c0_i32, %c0_i32_0 : i32, i32
  }
  func.func @transform_40(%arg0: i32) -> (i32, i32) {
    %c0_i32 = arith.constant 0 : i32
    %c0_i32_0 = arith.constant 0 : i32
    %c0_i32_1 = arith.constant 0 : i32
    return %c0_i32, %c0_i32_0 : i32, i32
  }
  func.func @transform_41(%arg0: i32) -> (i32, i32, i32) {
    %c0_i32 = arith.constant 0 : i32
    %c0_i32_0 = arith.constant 0 : i32
    %c0_i32_1 = arith.constant 0 : i32
    return %arg0, %c0_i32, %c0_i32_0 : i32, i32, i32
  }
  func.func @transform_42(%arg0: i32) -> (i32, i32, i32) {
    %c0_i32 = arith.constant 0 : i32
    %c0_i32_0 = arith.constant 0 : i32
    %c0_i32_1 = arith.constant 0 : i32
    return %arg0, %c0_i32, %c0_i32_0 : i32, i32, i32
  }
}

</mosaic_0001>

<bundles_post_ra>
// kernel: forward.1
= control target key start
LH: loop header
LB: loop body
LE: loop exit
PB: predicated region body
PF: predicated region fallthrough
CT: control target
= control target key end

     0   :  { %s16415_s6 = smov 1   ;;  %s16416_s10 = smov 2   ;;  %s18202_s0 = inlined_call_operand.smem [shape: u32[43], index: -1, kind: input, shape index: {}] }
   0x1   :  { %s16473_s5 = sld [smem:[%s18202_s0]]   ;;  %s16417_s14 = smov 3  }
   0x2   :  { %s16478_s9 = sld [smem:[%s18202_s0 + %s16415_s6]]   ;;  %s16418_s18 = smov 4  }
   0x3   :  { %s16483_s13 = sld [smem:[%s18202_s0 + %s16416_s10]]   ;;  %s16419_s22 = smov 5  }
   0x4   :  { %s16488_s17 = sld [smem:[%s18202_s0 + %s16417_s14]]   ;;  %s16420_s26 = smov 6  }
   0x5   :  { %s16493_s21 = sld [smem:[%s18202_s0 + %s16418_s18]]   ;;  %s16421_s30 = smov 7  }
   0x6   :  { %s16498_s25 = sld [smem:[%s18202_s0 + %s16419_s22]]   ;;  %s16422_s4 = smov 8  }
   0x7   :  { %18237 = sst [smem:[#allocation10_spill]] %s16473_s5  ;;  %s16423_s10 = smov 9  }
   0x8   :  { %18238 = sst [smem:[#allocation11_spill]] %s16478_s9  ;;  %s16424_s15 = smov 10  }
   0x9   :  { %18239 = sst [smem:[#allocation12_spill]] %s16483_s13  ;;  %s16425_s20 = smov 11  }
   0xa   :  { %18240 = sst [smem:[#allocation13_spill]] %s16488_s17  ;;  %s16427_s1 = smov 13  }
   0xb   :  { %s16503_s29 = sld [smem:[%s18202_s0 + %s16420_s26]]   ;;  %s16426_s26 = smov 12  }
   0xc   :  { %s16508_s3 = sld [smem:[%s18202_s0 + %s16421_s30]]   ;;  %s16428_s7 = smov 14  }
   0xd   :  { %s16513_s8 = sld [smem:[%s18202_s0 + %s16422_s4]]   ;;  %s16430_s22 = smov 16  }
   0xe   :  { %s16518_s14 = sld [smem:[%s18202_s0 + %s16423_s10]]   ;;  %s16431_s28 = smov 17  }
   0xf   :  { %s16523_s19 = sld [smem:[%s18202_s0 + %s16424_s15]]   ;;  %s16429_s15 = smov 15  }
  0x10   :  { %s16528_s24 = sld [smem:[%s18202_s0 + %s16425_s20]]  }
  0x11   :  { %s16533_s30 = sld [smem:[%s18202_s0 + %s16426_s26]]  }
  0x12   :  { %18241 = sst [smem:[#allocation14_spill]] %s16508_s3 }
  0x13   :  { %18242 = sst [smem:[#allocation15_spill]] %s16513_s8 }
  0x14   :  { %18243 = sst [smem:[#allocation16_spill]] %s16518_s14 }
  0x15   :  { %18244 = sst [smem:[#allocation17_spill]] %s16523_s19 }
  0x16   :  { %s16538_s6 = sld [smem:[%s18202_s0 + %s16427_s1]]  }
  0x17   :  { %18245 = sst [smem:[#allocation18_spill]] %s16533_s30 }
  0x18   :  { %s16543_s12 = sld [smem:[%s18202_s0 + %s16428_s7]]   ;;  %s16432_s7 = smov 18  }
  0x19   :  { %s16548_s20 = sld [smem:[%s18202_s0 + %s16429_s15]]   ;;  %s16433_s15 = smov 19  }
  0x1a   :  { %s16553_s27 = sld [smem:[%s18202_s0 + %s16430_s22]]   ;;  %s16434_s22 = smov 20  }
  0x1b   :  { %s16558_s4 = sld [smem:[%s18202_s0 + %s16431_s28]]   ;;  %s16435_s28 = smov 21  }
  0x1c   :  { %18246 = sst [smem:[#allocation19_spill]] %s16538_s6 }
  0x1e   :  { %18247 = sst [smem:[#allocation20_spill]] %s16543_s12 }
  0x1f   :  { %18248 = sst [smem:[#allocation21_spill]] %s16548_s20 }
  0x20   :  { %18249 = sst [smem:[#allocation22_spill]] %s16553_s27 }
  0x21   :  { %18250 = sst [smem:[#allocation23_spill]] %s16558_s4 }
  0x22   :  { %s16563_s12 = sld [smem:[%s18202_s0 + %s16432_s7]]   ;;  %s16436_s7 = smov 22  }
  0x23   :  { %s16568_s20 = sld [smem:[%s18202_s0 + %s16433_s15]]   ;;  %s16437_s15 = smov 23  }
  0x24   :  { %s16573_s27 = sld [smem:[%s18202_s0 + %s16434_s22]]   ;;  %s16438_s22 = smov 24  }
  0x25   :  { %s16578_s4 = sld [smem:[%s18202_s0 + %s16435_s28]]   ;;  %s16439_s28 = smov 25  }
  0x28   :  { %18251 = sst [smem:[#allocation24_spill]] %s16563_s12 }
  0x29   :  { %18252 = sst [smem:[#allocation25_spill]] %s16568_s20 }
  0x2a   :  { %18253 = sst [smem:[#allocation26_spill]] %s16573_s27 }
  0x2b   :  { %18254 = sst [smem:[#allocation27_spill]] %s16578_s4 }
  0x2c   :  { %s16583_s12 = sld [smem:[%s18202_s0 + %s16436_s7]]   ;;  %s16440_s7 = smov 26  }
  0x2d   :  { %s16588_s20 = sld [smem:[%s18202_s0 + %s16437_s15]]   ;;  %s16441_s15 = smov 27  }
  0x2e   :  { %s16593_s27 = sld [smem:[%s18202_s0 + %s16438_s22]]   ;;  %s16442_s22 = smov 28  }
  0x2f   :  { %s16598_s4 = sld [smem:[%s18202_s0 + %s16439_s28]]   ;;  %s16443_s28 = smov 29  }
  0x30   :  { %s16613_s6 = sld [smem:[%s18202_s0 + %s16442_s22]]   ;;  %s16446_s22 = smov 32  }
  0x31   :  { %s16618_s30 = sld [smem:[%s18202_s0 + %s16443_s28]]   ;;  %s16447_s28 = smov 33  }
  0x32   :  { %18255 = sst [smem:[#allocation28_spill]] %s16583_s12 }
  0x33   :  { %18256 = sst [smem:[#allocation29_spill]] %s16588_s20 }
  0x34   :  { %s16603_s12 = sld [smem:[%s18202_s0 + %s16440_s7]]   ;;  %s16444_s7 = smov 30  }
  0x35   :  { %18257 = sst [smem:[#allocation30_spill]] %s16598_s4 }
  0x36   :  { %s16608_s20 = sld [smem:[%s18202_s0 + %s16441_s15]]   ;;  %s16445_s15 = smov 31  }
  0x37   :  { %18260 = sst [smem:[#allocation33_spill]] %s16613_s6 }
  0x38   :  { %18261 = sst [smem:[#allocation34_spill]] %s16618_s30 }
  0x39   :  { %s16633_s6 = sld [smem:[%s18202_s0 + %s16446_s22]]   ;;  %s16450_s22 = smov 36  }
  0x3a   :  { %18258 = sst [smem:[#allocation31_spill]] %s16603_s12 }
  0x3b   :  { %s16623_s12 = sld [smem:[%s18202_s0 + %s16444_s7]]   ;;  %s16448_s7 = smov 34  }
  0x3c   :  { %18259 = sst [smem:[#allocation32_spill]] %s16608_s20 }
  0x3d   :  { %s16628_s20 = sld [smem:[%s18202_s0 + %s16445_s15]]   ;;  %s16449_s15 = smov 35  }
  0x3e   :  { %s16638_s30 = sld [smem:[%s18202_s0 + %s16447_s28]]   ;;  %s16451_s28 = smov 37  }
  0x3f   :  { %18264 = sst [smem:[#allocation37_spill]] %s16633_s6 }
  0x40   :  { %s16653_s6 = sld [smem:[%s18202_s0 + %s16450_s22]]   ;;  %s16454_s22 = smov 40  }
  0x41   :  { %18262 = sst [smem:[#allocation35_spill]] %s16623_s12 }
  0x42   :  { %s16643_s12 = sld [smem:[%s18202_s0 + %s16448_s7]]   ;;  %s16452_s7 = smov 38  }
  0x43   :  { %18263 = sst [smem:[#allocation36_spill]] %s16628_s20 }
  0x44   :  { %18265 = sst [smem:[#allocation38_spill]] %s16638_s30 }
  0x45   :  { %s16648_s20 = sld [smem:[%s18202_s0 + %s16449_s15]]   ;;  %s16453_s15 = smov 39  }
  0x46   :  { %18268 = sst [smem:[#allocation41_spill]] %s16653_s6 }
  0x47   :  { %s16658_s30 = sld [smem:[%s18202_s0 + %s16451_s28]]   ;;  %s16455_s28 = smov 41  }
  0x48   :  { %18266 = sst [smem:[#allocation39_spill]] %s16643_s12 }
  0x49   :  { %s16663_s12 = sld [smem:[%s18202_s0 + %s16452_s7]]   ;;  %s16456_s7 = smov 42  }
  0x4a   :  { %s16673_s6 = sld [smem:[%s18202_s0 + %s16454_s22]]  }
  0x4b   :  { %18267 = sst [smem:[#allocation40_spill]] %s16648_s20 }
  0x4c   :  { %s16668_s20 = sld [smem:[%s18202_s0 + %s16453_s15]]  }
  0x4d   :  { %18269 = sst [smem:[#allocation42_spill]] %s16658_s30 }
  0x4e   :  { %s16678_s30 = sld [smem:[%s18202_s0 + %s16455_s28]]  }
  0x4f   :  { %18270 = sst [smem:[#allocation43_spill]] %s16663_s12 }
  0x50   :  { %s16683_s12 = sld [smem:[%s18202_s0 + %s16456_s7]]  }
  0x51   :  { %91 = vsyncpa [#allocation5], 0 }
  0x52   :  { %93 = vsyncpa [#allocation5 + $0x1], 0 }
  0x53   :  { %94 = vsyncpa [#allocation7], 0 }
  0x54   :  { %96 = vsyncpa [#allocation7 + $0x1], 0  ;;  %s16685_s15 = smov 0   ;;  %s16687_s16 = smov 0  }
  0x55   :  { %s16689_s18 = smov 0   ;;  %s16691_s22 = smov 0  }
  0x56 LB: > { %s18271_s17 = sld [smem:[#allocation13_spill]]  ;;  %s16706_s0 = sadd.s32 4294967295, %s16413_s22   ;;  %s16401_s15 = sphi %s16685_s15, %s18310_s15   ;;  %s16413_s22 = sphi %s16691_s22, %s18313_s22   ;;  %s16409_s18 = sphi %s16689_s18, %s18312_s18   ;;  %s16405_s16 = sphi %s16687_s16, %s18311_s16  }
  0x57   : > { %s18272_s14 = sld [smem:[#allocation16_spill]]  ;;  %s12897_s23 = sadd.s32 4294967294, %s16413_s22  }
  0x58   : > { %s18273_s9 = sld [smem:[#allocation11_spill]]  ;;  %s16710_s26 = sadd.s32 1, %s16413_s22  }
  0x59   : > { %s18274_s4 = sld [smem:[#allocation30_spill]]  ;;  %s975_s28 = sadd.s32 1, %s16409_s18 }
  0x5a   : > { %s18275_s3 = sld [smem:[#allocation14_spill]]  ;;  %s972_s1 = ssub.s32 %s16413_s22, %s16710_s26 }
  0x5b   : > { %p985_p0 = scmp.ne.s32.totalorder %s16409_s18, %s16405_s16  ;;  %p973_p1 = scmp.eq.s32.totalorder %s972_s1, 0 }
  0x5c   : > { %p986_p2 = scmp.eq.s32.totalorder %s16706_s0, 1  ;;  %p991_p3 = scmp.ne.s32.totalorder %s16405_s16, %s16401_s15 }
  0x5d   : > { %p992_p4 = scmp.eq.s32.totalorder %s12897_s23, 1  ;;  %p12900_p7 = scmp.ge.s32.totalorder %s16413_s22, 1 }
  0x5e   : > { %s16721_s2 = scalar_select %p973_p1, %s16409_s18, %s975_s28  }
  0x5f   : > { %p16723_p5 = por %p986_p2, %p985_p0  ;;  %p16727_p6 = por %p992_p4, %p991_p3 }
  0x60   : > { %p1164_p8 = scmp.lt.s32.totalorder %s16413_s22, 3 }
  0x62   : > { %p1165_p9 = pnand %p12900_p7, %p1164_p8 }
  0x63   : > { %s18278_s5 = sld [smem:[#allocation10_spill]] (!%p1165_p9)  ;;  %p1269_p10 = scmp.lt.s32.totalorder (!%p1165_p9), %s16706_s0, 1 }
  0x64   : > { %1168 = sbr.rel (%p1165_p9) target bundleno = 11069 (0x2b3d), region = 184  ;;  %s18279_s13 = sld [smem:[#allocation12_spill]] (!%p1165_p9) }
  0x65   : > { %s18282_s8 = sld [smem:[#allocation15_spill]] (!%p1165_p9) }
  0x66   : > { %s18283_s19 = sld [smem:[#allocation17_spill]] (!%p1165_p9) }
  0x67   : > { %s18284_s1 = sld [smem:[#allocation18_spill]] (!%p1165_p9) }
  0x69   : > { %v15415_v0 = vld [vmem:[%s18273_s9 + $0x10] sm:$0xff]   ;;  %v15416_v1 = vld [vmem:[%s18273_s9 + $0x8] sm:$0xff]   ;;  %v15417_v2 = vld [vmem:[%s18273_s9] sm:$0xff]   ;;  %s1270_s11 = scalar_select %p1269_p10, %s16706_s0, 1  ;;  %vm1334_vm0 = vcmask 392192   ;;  %vm1552_vm1 = vcmask 130048  }
  0x6a   : > { %14986 = vmatprep.subr.bf16.mxu0 %v15415_v0  ;;  %v15422_v3 = vld [vmem:[%s18271_s17 + $0x38] sm:$0xff]   ;;  %v15423_v4 = vld [vmem:[%s18271_s17 + $0x30] sm:$0xff]   ;;  %v15424_v6 = vld [vmem:[%s18271_s17 + $0x28] sm:$0xff]   ;;  %vm1658_vm2 = vcmask 523264   ;;  %vm16459_vm4 = vmmov 0   ;;  %vm7225_vm5 = vcmask 1040384  }
  0x6b   : > { %14987 = vmatpush3.bf16.msra.mxu0 %v15415_v0  ;;  %s13892_s23 = sshll.u32 %s1270_s11, 5  ;;  %15000 = vmatprep.subr.bf16.mxu1 %v15422_v3  ;;  %v15425_v9 = vld [vmem:[%s18271_s17 + $0x20] sm:$0xff]   ;;  %v15426_v10 = vld [vmem:[%s18271_s17 + $0x18] sm:$0xff]   ;;  %v15427_v12 = vld [vmem:[%s18271_s17 + $0x10] sm:$0xff]   ;;  %s18285_s11 = sld [smem:[#allocation19_spill]]  ;;  %vm7765_vm6 = vcmask 1043456  }
  0x6c   : > { %14988 = vmatprep.subr.bf16.mxu0 %v15416_v1  ;;  %s1273_s28 = scalar_lea.vmem %s18278_s5, %s13892_s23  ;;  %15001 = vmatpush3.bf16.msra.mxu1 %v15422_v3  ;;  %v15428_v13 = vld [vmem:[%s18271_s17 + $0x8] sm:$0xff]   ;;  %v15429_v14 = vld [vmem:[%s18271_s17] sm:$0xff]   ;;  %s18286_s23 = sld [smem:[#allocation21_spill]]  ;;  %vm7766_vm7 = vcmask 1044480   ;;  %vm7221_vm8 = vcmask 122880   ;;  %vm7261_vm9 = vcmask 72704  }
  0x6d   : > { %v15418_v5 = vld [vmem:[%s1273_s28] sm:$0xff]   ;;  %15002 = vmatprep.subr.bf16.mxu1 %v15423_v4  ;;  %v15419_v7 = vld [vmem:[%s1273_s28 + $0x8] sm:$0xff]   ;;  %v15420_v8 = vld [vmem:[%s1273_s28 + $0x10] sm:$0xff]   ;;  %vm10907_vm10 = vcmask 125952   ;;  %s18295_s5 = sld [smem:[#allocation29_spill]]  ;;  %vm10937_vm11 = vcmask 31744  }
  0x6e   : > { %14992 = vmatprep.mubr.msk.bf16.mxu0 %vm1334_vm0, %v15418_v5  ;;  %v15421_v11 = vld [vmem:[%s1273_s28 + $0x18] sm:$0xff]   ;;  %v12903_v17 = vld [vmem:[%s18279_s13] ss:$0 sm:$0xff]  ;;  %s18287_s28 = sld [smem:[#allocation20_spill]]  ;;  %vm11881_vm12 = vcmask 261120   ;;  %vm12646_vm13 = vcmask 519168  }
  0x6f   : > { %14989 = vmatpush3.bf16.msra.mxu0 %v15416_v1  ;;  %vm12656_vm14 = vcmask 516096   ;;  %s16463_s13 = smov [#allocation4]  }
  0x70   : > { %14990 = vmatprep.subr.bf16.mxu0 %v15417_v2  ;;  %15003 = vmatpush3.bf16.msra.mxu1 %v15423_v4 }
  0x71   : > { %15004 = vmatprep.subr.bf16.mxu1 %v15424_v6 }
  0x73   : > { %14991 = vmatpush3.bf16.msra.mxu0 %v15417_v2 }
  0x74   : > { %15005 = vmatpush3.bf16.msra.mxu1 %v15424_v6 }
  0x75   : > { %15006 = vmatprep.subr.bf16.mxu1 %v15425_v9 }
  0x76   : > { %14993 = vmatmul.mubr.msk.bf16.vlgmr.msra.gmra.mxu0 %vm1334_vm0, %v15419_v7 }
  0x77   : > { %14996 = vmatprep.mubr.msk.bf16.mxu0 %vm1334_vm0, %v15420_v8 }
  0x78   : > { %15007 = vmatpush3.bf16.msra.mxu1 %v15425_v9 }
  0x79   : > { %15008 = vmatprep.subr.bf16.mxu1 %v15426_v10 }
  0x7c   : > { %15009 = vmatpush3.bf16.msra.mxu1 %v15426_v10 }
  0x7d   : > { %15010 = vmatprep.subr.bf16.mxu1 %v15427_v12 }
  0x7e   : > { %14997 = vmatmul.mubr.msk.bf16.gmra.mxu0 %vm1334_vm0, %v15421_v11 }
  0x80   : > { %15011 = vmatpush3.bf16.msra.mxu1 %v15427_v12 }
  0x81   : > { %15012 = vmatprep.subr.bf16.mxu1 %v15428_v13 }
  0x84   : > { %15013 = vmatpush3.bf16.msra.mxu1 %v15428_v13 }
  0x85   : > { %15014 = vmatprep.subr.bf16.mxu1 %v15429_v14 }
  0x88   : > { %15015 = vmatpush3.bf16.msra.mxu1 %v15429_v14 }
 0x136   : > { %v14994_v15 = vpop.f32.mrf.mxu0 }
 0x137   : > { %v1390_v23 = vadd.f32 %v14994_v15, %v12903_v17 }
 0x138   : > { %v1381_v16 = vpop.f32.mrf.mxu0 }
 0x139   : > { %v1382_v21 = vadd.f32 %v12903_v17, %v1381_v16 }
 0x13a   : > { %v14995_v18 = vpop.f32.mrf.mxu0 }
 0x13b   : > { %v1393_v19 = vadd.f32 %v14995_v18, %v12903_v17 }
 0x13c   : > { %v1384_v20 = vpop.f32.mrf.mxu0 }
 0x13d   : > { %v1385_v22 = vadd.f32 %v12903_v17, %v1384_v20  ;;  %v1413_v28 = vpack.c.bf16 %v1393_v19, %v1390_v23 }
 0x13e   : > { %v14998_v24 = vpop.f32.mrf.mxu0 }
 0x13f   : > { %v2024_v25 = vadd.f32 %v1385_v22, %v1382_v21  ;;  %v1412_v26 = vpack.c.bf16 %v1385_v22, %v1382_v21  ;;  %v1406_v37 = vadd.f32 %v14998_v24, %v12903_v17 }
 0x140   : > { %v1397_v27 = vpop.f32.mrf.mxu0 }
 0x141   : > { %v2025_v29 = vadd.f32 %v2024_v25, %v1390_v23  ;;  %15016 = vmatprep.mubr.bf16.mxu1 %v1412_v26  ;;  %v1398_v31 = vadd.f32 %v12903_v17, %v1397_v27 }
 0x142   : > { %v14999_v30 = vpop.f32.mrf.mxu0  ;;  %15017 = vmatmul.mubr.bf16.vlgmr.msra.gmra.mxu1 %v1413_v28 }
 0x143   : > { %v2026_v32 = vadd.f32 %v2025_v29, %v1393_v19  ;;  %v1409_v33 = vadd.f32 %v14999_v30, %v12903_v17 }
 0x144   : > { %v1400_v34 = vpop.f32.mrf.mxu0 }
 0x145   : > { %v2027_v35 = vadd.f32 %v2026_v32, %v1398_v31  ;;  %v1401_v36 = vadd.f32 %v12903_v17, %v1400_v34  ;;  %v1415_v40 = vpack.c.bf16 %v1409_v33, %v1406_v37 }
 0x147   : > { %v2028_v38 = vadd.f32 %v2027_v35, %v1401_v36  ;;  %v1414_v39 = vpack.c.bf16 %v1401_v36, %v1398_v31 }
 0x149   : > { %v2029_v41 = vadd.f32 %v2028_v38, %v1406_v37  ;;  %15020 = vmatprep.mubr.bf16.mxu1 %v1414_v39  ;;  %v12915_v38 = vld [vmem:[%s16493_s21] ss:$0 sm:$0xff] }
 0x14a   : > { %15021 = vmatmul.mubr.bf16.gmra.mxu1 %v1415_v40 }
 0x14b   : > { %v2030_v42 = vadd.f32 %v2029_v41, %v1409_v33 }
 0x14d   : > { %v2031_v43 = vrot.slane %v2030_v42, 4 }
 0x14f   : > { %v2032_v44 = vadd.f32 %v2031_v43, %v2030_v42 }
 0x151   : > { %v2033_v45 = vrot.slane %v2032_v44, 2 }
 0x153   : > { %v2034_v46 = vadd.f32 %v2033_v45, %v2032_v44 }
 0x155   : > { %v2035_v47 = vrot.slane %v2034_v46, 1 }
 0x157   : > { %v2036_v48 = vadd.f32 %v2035_v47, %v2034_v46 }
 0x159   : > { %v2038_v49 = vmul.f32 0.015625, %v2036_v48 }
 0x15b   : > { %v2039_v50 = vsub.f32 %v1382_v21, %v2038_v49  ;;  %v2040_v51 = vsub.f32 %v1385_v22, %v2038_v49  ;;  %v2041_v52 = vsub.f32 %v1390_v23, %v2038_v49  ;;  %v2042_v53 = vsub.f32 %v1393_v19, %v2038_v49 }
 0x15c   : > { %v2043_v56 = vsub.f32 %v1398_v31, %v2038_v49  ;;  %v2044_v59 = vsub.f32 %v1401_v36, %v2038_v49  ;;  %v2045_v0 = vsub.f32 %v1406_v37, %v2038_v49  ;;  %v2046_v3 = vsub.f32 %v1409_v33, %v2038_v49 }
 0x15d   : > { %v2047_v54 = vmul.f32 %v2039_v50, %v2039_v50  ;;  %v2048_v55 = vmul.f32 %v2040_v51, %v2040_v51  ;;  %v2049_v57 = vmul.f32 %v2041_v52, %v2041_v52  ;;  %v2050_v60 = vmul.f32 %v2042_v53, %v2042_v53 }
 0x15e   : > { %v2051_v62 = vmul.f32 %v2043_v56, %v2043_v56  ;;  %v2052_v1 = vmul.f32 %v2044_v59, %v2044_v59  ;;  %v2053_v5 = vmul.f32 %v2045_v0, %v2045_v0  ;;  %v2054_v6 = vmul.f32 %v2046_v3, %v2046_v3 }
 0x15f   : > { %v2055_v58 = vadd.f32 %v2048_v55, %v2047_v54 }
 0x161   : > { %v2056_v61 = vadd.f32 %v2055_v58, %v2049_v57 }
 0x163   : > { %v2057_v63 = vadd.f32 %v2056_v61, %v2050_v60 }
 0x165   : > { %v2058_v2 = vadd.f32 %v2057_v63, %v2051_v62 }
 0x167   : > { %v2059_v4 = vadd.f32 %v2058_v2, %v2052_v1 }
 0x169   : > { %v2060_v7 = vadd.f32 %v2059_v4, %v2053_v5 }
 0x16b   : > { %v2061_v8 = vadd.f32 %v2060_v7, %v2054_v6 }
 0x16d   : > { %v2062_v9 = vrot.slane %v2061_v8, 4 }
 0x16f   : > { %v2063_v10 = vadd.f32 %v2062_v9, %v2061_v8 }
 0x171   : > { %v2064_v11 = vrot.slane %v2063_v10, 2 }
 0x173   : > { %v2065_v12 = vadd.f32 %v2064_v11, %v2063_v10 }
 0x175   : > { %v2066_v13 = vrot.slane %v2065_v12, 1 }
 0x177   : > { %v2067_v14 = vadd.f32 %v2066_v13, %v2065_v12 }
 0x179   : > { %v2068_v15 = vmul.f32 0.015625, %v2067_v14 }
 0x17b   : > { %v2069_v16 = vadd.f32 1e-05, %v2068_v15 }
 0x17d   : > { %16267 = vrsqrt.f32 %v2069_v16 }
 0x18a   : > { %v16268_v17 = vpop.eup %16267 }
 0x18b   : > { %v2077_v18 = vmul.f32 %v16268_v17, %v2045_v0  ;;  %v2078_v19 = vmul.f32 %v16268_v17, %v2046_v3  ;;  %v2075_v20 = vmul.f32 %v16268_v17, %v2043_v56  ;;  %v2076_v21 = vmul.f32 %v16268_v17, %v2044_v59 }
 0x18c   : > { %v2073_v22 = vmul.f32 %v16268_v17, %v2041_v52  ;;  %v2074_v23 = vmul.f32 %v16268_v17, %v2042_v53  ;;  %v2071_v24 = vmul.f32 %v16268_v17, %v2039_v50  ;;  %v2072_v25 = vmul.f32 %v16268_v17, %v2040_v51 }
 0x18d   : > { %v2085_v26 = vmax.f32 %v2077_v18, 0.0  ;;  %v2086_v27 = vmax.f32 %v2078_v19, 0.0  ;;  %v2083_v28 = vmax.f32 %v2075_v20, 0.0  ;;  %v2084_v29 = vmax.f32 %v2076_v21, 0.0 }
 0x18e   : > { %v2081_v30 = vmax.f32 %v2073_v22, 0.0  ;;  %v2082_v31 = vmax.f32 %v2074_v23, 0.0  ;;  %v2079_v32 = vmax.f32 %v2071_v24, 0.0  ;;  %v2080_v33 = vmax.f32 %v2072_v25, 0.0 }
 0x18f   : > { %v2090_v34 = vpack.c.bf16 %v2086_v27, %v2085_v26  ;;  %v2089_v35 = vpack.c.bf16 %v2084_v29, %v2083_v28 }
 0x190   : > { %v2088_v36 = vpack.c.bf16 %v2082_v31, %v2081_v30  ;;  %v2087_v37 = vpack.c.bf16 %v2080_v33, %v2079_v32 }
 0x191   : > { %15050 = vmatprep.subr.bf16.mxu1 %v2090_v34 }
 0x192   : > { %15051 = vmatpush3.bf16.msra.mxu1 %v2090_v34 }
 0x193   : > { %15052 = vmatprep.subr.bf16.mxu1 %v2089_v35 }
 0x196   : > { %15053 = vmatpush3.bf16.msra.mxu1 %v2089_v35 }
 0x197   : > { %15054 = vmatprep.subr.bf16.mxu1 %v2088_v36 }
 0x19a   : > { %15055 = vmatpush3.bf16.msra.mxu1 %v2088_v36 }
 0x19b   : > { %15056 = vmatprep.subr.bf16.mxu1 %v2087_v37 }
 0x19e   : > { %15057 = vmatpush3.bf16.msra.mxu1 %v2087_v37 }
 0x202   : > { %v15018_v39 = vpop.f32.mrf.mxu1 }
 0x203   : > { %v1530_v40 = vadd.f32 %v15018_v39, %v12915_v38 }
 0x204   : > { %v1521_v41 = vpop.f32.mrf.mxu1 }
 0x205   : > { %v1522_v42 = vadd.f32 %v12915_v38, %v1521_v41  ;;  %v1559_v43 = vsel %vm1552_vm1, %v1530_v40, 0.0 }
 0x206   : > { %1560 = vadd.xlane.f32.xlu1 %v1559_v43  ;;  %v15019_v44 = vpop.f32.mrf.mxu1 }
 0x207   : > { %v1533_v45 = vadd.f32 %v15019_v44, %v12915_v38  ;;  %v1553_v46 = vsel %vm1552_vm1, %v1522_v42, 0.0 }
 0x208   : > { %v1524_v47 = vpop.f32.mrf.mxu1  ;;  %1554 = vadd.xlane.f32.xlu0 %v1553_v46 }
 0x209   : > { %v1525_v48 = vadd.f32 %v12915_v38, %v1524_v47  ;;  %v1562_v49 = vsel %vm1552_vm1, %v1533_v45, 0.0 }
 0x20a   : > { %1563 = vadd.xlane.f32.xlu1 %v1562_v49  ;;  %v15022_v50 = vpop.f32.mrf.mxu1 }
 0x20b   : > { %v1556_v51 = vsel %vm1552_vm1, %v1525_v48, 0.0  ;;  %v1546_v55 = vadd.f32 %v15022_v50, %v12915_v38 }
 0x20c   : > { %v1537_v52 = vpop.f32.mrf.mxu1  ;;  %1557 = vadd.xlane.f32.xlu0 %v1556_v51 }
 0x20d   : > { %v1538_v53 = vadd.f32 %v12915_v38, %v1537_v52  ;;  %v1571_v61 = vsel %vm1552_vm1, %v1546_v55, 0.0 }
 0x20e   : > { %v15023_v54 = vpop.f32.mrf.mxu1 }
 0x20f   : > { %v1565_v56 = vsel %vm1552_vm1, %v1538_v53, 0.0  ;;  %v1549_v59 = vadd.f32 %v15023_v54, %v12915_v38 }
 0x210   : > { %v1540_v57 = vpop.f32.mrf.mxu1  ;;  %1566 = vadd.xlane.f32.xlu0 %v1565_v56 }
 0x211   : > { %v1541_v58 = vadd.f32 %v12915_v38, %v1540_v57  ;;  %v1574_v62 = vsel %vm1552_vm1, %v1549_v59, 0.0 }
 0x213   : > { %v1568_v60 = vsel %vm1552_vm1, %v1541_v58, 0.0 }
 0x214   : > { %1569 = vadd.xlane.f32.xlu1 %v1568_v60  ;;  %1572 = vadd.xlane.f32.xlu0 %v1571_v61 }
 0x218   : > { %1575 = vadd.xlane.f32.xlu1 %v1574_v62 }
 0x28f   : > { %v1561_v0 = vpop.xlane.xlu1 %1560 }
 0x291   : > { %v1555_v63 = vpop.xlane.xlu0 %1554 }
 0x293   : > { %v1564_v4 = vpop.xlane.xlu1 %1563 }
 0x295   : > { %v1558_v1 = vpop.xlane.xlu0 %1557 }
 0x296   : > { %v1577_v2 = vadd.f32 %v1558_v1, %v1555_v63 }
 0x298   : > { %v1578_v3 = vadd.f32 %v1577_v2, %v1561_v0 }
 0x299   : > { %v1567_v5 = vpop.xlane.xlu0 %1566 }
 0x29a   : > { %v1579_v6 = vadd.f32 %v1578_v3, %v1564_v4 }
 0x29c   : > { %v1580_v7 = vadd.f32 %v1579_v6, %v1567_v5 }
 0x29d   : > { %v1570_v8 = vpop.xlane.xlu1 %1569  ;;  %v1573_v10 = vpop.xlane.xlu0 %1572 }
 0x29e   : > { %v1581_v9 = vadd.f32 %v1580_v7, %v1570_v8 }
 0x2a0   : > { %v1582_v11 = vadd.f32 %v1581_v9, %v1573_v10 }
 0x2a1   : > { %v1576_v12 = vpop.xlane.xlu1 %1575 }
 0x2a2   : > { %v1583_v13 = vadd.f32 %v1582_v11, %v1576_v12 }
 0x2a4   : > { %v1584_v14 = vrot.slane %v1583_v13, 4 }
 0x2a6   : > { %v1585_v15 = vadd.f32 %v1584_v14, %v1583_v13  ;;  %v1657_v14 = vld [vmem:[%s16498_s25 + $0x8] sm:$0xff] }
 0x2a8   : > { %v1586_v16 = vrot.slane %v1585_v15, 2 }
 0x2aa   : > { %v1587_v17 = vadd.f32 %v1586_v16, %v1585_v15 }
 0x2ac   : > { %v1588_v18 = vrot.slane %v1587_v17, 1 }
 0x2ae   : > { %v1589_v19 = vadd.f32 %v1588_v18, %v1587_v17 }
 0x2b0   : > { %v1591_v20 = vmul.f32 0.0009765625, %v1589_v19 }
 0x2b2   : > { %v16761_v21 = vsub.f32 %v1525_v48, %v1591_v20  ;;  %v16763_v22 = vsub.f32 %v1522_v42, %v1591_v20  ;;  %v16765_v23 = vsub.f32 %v1533_v45, %v1591_v20  ;;  %v16767_v24 = vsub.f32 %v1530_v40, %v1591_v20  ;;  %v1656_v45 = vld [vmem:[%s16498_s25] sm:$0xff] }
 0x2b3   : > { %v1597_v27 = vsub.f32 %v1541_v58, %v1591_v20  ;;  %v1596_v28 = vsub.f32 %v1538_v53, %v1591_v20  ;;  %v1599_v33 = vsub.f32 %v1549_v59, %v1591_v20  ;;  %v1598_v34 = vsub.f32 %v1546_v55, %v1591_v20  ;;  %15040 = vmatprep.mubr.msk.f32.mxu0 %vm1658_vm2, %v1656_v45 }
 0x2b4   : > { %v1601_v25 = vmul.f32 %v16761_v21, %v16761_v21  ;;  %v1600_v26 = vmul.f32 %v16763_v22, %v16763_v22  ;;  %v1603_v31 = vmul.f32 %v16765_v23, %v16765_v23  ;;  %v1602_v32 = vmul.f32 %v16767_v24, %v16767_v24 }
 0x2b5   : > { %v1605_v37 = vmul.f32 %v1597_v27, %v1597_v27  ;;  %v1604_v38 = vmul.f32 %v1596_v28, %v1596_v28  ;;  %v1607_v41 = vmul.f32 %v1599_v33, %v1599_v33  ;;  %v1606_v42 = vmul.f32 %v1598_v34, %v1598_v34 }
 0x2b6   : > { %v1611_v29 = vsel %vm1552_vm1, %v1601_v25, 0.0  ;;  %v1608_v30 = vsel %vm1552_vm1, %v1600_v26, 0.0  ;;  %v1617_v35 = vsel %vm1552_vm1, %v1603_v31, 0.0  ;;  %v1614_v36 = vsel %vm1552_vm1, %v1602_v32, 0.0 }
 0x2b7   : > { %1612 = vadd.xlane.f32.xlu1 %v1611_v29  ;;  %1609 = vadd.xlane.f32.xlu0 %v1608_v30  ;;  %v1623_v39 = vsel %vm1552_vm1, %v1605_v37, 0.0  ;;  %v1620_v40 = vsel %vm1552_vm1, %v1604_v38, 0.0  ;;  %v1629_v43 = vsel %vm1552_vm1, %v1607_v41, 0.0  ;;  %v1626_v44 = vsel %vm1552_vm1, %v1606_v42, 0.0 }
 0x2bb   : > { %1618 = vadd.xlane.f32.xlu1 %v1617_v35  ;;  %1615 = vadd.xlane.f32.xlu0 %v1614_v36 }
 0x2bf   : > { %1624 = vadd.xlane.f32.xlu1 %v1623_v39  ;;  %1621 = vadd.xlane.f32.xlu0 %v1620_v40 }
 0x2c3   : > { %1630 = vadd.xlane.f32.xlu1 %v1629_v43  ;;  %1627 = vadd.xlane.f32.xlu0 %v1626_v44 }
 0x340   : > { %v1613_v46 = vpop.xlane.xlu1 %1612  ;;  %v1610_v47 = vpop.xlane.xlu0 %1609 }
 0x341   : > { %v1632_v48 = vadd.f32 %v1613_v46, %v1610_v47 }
 0x344   : > { %v1619_v49 = vpop.xlane.xlu1 %1618  ;;  %v1616_v50 = vpop.xlane.xlu0 %1615 }
 0x345   : > { %v1633_v51 = vadd.f32 %v1632_v48, %v1616_v50  ;;  %v15431_v50 = vld [vmem:[%s16503_s29 + $0x8] sm:$0xff]  }
 0x347   : > { %v1634_v52 = vadd.f32 %v1633_v51, %v1619_v49  ;;  %v15430_v49 = vld [vmem:[%s16503_s29] sm:$0xff]   ;;  %v15432_v51 = vld [vmem:[%s16503_s29 + $0x10] sm:$0xff]  }
 0x348   : > { %v1625_v53 = vpop.xlane.xlu1 %1624  ;;  %v1622_v54 = vpop.xlane.xlu0 %1621  ;;  %15058 = vmatprep.mubr.msk.bf16.mxu1 %vm1658_vm2, %v15430_v49 }
 0x349   : > { %v1635_v55 = vadd.f32 %v1634_v52, %v1622_v54  ;;  %15059 = vmatmul.mubr.msk.bf16.vlgmr.msra.gmra.mxu1 %vm1658_vm2, %v15431_v50  ;;  %v15433_v52 = vld [vmem:[%s16503_s29 + $0x18] sm:$0xff]   ;;  %v15435_v54 = vld [vmem:[%s16503_s29 + $0x28] sm:$0xff]  }
 0x34a   : > { %15062 = vmatprep.mubr.msk.bf16.mxu1 %vm1658_vm2, %v15432_v51  ;;  %v15512_v50 = vld [vmem:[%s18275_s3 + $0x258] sm:$0xff]  }
 0x34b   : > { %v1636_v56 = vadd.f32 %v1635_v55, %v1625_v53  ;;  %v15434_v53 = vld [vmem:[%s16503_s29 + $0x20] sm:$0xff]   ;;  %v15436_v55 = vld [vmem:[%s16503_s29 + $0x30] sm:$0xff]  }
 0x34c   : > { %v1628_v57 = vpop.xlane.xlu0 %1627  ;;  %v1631_v59 = vpop.xlane.xlu1 %1630 }
 0x34d   : > { %v1637_v58 = vadd.f32 %v1636_v56, %v1628_v57  ;;  %v15437_v56 = vld [vmem:[%s16503_s29 + $0x38] sm:$0xff]   ;;  %v15438_v57 = vld [vmem:[%s16503_s29 + $0x40] sm:$0xff]  }
 0x34f   : > { %v1638_v60 = vadd.f32 %v1637_v58, %v1631_v59  ;;  %v15439_v58 = vld [vmem:[%s16503_s29 + $0x48] sm:$0xff]   ;;  %v15440_v59 = vld [vmem:[%s16503_s29 + $0x50] sm:$0xff]  }
 0x351   : > { %v1639_v61 = vrot.slane %v1638_v60, 4  ;;  %15063 = vmatmul.mubr.msk.bf16.gmra.mxu1 %vm1658_vm2, %v15433_v52  ;;  %v15513_v52 = vld [vmem:[%s18275_s3 + $0x218] sm:$0xff]  }
 0x352   : > { %15066 = vmatprep.mubr.msk.bf16.mxu1 %vm1658_vm2, %v15434_v53 }
 0x353   : > { %v1640_v62 = vadd.f32 %v1639_v61, %v1638_v60  ;;  %v15441_v60 = vld [vmem:[%s16503_s29 + $0x58] sm:$0xff]   ;;  %v15442_v61 = vld [vmem:[%s16503_s29 + $0x60] sm:$0xff]  }
 0x355   : > { %v1641_v63 = vrot.slane %v1640_v62, 2 }
 0x357   : > { %v1642_v0 = vadd.f32 %v1641_v63, %v1640_v62  ;;  %v15443_v62 = vld [vmem:[%s16503_s29 + $0x68] sm:$0xff]   ;;  %v15444_v63 = vld [vmem:[%s16503_s29 + $0x70] sm:$0xff]  }
 0x359   : > { %v1643_v1 = vrot.slane %v1642_v0, 1  ;;  %15067 = vmatmul.mubr.msk.bf16.gmra.mxu1 %vm1658_vm2, %v15435_v54 }
 0x35a   : > { %15070 = vmatprep.mubr.msk.bf16.mxu1 %vm1658_vm2, %v15436_v55  ;;  %v15516_v55 = vld [vmem:[%s18275_s3 + $0x250] sm:$0xff]  }
 0x35b   : > { %v1644_v2 = vadd.f32 %v1643_v1, %v1642_v0  ;;  %v15445_v0 = vld [vmem:[%s16503_s29 + $0x78] sm:$0xff]  }
 0x35d   : > { %v1645_v3 = vmul.f32 0.0009765625, %v1644_v2 }
 0x35f   : > { %v1646_v4 = vadd.f32 1e-05, %v1645_v3  ;;  %v1895_v3 = vld [vmem:[%s16593_s27 + $0x18] sm:$0xff] }
 0x361   : > { %16269 = vrsqrt.f32 %v1646_v4  ;;  %15071 = vmatmul.mubr.msk.bf16.gmra.mxu1 %vm1658_vm2, %v15437_v56  ;;  %v1894_v4 = vld [vmem:[%s16593_s27 + $0x10] sm:$0xff] }
 0x362   : > { %15074 = vmatprep.mubr.msk.bf16.mxu1 %vm1658_vm2, %v15438_v57  ;;  %v15517_v57 = vld [vmem:[%s18275_s3 + $0x210] sm:$0xff]  }
 0x369   : > { %15075 = vmatmul.mubr.msk.bf16.gmra.mxu1 %vm1658_vm2, %v15439_v58 }
 0x36a   : > { %15078 = vmatprep.mubr.msk.bf16.mxu1 %vm1658_vm2, %v15440_v59  ;;  %v15520_v59 = vld [vmem:[%s18275_s3 + $0x248] sm:$0xff]  }
 0x36e   : > { %v16270_v5 = vpop.eup %16269 }
 0x36f   : > { %v1655_v6 = vmul.f32 %v16270_v5, %v1599_v33  ;;  %v1654_v7 = vmul.f32 %v16270_v5, %v1598_v34  ;;  %v1653_v8 = vmul.f32 %v16270_v5, %v1597_v27  ;;  %v1652_v9 = vmul.f32 %v16270_v5, %v1596_v28 }
 0x370   : > { %v1651_v10 = vmul.f32 %v16270_v5, %v16765_v23  ;;  %v1650_v11 = vmul.f32 %v16270_v5, %v16767_v24  ;;  %v1649_v12 = vmul.f32 %v16270_v5, %v16761_v21  ;;  %v1648_v13 = vmul.f32 %v16270_v5, %v16763_v22  ;;  %v1893_v5 = vld [vmem:[%s16593_s27 + $0x8] sm:$0xff] }
 0x371   : > { %15024 = vmatprep.subr.mxu0 %v1655_v6  ;;  %15079 = vmatmul.mubr.msk.bf16.gmra.mxu1 %vm1658_vm2, %v15441_v60 }
 0x372   : > { %15025 = vmatpush3.msra.mxu0 %v1655_v6  ;;  %15082 = vmatprep.mubr.msk.bf16.mxu1 %vm1658_vm2, %v15442_v61  ;;  %v1892_v6 = vld [vmem:[%s16593_s27] sm:$0xff]  ;;  %v15521_v61 = vld [vmem:[%s18275_s3 + $0x208] sm:$0xff]  }
 0x373   : > { %15026 = vmatprep.subr.mxu0 %v1654_v7 }
 0x374   : > { %15027 = vmatpush3.msra.mxu0 %v1654_v7  ;;  %v15446_v7 = vld [vmem:[%s18275_s3 + $0x78] sm:$0xff]  }
 0x375   : > { %15028 = vmatprep.subr.mxu0 %v1653_v8 }
 0x376   : > { %15029 = vmatpush3.msra.mxu0 %v1653_v8  ;;  %v16457_v8 = vmov 0.0  }
 0x377   : > { %15030 = vmatprep.subr.mxu0 %v1652_v9 }
 0x378   : > { %15031 = vmatpush3.msra.mxu0 %v1652_v9 }
 0x379   : > { %15032 = vmatprep.subr.mxu0 %v1651_v10  ;;  %15083 = vmatmul.mubr.msk.bf16.gmra.mxu1 %vm1658_vm2, %v15443_v62 }
 0x37a   : > { %15033 = vmatpush3.msra.mxu0 %v1651_v10  ;;  %15086 = vmatprep.mubr.msk.bf16.mxu1 %vm1658_vm2, %v15444_v63 }
 0x37b   : > { %15034 = vmatprep.subr.mxu0 %v1650_v11 }
 0x37c   : > { %15035 = vmatpush3.msra.mxu0 %v1650_v11 }
 0x37d   : > { %15036 = vmatprep.subr.mxu0 %v1649_v12 }
 0x37e   : > { %15037 = vmatpush3.msra.mxu0 %v1649_v12 }
 0x37f   : > { %15038 = vmatprep.subr.mxu0 %v1648_v13 }
 0x380   : > { %15039 = vmatpush3.msra.mxu0 %v1648_v13  ;;  %v15464_v13 = vld [vmem:[%s18275_s3 + $0x178] sm:$0xff]  }
 0x381   : > { %15041 = vmatmul.mubr.msk.f32.vlgmr.msra.gmra.mxu0 %vm1658_vm2, %v1657_v14  ;;  %15087 = vmatmul.mubr.msk.bf16.gmra.mxu1 %vm1658_vm2, %v15445_v0  ;;  %v15465_v14 = vld [vmem:[%s18275_s3 + $0x138] sm:$0xff]   ;;  %v15524_v0 = vld [vmem:[%s18275_s3 + $0x240] sm:$0xff]  }
 0x382   : > { %14324 = vmatprep.subr.bf16.mxu1 %v15464_v13  ;;  %v15536_v13 = vld [vmem:[%s18275_s3 + $0x368] sm:$0xff]  }
 0x383   : > { %14325 = vmatpush3.bf16.msra.mxu1 %v15465_v14  ;;  %v15537_v14 = vld [vmem:[%s18275_s3 + $0x328] sm:$0xff]  }
 0x409   : > { %v16837_v9 = vpop.f32.mrf.mxu1 }
 0x40b   : > { %v16839_v10 = vpop.f32.mrf.mxu1 }
 0x40d   : > { %v16841_v11 = vpop.f32.mrf.mxu1 }
 0x40e   : > { %v14164_v12 = vpack.c.bf16 %v16841_v11, %v16837_v9  ;;  %v15458_v9 = vld [vmem:[%s18275_s3 + $0x48] sm:$0xff]  }
 0x40f   : > { %v15459_v11 = vld [vmem:[%s18275_s3 + $0x8] sm:$0xff]  }
 0x441   : > { %v15042_v15 = vpop.f32.mrf.mxu0 }
 0x442   : > { %v1743_v16 = vsel %vm1552_vm1, %v15042_v15, 0.0 }
 0x443   : > { %1744 = vadd.xlane.f32.xlu1 %v1743_v16  ;;  %v1731_v17 = vpop.f32.mrf.mxu0  ;;  %v15469_v16 = vld [vmem:[%s18275_s3 + $0x130] sm:$0xff]  }
 0x444   : > { %v1740_v18 = vsel %vm1552_vm1, %v1731_v17, 0.0 }
 0x445   : > { %1741 = vadd.xlane.f32.xlu0 %v1740_v18  ;;  %v15473_v18 = vld [vmem:[%s18275_s3 + $0x128] sm:$0xff]  }
 0x4cc   : > { %v1745_v19 = vpop.xlane.xlu1 %1744 }
 0x4ce   : > { %v1742_v20 = vpop.xlane.xlu0 %1741 }
 0x4cf   : > { %v1746_v21 = vadd.f32 %v1745_v19, %v1742_v20  ;;  %v16851_v19 = vpop.f32.mrf.mxu1  ;;  %v15476_v20 = vld [vmem:[%s18275_s3 + $0x160] sm:$0xff]  }
 0x4d1   : > { %v1747_v23 = vrot.slane %v1746_v21, 4 }
 0x4d3   : > { %v1748_v24 = vadd.f32 %v1747_v23, %v1746_v21  ;;  %v15477_v21 = vld [vmem:[%s18275_s3 + $0x120] sm:$0xff]   ;;  %v16855_v23 = vpop.f32.mrf.mxu1 }
 0x4d5   : > { %v1749_v22 = vrot.slane %v1748_v24, 2 }
 0x4d7   : > { %v1750_v25 = vadd.f32 %v1749_v22, %v1748_v24  ;;  %v15480_v24 = vld [vmem:[%s18275_s3 + $0x158] sm:$0xff]   ;;  %v16858_v22 = vpop.f32.mrf.mxu1 }
 0x4d9   : > { %v1751_v26 = vrot.slane %v1750_v25, 1 }
 0x4db   : > { %v1752_v27 = vadd.f32 %v1751_v26, %v1750_v25  ;;  %v15481_v25 = vld [vmem:[%s18275_s3 + $0x118] sm:$0xff]   ;;  %v16861_v26 = vpop.f32.mrf.mxu1 }
 0x4dd   : > { %v1754_v28 = vmul.f32 0.00390625, %v1752_v27  ;;  %v14166_v27 = vpack.c.bf16 %v16861_v26, %v16855_v23  ;;  %v15482_v23 = vld [vmem:[%s18275_s3 + $0xd0] sm:$0xff]  }
 0x4de   : > { %v15483_v26 = vld [vmem:[%s18275_s3 + $0x90] sm:$0xff]  }
 0x4df   : > { %v1756_v29 = vsub.f32 %v15042_v15, %v1754_v28  ;;  %v1755_v30 = vsub.f32 %v1731_v17, %v1754_v28  ;;  %v15468_v15 = vld [vmem:[%s18275_s3 + $0x170] sm:$0xff]   ;;  %v15472_v17 = vld [vmem:[%s18275_s3 + $0x168] sm:$0xff]  }
 0x4e0   : > { %14326 = vmatprep.subr.bf16.mxu1 %v15468_v15  ;;  %v15484_v28 = vld [vmem:[%s18275_s3 + $0x150] sm:$0xff]   ;;  %v15540_v15 = vld [vmem:[%s18275_s3 + $0x360] sm:$0xff]  }
 0x4e1   : > { %v1758_v31 = vmul.f32 %v1756_v29, %v1756_v29  ;;  %v1757_v32 = vmul.f32 %v1755_v30, %v1755_v30  ;;  %14327 = vmatpush3.bf16.msra.mxu1 %v15469_v16  ;;  %v15541_v16 = vld [vmem:[%s18275_s3 + $0x320] sm:$0xff]  }
 0x4e2   : > { %14328 = vmatprep.subr.bf16.mxu1 %v15472_v17 }
 0x4e3   : > { %v1762_v33 = vsel %vm1552_vm1, %v1758_v31, 0.0  ;;  %v1759_v34 = vsel %vm1552_vm1, %v1757_v32, 0.0  ;;  %v15488_v32 = vld [vmem:[%s18275_s3 + $0x148] sm:$0xff]  }
 0x4e4   : > { %1763 = vadd.xlane.f32.xlu1 %v1762_v33  ;;  %1760 = vadd.xlane.f32.xlu0 %v1759_v34  ;;  %v15489_v34 = vld [vmem:[%s18275_s3 + $0x108] sm:$0xff]  }
 0x4e5   : > { %14329 = vmatpush3.bf16.msra.mxu1 %v15473_v18  ;;  %v15544_v18 = vld [vmem:[%s18275_s3 + $0x358] sm:$0xff]  }
 0x4e6   : > { %14330 = vmatprep.subr.bf16.mxu1 %v15476_v20 }
 0x4e9   : > { %14331 = vmatpush3.bf16.msra.mxu1 %v15477_v21  ;;  %v15545_v21 = vld [vmem:[%s18275_s3 + $0x318] sm:$0xff]  }
 0x4ea   : > { %14332 = vmatprep.subr.bf16.mxu1 %v15480_v24 }
 0x4ed   : > { %14333 = vmatpush3.bf16.msra.mxu1 %v15481_v25 }
 0x4ee   : > { %14334 = vmatprep.subr.bf16.mxu1 %v15484_v28  ;;  %v15548_v28 = vld [vmem:[%s18275_s3 + $0x350] sm:$0xff]  }
 0x56d   : > { %v1764_v35 = vpop.xlane.xlu1 %1763  ;;  %v1761_v36 = vpop.xlane.xlu0 %1760 }
 0x56e   : > { %v1765_v37 = vadd.f32 %v1764_v35, %v1761_v36 }
 0x570   : > { %v1766_v38 = vrot.slane %v1765_v37, 4 }
 0x572   : > { %v1767_v39 = vadd.f32 %v1766_v38, %v1765_v37  ;;  %v15492_v37 = vld [vmem:[%s18275_s3 + $0x140] sm:$0xff]  }
 0x574   : > { %v1768_v40 = vrot.slane %v1767_v39, 2 }
 0x576   : > { %v1769_v41 = vadd.f32 %v1768_v40, %v1767_v39  ;;  %v15493_v39 = vld [vmem:[%s18275_s3 + $0x100] sm:$0xff]  }
 0x578   : > { %v1770_v42 = vrot.slane %v1769_v41, 1 }
 0x57a   : > { %v1771_v43 = vadd.f32 %v1770_v42, %v1769_v41  ;;  %v15496_v41 = vld [vmem:[%s18275_s3 + $0x278] sm:$0xff]  }
 0x57b   : > { %v15497_v42 = vld [vmem:[%s18275_s3 + $0x238] sm:$0xff]  }
 0x57c   : > { %v1772_v44 = vmul.f32 0.00390625, %v1771_v43  ;;  %v15500_v43 = vld [vmem:[%s18275_s3 + $0x270] sm:$0xff]  }
 0x57e   : > { %v1773_v45 = vadd.f32 1e-05, %v1772_v44  ;;  %v15501_v44 = vld [vmem:[%s18275_s3 + $0x230] sm:$0xff]  }
 0x580   : > { %16271 = vrsqrt.f32 %v1773_v45  ;;  %v15504_v45 = vld [vmem:[%s18275_s3 + $0x268] sm:$0xff]  }
 0x58d   : > { %v16272_v46 = vpop.eup %16271 }
 0x58e   : > { %v1776_v47 = vmul.f32 %v16272_v46, %v1756_v29  ;;  %v1775_v48 = vmul.f32 %v16272_v46, %v1755_v30  ;;  %v16866_v29 = vpop.f32.mrf.mxu1  ;;  %v15485_v30 = vld [vmem:[%s18275_s3 + $0x110] sm:$0xff]   ;;  %v15505_v46 = vld [vmem:[%s18275_s3 + $0x228] sm:$0xff]  }
 0x58f   : > { %14335 = vmatpush3.bf16.msra.mxu1 %v15485_v30 }
 0x590   : > { %15043 = vmatprep.subr.mxu0 %v1776_v47  ;;  %1777 = vxpose.xlu0.b32.start [1/2] (short) (narrow) %v1775_v48, 16  ;;  %v15068_v31 = vpop.f32.mrf.mxu1 }
 0x591   : > { %15044 = vmatpush3.msra.mxu0 %v1776_v47  ;;  %14336 = vmatprep.subr.bf16.mxu1 %v15488_v32 }
 0x592   : > { %15045 = vmatprep.subr.mxu0 %v1775_v48  ;;  %v2317_v33 = vpop.f32.mrf.mxu1 }
 0x593   : > { %15046 = vmatpush3.msra.mxu0 %v1775_v48  ;;  %14337 = vmatpush3.bf16.msra.mxu1 %v15489_v34  ;;  %v15509_v48 = vld [vmem:[%s18275_s3 + $0x220] sm:$0xff]  }
 0x594   : > { %1778 = vxpose.xlu0.b32.end [2/2] (short) (narrow) %v1776_v47, 16  ;;  %1930 = vmatprep.subr.mxu0 %v1895_v3  ;;  %v15069_v35 = vpop.f32.mrf.mxu1  ;;  %v15508_v47 = vld [vmem:[%s18275_s3 + $0x260] sm:$0xff]  }
 0x595   : > { %v14168_v36 = vpack.c.bf16 %v15069_v35, %v15068_v31  ;;  %14338 = vmatprep.subr.bf16.mxu1 %v15492_v37  ;;  %v15549_v31 = vld [vmem:[%s18275_s3 + $0x310] sm:$0xff]   ;;  %v15553_v35 = vld [vmem:[%s18275_s3 + $0x308] sm:$0xff]  }
 0x596   : > { %v2320_v38 = vpop.f32.mrf.mxu1 }
 0x597   : > { %v14167_v40 = vpack.c.bf16 %v2320_v38, %v2317_v33  ;;  %3813 = vmatprep.mubr.bf16.mxu1 %v14168_v36  ;;  %14339 = vmatpush3.bf16.msra.mxu1 %v15493_v39  ;;  %v15552_v33 = vld [vmem:[%s18275_s3 + $0x348] sm:$0xff]   ;;  %v15556_v39 = vld [vmem:[%s18275_s3 + $0x340] sm:$0xff]  }
 0x598   : > { %14368 = vmatprep.subr.bf16.mxu1 %v15496_v41  ;;  %v16881_v49 = vpop.f32.mrf.mxu1  ;;  %v15447_v41 = vld [vmem:[%s18275_s3 + $0x38] sm:$0xff]  }
 0x59a   : > { %3814 = vmatmul.mubr.bf16.vlgmr.msra.gmra.mxu1 %v14167_v40  ;;  %v16884_v51 = vpop.f32.mrf.mxu1 }
 0x59b   : > { %14369 = vmatpush3.bf16.msra.mxu1 %v15497_v42 }
 0x59c   : > { %14370 = vmatprep.subr.bf16.mxu1 %v15500_v43  ;;  %v16887_v53 = vpop.f32.mrf.mxu1  ;;  %v15557_v43 = vld [vmem:[%s18275_s3 + $0x300] sm:$0xff]  }
 0x59d   : > { %v14170_v54 = vpack.c.bf16 %v16887_v53, %v16881_v49  ;;  %v15514_v49 = vld [vmem:[%s18275_s3 + $0x1d0] sm:$0xff]  }
 0x59e   : > { %v16892_v56 = vpop.f32.mrf.mxu1  ;;  %v15515_v53 = vld [vmem:[%s18275_s3 + $0x190] sm:$0xff]  }
 0x59f   : > { %14371 = vmatpush3.bf16.msra.mxu1 %v15501_v44 }
 0x5a0   : > { %14372 = vmatprep.subr.bf16.mxu1 %v15504_v45  ;;  %v15076_v58 = vpop.f32.mrf.mxu1  ;;  %v15448_v45 = vld [vmem:[%s18275_s3 + $0x70] sm:$0xff]  }
 0x5a2   : > { %v2349_v60 = vpop.f32.mrf.mxu1 }
 0x5a3   : > { %14373 = vmatpush3.bf16.msra.mxu1 %v15505_v46 }
 0x5a4   : > { %14374 = vmatprep.subr.bf16.mxu1 %v15508_v47  ;;  %v15077_v62 = vpop.f32.mrf.mxu1  ;;  %v15449_v47 = vld [vmem:[%s18275_s3 + $0x30] sm:$0xff]  }
 0x5a5   : > { %v14172_v63 = vpack.c.bf16 %v15077_v62, %v15076_v58  ;;  %v15454_v58 = vld [vmem:[%s18275_s3 + $0x58] sm:$0xff]   ;;  %v15461_v62 = vld [vmem:[%s18275_s3] sm:$0xff]  }
 0x5a7   : > { %14375 = vmatpush3.bf16.msra.mxu1 %v15509_v48  ;;  %3895 = vmatprep.mubr.bf16.mxu1 %v14172_v63  ;;  %v15462_v63 = vld [vmem:[%s18275_s3 + $0xf8] sm:$0xff]  }
 0x5a8   : > { %14376 = vmatprep.subr.bf16.mxu1 %v15512_v50  ;;  %v15450_v50 = vld [vmem:[%s18275_s3 + $0x68] sm:$0xff]  }
 0x5ab   : > { %14377 = vmatpush3.bf16.msra.mxu1 %v15513_v52  ;;  %v15451_v52 = vld [vmem:[%s18275_s3 + $0x28] sm:$0xff]  }
 0x5ac   : > { %14378 = vmatprep.subr.bf16.mxu1 %v15516_v55  ;;  %v15452_v55 = vld [vmem:[%s18275_s3 + $0x60] sm:$0xff]  }
 0x5af   : > { %14379 = vmatpush3.bf16.msra.mxu1 %v15517_v57  ;;  %v15453_v57 = vld [vmem:[%s18275_s3 + $0x20] sm:$0xff]  }
 0x5b0   : > { %14380 = vmatprep.subr.bf16.mxu1 %v15520_v59  ;;  %v15455_v59 = vld [vmem:[%s18275_s3 + $0x18] sm:$0xff]  }
 0x5b3   : > { %14381 = vmatpush3.bf16.msra.mxu1 %v15521_v61  ;;  %v15457_v61 = vld [vmem:[%s18275_s3 + $0x10] sm:$0xff]  }
 0x5b4   : > { %14382 = vmatprep.subr.bf16.mxu1 %v15524_v0  ;;  %v15463_v0 = vld [vmem:[%s18275_s3 + $0xb8] sm:$0xff]  }
 0x60c   : > { %v1793_v1 = vpop.trf.xlu0 }
 0x60d   : > { %15047 = vmatprep.mubr.msk.f32.mxu0 %vm1552_vm1, %v1793_v1  ;;  %v2352_v1 = vpop.f32.mrf.mxu1 }
 0x60e   : > { %v14171_v3 = vpack.c.bf16 %v2352_v1, %v2349_v60  ;;  %v15456_v60 = vld [vmem:[%s18275_s3 + $0x50] sm:$0xff]   ;;  %v14163_v1 = vpack.c.bf16 %v16851_v19, %v16839_v10  ;;  %v15474_v10 = vld [vmem:[%s18275_s3 + $0xe0] sm:$0xff]  }
 0x60f   : > { %v16907_v17 = vpop.f32.mrf.mxu1  ;;  %v15475_v19 = vld [vmem:[%s18275_s3 + $0xa0] sm:$0xff]  }
 0x610   : > { %v1794_v2 = vpop.trf.xlu0 }
 0x611   : > { %15048 = vmatmul.mubr.msk.f32.vlgmr.msra.gmra.mxu0 %vm1552_vm1, %v1794_v2  ;;  %v15525_v2 = vld [vmem:[%s18275_s3 + $0x200] sm:$0xff]   ;;  %v16910_v20 = vpop.f32.mrf.mxu1 }
 0x612   : > { %1931 = vmatpush1.msra.mxu0 %v1894_v4  ;;  %1966 = vmatprep.mubr.f32.mxu0 %v16457_v8  ;;  %v15528_v4 = vld [vmem:[%s18275_s3 + $0x378] sm:$0xff]  }
 0x613   : > { %1932 = vmatprep.subr.mxu0 %v1893_v5  ;;  %14383 = vmatpush3.bf16.msra.mxu1 %v15525_v2  ;;  %v15529_v5 = vld [vmem:[%s18275_s3 + $0x338] sm:$0xff]   ;;  %v16913_v24 = vpop.f32.mrf.mxu1  ;;  %v15466_v2 = vld [vmem:[%s18275_s3 + $0xf0] sm:$0xff]  }
 0x614   : > { %1933 = vmatpush1.msra.mxu0 %v1892_v6  ;;  %14412 = vmatprep.subr.bf16.mxu1 %v15528_v4  ;;  %v15532_v6 = vld [vmem:[%s18275_s3 + $0x370] sm:$0xff]   ;;  %v14174_v25 = vpack.c.bf16 %v16913_v24, %v16907_v17  ;;  %v15470_v4 = vld [vmem:[%s18275_s3 + $0xe8] sm:$0xff]  }
 0x615   : > { %14280 = vmatprep.subr.bf16.mxu0 %v15446_v7  ;;  %v15533_v7 = vld [vmem:[%s18275_s3 + $0x330] sm:$0xff]   ;;  %v16918_v30 = vpop.f32.mrf.mxu1 }
 0x616   : > { %3896 = vmatmul.mubr.bf16.vlgmr.msra.gmra.mxu1 %v14171_v3  ;;  %v15467_v3 = vld [vmem:[%s18275_s3 + $0xb0] sm:$0xff]  }
 0x617   : > { %14413 = vmatpush3.bf16.msra.mxu1 %v15529_v5  ;;  %v15084_v32 = vpop.f32.mrf.mxu1  ;;  %v15471_v5 = vld [vmem:[%s18275_s3 + $0xa8] sm:$0xff]   ;;  %v15546_v17 = vld [vmem:[%s18275_s3 + $0x2d0] sm:$0xff]  }
 0x618   : > { %14414 = vmatprep.subr.bf16.mxu1 %v15532_v6  ;;  %v15478_v6 = vld [vmem:[%s18275_s3 + $0xd8] sm:$0xff]   ;;  %v15547_v24 = vld [vmem:[%s18275_s3 + $0x290] sm:$0xff]  }
 0x619   : > { %v2381_v34 = vpop.f32.mrf.mxu1 }
 0x61b   : > { %14415 = vmatpush3.bf16.msra.mxu1 %v15533_v7  ;;  %v15085_v37 = vpop.f32.mrf.mxu1  ;;  %v15479_v7 = vld [vmem:[%s18275_s3 + $0x98] sm:$0xff]  }
 0x61c   : > { %14416 = vmatprep.subr.bf16.mxu1 %v15536_v13  ;;  %v14176_v38 = vpack.c.bf16 %v15085_v37, %v15084_v32  ;;  %v15487_v13 = vld [vmem:[%s18275_s3 + $0x88] sm:$0xff]   ;;  %v15522_v37 = vld [vmem:[%s18275_s3 + $0x1c0] sm:$0xff]  }
 0x61d   : > { %v2384_v42 = vpop.f32.mrf.mxu1  ;;  %v15502_v32 = vld [vmem:[%s18275_s3 + $0x1e8] sm:$0xff]  }
 0x61e   : > { %v14175_v46 = vpack.c.bf16 %v2384_v42, %v2381_v34  ;;  %3977 = vmatprep.mubr.bf16.mxu1 %v14176_v38  ;;  %v15510_v34 = vld [vmem:[%s18275_s3 + $0x1d8] sm:$0xff]   ;;  %v15523_v38 = vld [vmem:[%s18275_s3 + $0x180] sm:$0xff]   ;;  %v15530_v42 = vld [vmem:[%s18275_s3 + $0x2f0] sm:$0xff]  }
 0x61f   : > { %14417 = vmatpush3.bf16.msra.mxu1 %v15537_v14  ;;  %v15490_v14 = vld [vmem:[%s18275_s3 + $0xc0] sm:$0xff]  }
 0x620   : > { %14418 = vmatprep.subr.bf16.mxu1 %v15540_v15  ;;  %v15491_v15 = vld [vmem:[%s18275_s3 + $0x80] sm:$0xff]  }
 0x623   : > { %14419 = vmatpush3.bf16.msra.mxu1 %v15541_v16  ;;  %v15494_v16 = vld [vmem:[%s18275_s3 + $0x1f8] sm:$0xff]  }
 0x624   : > { %14420 = vmatprep.subr.bf16.mxu1 %v15544_v18  ;;  %v15495_v18 = vld [vmem:[%s18275_s3 + $0x1b8] sm:$0xff]  }
 0x627   : > { %14421 = vmatpush3.bf16.msra.mxu1 %v15545_v21  ;;  %v14165_v21 = vpack.c.bf16 %v16866_v29, %v16858_v22  ;;  %v15506_v22 = vld [vmem:[%s18275_s3 + $0x1e0] sm:$0xff]  }
 0x628   : > { %14422 = vmatprep.subr.bf16.mxu1 %v15548_v28  ;;  %v15498_v28 = vld [vmem:[%s18275_s3 + $0x1f0] sm:$0xff]   ;;  %v15507_v29 = vld [vmem:[%s18275_s3 + $0x1a0] sm:$0xff]  }
 0x62b   : > { %14423 = vmatpush3.bf16.msra.mxu1 %v15549_v31  ;;  %v15499_v31 = vld [vmem:[%s18275_s3 + $0x1b0] sm:$0xff]  }
 0x62c   : > { %14424 = vmatprep.subr.bf16.mxu1 %v15552_v33  ;;  %v15503_v33 = vld [vmem:[%s18275_s3 + $0x1a8] sm:$0xff]  }
 0x62f   : > { %14425 = vmatpush3.bf16.msra.mxu1 %v15553_v35  ;;  %v15511_v35 = vld [vmem:[%s18275_s3 + $0x198] sm:$0xff]  }
 0x630   : > { %14426 = vmatprep.subr.bf16.mxu1 %v15556_v39  ;;  %v15526_v39 = vld [vmem:[%s18275_s3 + $0x2f8] sm:$0xff]  }
 0x633   : > { %14427 = vmatpush3.bf16.msra.mxu1 %v15557_v43  ;;  %v15531_v43 = vld [vmem:[%s18275_s3 + $0x2b0] sm:$0xff]  }
 0x634   : > { %15090 = vmatprep.subr.bf16.mxu1 %v16457_v8 }
 0x636   : > { %3978 = vmatmul.mubr.bf16.vlgmr.msra.gmra.mxu1 %v14175_v46  ;;  %v15542_v46 = vld [vmem:[%s18275_s3 + $0x2d8] sm:$0xff]  }
 0x637   : > { %15106 = vmatprep.mubr.msk.bf16.mxu1 %vm16459_vm4, %v16457_v8 }
 0x6d1   : > { %v15049_v36 = vpop.f32.mrf.mxu0 }
 0x6d2   : > { %v1891_v48 = vmul.f32 0.062499996, %v15049_v36  ;;  %v15519_v36 = vld [vmem:[%s18275_s3 + $0x188] sm:$0xff]  }
 0x6d3   : > { %v1881_v40 = vpop.f32.mrf.mxu0 }
 0x6d4   : > { %v1890_v44 = vmul.f32 0.062499996, %v1881_v40  ;;  %v15527_v40 = vld [vmem:[%s18275_s3 + $0x2b8] sm:$0xff]  }
 0x6d6   : > { %12928 = vmatmul.mubr.msk.f32.vlgmr.msra.gmra.mxu0 %vm1552_vm1, %v1890_v44  ;;  %v15534_v44 = vld [vmem:[%s18275_s3 + $0x2e8] sm:$0xff]  }
 0x6d7   : > { %14281 = vmatpush3.bf16.msra.mxu0 %v15447_v41  ;;  %1972 = vmatprep.mubr.f32.mxu0 %v16457_v8  ;;  %v14169_v41 = vpack.c.bf16 %v16892_v56, %v16884_v51  ;;  %v15538_v51 = vld [vmem:[%s18275_s3 + $0x2e0] sm:$0xff]  }
 0x6d8   : > { %14282 = vmatprep.subr.bf16.mxu0 %v15448_v45  ;;  %v15535_v45 = vld [vmem:[%s18275_s3 + $0x2a8] sm:$0xff]   ;;  %v15539_v56 = vld [vmem:[%s18275_s3 + $0x2a0] sm:$0xff]  }
 0x6da   : > { %12929 = vmatmul.mubr.msk.f32.gmra.mxu0 %vm1552_vm1, %v1891_v48  ;;  %v15088_v48 = vpop.f32.mrf.mxu1 }
 0x6db   : > { %14283 = vmatpush3.bf16.msra.mxu0 %v15449_v47  ;;  %3731 = vmatprep.mubr.bf16.mxu0 %v14164_v12  ;;  %v15460_v12 = vld [vmem:[%s18275_s3 + $0x40] sm:$0xff]   ;;  %v15543_v47 = vld [vmem:[%s18275_s3 + $0x298] sm:$0xff]  }
 0x6dc   : > { %14284 = vmatprep.subr.bf16.mxu0 %v15450_v50  ;;  %v15551_v50 = vld [vmem:[%s18275_s3 + $0x288] sm:$0xff]  }
 0x6df   : > { %14285 = vmatpush3.bf16.msra.mxu0 %v15451_v52  ;;  %v15554_v52 = vld [vmem:[%s18275_s3 + $0x2c0] sm:$0xff]  }
 0x6e0   : > { %14286 = vmatprep.subr.bf16.mxu0 %v15452_v55  ;;  %v2397_v55 = vpop.f32.mrf.mxu1 }
 0x6e3   : > { %14287 = vmatpush3.bf16.msra.mxu0 %v15453_v57  ;;  %v15555_v57 = vld [vmem:[%s18275_s3 + $0x280] sm:$0xff]  }
 0x6e4   : > { %14288 = vmatprep.subr.bf16.mxu0 %v15454_v58  ;;  %v15558_v58 = vld [vmem:[%s18275_s3 + $0x3f8] sm:$0xff]  }
 0x6e7   : > { %14289 = vmatpush3.bf16.msra.mxu0 %v15455_v59  ;;  %v15089_v59 = vpop.f32.mrf.mxu1 }
 0x6e8   : > { %14290 = vmatprep.subr.bf16.mxu0 %v15456_v60  ;;  %v15559_v60 = vld [vmem:[%s18275_s3 + $0x3b8] sm:$0xff]  }
 0x6eb   : > { %14291 = vmatpush3.bf16.msra.mxu0 %v15457_v61  ;;  %v14178_v61 = vpack.c.bf16 %v15089_v59, %v15088_v48  ;;  %v15581_v59 = vld [vmem:[%s18272_s14] sm:$0xff]  }
 0x6ec   : > { %14292 = vmatprep.subr.bf16.mxu0 %v15458_v9  ;;  %v14173_v9 = vpack.c.bf16 %v16918_v30, %v16910_v20  ;;  %v15565_v20 = vld [vmem:[%s18275_s3 + $0x3a0] sm:$0xff]   ;;  %v15566_v30 = vld [vmem:[%s18275_s3 + $0x3d8] sm:$0xff]  }
 0x6ef   : > { %14293 = vmatpush3.bf16.msra.mxu0 %v15459_v11  ;;  %v15560_v11 = vld [vmem:[%s18275_s3 + $0x3f0] sm:$0xff]  }
 0x6f0   : > { %14294 = vmatprep.subr.bf16.mxu0 %v15460_v12  ;;  %v15561_v12 = vld [vmem:[%s18275_s3 + $0x3b0] sm:$0xff]  }
 0x6f3   : > { %14295 = vmatpush3.bf16.msra.mxu0 %v15461_v62  ;;  %v15562_v62 = vld [vmem:[%s18275_s3 + $0x3e8] sm:$0xff]  }
 0x6f4   : > { %14302 = vmatprep.subr.bf16.mxu0 %v15462_v63  ;;  %v15563_v63 = vld [vmem:[%s18275_s3 + $0x3a8] sm:$0xff]  }
 0x6f6   : > { %3732 = vmatmul.mubr.bf16.vlgmr.msra.gmra.mxu0 %v14163_v1  ;;  %v15567_v1 = vld [vmem:[%s18275_s3 + $0x398] sm:$0xff]  }
 0x6f7   : > { %14303 = vmatpush3.bf16.msra.mxu0 %v15463_v0  ;;  %3772 = vmatprep.mubr.bf16.mxu0 %v14166_v27  ;;  %v15486_v27 = vld [vmem:[%s18275_s3 + $0xc8] sm:$0xff]   ;;  %v15564_v0 = vld [vmem:[%s18275_s3 + $0x3e0] sm:$0xff]  }
 0x6f8   : > { %14304 = vmatprep.subr.bf16.mxu0 %v15466_v2  ;;  %v15568_v2 = vld [vmem:[%s18275_s3 + $0x3d0] sm:$0xff]  }
 0x6fb   : > { %14305 = vmatpush3.bf16.msra.mxu0 %v15467_v3  ;;  %v15569_v3 = vld [vmem:[%s18275_s3 + $0x390] sm:$0xff]  }
 0x6fc   : > { %14306 = vmatprep.subr.bf16.mxu0 %v15470_v4  ;;  %v15570_v4 = vld [vmem:[%s18275_s3 + $0x3c8] sm:$0xff]  }
 0x6ff   : > { %14307 = vmatpush3.bf16.msra.mxu0 %v15471_v5  ;;  %v15571_v5 = vld [vmem:[%s18275_s3 + $0x388] sm:$0xff]  }
 0x700   : > { %14308 = vmatprep.subr.bf16.mxu0 %v15474_v10  ;;  %v15572_v10 = vld [vmem:[%s18275_s3 + $0x3c0] sm:$0xff]  }
 0x703   : > { %14309 = vmatpush3.bf16.msra.mxu0 %v15475_v19  ;;  %v15573_v19 = vld [vmem:[%s18275_s3 + $0x380] sm:$0xff]  }
 0x704   : > { %14310 = vmatprep.subr.bf16.mxu0 %v15478_v6  ;;  %v2400_v6 = vpop.f32.mrf.mxu1 }
 0x707   : > { %14311 = vmatpush3.bf16.msra.mxu0 %v15479_v7  ;;  %v14177_v7 = vpack.c.bf16 %v2400_v6, %v2397_v55 }
 0x708   : > { %14312 = vmatprep.subr.bf16.mxu0 %v15482_v23 }
 0x70b   : > { %14313 = vmatpush3.bf16.msra.mxu0 %v15483_v26  ;;  %v1979_v26 = vld [vmem:[%s18274_s4] sm:$0xff] }
 0x70c   : > { %14314 = vmatprep.subr.bf16.mxu0 %v15486_v27 }
 0x70f   : > { %14315 = vmatpush3.bf16.msra.mxu0 %v15487_v13  ;;  %v1981_v13 = vld [vmem:[%s18274_s4 + $0x10] sm:$0xff] }
 0x710   : > { %14316 = vmatprep.subr.bf16.mxu0 %v15490_v14  ;;  %v1980_v14 = vld [vmem:[%s18274_s4 + $0x8] sm:$0xff] }
 0x713   : > { %14317 = vmatpush3.bf16.msra.mxu0 %v15491_v15 }
 0x714   : > { %14346 = vmatprep.subr.bf16.mxu0 %v15494_v16  ;;  %v1982_v16 = vld [vmem:[%s18274_s4 + $0x18] sm:$0xff] }
 0x716   : > { %3773 = vmatmul.mubr.bf16.vlgmr.msra.gmra.mxu0 %v14165_v21 }
 0x717   : > { %14347 = vmatpush3.bf16.msra.mxu0 %v15495_v18  ;;  %3854 = vmatprep.mubr.bf16.mxu0 %v14170_v54  ;;  %v15518_v54 = vld [vmem:[%s18275_s3 + $0x1c8] sm:$0xff]  }
 0x718   : > { %14348 = vmatprep.subr.bf16.mxu0 %v15498_v28 }
 0x71b   : > { %14349 = vmatpush3.bf16.msra.mxu0 %v15499_v31 }
 0x71c   : > { %14350 = vmatprep.subr.bf16.mxu0 %v15502_v32 }
 0x71f   : > { %14351 = vmatpush3.bf16.msra.mxu0 %v15503_v33 }
 0x720   : > { %14352 = vmatprep.subr.bf16.mxu0 %v15506_v22 }
 0x723   : > { %14353 = vmatpush3.bf16.msra.mxu0 %v15507_v29 }
 0x724   : > { %14354 = vmatprep.subr.bf16.mxu0 %v15510_v34 }
 0x727   : > { %14355 = vmatpush3.bf16.msra.mxu0 %v15511_v35 }
 0x728   : > { %14356 = vmatprep.subr.bf16.mxu0 %v15514_v49  ;;  %v15574_v49 = vld [vmem:[%s18272_s14 + $0x38] sm:$0xff]  }
 0x729   : > { %15091 = vmatpush3.bf16.msra.mxu1 %v15574_v49 }
 0x72a   : > { %15092 = vmatprep.subr.bf16.mxu1 %v16457_v8 }
 0x72b   : > { %14357 = vmatpush3.bf16.msra.mxu0 %v15515_v53 }
 0x72c   : > { %14358 = vmatprep.subr.bf16.mxu0 %v15518_v54 }
 0x72f   : > { %14359 = vmatpush3.bf16.msra.mxu0 %v15519_v36  ;;  %v16458_v36 = vmov 1966171168  }
 0x730   : > { %14360 = vmatprep.subr.bf16.mxu0 %v15522_v37  ;;  %v2005_v37 = vunpack.c.l.s4 %v16458_v36 }
 0x733   : > { %14361 = vmatpush3.bf16.msra.mxu0 %v15523_v38  ;;  %v2007_v38 = vlaneseq }
 0x734   : > { %14390 = vmatprep.subr.bf16.mxu0 %v15526_v39  ;;  %v15575_v39 = vld [vmem:[%s18272_s14 + $0x30] sm:$0xff]  }
 0x735   : > { %15093 = vmatpush3.bf16.msra.mxu1 %v15575_v39  ;;  %vm17046_vm3 = vcmp.lt.s32.totalorder %v2007_v38, 256 }
 0x736   : > { %3855 = vmatmul.mubr.bf16.vlgmr.msra.gmra.mxu0 %v14169_v41  ;;  %15094 = vmatprep.subr.bf16.mxu1 %v16457_v8 }
 0x737   : > { %14391 = vmatpush3.bf16.msra.mxu0 %v15527_v40  ;;  %3936 = vmatprep.mubr.bf16.mxu0 %v14174_v25  ;;  %v15550_v25 = vld [vmem:[%s18275_s3 + $0x2c8] sm:$0xff]   ;;  %s18294_s3 = sld [smem:[#allocation28_spill]] }
 0x738   : > { %14392 = vmatprep.subr.bf16.mxu0 %v15530_v42 }
 0x73b   : > { %14393 = vmatpush3.bf16.msra.mxu0 %v15531_v43 }
 0x73c   : > { %14394 = vmatprep.subr.bf16.mxu0 %v15534_v44  ;;  %v2006_v44 = vunpack.c.0.s8 %v2005_v37 }
 0x73f   : > { %14395 = vmatpush3.bf16.msra.mxu0 %v15535_v45  ;;  %v17035_v45 = vshrl.u32 %v2007_v38, 7 }
 0x740   : > { %14396 = vmatprep.subr.bf16.mxu0 %v15538_v51  ;;  %v15576_v51 = vld [vmem:[%s18272_s14 + $0x28] sm:$0xff]  }
 0x741   : > { %15095 = vmatpush3.bf16.msra.mxu1 %v15576_v51 }
 0x742   : > { %15096 = vmatprep.subr.bf16.mxu1 %v16457_v8 }
 0x743   : > { %14397 = vmatpush3.bf16.msra.mxu0 %v15539_v56 }
 0x744   : > { %14398 = vmatprep.subr.bf16.mxu0 %v15542_v46 }
 0x747   : > { %14399 = vmatpush3.bf16.msra.mxu0 %v15543_v47 }
 0x748   : > { %14400 = vmatprep.subr.bf16.mxu0 %v15546_v17  ;;  %v17040_v17 = vsub.s32 %v2006_v44, %v17035_v45 }
 0x74b   : > { %14401 = vmatpush3.bf16.msra.mxu0 %v15547_v24  ;;  %v15577_v24 = vld [vmem:[%s18272_s14 + $0x20] sm:$0xff]  }
 0x74c   : > { %14402 = vmatprep.subr.bf16.mxu0 %v15550_v25  ;;  %15097 = vmatpush3.bf16.msra.mxu1 %v15577_v24 }
 0x74d   : > { %15098 = vmatprep.subr.bf16.mxu1 %v16457_v8 }
 0x74f   : > { %14403 = vmatpush3.bf16.msra.mxu0 %v15551_v50  ;;  %v15578_v50 = vld [vmem:[%s18272_s14 + $0x18] sm:$0xff]  }
 0x750   : > { %14404 = vmatprep.subr.bf16.mxu0 %v15554_v52  ;;  %15099 = vmatpush3.bf16.msra.mxu1 %v15578_v50 }
 0x751   : > { %15100 = vmatprep.subr.bf16.mxu1 %v16457_v8 }
 0x753   : > { %14405 = vmatpush3.bf16.msra.mxu0 %v15555_v57  ;;  %v15579_v57 = vld [vmem:[%s18272_s14 + $0x10] sm:$0xff]  }
 0x754   : > { %14434 = vmatprep.subr.bf16.mxu0 %v15558_v58  ;;  %15101 = vmatpush3.bf16.msra.mxu1 %v15579_v57  ;;  %v15580_v58 = vld [vmem:[%s18272_s14 + $0x8] sm:$0xff]   ;;  %s16327_s14 = sshll.u32 %s16463_s13, 4  ;;  %s16328_s14 = int_to_ptr.vmem [resolvable:$false] %s16327_s14 }
 0x755   : > { %15102 = vmatprep.subr.bf16.mxu1 %v16457_v8  ;;  %s16329_s17 = scalar_lea.vmem %s16328_s14, 32 }
 0x756   : > { %3937 = vmatmul.mubr.bf16.vlgmr.msra.gmra.mxu0 %v14173_v9 }
 0x757   : > { %14435 = vmatpush3.bf16.msra.mxu0 %v15559_v60  ;;  %4018 = vmatprep.mubr.bf16.mxu0 %v14178_v61 }
 0x758   : > { %14436 = vmatprep.subr.bf16.mxu0 %v15560_v11  ;;  %15103 = vmatpush3.bf16.msra.mxu1 %v15580_v58 }
 0x759   : > { %15104 = vmatprep.subr.bf16.mxu1 %v16457_v8 }
 0x75b   : > { %14437 = vmatpush3.bf16.msra.mxu0 %v15561_v12 }
 0x75c   : > { %14438 = vmatprep.subr.bf16.mxu0 %v15562_v62  ;;  %15105 = vmatpush3.bf16.msra.mxu1 %v15581_v59 }
 0x75f   : > { %14439 = vmatpush3.bf16.msra.mxu0 %v15563_v63  ;;  %v14340_v63 = vpop.f32.mrf.mxu1 }
 0x760   : > { %14440 = vmatprep.subr.bf16.mxu0 %v15564_v0 }
 0x763   : > { %14441 = vmatpush3.bf16.msra.mxu0 %v15565_v20  ;;  %v14341_v20 = vpop.f32.mrf.mxu1 }
 0x764   : > { %14442 = vmatprep.subr.bf16.mxu0 %v15566_v30 }
 0x767   : > { %14443 = vmatpush3.bf16.msra.mxu0 %v15567_v1  ;;  %v14343_v1 = vpop.f32.mrf.mxu1 }
 0x768   : > { %14444 = vmatprep.subr.bf16.mxu0 %v15568_v2 }
 0x76b   : > { %14445 = vmatpush3.bf16.msra.mxu0 %v15569_v3  ;;  %v14344_v3 = vpop.f32.mrf.mxu1 }
 0x76c   : > { %14446 = vmatprep.subr.bf16.mxu0 %v15570_v4 }
 0x76f   : > { %14447 = vmatpush3.bf16.msra.mxu0 %v15571_v5  ;;  %v14384_v5 = vpop.f32.mrf.mxu1 }
 0x770   : > { %14448 = vmatprep.subr.bf16.mxu0 %v15572_v10 }
 0x773   : > { %14449 = vmatpush3.bf16.msra.mxu0 %v15573_v19  ;;  %v14385_v19 = vpop.f32.mrf.mxu1 }
 0x776   : > { %4019 = vmatmul.mubr.bf16.vlgmr.msra.gmra.mxu0 %v14177_v7  ;;  %v14387_v7 = vpop.f32.mrf.mxu1 }
 0x796   : > { %v1968_v23 = vpop.f32.mrf.mxu0 }
 0x797   : > { %v1983_v18 = vmul.f32 %v1979_v26, %v1968_v23 }
 0x798   : > { %v1970_v27 = vpop.f32.mrf.mxu0 }
 0x799   : > { %v1984_v31 = vmul.f32 %v1980_v14, %v1970_v27  ;;  %v14388_v14 = vpop.f32.mrf.mxu1 }
 0x79a   : > { %v1974_v15 = vpop.f32.mrf.mxu0 }
 0x79b   : > { %v1985_v21 = vmul.f32 %v1981_v13, %v1974_v15  ;;  %v12994_v13 = vld [vmem:[%s18282_s8] ss:$0 sm:$0xff] }
 0x79c   : > { %v1976_v28 = vpop.f32.mrf.mxu0 }
 0x79d   : > { %v1987_v32 = vadd.f32 %v1985_v21, %v1983_v18  ;;  %v1986_v33 = vmul.f32 %v1982_v16, %v1976_v28  ;;  %v14428_v21 = vpop.f32.mrf.mxu1 }
 0x79f   : > { %v1988_v22 = vrot.slane %v1987_v32, 4  ;;  %v1994_v29 = vadd.f32 %v1986_v33, %v1984_v31  ;;  %v14342_v33 = vadd.f32 %v14341_v20, %v14340_v63 }
 0x7a1   : > { %v1989_v34 = vadd.f32 %v1988_v22, %v1987_v32  ;;  %v1995_v35 = vrot.slane %v1994_v29, 4 }
 0x7a3   : > { %v1990_v53 = vrot.slane %v1989_v34, 2  ;;  %v1996_v54 = vadd.f32 %v1995_v35, %v1994_v29  ;;  %v14345_v29 = vadd.f32 %v14344_v3, %v14343_v1  ;;  %v14429_v35 = vpop.f32.mrf.mxu1 }
 0x7a5   : > { %v1991_v40 = vadd.f32 %v1990_v53, %v1989_v34  ;;  %v1997_v41 = vrot.slane %v1996_v54, 2  ;;  %v14431_v38 = vpop.f32.mrf.mxu1 }
 0x7a7   : > { %v1992_v42 = vrot.slane %v1991_v40, 1  ;;  %v1998_v43 = vadd.f32 %v1997_v41, %v1996_v54  ;;  %v14432_v51 = vpop.f32.mrf.mxu1 }
 0x7a9   : > { %v1999_v56 = vrot.slane %v1998_v43, 1  ;;  %v1993_v46 = vadd.f32 %v1992_v42, %v1991_v40  ;;  %v14386_v40 = vadd.f32 %v14385_v19, %v14384_v5  ;;  %v14389_v42 = vadd.f32 %v14388_v14, %v14387_v7 }
 0x7ab   : > { %v2000_v47 = vadd.f32 %v1999_v56, %v1998_v43 }
 0x7ad   : > { %v2003_v25 = vcombine.low %v1993_v46, %v2000_v47 }
 0x7af   : > { %v2010_v48 = vrot.slane %v2003_v25, %v17040_v17 }
 0x7b1   : > { %v2017_v55 = vrot.slane %v2010_v48, %v17040_v17  ;;  %v14430_v48 = vadd.f32 %v14429_v35, %v14428_v21 }
 0x7b3   : > { %2023 = vst.msk [vmem:[#allocation3] ss:$4 sm:$0x3] %vm17046_vm3, %v2017_v55  ;;  %v14433_v55 = vadd.f32 %v14432_v51, %v14431_v38 }
 0x7b6   : > { %v14296_v60 = vpop.f32.mrf.mxu0 }
 0x7b8   : > { %v14297_v61 = vpop.f32.mrf.mxu0 }
 0x7b9   : > { %v14298_v26 = vadd.f32 %v14297_v61, %v14296_v60 }
 0x7ba   : > { %v14299_v9 = vpop.f32.mrf.mxu0 }
 0x7bb   : > { %v3734_v31 = vadd.f32 %v14298_v26, %v12994_v13 }
 0x7bc   : > { %v14300_v11 = vpop.f32.mrf.mxu0 }
 0x7bd   : > { %v14301_v27 = vadd.f32 %v14300_v11, %v14299_v9 }
 0x7bf   : > { %v3737_v28 = vadd.f32 %v14301_v27, %v12994_v13 }
 0x7d6   : > { %v14318_v12 = vpop.f32.mrf.mxu0 }
 0x7d8   : > { %v14319_v62 = vpop.f32.mrf.mxu0 }
 0x7d9   : > { %v14320_v15 = vadd.f32 %v14319_v62, %v14318_v12 }
 0x7da   : > { %v14321_v0 = vpop.f32.mrf.mxu0 }
 0x7db   : > { %v3775_v32 = vadd.f32 %v14320_v15, %v3734_v31 }
 0x7dc   : > { %v14322_v30 = vpop.f32.mrf.mxu0 }
 0x7dd   : > { %v14323_v16 = vadd.f32 %v14322_v30, %v14321_v0  ;;  %v3816_v54 = vadd.f32 %v14342_v33, %v3775_v32 }
 0x7df   : > { %v3778_v22 = vadd.f32 %v14323_v16, %v3737_v28 }
 0x7e1   : > { %v3819_v36 = vadd.f32 %v14345_v29, %v3778_v22  ;;  %v13139_v29 = vld [vmem:[%s18283_s19] ss:$0 sm:$0xff] }
 0x7f6   : > { %v14362_v2 = vpop.f32.mrf.mxu0 }
 0x7f8   : > { %v14363_v4 = vpop.f32.mrf.mxu0 }
 0x7f9   : > { %v14364_v49 = vadd.f32 %v14363_v4, %v14362_v2 }
 0x7fa   : > { %v14365_v10 = vpop.f32.mrf.mxu0 }
 0x7fb   : > { %v3857_v39 = vadd.f32 %v14364_v49, %v3816_v54 }
 0x7fc   : > { %v14366_v6 = vpop.f32.mrf.mxu0 }
 0x7fd   : > { %v14367_v53 = vadd.f32 %v14366_v6, %v14365_v10  ;;  %v3898_v46 = vadd.f32 %v14386_v40, %v3857_v39 }
 0x7ff   : > { %v3860_v41 = vadd.f32 %v14367_v53, %v3819_v36 }
 0x801   : > { %v3901_v47 = vadd.f32 %v14389_v42, %v3860_v41 }
 0x816   : > { %v14406_v23 = vpop.f32.mrf.mxu0 }
 0x818   : > { %v14407_v18 = vpop.f32.mrf.mxu0 }
 0x819   : > { %v14408_v43 = vadd.f32 %v14407_v18, %v14406_v23 }
 0x81a   : > { %v14409_v34 = vpop.f32.mrf.mxu0 }
 0x81b   : > { %v3939_v25 = vadd.f32 %v14408_v43, %v3898_v46 }
 0x81c   : > { %v14410_v37 = vpop.f32.mrf.mxu0 }
 0x81d   : > { %v14411_v44 = vadd.f32 %v14410_v37, %v14409_v34  ;;  %v3980_v60 = vadd.f32 %v14430_v48, %v3939_v25 }
 0x81f   : > { %v3942_v50 = vadd.f32 %v14411_v44, %v3901_v47 }
 0x821   : > { %v3983_v61 = vadd.f32 %v14433_v55, %v3942_v50 }
 0x836   : > { %v14450_v56 = vpop.f32.mrf.mxu0 }
 0x838   : > { %v14451_v24 = vpop.f32.mrf.mxu0 }
 0x839   : > { %v14452_v58 = vadd.f32 %v14451_v24, %v14450_v56 }
 0x83a   : > { %v14453_v57 = vpop.f32.mrf.mxu0 }
 0x83b   : > { %v4021_v11 = vadd.f32 %v14452_v58, %v3980_v60  ;;  %v4176_v58 = vld [vmem:[%s16528_s24] sm:$0xff] }
 0x83c   : > { %v14454_v59 = vpop.f32.mrf.mxu0  ;;  %15114 = vmatprep.mubr.msk.f32.mxu0 %vm1552_vm1, %v4176_v58  ;;  %v15588_v58 = vld [vmem:[%s18284_s1 + $0x30] sm:$0xff]  }
 0x83d   : > { %v14455_v9 = vadd.f32 %v14454_v59, %v14453_v57 }
 0x83f   : > { %v4024_v12 = vadd.f32 %v14455_v9, %v3983_v61 }
 0x841   : > { %v4027_v62 = vpack.c.bf16 %v4024_v12, %v4021_v11  ;;  %v4539_v63 = vadd.f32 %v4024_v12, %v4021_v11 }
 0x843   : > { %v4540_v0 = vrot.slane %v4539_v63, 4  ;;  %15107 = vmatmul.mubr.bf16.vlgmr.msra.gmra.mxu1 %v4027_v62 }
 0x845   : > { %v4541_v20 = vadd.f32 %v4540_v0, %v4539_v63 }
 0x847   : > { %v4542_v30 = vrot.slane %v4541_v20, 2 }
 0x849   : > { %v4543_v1 = vadd.f32 %v4542_v30, %v4541_v20 }
 0x84b   : > { %v4544_v2 = vrot.slane %v4543_v1, 1 }
 0x84d   : > { %v4545_v3 = vadd.f32 %v4544_v2, %v4543_v1 }
 0x84f   : > { %v4547_v4 = vmul.f32 0.0625, %v4545_v3 }
 0x851   : > { %v4549_v5 = vsub.f32 %v4024_v12, %v4547_v4  ;;  %v4548_v10 = vsub.f32 %v4021_v11, %v4547_v4  ;;  %v4177_v4 = vld [vmem:[%s16528_s24 + $0x8] sm:$0xff] }
 0x853   : > { %v4551_v19 = vmul.f32 %v4549_v5, %v4549_v5  ;;  %v4550_v6 = vmul.f32 %v4548_v10, %v4548_v10 }
 0x855   : > { %v4552_v7 = vadd.f32 %v4551_v19, %v4550_v6 }
 0x857   : > { %v4553_v23 = vrot.slane %v4552_v7, 4 }
 0x859   : > { %v4554_v26 = vadd.f32 %v4553_v23, %v4552_v7 }
 0x85b   : > { %v4555_v27 = vrot.slane %v4554_v26, 2 }
 0x85d   : > { %v4556_v13 = vadd.f32 %v4555_v27, %v4554_v26 }
 0x85f   : > { %v4557_v14 = vrot.slane %v4556_v13, 1 }
 0x861   : > { %v4558_v15 = vadd.f32 %v4557_v14, %v4556_v13 }
 0x863   : > { %v4559_v16 = vmul.f32 0.0625, %v4558_v15 }
 0x865   : > { %v4560_v18 = vadd.f32 1e-05, %v4559_v16 }
 0x867   : > { %16273 = vrsqrt.f32 %v4560_v18 }
 0x874   : > { %v16274_v21 = vpop.eup %16273 }
 0x875   : > { %v4562_v28 = vmul.f32 %v16274_v21, %v4548_v10  ;;  %v4563_v31 = vmul.f32 %v16274_v21, %v4549_v5 }
 0x877   : > { %v4564_v32 = vmax.f32 %v4562_v28, 0.0  ;;  %v4565_v33 = vmax.f32 %v4563_v31, 0.0 }
 0x879   : > { %v4566_v22 = vpack.c.bf16 %v4565_v33, %v4564_v32 }
 0x87b   : > { %15124 = vmatprep.subr.bf16.mxu1 %v4566_v22 }
 0x87c   : > { %15125 = vmatpush3.bf16.msra.mxu1 %v4566_v22 }
 0x903   : > { %v4133_v34 = vpop.f32.mrf.mxu1 }
 0x904   : > { %v4134_v35 = vadd.f32 %v13139_v29, %v4133_v34 }
 0x905   : > { %v15108_v49 = vpop.f32.mrf.mxu1 }
 0x906   : > { %v4140_v53 = vsel %vm1552_vm1, %v4134_v35, 0.0 }
 0x907   : > { %4141 = vadd.xlane.f32.xlu1 %v4140_v53  ;;  %v4136_v54 = vpop.f32.mrf.mxu1 }
 0x908   : > { %v4137_v36 = vadd.f32 %v13139_v29, %v4136_v54 }
 0x909   : > { %v15109_v37 = vpop.f32.mrf.mxu1 }
 0x90a   : > { %v4143_v38 = vsel %vm1552_vm1, %v4137_v36, 0.0 }
 0x90b   : > { %4144 = vadd.xlane.f32.xlu1 %v4143_v38 }
 0x990   : > { %v4142_v39 = vpop.xlane.xlu1 %4141 }
 0x994   : > { %v4145_v40 = vpop.xlane.xlu1 %4144 }
 0x995   : > { %v4146_v41 = vadd.f32 %v4145_v40, %v4142_v39 }
 0x997   : > { %v4147_v42 = vrot.slane %v4146_v41, 4 }
 0x999   : > { %v4148_v43 = vadd.f32 %v4147_v42, %v4146_v41 }
 0x99b   : > { %v4149_v44 = vrot.slane %v4148_v43, 2 }
 0x99d   : > { %v4150_v51 = vadd.f32 %v4149_v44, %v4148_v43 }
 0x99f   : > { %v4151_v56 = vrot.slane %v4150_v51, 1 }
 0x9a1   : > { %v4152_v46 = vadd.f32 %v4151_v56, %v4150_v51  ;;  %v15582_v51 = vld [vmem:[%s18284_s1] sm:$0xff]   ;;  %v15583_v56 = vld [vmem:[%s18284_s1 + $0x8] sm:$0xff]  }
 0x9a2   : > { %15126 = vmatprep.mubr.msk.bf16.mxu1 %vm1552_vm1, %v15582_v51  ;;  %v15684_v51 = vld [vmem:[%s18285_s11 + $0x184] ss:$8 sps:$4 sm:$0xff]  }
 0x9a3   : > { %v4153_v47 = vmul.f32 0.00390625, %v4152_v46  ;;  %v15584_v46 = vld [vmem:[%s18284_s1 + $0x10] sm:$0xff]   ;;  %15127 = vmatmul.mubr.msk.bf16.vlgmr.msra.gmra.mxu1 %vm1552_vm1, %v15583_v56 }
 0x9a4   : > { %15130 = vmatprep.mubr.msk.bf16.mxu1 %vm1552_vm1, %v15584_v46  ;;  %v15682_v46 = vld [vmem:[%s18285_s11 + $0x180] ss:$8 sps:$4 sm:$0xff]  }
 0x9a5   : > { %v4154_v24 = vsub.f32 %v4134_v35, %v4153_v47  ;;  %v4155_v25 = vsub.f32 %v4137_v36, %v4153_v47  ;;  %v15594_v47 = vld [vmem:[%s18285_s11 + $0x170] ss:$8 sps:$4 sm:$0xff]  }
 0x9a7   : > { %v4156_v48 = vmul.f32 %v4154_v24, %v4154_v24  ;;  %v4157_v55 = vmul.f32 %v4155_v25, %v4155_v25 }
 0x9a9   : > { %v4158_v50 = vsel %vm1552_vm1, %v4156_v48, 0.0  ;;  %v4161_v57 = vsel %vm1552_vm1, %v4157_v55, 0.0  ;;  %v15585_v48 = vld [vmem:[%s18284_s1 + $0x18] sm:$0xff]   ;;  %v15597_v55 = vld [vmem:[%s18285_s11 + $0x160] ss:$8 sps:$4 sm:$0xff]  }
 0x9aa   : > { %4159 = vadd.xlane.f32.xlu1 %v4158_v50  ;;  %v15586_v50 = vld [vmem:[%s18284_s1 + $0x20] sm:$0xff]  }
 0x9ab   : > { %15131 = vmatmul.mubr.msk.bf16.gmra.mxu1 %vm1552_vm1, %v15585_v48  ;;  %v15690_v48 = vld [vmem:[%s18285_s11 + $0x374] ss:$8 sps:$4 sm:$0xff]  }
 0x9ac   : > { %15134 = vmatprep.mubr.msk.bf16.mxu1 %vm1552_vm1, %v15586_v50  ;;  %v15688_v50 = vld [vmem:[%s18285_s11 + $0x370] ss:$8 sps:$4 sm:$0xff]  }
 0x9ae   : > { %4162 = vadd.xlane.f32.xlu1 %v4161_v57  ;;  %v15587_v57 = vld [vmem:[%s18284_s1 + $0x28] sm:$0xff]  }
 0x9b3   : > { %15135 = vmatmul.mubr.msk.bf16.gmra.mxu1 %vm1552_vm1, %v15587_v57  ;;  %v15694_v57 = vld [vmem:[%s18285_s11 + $0x360] ss:$8 sps:$4 sm:$0xff]  }
 0x9b4   : > { %15138 = vmatprep.mubr.msk.bf16.mxu1 %vm1552_vm1, %v15588_v58  ;;  %v15702_v58 = vld [vmem:[%s18285_s11 + $0x354] ss:$8 sps:$4 sm:$0xff]  }
 0xa33   : > { %v4160_v59 = vpop.xlane.xlu1 %4159 }
 0xa37   : > { %v4163_v60 = vpop.xlane.xlu1 %4162 }
 0xa38   : > { %v4164_v61 = vadd.f32 %v4163_v60, %v4160_v59  ;;  %v15589_v59 = vld [vmem:[%s18284_s1 + $0x38] sm:$0xff]   ;;  %v15590_v60 = vld [vmem:[%s18284_s1 + $0x40] sm:$0xff]  }
 0xa39   : > { %15139 = vmatmul.mubr.msk.bf16.gmra.mxu1 %vm1552_vm1, %v15589_v59  ;;  %v15700_v59 = vld [vmem:[%s18285_s11 + $0x350] ss:$8 sps:$4 sm:$0xff]  }
 0xa3a   : > { %v4165_v9 = vrot.slane %v4164_v61, 4  ;;  %15142 = vmatprep.mubr.msk.bf16.mxu1 %vm1552_vm1, %v15590_v60  ;;  %v15708_v60 = vld [vmem:[%s18285_s11 + $0x344] ss:$8 sps:$4 sm:$0xff]  }
 0xa3c   : > { %v4166_v11 = vadd.f32 %v4165_v9, %v4164_v61  ;;  %v15591_v61 = vld [vmem:[%s18284_s1 + $0x48] sm:$0xff]   ;;  %v15592_v9 = vld [vmem:[%s18284_s1 + $0x50] sm:$0xff]  }
 0xa3e   : > { %v4167_v12 = vrot.slane %v4166_v11, 2 }
 0xa40   : > { %v4168_v62 = vadd.f32 %v4167_v12, %v4166_v11  ;;  %v15593_v11 = vld [vmem:[%s18284_s1 + $0x58] sm:$0xff]  }
 0xa41   : > { %15143 = vmatmul.mubr.msk.bf16.gmra.mxu1 %vm1552_vm1, %v15591_v61  ;;  %v15706_v61 = vld [vmem:[%s18285_s11 + $0x340] ss:$8 sps:$4 sm:$0xff]  }
 0xa42   : > { %v4169_v63 = vrot.slane %v4168_v62, 1  ;;  %15146 = vmatprep.mubr.msk.bf16.mxu1 %vm1552_vm1, %v15592_v9  ;;  %v15714_v9 = vld [vmem:[%s18285_s11 + $0x334] ss:$8 sps:$4 sm:$0xff]  }
 0xa44   : > { %v4170_v0 = vadd.f32 %v4169_v63, %v4168_v62  ;;  %v4413_v63 = vld [vmem:[%s16593_s27 + $0x18] sm:$0xff] }
 0xa46   : > { %v4171_v20 = vmul.f32 0.00390625, %v4170_v0  ;;  %v4412_v0 = vld [vmem:[%s16593_s27 + $0x10] sm:$0xff] }
 0xa48   : > { %v4172_v30 = vadd.f32 1e-05, %v4171_v20  ;;  %v15602_v20 = vld [vmem:[%s18285_s11 + $0x154] ss:$8 sps:$4 sm:$0xff]  }
 0xa49   : > { %15147 = vmatmul.mubr.msk.bf16.gmra.mxu1 %vm1552_vm1, %v15593_v11  ;;  %v15712_v11 = vld [vmem:[%s18285_s11 + $0x330] ss:$8 sps:$4 sm:$0xff]  }
 0xa4a   : > { %16275 = vrsqrt.f32 %v4172_v30  ;;  %v4411_v30 = vld [vmem:[%s16593_s27 + $0x8] sm:$0xff] }
 0xa57   : > { %v16276_v1 = vpop.eup %16275 }
 0xa58   : > { %v4175_v2 = vmul.f32 %v16276_v1, %v4155_v25  ;;  %v4174_v3 = vmul.f32 %v16276_v1, %v4154_v24  ;;  %v15596_v24 = vld [vmem:[%s18285_s11 + $0x174] ss:$8 sps:$4 sm:$0xff]   ;;  %v15599_v25 = vld [vmem:[%s18285_s11 + $0x164] ss:$8 sps:$4 sm:$0xff]   ;;  %v15600_v1 = vld [vmem:[%s18285_s11 + $0x150] ss:$8 sps:$4 sm:$0xff]  }
 0xa59   : > { %6723 = vmatprep.subr.bf16.mxu1 %v15596_v24 }
 0xa5a   : > { %15110 = vmatprep.subr.mxu0 %v4175_v2  ;;  %6724 = vmatpush1.bf16.msra.mxu1 %v15594_v47 }
 0xa5b   : > { %15111 = vmatpush3.msra.mxu0 %v4175_v2  ;;  %6725 = vmatprep.subr.bf16.mxu1 %v15599_v25  ;;  %v4410_v2 = vld [vmem:[%s16593_s27] sm:$0xff] }
 0xa5c   : > { %15112 = vmatprep.subr.mxu0 %v4174_v3 }
 0xa5d   : > { %15113 = vmatpush3.msra.mxu0 %v4174_v3  ;;  %v15605_v3 = vld [vmem:[%s18285_s11 + $0x74] ss:$8 sps:$4 sm:$0xff]  }
 0xa5e   : > { %15115 = vmatmul.mubr.msk.f32.vlgmr.msra.gmra.mxu0 %vm1552_vm1, %v4177_v4  ;;  %6726 = vmatpush1.bf16.msra.mxu1 %v15597_v55  ;;  %v15608_v4 = vld [vmem:[%s18285_s11 + $0x144] ss:$8 sps:$4 sm:$0xff]  }
 0xa5f   : > { %6727 = vmatprep.subr.bf16.mxu1 %v15602_v20  ;;  %v15696_v55 = vld [vmem:[%s18285_s11 + $0x364] ss:$8 sps:$4 sm:$0xff]  }
 0xa60   : > { %v15732_v20 = vld [vmem:[%s18285_s11 + $0x304] ss:$8 sps:$4 sm:$0xff]  }
 0xa62   : > { %6728 = vmatpush1.bf16.msra.mxu1 %v15600_v1  ;;  %v15738_v1 = vld [vmem:[%s18285_s11 + $0x3f4] ss:$8 sps:$4 sm:$0xff]  }
 0xa63   : > { %6729 = vmatprep.subr.bf16.mxu1 %v15608_v4  ;;  %v15742_v4 = vld [vmem:[%s18285_s11 + $0x3e0] ss:$8 sps:$4 sm:$0xff]  }
 0xb1e   : > { %v15116_v5 = vpop.f32.mrf.mxu0 }
 0xb1f   : > { %v4262_v6 = vsel %vm1552_vm1, %v15116_v5, 0.0 }
 0xb20   : > { %v4250_v10 = vpop.f32.mrf.mxu0 }
 0xb21   : > { %v4259_v19 = vsel %vm1552_vm1, %v4250_v10, 0.0 }
 0xb22   : > { %4260 = vadd.xlane.f32.xlu1 %v4259_v19  ;;  %v15612_v19 = vld [vmem:[%s18285_s11 + $0x130] ss:$8 sps:$4 sm:$0xff]  }
 0xb26   : > { %4263 = vadd.xlane.f32.xlu1 %v4262_v6  ;;  %v15620_v6 = vld [vmem:[%s18285_s11 + $0x124] ss:$8 sps:$4 sm:$0xff]  }
 0xbab   : > { %v4261_v7 = vpop.xlane.xlu1 %4260 }
 0xbaf   : > { %v4264_v23 = vpop.xlane.xlu1 %4263 }
 0xbb0   : > { %v4265_v26 = vadd.f32 %v4264_v23, %v4261_v7  ;;  %v15618_v7 = vld [vmem:[%s18285_s11 + $0x120] ss:$8 sps:$4 sm:$0xff]   ;;  %v15626_v23 = vld [vmem:[%s18285_s11 + $0x114] ss:$8 sps:$4 sm:$0xff]  }
 0xbb2   : > { %v4266_v27 = vrot.slane %v4265_v26, 4 }
 0xbb4   : > { %v4267_v13 = vadd.f32 %v4266_v27, %v4265_v26  ;;  %v15624_v26 = vld [vmem:[%s18285_s11 + $0x110] ss:$8 sps:$4 sm:$0xff]   ;;  %v15632_v27 = vld [vmem:[%s18285_s11 + $0x104] ss:$8 sps:$4 sm:$0xff]  }
 0xbb6   : > { %v4268_v14 = vrot.slane %v4267_v13, 2 }
 0xbb8   : > { %v4269_v15 = vadd.f32 %v4268_v14, %v4267_v13  ;;  %v15630_v13 = vld [vmem:[%s18285_s11 + $0x100] ss:$8 sps:$4 sm:$0xff]   ;;  %v15638_v14 = vld [vmem:[%s18285_s11 + $0x1f4] ss:$8 sps:$4 sm:$0xff]  }
 0xbba   : > { %v4270_v16 = vrot.slane %v4269_v15, 1 }
 0xbbc   : > { %v4271_v18 = vadd.f32 %v4270_v16, %v4269_v15  ;;  %v15636_v15 = vld [vmem:[%s18285_s11 + $0x1f0] ss:$8 sps:$4 sm:$0xff]   ;;  %v15644_v16 = vld [vmem:[%s18285_s11 + $0x1e4] ss:$8 sps:$4 sm:$0xff]  }
 0xbbe   : > { %v4272_v21 = vmul.f32 0.00390625, %v4271_v18  ;;  %v15642_v18 = vld [vmem:[%s18285_s11 + $0x1e0] ss:$8 sps:$4 sm:$0xff]  }
 0xbc0   : > { %v4273_v28 = vsub.f32 %v4250_v10, %v4272_v21  ;;  %v4274_v31 = vsub.f32 %v15116_v5, %v4272_v21  ;;  %v15606_v5 = vld [vmem:[%s18285_s11 + $0x140] ss:$8 sps:$4 sm:$0xff]   ;;  %v15614_v10 = vld [vmem:[%s18285_s11 + $0x134] ss:$8 sps:$4 sm:$0xff]  }
 0xbc1   : > { %6730 = vmatpush1.bf16.msra.mxu1 %v15606_v5  ;;  %v15650_v21 = vld [vmem:[%s18285_s11 + $0x1d4] ss:$8 sps:$4 sm:$0xff]  }
 0xbc2   : > { %v4275_v32 = vmul.f32 %v4273_v28, %v4273_v28  ;;  %v4276_v22 = vmul.f32 %v4274_v31, %v4274_v31  ;;  %6731 = vmatprep.subr.bf16.mxu1 %v15614_v10  ;;  %v15750_v5 = vld [vmem:[%s18285_s11 + $0x3d4] ss:$8 sps:$4 sm:$0xff]   ;;  %v15748_v10 = vld [vmem:[%s18285_s11 + $0x3d0] ss:$8 sps:$4 sm:$0xff]  }
 0xbc4   : > { %v4277_v33 = vsel %vm1552_vm1, %v4275_v32, 0.0  ;;  %v4280_v29 = vsel %vm1552_vm1, %v4276_v22, 0.0  ;;  %v15654_v32 = vld [vmem:[%s18285_s11 + $0x1c0] ss:$8 sps:$4 sm:$0xff]  }
 0xbc5   : > { %4278 = vadd.xlane.f32.xlu1 %v4277_v33  ;;  %6732 = vmatpush1.bf16.msra.mxu1 %v15612_v19  ;;  %v15657_v33 = vld [vmem:[%s18284_s1 + $0x60] sm:$0xff]   ;;  %v15661_v22 = vld [vmem:[%s18284_s1 + $0x68] sm:$0xff]  }
 0xbc6   : > { %6733 = vmatprep.subr.bf16.mxu1 %v15620_v6  ;;  %15150 = vmatprep.mubr.msk.bf16.mxu1 %vm1552_vm1, %v15657_v33  ;;  %v15756_v19 = vld [vmem:[%s18285_s11 + $0x3c4] ss:$8 sps:$4 sm:$0xff]   ;;  %v15754_v6 = vld [vmem:[%s18285_s11 + $0x3c0] ss:$8 sps:$4 sm:$0xff]  }
 0xbc7   : > { %15151 = vmatmul.mubr.msk.bf16.gmra.mxu1 %vm1552_vm1, %v15661_v22  ;;  %v15780_v33 = vld [vmem:[%s18285_s11 + $0x384] ss:$8 sps:$4 sm:$0xff]  }
 0xbc9   : > { %4281 = vadd.xlane.f32.xlu1 %v4280_v29  ;;  %6734 = vmatpush1.bf16.msra.mxu1 %v15618_v7  ;;  %v15664_v29 = vld [vmem:[%s18285_s11 + $0x1b4] ss:$8 sps:$4 sm:$0xff]  }
 0xbca   : > { %6735 = vmatprep.subr.bf16.mxu1 %v15626_v23  ;;  %v15762_v7 = vld [vmem:[%s18285_s11 + $0x3b4] ss:$8 sps:$4 sm:$0xff]  }
 0xbcd   : > { %6736 = vmatpush1.bf16.msra.mxu1 %v15624_v26  ;;  %v15760_v26 = vld [vmem:[%s18285_s11 + $0x3b0] ss:$8 sps:$4 sm:$0xff]  }
 0xbce   : > { %6737 = vmatprep.subr.bf16.mxu1 %v15632_v27 }
 0xbd1   : > { %6738 = vmatpush1.bf16.msra.mxu1 %v15630_v13  ;;  %v15768_v13 = vld [vmem:[%s18285_s11 + $0x3a4] ss:$8 sps:$4 sm:$0xff]  }
 0xbd2   : > { %6739 = vmatprep.subr.bf16.mxu1 %v15638_v14 }
 0xbd5   : > { %6740 = vmatpush2.bf16.msra.mxu1 %v15636_v15  ;;  %v15766_v15 = vld [vmem:[%s18285_s11 + $0x3a0] ss:$8 sps:$4 sm:$0xff]  }
 0xbd6   : > { %6741 = vmatprep.subr.bf16.mxu1 %v15644_v16 }
 0xbd9   : > { %6742 = vmatpush2.bf16.msra.mxu1 %v15642_v18 }
 0xbda   : > { %6743 = vmatprep.subr.bf16.mxu1 %v15650_v21  ;;  %v15774_v21 = vld [vmem:[%s18285_s11 + $0x394] ss:$8 sps:$4 sm:$0xff]  }
 0xc4e   : > { %v4279_v34 = vpop.xlane.xlu1 %4278 }
 0xc52   : > { %v4282_v35 = vpop.xlane.xlu1 %4281 }
 0xc53   : > { %v4283_v49 = vadd.f32 %v4282_v35, %v4279_v34  ;;  %v17137_v34 = vpop.f32.mrf.mxu1  ;;  %v15662_v35 = vld [vmem:[%s18285_s11 + $0x1b0] ss:$8 sps:$4 sm:$0xff]  }
 0xc55   : > { %v4284_v53 = vrot.slane %v4283_v49, 4 }
 0xc57   : > { %v4285_v54 = vadd.f32 %v4284_v53, %v4283_v49  ;;  %v17140_v49 = vpop.f32.mrf.mxu1  ;;  %v15670_v53 = vld [vmem:[%s18285_s11 + $0x1a4] ss:$8 sps:$4 sm:$0xff]  }
 0xc59   : > { %v4286_v36 = vrot.slane %v4285_v54, 2 }
 0xc5b   : > { %v4287_v37 = vadd.f32 %v4286_v36, %v4285_v54  ;;  %v17143_v54 = vpop.f32.mrf.mxu1  ;;  %v15668_v36 = vld [vmem:[%s18285_s11 + $0x1a0] ss:$8 sps:$4 sm:$0xff]  }
 0xc5d   : > { %v4288_v38 = vrot.slane %v4287_v37, 1 }
 0xc5f   : > { %v4289_v39 = vadd.f32 %v4288_v38, %v4287_v37  ;;  %v15671_v37 = vld [vmem:[%s18284_s1 + $0x70] sm:$0xff]   ;;  %v14180_v38 = vpack.c.bf16 %v17143_v54, %v17137_v34 }
 0xc60   : > { %15154 = vmatprep.mubr.msk.bf16.mxu1 %vm1552_vm1, %v15671_v37  ;;  %v15786_v37 = vld [vmem:[%s18285_s11 + $0x574] ss:$8 sps:$4 sm:$0xff]   ;;  %v15627_v54 = vld [vmem:[%s18285_s11 + $0x30] ss:$8 sps:$4 sm:$0xff]  }
 0xc61   : > { %v4290_v40 = vmul.f32 0.00390625, %v4289_v39  ;;  %v15675_v39 = vld [vmem:[%s18284_s1 + $0x78] sm:$0xff]   ;;  %s18289_s1 = sld [smem:[#allocation23_spill]] }
 0xc62   : > { %15155 = vmatmul.mubr.msk.bf16.gmra.mxu1 %vm1552_vm1, %v15675_v39  ;;  %v15784_v39 = vld [vmem:[%s18285_s11 + $0x570] ss:$8 sps:$4 sm:$0xff]   ;;  %v15822_v34 = vld [vmem:[%s18285_s11 + $0x514] ss:$8 sps:$4 sm:$0xff]  }
 0xc63   : > { %v4291_v41 = vadd.f32 1e-05, %v4290_v40  ;;  %v17150_v40 = vpop.f32.mrf.mxu1 }
 0xc65   : > { %16277 = vrsqrt.f32 %v4291_v41  ;;  %v15678_v41 = vld [vmem:[%s18285_s11 + $0x194] ss:$8 sps:$4 sm:$0xff]  }
 0xc72   : > { %v16278_v42 = vpop.eup %16277 }
 0xc73   : > { %v4294_v43 = vmul.f32 %v16278_v42, %v4274_v31  ;;  %v4293_v44 = vmul.f32 %v16278_v42, %v4273_v28  ;;  %v15648_v28 = vld [vmem:[%s18285_s11 + $0x1d0] ss:$8 sps:$4 sm:$0xff]   ;;  %v15656_v31 = vld [vmem:[%s18285_s11 + $0x1c4] ss:$8 sps:$4 sm:$0xff]   ;;  %v15132_v42 = vpop.f32.mrf.mxu1 }
 0xc74   : > { %6744 = vmatpush2.bf16.msra.mxu1 %v15648_v28 }
 0xc75   : > { %15117 = vmatprep.subr.mxu0 %v4294_v43  ;;  %4295 = vxpose.xlu1.b32.start [1/2] (short) (narrow) %v4293_v44, 16 }
 0xc76   : > { %15118 = vmatpush3.msra.mxu0 %v4294_v43  ;;  %6745 = vmatprep.subr.bf16.mxu1 %v15656_v31  ;;  %v15772_v31 = vld [vmem:[%s18285_s11 + $0x390] ss:$8 sps:$4 sm:$0xff]  }
 0xc77   : > { %15119 = vmatprep.subr.mxu0 %v4293_v44 }
 0xc78   : > { %15120 = vmatpush3.msra.mxu0 %v4293_v44  ;;  %6746 = vmatpush2.bf16.msra.mxu1 %v15654_v32  ;;  %v4777_v44 = vpop.f32.mrf.mxu1 }
 0xc79   : > { %4296 = vxpose.xlu1.b32.end [2/2] (short) (narrow) %v4294_v43, 16  ;;  %4448 = vmatprep.subr.mxu0 %v4413_v63  ;;  %v15676_v43 = vld [vmem:[%s18285_s11 + $0x190] ss:$8 sps:$4 sm:$0xff]   ;;  %v15726_v63 = vld [vmem:[%s18285_s11 + $0x314] ss:$8 sps:$4 sm:$0xff]  }
 0xc7a   : > { %6747 = vmatprep.subr.bf16.mxu1 %v15664_v29  ;;  %v15133_v56 = vpop.f32.mrf.mxu1  ;;  %v15778_v29 = vld [vmem:[%s18285_s11 + $0x380] ss:$8 sps:$4 sm:$0xff]  }
 0xc7b   : > { %v14182_v47 = vpack.c.bf16 %v15133_v56, %v15132_v42  ;;  %v15790_v42 = vld [vmem:[%s18285_s11 + $0x560] ss:$8 sps:$4 sm:$0xff]   ;;  %v15603_v56 = vld [vmem:[%s18285_s11 + $0x70] ss:$8 sps:$4 sm:$0xff]  }
 0xc7c   : > { %6748 = vmatpush2.bf16.msra.mxu1 %v15662_v35  ;;  %v4780_v24 = vpop.f32.mrf.mxu1 }
 0xc7d   : > { %6749 = vmatprep.subr.bf16.mxu1 %v15670_v53  ;;  %v14181_v25 = vpack.c.bf16 %v4780_v24, %v4777_v44  ;;  %6755 = vmatprep.mubr.bf16.mxu1 %v14182_v47  ;;  %v15798_v44 = vld [vmem:[%s18285_s11 + $0x554] ss:$8 sps:$4 sm:$0xff]   ;;  %v15611_v24 = vld [vmem:[%s18285_s11 + $0x64] ss:$8 sps:$4 sm:$0xff]  }
 0xc7e   : > { %v17183_v23 = vpop.f32.mrf.mxu1 }
 0xc80   : > { %6750 = vmatpush2.bf16.msra.mxu1 %v15668_v36  ;;  %v17186_v27 = vpop.f32.mrf.mxu1 }
 0xc81   : > { %6751 = vmatprep.subr.bf16.mxu1 %v15678_v41  ;;  %v15792_v41 = vld [vmem:[%s18285_s11 + $0x564] ss:$8 sps:$4 sm:$0xff]  }
 0xc82   : > { %v17189_v14 = vpop.f32.mrf.mxu1 }
 0xc83   : > { %v14184_v16 = vpack.c.bf16 %v17189_v14, %v17183_v23  ;;  %v15912_v23 = vld [vmem:[%s18285_s11 + $0x724] ss:$8 sps:$4 sm:$0xff]   ;;  %v15721_v14 = vld [vmem:[%s18285_s11 + $0x240] ss:$8 sps:$4 sm:$0xff]  }
 0xc84   : > { %6752 = vmatpush2.bf16.msra.mxu1 %v15676_v43  ;;  %v17194_v18 = vpop.f32.mrf.mxu1 }
 0xc85   : > { %6753 = vmatprep.subr.bf16.mxu1 %v15684_v51 }
 0xc86   : > { %v15140_v28 = vpop.f32.mrf.mxu1 }
 0xc88   : > { %6754 = vmatpush2.bf16.msra.mxu1 %v15682_v46  ;;  %v4809_v32 = vpop.f32.mrf.mxu1  ;;  %v15796_v46 = vld [vmem:[%s18285_s11 + $0x550] ss:$8 sps:$4 sm:$0xff]  }
 0xc89   : > { %6809 = vmatprep.subr.bf16.mxu1 %v15690_v48  ;;  %v15609_v48 = vld [vmem:[%s18285_s11 + $0x60] ss:$8 sps:$4 sm:$0xff]  }
 0xc8a   : > { %v15141_v22 = vpop.f32.mrf.mxu1 }
 0xc8b   : > { %6756 = vmatmul.mubr.bf16.vlgmr.msra.gmra.mxu1 %v14181_v25  ;;  %v14186_v35 = vpack.c.bf16 %v15141_v22, %v15140_v28  ;;  %v15804_v25 = vld [vmem:[%s18285_s11 + $0x544] ss:$8 sps:$4 sm:$0xff]   ;;  %v15858_v22 = vld [vmem:[%s18285_s11 + $0x5b4] ss:$8 sps:$4 sm:$0xff]  }
 0xc8c   : > { %6810 = vmatpush1.bf16.msra.mxu1 %v15688_v50  ;;  %v4812_v53 = vpop.f32.mrf.mxu1  ;;  %v15802_v50 = vld [vmem:[%s18285_s11 + $0x540] ss:$8 sps:$4 sm:$0xff]   ;;  %v15852_v28 = vld [vmem:[%s18285_s11 + $0x5c4] ss:$8 sps:$4 sm:$0xff]  }
 0xc8d   : > { %6811 = vmatprep.subr.bf16.mxu1 %v15696_v55  ;;  %v14185_v36 = vpack.c.bf16 %v4812_v53, %v4809_v32  ;;  %6841 = vmatprep.mubr.bf16.mxu1 %v14186_v35  ;;  %v15850_v32 = vld [vmem:[%s18285_s11 + $0x5c0] ss:$8 sps:$4 sm:$0xff]   ;;  %v15856_v53 = vld [vmem:[%s18285_s11 + $0x5b0] ss:$8 sps:$4 sm:$0xff]  }
 0xc8e   : > { %v17252_v35 = vpop.f32.mrf.mxu1 }
 0xc90   : > { %6812 = vmatpush1.bf16.msra.mxu1 %v15694_v57  ;;  %v15617_v57 = vld [vmem:[%s18285_s11 + $0x54] ss:$8 sps:$4 sm:$0xff]  }
 0xc91   : > { %6813 = vmatprep.subr.bf16.mxu1 %v15702_v58  ;;  %v15810_v58 = vld [vmem:[%s18285_s11 + $0x534] ss:$8 sps:$4 sm:$0xff]  }
 0xc94   : > { %6814 = vmatpush1.bf16.msra.mxu1 %v15700_v59  ;;  %v15615_v59 = vld [vmem:[%s18285_s11 + $0x50] ss:$8 sps:$4 sm:$0xff]  }
 0xc95   : > { %6815 = vmatprep.subr.bf16.mxu1 %v15708_v60  ;;  %v15808_v60 = vld [vmem:[%s18285_s11 + $0x530] ss:$8 sps:$4 sm:$0xff]  }
 0xc98   : > { %6816 = vmatpush1.bf16.msra.mxu1 %v15706_v61  ;;  %v15623_v61 = vld [vmem:[%s18285_s11 + $0x44] ss:$8 sps:$4 sm:$0xff]  }
 0xc99   : > { %6817 = vmatprep.subr.bf16.mxu1 %v15714_v9  ;;  %v15816_v9 = vld [vmem:[%s18285_s11 + $0x524] ss:$8 sps:$4 sm:$0xff]  }
 0xc9c   : > { %6818 = vmatpush1.bf16.msra.mxu1 %v15712_v11  ;;  %v15621_v11 = vld [vmem:[%s18285_s11 + $0x40] ss:$8 sps:$4 sm:$0xff]  }
 0xcf1   : > { %v4311_v12 = vpop.trf.xlu1 }
 0xcf2   : > { %15121 = vmatprep.mubr.msk.f32.mxu0 %vm1552_vm1, %v4311_v12  ;;  %v15720_v12 = vld [vmem:[%s18285_s11 + $0x324] ss:$8 sps:$4 sm:$0xff]  }
 0xcf3   : > { %6819 = vmatprep.subr.bf16.mxu1 %v15720_v12  ;;  %v15814_v12 = vld [vmem:[%s18285_s11 + $0x520] ss:$8 sps:$4 sm:$0xff]  }
 0xcf5   : > { %v4312_v62 = vpop.trf.xlu1 }
 0xcf6   : > { %15122 = vmatmul.mubr.msk.f32.vlgmr.msra.gmra.mxu0 %vm1552_vm1, %v4312_v62  ;;  %v15718_v62 = vld [vmem:[%s18285_s11 + $0x320] ss:$8 sps:$4 sm:$0xff]  }
 0xcf7   : > { %4484 = vmatprep.mubr.f32.mxu0 %v16457_v8  ;;  %4449 = vmatpush1.msra.mxu0 %v4412_v0  ;;  %v15724_v0 = vld [vmem:[%s18285_s11 + $0x310] ss:$8 sps:$4 sm:$0xff]  }
 0xcf8   : > { %4450 = vmatprep.subr.mxu0 %v4411_v30  ;;  %6820 = vmatpush1.bf16.msra.mxu1 %v15718_v62  ;;  %v15730_v30 = vld [vmem:[%s18285_s11 + $0x300] ss:$8 sps:$4 sm:$0xff]   ;;  %v15629_v62 = vld [vmem:[%s18285_s11 + $0x34] ss:$8 sps:$4 sm:$0xff]  }
 0xcf9   : > { %4451 = vmatpush1.msra.mxu0 %v4410_v2  ;;  %6821 = vmatprep.subr.bf16.mxu1 %v15726_v63  ;;  %v15736_v2 = vld [vmem:[%s18285_s11 + $0x3f0] ss:$8 sps:$4 sm:$0xff]   ;;  %v15635_v63 = vld [vmem:[%s18285_s11 + $0x24] ss:$8 sps:$4 sm:$0xff]  }
 0xcfa   : > { %6680 = vmatprep.subr.bf16.mxu0 %v15605_v3  ;;  %v15744_v3 = vld [vmem:[%s18285_s11 + $0x3e4] ss:$8 sps:$4 sm:$0xff]  }
 0xcfc   : > { %6822 = vmatpush1.bf16.msra.mxu1 %v15724_v0  ;;  %v15828_v0 = vld [vmem:[%s18285_s11 + $0x504] ss:$8 sps:$4 sm:$0xff]  }
 0xcfd   : > { %6823 = vmatprep.subr.bf16.mxu1 %v15732_v20  ;;  %v15633_v20 = vld [vmem:[%s18285_s11 + $0x20] ss:$8 sps:$4 sm:$0xff]  }
 0xd00   : > { %6824 = vmatpush1.bf16.msra.mxu1 %v15730_v30  ;;  %v15826_v30 = vld [vmem:[%s18285_s11 + $0x500] ss:$8 sps:$4 sm:$0xff]  }
 0xd01   : > { %6825 = vmatprep.subr.bf16.mxu1 %v15738_v1  ;;  %v15641_v1 = vld [vmem:[%s18285_s11 + $0x14] ss:$8 sps:$4 sm:$0xff]  }
 0xd04   : > { %6826 = vmatpush2.bf16.msra.mxu1 %v15736_v2  ;;  %v15834_v2 = vld [vmem:[%s18285_s11 + $0x5f4] ss:$8 sps:$4 sm:$0xff]  }
 0xd05   : > { %6827 = vmatprep.subr.bf16.mxu1 %v15744_v3  ;;  %v15639_v3 = vld [vmem:[%s18285_s11 + $0x10] ss:$8 sps:$4 sm:$0xff]  }
 0xd08   : > { %6828 = vmatpush2.bf16.msra.mxu1 %v15742_v4  ;;  %v15832_v4 = vld [vmem:[%s18285_s11 + $0x5f0] ss:$8 sps:$4 sm:$0xff]  }
 0xd09   : > { %6829 = vmatprep.subr.bf16.mxu1 %v15750_v5  ;;  %v15647_v5 = vld [vmem:[%s18285_s11 + $0x4] ss:$8 sps:$4 sm:$0xff]  }
 0xd0c   : > { %6830 = vmatpush2.bf16.msra.mxu1 %v15748_v10  ;;  %v15840_v10 = vld [vmem:[%s18285_s11 + $0x5e4] ss:$8 sps:$4 sm:$0xff]  }
 0xd0d   : > { %6831 = vmatprep.subr.bf16.mxu1 %v15756_v19  ;;  %v15645_v19 = vld [vmem:[%s18285_s11] ss:$8 sps:$4 sm:$0xff]  }
 0xd10   : > { %6832 = vmatpush2.bf16.msra.mxu1 %v15754_v6  ;;  %v15838_v6 = vld [vmem:[%s18285_s11 + $0x5e0] ss:$8 sps:$4 sm:$0xff]  }
 0xd11   : > { %6833 = vmatprep.subr.bf16.mxu1 %v15762_v7  ;;  %v15653_v7 = vld [vmem:[%s18285_s11 + $0xf4] ss:$8 sps:$4 sm:$0xff]  }
 0xd14   : > { %6834 = vmatpush2.bf16.msra.mxu1 %v15760_v26  ;;  %v15846_v26 = vld [vmem:[%s18285_s11 + $0x5d4] ss:$8 sps:$4 sm:$0xff]  }
 0xd15   : > { %6835 = vmatprep.subr.bf16.mxu1 %v15768_v13  ;;  %v15651_v13 = vld [vmem:[%s18285_s11 + $0xf0] ss:$8 sps:$4 sm:$0xff]  }
 0xd18   : > { %6836 = vmatpush2.bf16.msra.mxu1 %v15766_v15  ;;  %v15844_v15 = vld [vmem:[%s18285_s11 + $0x5d0] ss:$8 sps:$4 sm:$0xff]  }
 0xd19   : > { %6837 = vmatprep.subr.bf16.mxu1 %v15774_v21  ;;  %v15660_v21 = vld [vmem:[%s18285_s11 + $0xe4] ss:$8 sps:$4 sm:$0xff]  }
 0xd1c   : > { %6838 = vmatpush2.bf16.msra.mxu1 %v15772_v31  ;;  %v15658_v31 = vld [vmem:[%s18285_s11 + $0xe0] ss:$8 sps:$4 sm:$0xff]  }
 0xd1d   : > { %6839 = vmatprep.subr.bf16.mxu1 %v15780_v33  ;;  %v15667_v33 = vld [vmem:[%s18285_s11 + $0xd4] ss:$8 sps:$4 sm:$0xff]  }
 0xd20   : > { %6840 = vmatpush2.bf16.msra.mxu1 %v15778_v29  ;;  %v15665_v29 = vld [vmem:[%s18285_s11 + $0xd0] ss:$8 sps:$4 sm:$0xff]  }
 0xd21   : > { %6895 = vmatprep.subr.bf16.mxu1 %v15786_v37  ;;  %v17256_v37 = vpop.f32.mrf.mxu1 }
 0xd23   : > { %6842 = vmatmul.mubr.bf16.vlgmr.msra.gmra.mxu1 %v14185_v36  ;;  %v15674_v36 = vld [vmem:[%s18285_s11 + $0xc4] ss:$8 sps:$4 sm:$0xff]  }
 0xd24   : > { %6896 = vmatpush1.bf16.msra.mxu1 %v15784_v39  ;;  %v15864_v39 = vld [vmem:[%s18285_s11 + $0x5a4] ss:$8 sps:$4 sm:$0xff]  }
 0xd25   : > { %6897 = vmatprep.subr.bf16.mxu1 %v15792_v41  ;;  %v15672_v41 = vld [vmem:[%s18285_s11 + $0xc0] ss:$8 sps:$4 sm:$0xff]  }
 0xd28   : > { %6898 = vmatpush1.bf16.msra.mxu1 %v15790_v42  ;;  %v17260_v42 = vpop.f32.mrf.mxu1 }
 0xd29   : > { %6899 = vmatprep.subr.bf16.mxu1 %v15798_v44  ;;  %v15681_v44 = vld [vmem:[%s18285_s11 + $0xb4] ss:$8 sps:$4 sm:$0xff]  }
 0xd2c   : > { %6900 = vmatpush1.bf16.msra.mxu1 %v15796_v46  ;;  %v15870_v46 = vld [vmem:[%s18285_s11 + $0x594] ss:$8 sps:$4 sm:$0xff]  }
 0xd2d   : > { %6901 = vmatprep.subr.bf16.mxu1 %v15804_v25  ;;  %v15868_v25 = vld [vmem:[%s18285_s11 + $0x590] ss:$8 sps:$4 sm:$0xff]  }
 0xd30   : > { %6902 = vmatpush1.bf16.msra.mxu1 %v15802_v50 }
 0xd31   : > { %6903 = vmatprep.subr.bf16.mxu1 %v15810_v58 }
 0xd34   : > { %6904 = vmatpush1.bf16.msra.mxu1 %v15808_v60  ;;  %v15693_v60 = vld [vmem:[%s18285_s11 + $0x94] ss:$8 sps:$4 sm:$0xff]  }
 0xd35   : > { %6905 = vmatprep.subr.bf16.mxu1 %v15816_v9 }
 0xd38   : > { %6906 = vmatpush1.bf16.msra.mxu1 %v15814_v12  ;;  %v15882_v12 = vld [vmem:[%s18285_s11 + $0x774] ss:$8 sps:$4 sm:$0xff]  }
 0xd39   : > { %6907 = vmatprep.subr.bf16.mxu1 %v15822_v34  ;;  %v15880_v34 = vld [vmem:[%s18285_s11 + $0x770] ss:$8 sps:$4 sm:$0xff]  }
 0xdb6   : > { %v15123_v43 = vpop.f32.mrf.mxu0 }
 0xdb7   : > { %v4409_v55 = vmul.f32 0.062499996, %v15123_v43  ;;  %v15862_v43 = vld [vmem:[%s18285_s11 + $0x5a0] ss:$8 sps:$4 sm:$0xff]  }
 0xdb8   : > { %v4399_v51 = vpop.f32.mrf.mxu0 }
 0xdb9   : > { %v4408_v47 = vmul.f32 0.062499996, %v4399_v51  ;;  %v14188_v51 = vpack.c.bf16 %v17260_v42, %v17252_v35  ;;  %v15831_v35 = vld [vmem:[%s18285_s11 + $0x424] ss:$8 sps:$4 sm:$0xff]   ;;  %v15829_v42 = vld [vmem:[%s18285_s11 + $0x420] ss:$8 sps:$4 sm:$0xff]  }
 0xdbb   : > { %13152 = vmatmul.mubr.msk.f32.vlgmr.msra.gmra.mxu0 %vm1552_vm1, %v4408_v47  ;;  %v15679_v47 = vld [vmem:[%s18285_s11 + $0xb0] ss:$8 sps:$4 sm:$0xff]  }
 0xdbc   : > { %6681 = vmatpush1.bf16.msra.mxu0 %v15603_v56  ;;  %4490 = vmatprep.mubr.f32.mxu0 %v16457_v8  ;;  %v17266_v56 = vpop.f32.mrf.mxu1 }
 0xdbd   : > { %6682 = vmatprep.subr.bf16.mxu0 %v15611_v24 }
 0xdbe   : > { %v15148_v24 = vpop.f32.mrf.mxu1 }
 0xdbf   : > { %13153 = vmatmul.mubr.msk.f32.gmra.mxu0 %vm1552_vm1, %v4409_v55  ;;  %v15876_v55 = vld [vmem:[%s18285_s11 + $0x584] ss:$8 sps:$4 sm:$0xff]  }
 0xdc0   : > { %6683 = vmatpush1.bf16.msra.mxu0 %v15609_v48  ;;  %6712 = vmatprep.mubr.bf16.mxu0 %v14180_v38  ;;  %v15820_v38 = vld [vmem:[%s18285_s11 + $0x510] ss:$8 sps:$4 sm:$0xff]   ;;  %v15687_v48 = vld [vmem:[%s18285_s11 + $0xa4] ss:$8 sps:$4 sm:$0xff]   ;;  %v4841_v50 = vpop.f32.mrf.mxu1 }
 0xdc1   : > { %6684 = vmatprep.subr.bf16.mxu0 %v15617_v57  ;;  %6908 = vmatpush1.bf16.msra.mxu1 %v15820_v38  ;;  %v15685_v57 = vld [vmem:[%s18285_s11 + $0xa0] ss:$8 sps:$4 sm:$0xff]   ;;  %v15888_v38 = vld [vmem:[%s18285_s11 + $0x764] ss:$8 sps:$4 sm:$0xff]  }
 0xdc2   : > { %6909 = vmatprep.subr.bf16.mxu1 %v15828_v0  ;;  %v15149_v58 = vpop.f32.mrf.mxu1  ;;  %v15886_v0 = vld [vmem:[%s18285_s11 + $0x760] ss:$8 sps:$4 sm:$0xff]  }
 0xdc4   : > { %6685 = vmatpush1.bf16.msra.mxu0 %v15615_v59  ;;  %v15874_v59 = vld [vmem:[%s18285_s11 + $0x580] ss:$8 sps:$4 sm:$0xff]   ;;  %v4844_v9 = vpop.f32.mrf.mxu1 }
 0xdc5   : > { %6686 = vmatprep.subr.bf16.mxu0 %v15623_v61  ;;  %6910 = vmatpush1.bf16.msra.mxu1 %v15826_v30  ;;  %v14190_v61 = vpack.c.bf16 %v15149_v58, %v15148_v24  ;;  %v15894_v30 = vld [vmem:[%s18285_s11 + $0x754] ss:$8 sps:$4 sm:$0xff]   ;;  %v15946_v58 = vld [vmem:[%s18285_s11 + $0x7c0] ss:$8 sps:$4 sm:$0xff]  }
 0xdc6   : > { %6911 = vmatprep.subr.bf16.mxu1 %v15834_v2  ;;  %v15892_v2 = vld [vmem:[%s18285_s11 + $0x750] ss:$8 sps:$4 sm:$0xff]   ;;  %v15942_v24 = vld [vmem:[%s18285_s11 + $0x7d4] ss:$8 sps:$4 sm:$0xff]  }
 0xdc7   : > { %6927 = vmatprep.mubr.bf16.mxu1 %v14190_v61  ;;  %v15954_v61 = vld [vmem:[%s18285_s11 + $0x7b4] ss:$8 sps:$4 sm:$0xff]  }
 0xdc8   : > { %6687 = vmatpush1.bf16.msra.mxu0 %v15621_v11  ;;  %v14189_v11 = vpack.c.bf16 %v4844_v9, %v4841_v50  ;;  %v15759_v50 = vld [vmem:[%s18285_s11 + $0x2e4] ss:$8 sps:$4 sm:$0xff]   ;;  %v15763_v9 = vld [vmem:[%s18285_s11 + $0x2d0] ss:$8 sps:$4 sm:$0xff]  }
 0xdc9   : > { %6688 = vmatprep.subr.bf16.mxu0 %v15629_v62  ;;  %6912 = vmatpush2.bf16.msra.mxu1 %v15832_v4  ;;  %v15691_v62 = vld [vmem:[%s18285_s11 + $0x90] ss:$8 sps:$4 sm:$0xff]   ;;  %v15711_v4 = vld [vmem:[%s18285_s11 + $0x264] ss:$8 sps:$4 sm:$0xff]  }
 0xdca   : > { %6913 = vmatprep.subr.bf16.mxu1 %v15840_v10  ;;  %v15709_v10 = vld [vmem:[%s18285_s11 + $0x260] ss:$8 sps:$4 sm:$0xff]  }
 0xdcc   : > { %6689 = vmatpush1.bf16.msra.mxu0 %v15627_v54  ;;  %v15699_v54 = vld [vmem:[%s18285_s11 + $0x84] ss:$8 sps:$4 sm:$0xff]  }
 0xdcd   : > { %6690 = vmatprep.subr.bf16.mxu0 %v15635_v63  ;;  %6914 = vmatpush2.bf16.msra.mxu1 %v15838_v6  ;;  %v15697_v63 = vld [vmem:[%s18285_s11 + $0x80] ss:$8 sps:$4 sm:$0xff]   ;;  %v15715_v6 = vld [vmem:[%s18285_s11 + $0x250] ss:$8 sps:$4 sm:$0xff]  }
 0xdce   : > { %6915 = vmatprep.subr.bf16.mxu1 %v15846_v26  ;;  %v15723_v26 = vld [vmem:[%s18285_s11 + $0x244] ss:$8 sps:$4 sm:$0xff]  }
 0xdd0   : > { %6691 = vmatpush1.bf16.msra.mxu0 %v15633_v20  ;;  %v15705_v20 = vld [vmem:[%s18285_s11 + $0x274] ss:$8 sps:$4 sm:$0xff]  }
 0xdd1   : > { %6692 = vmatprep.subr.bf16.mxu0 %v15641_v1  ;;  %6916 = vmatpush2.bf16.msra.mxu1 %v15844_v15  ;;  %v15703_v1 = vld [vmem:[%s18285_s11 + $0x270] ss:$8 sps:$4 sm:$0xff]   ;;  %v15918_v15 = vld [vmem:[%s18285_s11 + $0x714] ss:$8 sps:$4 sm:$0xff]  }
 0xdd2   : > { %6917 = vmatprep.subr.bf16.mxu1 %v15852_v28  ;;  %v15916_v28 = vld [vmem:[%s18285_s11 + $0x710] ss:$8 sps:$4 sm:$0xff]  }
 0xdd4   : > { %6693 = vmatpush1.bf16.msra.mxu0 %v15639_v3  ;;  %v14179_v3 = vpack.c.bf16 %v17150_v40, %v17140_v49  ;;  %v15717_v49 = vld [vmem:[%s18285_s11 + $0x254] ss:$8 sps:$4 sm:$0xff]  }
 0xdd5   : > { %6694 = vmatprep.subr.bf16.mxu0 %v15647_v5  ;;  %6918 = vmatpush2.bf16.msra.mxu1 %v15850_v32  ;;  %v15900_v5 = vld [vmem:[%s18285_s11 + $0x744] ss:$8 sps:$4 sm:$0xff]   ;;  %v15906_v40 = vld [vmem:[%s18285_s11 + $0x734] ss:$8 sps:$4 sm:$0xff]  }
 0xdd6   : > { %6919 = vmatprep.subr.bf16.mxu1 %v15858_v22  ;;  %v15924_v32 = vld [vmem:[%s18285_s11 + $0x704] ss:$8 sps:$4 sm:$0xff]   ;;  %v15922_v22 = vld [vmem:[%s18285_s11 + $0x700] ss:$8 sps:$4 sm:$0xff]  }
 0xdd8   : > { %6695 = vmatpush1.bf16.msra.mxu0 %v15645_v19  ;;  %v15898_v19 = vld [vmem:[%s18285_s11 + $0x740] ss:$8 sps:$4 sm:$0xff]  }
 0xdd9   : > { %6696 = vmatprep.subr.bf16.mxu0 %v15653_v7  ;;  %6920 = vmatpush2.bf16.msra.mxu1 %v15856_v53  ;;  %v15904_v7 = vld [vmem:[%s18285_s11 + $0x730] ss:$8 sps:$4 sm:$0xff]   ;;  %v15930_v53 = vld [vmem:[%s18285_s11 + $0x7f4] ss:$8 sps:$4 sm:$0xff]  }
 0xdda   : > { %6921 = vmatprep.subr.bf16.mxu1 %v15864_v39  ;;  %v15928_v39 = vld [vmem:[%s18285_s11 + $0x7f0] ss:$8 sps:$4 sm:$0xff]  }
 0xddc   : > { %6697 = vmatpush2.bf16.msra.mxu0 %v15651_v13  ;;  %v15729_v13 = vld [vmem:[%s18285_s11 + $0x234] ss:$8 sps:$4 sm:$0xff]  }
 0xddd   : > { %6698 = vmatprep.subr.bf16.mxu0 %v15660_v21  ;;  %6922 = vmatpush2.bf16.msra.mxu1 %v15862_v43  ;;  %v15727_v21 = vld [vmem:[%s18285_s11 + $0x230] ss:$8 sps:$4 sm:$0xff]   ;;  %v15936_v43 = vld [vmem:[%s18285_s11 + $0x7e4] ss:$8 sps:$4 sm:$0xff]  }
 0xdde   : > { %6923 = vmatprep.subr.bf16.mxu1 %v15870_v46  ;;  %v15934_v46 = vld [vmem:[%s18285_s11 + $0x7e0] ss:$8 sps:$4 sm:$0xff]  }
 0xde0   : > { %6699 = vmatpush2.bf16.msra.mxu0 %v15658_v31  ;;  %v15735_v31 = vld [vmem:[%s18285_s11 + $0x224] ss:$8 sps:$4 sm:$0xff]  }
 0xde1   : > { %6700 = vmatprep.subr.bf16.mxu0 %v15667_v33  ;;  %6924 = vmatpush2.bf16.msra.mxu1 %v15868_v25  ;;  %v15733_v33 = vld [vmem:[%s18285_s11 + $0x220] ss:$8 sps:$4 sm:$0xff]   ;;  %v15751_v25 = vld [vmem:[%s18285_s11 + $0x2f0] ss:$8 sps:$4 sm:$0xff]  }
 0xde2   : > { %6925 = vmatprep.subr.bf16.mxu1 %v15876_v55  ;;  %v15948_v55 = vld [vmem:[%s18285_s11 + $0x7c4] ss:$8 sps:$4 sm:$0xff]  }
 0xde4   : > { %6701 = vmatpush2.bf16.msra.mxu0 %v15665_v29  ;;  %v15741_v29 = vld [vmem:[%s18285_s11 + $0x214] ss:$8 sps:$4 sm:$0xff]  }
 0xde5   : > { %6702 = vmatprep.subr.bf16.mxu0 %v15674_v36  ;;  %6926 = vmatpush2.bf16.msra.mxu1 %v15874_v59  ;;  %v15739_v36 = vld [vmem:[%s18285_s11 + $0x210] ss:$8 sps:$4 sm:$0xff]   ;;  %v15765_v59 = vld [vmem:[%s18285_s11 + $0x2d4] ss:$8 sps:$4 sm:$0xff]  }
 0xde6   : > { %6981 = vmatprep.subr.bf16.mxu1 %v15882_v12  ;;  %v15771_v12 = vld [vmem:[%s18285_s11 + $0x2c4] ss:$8 sps:$4 sm:$0xff]  }
 0xde8   : > { %6703 = vmatpush2.bf16.msra.mxu0 %v15672_v41  ;;  %6928 = vmatmul.mubr.bf16.vlgmr.msra.gmra.mxu1 %v14189_v11  ;;  %v15747_v41 = vld [vmem:[%s18285_s11 + $0x204] ss:$8 sps:$4 sm:$0xff]   ;;  %v15952_v11 = vld [vmem:[%s18285_s11 + $0x7b0] ss:$8 sps:$4 sm:$0xff]  }
 0xde9   : > { %6704 = vmatprep.subr.bf16.mxu0 %v15681_v44  ;;  %6982 = vmatpush1.bf16.msra.mxu1 %v15880_v34  ;;  %v15745_v44 = vld [vmem:[%s18285_s11 + $0x200] ss:$8 sps:$4 sm:$0xff]  }
 0xdea   : > { %6983 = vmatprep.subr.bf16.mxu1 %v15888_v38  ;;  %v15769_v38 = vld [vmem:[%s18285_s11 + $0x2c0] ss:$8 sps:$4 sm:$0xff]  }
 0xdec   : > { %6705 = vmatpush2.bf16.msra.mxu0 %v15679_v47  ;;  %v15753_v47 = vld [vmem:[%s18285_s11 + $0x2f4] ss:$8 sps:$4 sm:$0xff]  }
 0xded   : > { %6706 = vmatprep.subr.bf16.mxu0 %v15687_v48  ;;  %6984 = vmatpush1.bf16.msra.mxu1 %v15886_v0  ;;  %v15940_v48 = vld [vmem:[%s18285_s11 + $0x7d0] ss:$8 sps:$4 sm:$0xff]   ;;  %v15958_v0 = vld [vmem:[%s18285_s11 + $0x7a0] ss:$8 sps:$4 sm:$0xff]  }
 0xdee   : > { %6985 = vmatprep.subr.bf16.mxu1 %v15894_v30 }
 0xdf0   : > { %6707 = vmatpush2.bf16.msra.mxu0 %v15685_v57  ;;  %v15757_v57 = vld [vmem:[%s18285_s11 + $0x2e0] ss:$8 sps:$4 sm:$0xff]  }
 0xdf1   : > { %6708 = vmatprep.subr.bf16.mxu0 %v15693_v60  ;;  %6986 = vmatpush1.bf16.msra.mxu1 %v15892_v2  ;;  %v17329_v60 = vpop.f32.mrf.mxu1  ;;  %v15966_v2 = vld [vmem:[%s18285_s11 + $0x794] ss:$8 sps:$4 sm:$0xff]  }
 0xdf2   : > { %6987 = vmatprep.subr.bf16.mxu1 %v15900_v5  ;;  %v15783_v5 = vld [vmem:[%s18285_s11 + $0x2a4] ss:$8 sps:$4 sm:$0xff]  }
 0xdf4   : > { %6709 = vmatpush2.bf16.msra.mxu0 %v15691_v62  ;;  %v17335_v62 = vpop.f32.mrf.mxu1 }
 0xdf5   : > { %6710 = vmatprep.subr.bf16.mxu0 %v15699_v54  ;;  %6988 = vmatpush1.bf16.msra.mxu1 %v15898_v19  ;;  %v15960_v54 = vld [vmem:[%s18285_s11 + $0x7a4] ss:$8 sps:$4 sm:$0xff]  }
 0xdf6   : > { %6989 = vmatprep.subr.bf16.mxu1 %v15906_v40  ;;  %v17337_v34 = vpop.f32.mrf.mxu1  ;;  %v15781_v40 = vld [vmem:[%s18285_s11 + $0x2a0] ss:$8 sps:$4 sm:$0xff]  }
 0xdf8   : > { %6711 = vmatpush2.bf16.msra.mxu0 %v15697_v63  ;;  %v14192_v63 = vpack.c.bf16 %v17337_v34, %v17329_v60  ;;  %v17345_v30 = vpop.f32.mrf.mxu1  ;;  %v15915_v60 = vld [vmem:[%s18285_s11 + $0x644] ss:$8 sps:$4 sm:$0xff]  }
 0xdf9   : > { %6766 = vmatprep.subr.bf16.mxu0 %v15705_v20  ;;  %6990 = vmatpush1.bf16.msra.mxu1 %v15904_v7  ;;  %v15777_v20 = vld [vmem:[%s18285_s11 + $0x2b4] ss:$8 sps:$4 sm:$0xff]   ;;  %v15970_v7 = vld [vmem:[%s18285_s11 + $0x780] ss:$8 sps:$4 sm:$0xff]  }
 0xdfa   : > { %6991 = vmatprep.subr.bf16.mxu1 %v15912_v23 }
 0xdfb   : > { %6713 = vmatmul.mubr.bf16.vlgmr.msra.gmra.mxu0 %v14179_v3  ;;  %v15775_v3 = vld [vmem:[%s18285_s11 + $0x2b0] ss:$8 sps:$4 sm:$0xff]  }
 0xdfc   : > { %6767 = vmatpush1.bf16.msra.mxu0 %v15703_v1  ;;  %6798 = vmatprep.mubr.bf16.mxu0 %v14184_v16  ;;  %v15910_v16 = vld [vmem:[%s18285_s11 + $0x720] ss:$8 sps:$4 sm:$0xff]   ;;  %v15156_v1 = vpop.f32.mrf.mxu1 }
 0xdfd   : > { %6768 = vmatprep.subr.bf16.mxu0 %v15711_v4  ;;  %6992 = vmatpush1.bf16.msra.mxu1 %v15910_v16  ;;  %v15964_v4 = vld [vmem:[%s18285_s11 + $0x790] ss:$8 sps:$4 sm:$0xff]  }
 0xdfe   : > { %6993 = vmatprep.subr.bf16.mxu1 %v15918_v15  ;;  %v15787_v16 = vld [vmem:[%s18285_s11 + $0x290] ss:$8 sps:$4 sm:$0xff]   ;;  %v15793_v15 = vld [vmem:[%s18285_s11 + $0x280] ss:$8 sps:$4 sm:$0xff]  }
 0xe00   : > { %6769 = vmatpush1.bf16.msra.mxu0 %v15709_v10  ;;  %v4873_v10 = vpop.f32.mrf.mxu1 }
 0xe01   : > { %6770 = vmatprep.subr.bf16.mxu0 %v15717_v49  ;;  %6994 = vmatpush1.bf16.msra.mxu1 %v15916_v28  ;;  %v15972_v49 = vld [vmem:[%s18285_s11 + $0x784] ss:$8 sps:$4 sm:$0xff]   ;;  %v15799_v28 = vld [vmem:[%s18285_s11 + $0x470] ss:$8 sps:$4 sm:$0xff]  }
 0xe02   : > { %6995 = vmatprep.subr.bf16.mxu1 %v15924_v32  ;;  %v15157_v19 = vpop.f32.mrf.mxu1  ;;  %v15807_v32 = vld [vmem:[%s18285_s11 + $0x464] ss:$8 sps:$4 sm:$0xff]  }
 0xe04   : > { %6771 = vmatpush1.bf16.msra.mxu0 %v15715_v6  ;;  %v14194_v6 = vpack.c.bf16 %v15157_v19, %v15156_v1  ;;  %v4876_v23 = vpop.f32.mrf.mxu1  ;;  %v15903_v1 = vld [vmem:[%s18285_s11 + $0x664] ss:$8 sps:$4 sm:$0xff]   ;;  %v15909_v19 = vld [vmem:[%s18285_s11 + $0x654] ss:$8 sps:$4 sm:$0xff]  }
 0xe05   : > { %6772 = vmatprep.subr.bf16.mxu0 %v15723_v26  ;;  %6996 = vmatpush1.bf16.msra.mxu1 %v15922_v22  ;;  %v15789_v26 = vld [vmem:[%s18285_s11 + $0x294] ss:$8 sps:$4 sm:$0xff]  }
 0xe06   : > { %6997 = vmatprep.subr.bf16.mxu1 %v15930_v53  ;;  %7013 = vmatprep.mubr.bf16.mxu1 %v14194_v6  ;;  %v15813_v22 = vld [vmem:[%s18285_s11 + $0x454] ss:$8 sps:$4 sm:$0xff]  }
 0xe07   : > { %v15825_v53 = vld [vmem:[%s18285_s11 + $0x434] ss:$8 sps:$4 sm:$0xff]  }
 0xe08   : > { %6773 = vmatpush1.bf16.msra.mxu0 %v15721_v14  ;;  %v14193_v14 = vpack.c.bf16 %v4876_v23, %v4873_v10  ;;  %v4499_v10 = vld [vmem:[%s18274_s4 + $0x10] sm:$0xff] }
 0xe09   : > { %6774 = vmatprep.subr.bf16.mxu0 %v15729_v13  ;;  %6998 = vmatpush2.bf16.msra.mxu1 %v15928_v39  ;;  %v15795_v13 = vld [vmem:[%s18285_s11 + $0x284] ss:$8 sps:$4 sm:$0xff]   ;;  %v15835_v39 = vld [vmem:[%s18285_s11 + $0x410] ss:$8 sps:$4 sm:$0xff]  }
 0xe0a   : > { %6999 = vmatprep.subr.bf16.mxu1 %v15936_v43  ;;  %v15841_v43 = vld [vmem:[%s18285_s11 + $0x400] ss:$8 sps:$4 sm:$0xff]  }
 0xe0c   : > { %6775 = vmatpush1.bf16.msra.mxu0 %v15727_v21  ;;  %v15801_v21 = vld [vmem:[%s18285_s11 + $0x474] ss:$8 sps:$4 sm:$0xff]  }
 0xe0d   : > { %6776 = vmatprep.subr.bf16.mxu0 %v15735_v31  ;;  %7000 = vmatpush2.bf16.msra.mxu1 %v15934_v46  ;;  %v14183_v31 = vpack.c.bf16 %v17194_v18, %v17186_v27  ;;  %v15819_v27 = vld [vmem:[%s18285_s11 + $0x444] ss:$8 sps:$4 sm:$0xff]   ;;  %v15817_v18 = vld [vmem:[%s18285_s11 + $0x440] ss:$8 sps:$4 sm:$0xff]   ;;  %v15847_v46 = vld [vmem:[%s18285_s11 + $0x4f0] ss:$8 sps:$4 sm:$0xff]  }
 0xe0e   : > { %7001 = vmatprep.subr.bf16.mxu1 %v15942_v24  ;;  %v15853_v24 = vld [vmem:[%s18285_s11 + $0x4e0] ss:$8 sps:$4 sm:$0xff]  }
 0xe10   : > { %6777 = vmatpush1.bf16.msra.mxu0 %v15733_v33  ;;  %v15805_v33 = vld [vmem:[%s18285_s11 + $0x460] ss:$8 sps:$4 sm:$0xff]  }
 0xe11   : > { %6778 = vmatprep.subr.bf16.mxu0 %v15741_v29  ;;  %7002 = vmatpush2.bf16.msra.mxu1 %v15940_v48  ;;  %v15811_v29 = vld [vmem:[%s18285_s11 + $0x450] ss:$8 sps:$4 sm:$0xff]  }
 0xe12   : > { %7003 = vmatprep.subr.bf16.mxu1 %v15948_v55  ;;  %v15859_v48 = vld [vmem:[%s18285_s11 + $0x4d0] ss:$8 sps:$4 sm:$0xff]   ;;  %v15865_v55 = vld [vmem:[%s18285_s11 + $0x4c0] ss:$8 sps:$4 sm:$0xff]  }
 0xe14   : > { %6779 = vmatpush1.bf16.msra.mxu0 %v15739_v36  ;;  %v15823_v36 = vld [vmem:[%s18285_s11 + $0x430] ss:$8 sps:$4 sm:$0xff]  }
 0xe15   : > { %6780 = vmatprep.subr.bf16.mxu0 %v15747_v41  ;;  %7004 = vmatpush2.bf16.msra.mxu1 %v15946_v58  ;;  %v15843_v41 = vld [vmem:[%s18285_s11 + $0x404] ss:$8 sps:$4 sm:$0xff]   ;;  %v15871_v58 = vld [vmem:[%s18285_s11 + $0x4b0] ss:$8 sps:$4 sm:$0xff]  }
 0xe16   : > { %7005 = vmatprep.subr.bf16.mxu1 %v15954_v61  ;;  %v15877_v61 = vld [vmem:[%s18285_s11 + $0x4a0] ss:$8 sps:$4 sm:$0xff]  }
 0xe18   : > { %6781 = vmatpush1.bf16.msra.mxu0 %v15745_v44  ;;  %v15849_v44 = vld [vmem:[%s18285_s11 + $0x4f4] ss:$8 sps:$4 sm:$0xff]  }
 0xe19   : > { %6782 = vmatprep.subr.bf16.mxu0 %v15753_v47  ;;  %7006 = vmatpush2.bf16.msra.mxu1 %v15952_v11  ;;  %v15855_v47 = vld [vmem:[%s18285_s11 + $0x4e4] ss:$8 sps:$4 sm:$0xff]   ;;  %v15883_v11 = vld [vmem:[%s18285_s11 + $0x490] ss:$8 sps:$4 sm:$0xff]  }
 0xe1a   : > { %7007 = vmatprep.subr.bf16.mxu1 %v15960_v54  ;;  %v15889_v54 = vld [vmem:[%s18285_s11 + $0x480] ss:$8 sps:$4 sm:$0xff]  }
 0xe1c   : > { %6783 = vmatpush2.bf16.msra.mxu0 %v15751_v25  ;;  %v15861_v25 = vld [vmem:[%s18285_s11 + $0x4d4] ss:$8 sps:$4 sm:$0xff]  }
 0xe1d   : > { %6784 = vmatprep.subr.bf16.mxu0 %v15759_v50  ;;  %7008 = vmatpush2.bf16.msra.mxu1 %v15958_v0  ;;  %v15867_v50 = vld [vmem:[%s18285_s11 + $0x4c4] ss:$8 sps:$4 sm:$0xff]   ;;  %v15895_v0 = vld [vmem:[%s18285_s11 + $0x670] ss:$8 sps:$4 sm:$0xff]  }
 0xe1e   : > { %7009 = vmatprep.subr.bf16.mxu1 %v15966_v2 }
 0xe20   : > { %6785 = vmatpush2.bf16.msra.mxu0 %v15757_v57  ;;  %v15873_v57 = vld [vmem:[%s18285_s11 + $0x4b4] ss:$8 sps:$4 sm:$0xff]  }
 0xe21   : > { %6786 = vmatprep.subr.bf16.mxu0 %v15765_v59  ;;  %7010 = vmatpush2.bf16.msra.mxu1 %v15964_v4  ;;  %v15879_v59 = vld [vmem:[%s18285_s11 + $0x4a4] ss:$8 sps:$4 sm:$0xff]  }
 0xe22   : > { %7011 = vmatprep.subr.bf16.mxu1 %v15972_v49  ;;  %v4497_v4 = vld [vmem:[%s18274_s4] sm:$0xff]  ;;  %v4498_v49 = vld [vmem:[%s18274_s4 + $0x8] sm:$0xff] }
 0xe24   : > { %6787 = vmatpush2.bf16.msra.mxu0 %v15763_v9  ;;  %v15885_v9 = vld [vmem:[%s18285_s11 + $0x494] ss:$8 sps:$4 sm:$0xff]  }
 0xe25   : > { %6788 = vmatprep.subr.bf16.mxu0 %v15771_v12  ;;  %7012 = vmatpush2.bf16.msra.mxu1 %v15970_v7  ;;  %v15891_v12 = vld [vmem:[%s18285_s11 + $0x484] ss:$8 sps:$4 sm:$0xff]   ;;  %v15907_v7 = vld [vmem:[%s18285_s11 + $0x650] ss:$8 sps:$4 sm:$0xff]  }
 0xe28   : > { %6789 = vmatpush2.bf16.msra.mxu0 %v15769_v38  ;;  %7014 = vmatmul.mubr.bf16.vlgmr.msra.gmra.mxu1 %v14193_v14  ;;  %v15897_v38 = vld [vmem:[%s18285_s11 + $0x674] ss:$8 sps:$4 sm:$0xff]  }
 0xe29   : > { %6790 = vmatprep.subr.bf16.mxu0 %v15777_v20  ;;  %v14187_v20 = vpack.c.bf16 %v17266_v56, %v17256_v37  ;;  %v4500_v56 = vld [vmem:[%s18274_s4 + $0x18] sm:$0xff] }
 0xe2c   : > { %6791 = vmatpush2.bf16.msra.mxu0 %v15775_v3  ;;  %v15901_v3 = vld [vmem:[%s18285_s11 + $0x660] ss:$8 sps:$4 sm:$0xff]  }
 0xe2d   : > { %6792 = vmatprep.subr.bf16.mxu0 %v15783_v5 }
 0xe30   : > { %6793 = vmatpush2.bf16.msra.mxu0 %v15781_v40 }
 0xe31   : > { %6794 = vmatprep.subr.bf16.mxu0 %v15789_v26 }
 0xe34   : > { %6795 = vmatpush2.bf16.msra.mxu0 %v15787_v16 }
 0xe35   : > { %6796 = vmatprep.subr.bf16.mxu0 %v15795_v13  ;;  %v15913_v13 = vld [vmem:[%s18285_s11 + $0x640] ss:$8 sps:$4 sm:$0xff]  }
 0xe38   : > { %6797 = vmatpush2.bf16.msra.mxu0 %v15793_v15  ;;  %v15921_v15 = vld [vmem:[%s18285_s11 + $0x634] ss:$8 sps:$4 sm:$0xff]  }
 0xe39   : > { %6852 = vmatprep.subr.bf16.mxu0 %v15801_v21 }
 0xe3b   : > { %6799 = vmatmul.mubr.bf16.vlgmr.msra.gmra.mxu0 %v14183_v31 }
 0xe3c   : > { %6853 = vmatpush1.bf16.msra.mxu0 %v15799_v28  ;;  %6884 = vmatprep.mubr.bf16.mxu0 %v14188_v51  ;;  %v15837_v51 = vld [vmem:[%s18285_s11 + $0x414] ss:$8 sps:$4 sm:$0xff]  }
 0xe3d   : > { %6854 = vmatprep.subr.bf16.mxu0 %v15807_v32 }
 0xe40   : > { %6855 = vmatpush1.bf16.msra.mxu0 %v15805_v33  ;;  %v15919_v33 = vld [vmem:[%s18285_s11 + $0x630] ss:$8 sps:$4 sm:$0xff]  }
 0xe41   : > { %6856 = vmatprep.subr.bf16.mxu0 %v15813_v22  ;;  %v15927_v22 = vld [vmem:[%s18285_s11 + $0x624] ss:$8 sps:$4 sm:$0xff]  }
 0xe44   : > { %6857 = vmatpush1.bf16.msra.mxu0 %v15811_v29 }
 0xe45   : > { %6858 = vmatprep.subr.bf16.mxu0 %v15819_v27 }
 0xe48   : > { %6859 = vmatpush1.bf16.msra.mxu0 %v15817_v18 }
 0xe49   : > { %6860 = vmatprep.subr.bf16.mxu0 %v15825_v53 }
 0xe4c   : > { %6861 = vmatpush1.bf16.msra.mxu0 %v15823_v36  ;;  %v15925_v36 = vld [vmem:[%s18285_s11 + $0x620] ss:$8 sps:$4 sm:$0xff]  }
 0xe4d   : > { %6862 = vmatprep.subr.bf16.mxu0 %v15831_v35  ;;  %v15933_v35 = vld [vmem:[%s18285_s11 + $0x614] ss:$8 sps:$4 sm:$0xff]  }
 0xe50   : > { %6863 = vmatpush1.bf16.msra.mxu0 %v15829_v42 }
 0xe51   : > { %6864 = vmatprep.subr.bf16.mxu0 %v15837_v51 }
 0xe54   : > { %6865 = vmatpush1.bf16.msra.mxu0 %v15835_v39 }
 0xe55   : > { %6866 = vmatprep.subr.bf16.mxu0 %v15843_v41  ;;  %v15931_v41 = vld [vmem:[%s18285_s11 + $0x610] ss:$8 sps:$4 sm:$0xff]  }
 0xe58   : > { %6867 = vmatpush1.bf16.msra.mxu0 %v15841_v43  ;;  %v15939_v43 = vld [vmem:[%s18285_s11 + $0x604] ss:$8 sps:$4 sm:$0xff]  }
 0xe59   : > { %6868 = vmatprep.subr.bf16.mxu0 %v15849_v44 }
 0xe5c   : > { %6869 = vmatpush2.bf16.msra.mxu0 %v15847_v46 }
 0xe5d   : > { %6870 = vmatprep.subr.bf16.mxu0 %v15855_v47  ;;  %v15937_v47 = vld [vmem:[%s18285_s11 + $0x600] ss:$8 sps:$4 sm:$0xff]  }
 0xe60   : > { %6871 = vmatpush2.bf16.msra.mxu0 %v15853_v24  ;;  %v15945_v24 = vld [vmem:[%s18285_s11 + $0x6f4] ss:$8 sps:$4 sm:$0xff]  }
 0xe61   : > { %6872 = vmatprep.subr.bf16.mxu0 %v15861_v25 }
 0xe64   : > { %6873 = vmatpush2.bf16.msra.mxu0 %v15859_v48  ;;  %v15943_v48 = vld [vmem:[%s18285_s11 + $0x6f0] ss:$8 sps:$4 sm:$0xff]  }
 0xe65   : > { %6874 = vmatprep.subr.bf16.mxu0 %v15867_v50  ;;  %v15951_v50 = vld [vmem:[%s18285_s11 + $0x6e4] ss:$8 sps:$4 sm:$0xff]  }
 0xe68   : > { %6875 = vmatpush2.bf16.msra.mxu0 %v15865_v55  ;;  %v15949_v55 = vld [vmem:[%s18285_s11 + $0x6e0] ss:$8 sps:$4 sm:$0xff]  }
 0xe69   : > { %6876 = vmatprep.subr.bf16.mxu0 %v15873_v57  ;;  %v15957_v57 = vld [vmem:[%s18285_s11 + $0x6d4] ss:$8 sps:$4 sm:$0xff]  }
 0xe6c   : > { %6877 = vmatpush2.bf16.msra.mxu0 %v15871_v58  ;;  %v15955_v58 = vld [vmem:[%s18285_s11 + $0x6d0] ss:$8 sps:$4 sm:$0xff]  }
 0xe6d   : > { %6878 = vmatprep.subr.bf16.mxu0 %v15879_v59  ;;  %v15963_v59 = vld [vmem:[%s18285_s11 + $0x6c4] ss:$8 sps:$4 sm:$0xff]  }
 0xe70   : > { %6879 = vmatpush2.bf16.msra.mxu0 %v15877_v61  ;;  %v15961_v61 = vld [vmem:[%s18285_s11 + $0x6c0] ss:$8 sps:$4 sm:$0xff]  }
 0xe71   : > { %6880 = vmatprep.subr.bf16.mxu0 %v15885_v9  ;;  %v15969_v9 = vld [vmem:[%s18285_s11 + $0x6b4] ss:$8 sps:$4 sm:$0xff]  }
 0xe74   : > { %6881 = vmatpush2.bf16.msra.mxu0 %v15883_v11  ;;  %v15967_v11 = vld [vmem:[%s18285_s11 + $0x6b0] ss:$8 sps:$4 sm:$0xff]  }
 0xe75   : > { %6882 = vmatprep.subr.bf16.mxu0 %v15891_v12  ;;  %v15975_v12 = vld [vmem:[%s18285_s11 + $0x6a4] ss:$8 sps:$4 sm:$0xff]  }
 0xe78   : > { %6883 = vmatpush2.bf16.msra.mxu0 %v15889_v54  ;;  %v15973_v54 = vld [vmem:[%s18285_s11 + $0x6a0] ss:$8 sps:$4 sm:$0xff]  }
 0xe79   : > { %6938 = vmatprep.subr.bf16.mxu0 %v15897_v38  ;;  %v15978_v38 = vld [vmem:[%s18285_s11 + $0x694] ss:$8 sps:$4 sm:$0xff]  }
 0xe7b   : > { %6885 = vmatmul.mubr.bf16.vlgmr.msra.gmra.mxu0 %v14187_v20  ;;  %v4486_v2 = vpop.f32.mrf.mxu0  ;;  %v15981_v20 = vld [vmem:[%s18285_s11 + $0x684] ss:$8 sps:$4 sm:$0xff]  }
 0xe7c   : > { %6939 = vmatpush1.bf16.msra.mxu0 %v15895_v0  ;;  %6970 = vmatprep.mubr.bf16.mxu0 %v14192_v63  ;;  %v4501_v40 = vmul.f32 %v4497_v4, %v4486_v2  ;;  %v15976_v0 = vld [vmem:[%s18285_s11 + $0x690] ss:$8 sps:$4 sm:$0xff]   ;;  %v14191_v2 = vpack.c.bf16 %v17345_v30, %v17335_v62  ;;  %v15989_v62 = vld [vmem:[%s18286_s23 + $0x20] sm:$0xff]  }
 0xe7d   : > { %v4488_v5 = vpop.f32.mrf.mxu0  ;;  %6940 = vmatprep.subr.bf16.mxu0 %v15903_v1  ;;  %v15979_v1 = vld [vmem:[%s18285_s11 + $0x680] ss:$8 sps:$4 sm:$0xff]   ;;  %v15983_v4 = vld [vmem:[%s18286_s23 + $0x38] sm:$0xff]  }
 0xe7e   : > { %v4502_v34 = vmul.f32 %v4498_v49, %v4488_v5  ;;  %v15984_v5 = vld [vmem:[%s18286_s23 + $0x70] sm:$0xff]   ;;  %v15987_v49 = vld [vmem:[%s18286_s23 + $0x28] sm:$0xff]   ;;  %v15990_v30 = vld [vmem:[%s18286_s23 + $0x58] sm:$0xff]  }
 0xe7f   : > { %v4492_v37 = vpop.f32.mrf.mxu0 }
 0xe80   : > { %v4503_v6 = vmul.f32 %v4499_v10, %v4492_v37  ;;  %6941 = vmatpush1.bf16.msra.mxu0 %v15901_v3  ;;  %v15982_v3 = vld [vmem:[%s18286_s23 + $0x78] sm:$0xff]   ;;  %v15985_v10 = vld [vmem:[%s18286_s23 + $0x30] sm:$0xff]   ;;  %v15988_v37 = vld [vmem:[%s18286_s23 + $0x60] sm:$0xff]  }
 0xe81   : > { %v4494_v26 = vpop.f32.mrf.mxu0  ;;  %6942 = vmatprep.subr.bf16.mxu0 %v15909_v19  ;;  %v15986_v19 = vld [vmem:[%s18286_s23 + $0x68] sm:$0xff]  }
 0xe82   : > { %v4505_v63 = vadd.f32 %v4503_v6, %v4501_v40  ;;  %v4504_v23 = vmul.f32 %v4500_v56, %v4494_v26  ;;  %v15991_v56 = vld [vmem:[%s18286_s23 + $0x18] sm:$0xff]   ;;  %v15992_v40 = vld [vmem:[%s18286_s23 + $0x50] sm:$0xff]   ;;  %v15995_v26 = vld [vmem:[%s18286_s23 + $0x8] sm:$0xff]  }
 0xe83   : > { %v15993_v6 = vld [vmem:[%s18286_s23 + $0x10] sm:$0xff]  }
 0xe84   : > { %v4506_v14 = vrot.slane %v4505_v63, 4  ;;  %v4512_v16 = vadd.f32 %v4504_v23, %v4502_v34  ;;  %6943 = vmatpush1.bf16.msra.mxu0 %v15907_v7  ;;  %v15994_v7 = vld [vmem:[%s18286_s23 + $0x48] sm:$0xff]   ;;  %v15997_v34 = vld [vmem:[%s18286_s23] sm:$0xff]  }
 0xe85   : > { %6944 = vmatprep.subr.bf16.mxu0 %v15915_v60  ;;  %v15996_v60 = vld [vmem:[%s18286_s23 + $0x40] sm:$0xff]  }
 0xe86   : > { %v4507_v21 = vadd.f32 %v4506_v14, %v4505_v63  ;;  %v4513_v28 = vrot.slane %v4512_v16, 4  ;;  %v6757_v63 = vpop.f32.mrf.mxu1 }
 0xe88   : > { %v4508_v31 = vrot.slane %v4507_v21, 2  ;;  %v4514_v32 = vadd.f32 %v4513_v28, %v4512_v16  ;;  %6945 = vmatpush1.bf16.msra.mxu0 %v15913_v13  ;;  %v6759_v23 = vpop.f32.mrf.mxu1 }
 0xe89   : > { %6946 = vmatprep.subr.bf16.mxu0 %v15921_v15 }
 0xe8a   : > { %v4509_v29 = vadd.f32 %v4508_v31, %v4507_v21  ;;  %v4515_v27 = vrot.slane %v4514_v32, 2  ;;  %v6761_v16 = vpop.f32.mrf.mxu1 }
 0xe8c   : > { %v4510_v18 = vrot.slane %v4509_v29, 1  ;;  %v4516_v53 = vadd.f32 %v4515_v27, %v4514_v32  ;;  %6947 = vmatpush1.bf16.msra.mxu0 %v15919_v33  ;;  %v6763_v15 = vpop.f32.mrf.mxu1 }
 0xe8d   : > { %6948 = vmatprep.subr.bf16.mxu0 %v15927_v22 }
 0xe8e   : > { %v4517_v42 = vrot.slane %v4516_v53, 1  ;;  %v4511_v51 = vadd.f32 %v4510_v18, %v4509_v29  ;;  %v6843_v28 = vpop.f32.mrf.mxu1 }
 0xe90   : > { %v4518_v39 = vadd.f32 %v4517_v42, %v4516_v53  ;;  %6949 = vmatpush1.bf16.msra.mxu0 %v15925_v36  ;;  %v6845_v32 = vpop.f32.mrf.mxu1 }
 0xe91   : > { %6950 = vmatprep.subr.bf16.mxu0 %v15933_v35 }
 0xe92   : > { %v4521_v44 = vcombine.low %v4511_v51, %v4518_v39  ;;  %v6847_v22 = vpop.f32.mrf.mxu1 }
 0xe94   : > { %v4528_v46 = vrot.slane %v4521_v44, %v17040_v17  ;;  %6951 = vmatpush1.bf16.msra.mxu0 %v15931_v41  ;;  %v6849_v27 = vpop.f32.mrf.mxu1 }
 0xe95   : > { %6952 = vmatprep.subr.bf16.mxu0 %v15939_v43 }
 0xe96   : > { %v4535_v25 = vrot.slane %v4528_v46, %v17040_v17 }
 0xe98   : > { %4538 = vst.msk [vmem:[#allocation3 + $0x1] ss:$4 sm:$0x3] %vm17046_vm3, %v4535_v25  ;;  %6953 = vmatpush1.bf16.msra.mxu0 %v15937_v47 }
 0xe99   : > { %6954 = vmatprep.subr.bf16.mxu0 %v15945_v24 }
 0xe9c   : > { %6955 = vmatpush2.bf16.msra.mxu0 %v15943_v48 }
 0xe9d   : > { %6956 = vmatprep.subr.bf16.mxu0 %v15951_v50 }
 0xea0   : > { %6957 = vmatpush2.bf16.msra.mxu0 %v15949_v55 }
 0xea1   : > { %6958 = vmatprep.subr.bf16.mxu0 %v15957_v57 }
 0xea4   : > { %6959 = vmatpush2.bf16.msra.mxu0 %v15955_v58 }
 0xea5   : > { %6960 = vmatprep.subr.bf16.mxu0 %v15963_v59 }
 0xea8   : > { %6961 = vmatpush2.bf16.msra.mxu0 %v15961_v61  ;;  %v6929_v53 = vpop.f32.mrf.mxu1 }
 0xea9   : > { %6962 = vmatprep.subr.bf16.mxu0 %v15969_v9 }
 0xeaa   : > { %v6931_v35 = vpop.f32.mrf.mxu1 }
 0xeac   : > { %6963 = vmatpush2.bf16.msra.mxu0 %v15967_v11  ;;  %v6933_v43 = vpop.f32.mrf.mxu1 }
 0xead   : > { %6964 = vmatprep.subr.bf16.mxu0 %v15975_v12 }
 0xeae   : > { %v6935_v48 = vpop.f32.mrf.mxu1 }
 0xeb0   : > { %6965 = vmatpush2.bf16.msra.mxu0 %v15973_v54 }
 0xeb1   : > { %6966 = vmatprep.subr.bf16.mxu0 %v15978_v38 }
 0xeb4   : > { %6967 = vmatpush2.bf16.msra.mxu0 %v15976_v0 }
 0xeb5   : > { %6968 = vmatprep.subr.bf16.mxu0 %v15981_v20 }
 0xeb8   : > { %6969 = vmatpush2.bf16.msra.mxu0 %v15979_v1 }
 0xeb9   : > { %14490 = vmatprep.subr.bf16.mxu0 %v15982_v3 }
 0xebb   : > { %6971 = vmatmul.mubr.bf16.vlgmr.msra.gmra.mxu0 %v14191_v2  ;;  %v6714_v14 = vpop.f32.mrf.mxu0 }
 0xebc   : > { %14491 = vmatpush3.bf16.msra.mxu0 %v15983_v4  ;;  %v6758_v51 = vadd.f32 %v6757_v63, %v6714_v14 }
 0xebd   : > { %14492 = vmatprep.subr.bf16.mxu0 %v15984_v5  ;;  %v6716_v13 = vpop.f32.mrf.mxu0  ;;  %v17459_v5 = vsub.s32 0, %v17035_v45 }
 0xebe   : > { %v6760_v39 = vadd.f32 %v6759_v23, %v6716_v13 }
 0xebf   : > { %v6718_v21 = vpop.f32.mrf.mxu0 }
 0xec0   : > { %14493 = vmatpush3.bf16.msra.mxu0 %v15985_v10  ;;  %v6762_v46 = vadd.f32 %v6761_v16, %v6718_v21 }
 0xec1   : > { %14494 = vmatprep.subr.bf16.mxu0 %v15986_v19  ;;  %v6720_v31 = vpop.f32.mrf.mxu0  ;;  %v7024_v19 = vld [vmem:[%s18287_s28] sm:$0x3]  ;;  %s18288_s28 = sld [smem:[#allocation22_spill]] }
 0xec2   : > { %v6764_v24 = vadd.f32 %v6763_v15, %v6720_v31 }
 0xec4   : > { %14495 = vmatpush3.bf16.msra.mxu0 %v15987_v49 }
 0xec5   : > { %14496 = vmatprep.subr.bf16.mxu0 %v15988_v37  ;;  %v17463_v37 = vsub.s32 1, %v17035_v45 }
 0xec7   : > { %v7033_v63 = vrot.slane %v7024_v19, %v17463_v37 }
 0xec8   : > { %14497 = vmatpush3.bf16.msra.mxu0 %v15989_v62 }
 0xec9   : > { %14498 = vmatprep.subr.bf16.mxu0 %v15990_v30 }
 0xecc   : > { %14499 = vmatpush3.bf16.msra.mxu0 %v15991_v56 }
 0xecd   : > { %14500 = vmatprep.subr.bf16.mxu0 %v15992_v40 }
 0xed0   : > { %14501 = vmatpush3.bf16.msra.mxu0 %v15993_v6 }
 0xed1   : > { %14502 = vmatprep.subr.bf16.mxu0 %v15994_v7 }
 0xed4   : > { %14503 = vmatpush3.bf16.msra.mxu0 %v15995_v26  ;;  %v7029_v26 = vrot.slane %v7024_v19, %v17459_v5 }
 0xed5   : > { %14504 = vmatprep.subr.bf16.mxu0 %v15996_v60 }
 0xed8   : > { %14505 = vmatpush3.bf16.msra.mxu0 %v15997_v34 }
 0xee8   : > { %v7015_v61 = vpop.f32.mrf.mxu1 }
 0xeea   : > { %v7017_v0 = vpop.f32.mrf.mxu1 }
 0xeec   : > { %v7019_v30 = vpop.f32.mrf.mxu1 }
 0xeee   : > { %v7021_v16 = vpop.f32.mrf.mxu1 }
 0xefb   : > { %v6800_v33 = vpop.f32.mrf.mxu0 }
 0xefc   : > { %v6801_v41 = vadd.f32 %v6800_v33, %v6758_v51 }
 0xefd   : > { %v6802_v29 = vpop.f32.mrf.mxu0 }
 0xefe   : > { %v6803_v47 = vadd.f32 %v6802_v29, %v6760_v39  ;;  %v6844_v50 = vadd.f32 %v6843_v28, %v6801_v41 }
 0xeff   : > { %v6804_v18 = vpop.f32.mrf.mxu0 }
 0xf00   : > { %v6805_v25 = vadd.f32 %v6804_v18, %v6762_v46  ;;  %v6846_v58 = vadd.f32 %v6845_v32, %v6803_v47 }
 0xf01   : > { %v6806_v36 = vpop.f32.mrf.mxu0 }
 0xf02   : > { %v6807_v57 = vadd.f32 %v6806_v36, %v6764_v24  ;;  %v6848_v11 = vadd.f32 %v6847_v22, %v6805_v25 }
 0xf04   : > { %v6850_v38 = vadd.f32 %v6849_v27, %v6807_v57 }
 0xf3b   : > { %v6886_v42 = vpop.f32.mrf.mxu0 }
 0xf3c   : > { %v6887_v59 = vadd.f32 %v6886_v42, %v6844_v50 }
 0xf3d   : > { %v6888_v44 = vpop.f32.mrf.mxu0 }
 0xf3e   : > { %v6889_v9 = vadd.f32 %v6888_v44, %v6846_v58  ;;  %v6930_v20 = vadd.f32 %v6929_v53, %v6887_v59 }
 0xf3f   : > { %v6890_v55 = vpop.f32.mrf.mxu0 }
 0xf40   : > { %v6891_v54 = vadd.f32 %v6890_v55, %v6848_v11  ;;  %v6932_v3 = vadd.f32 %v6931_v35, %v6889_v9 }
 0xf41   : > { %v6892_v12 = vpop.f32.mrf.mxu0 }
 0xf42   : > { %v6893_v2 = vadd.f32 %v6892_v12, %v6850_v38  ;;  %v6934_v62 = vadd.f32 %v6933_v43, %v6891_v54 }
 0xf44   : > { %v6936_v6 = vadd.f32 %v6935_v48, %v6893_v2 }
 0xf7b   : > { %v6972_v1 = vpop.f32.mrf.mxu0 }
 0xf7c   : > { %v6973_v4 = vadd.f32 %v6972_v1, %v6930_v20 }
 0xf7d   : > { %v6974_v10 = vpop.f32.mrf.mxu0 }
 0xf7e   : > { %v6975_v49 = vadd.f32 %v6974_v10, %v6932_v3  ;;  %v7016_v7 = vadd.f32 %v7015_v61, %v6973_v4 }
 0xf7f   : > { %v6976_v56 = vpop.f32.mrf.mxu0 }
 0xf80   : > { %v6977_v40 = vadd.f32 %v6976_v56, %v6934_v62  ;;  %v7018_v34 = vadd.f32 %v7017_v0, %v6975_v49  ;;  %v7036_v45 = vadd.f32 %v7029_v26, %v7016_v7 }
 0xf81   : > { %v6978_v60 = vpop.f32.mrf.mxu0 }
 0xf82   : > { %v7020_v23 = vadd.f32 %v7019_v30, %v6977_v40  ;;  %v6979_v14 = vadd.f32 %v6978_v60, %v6936_v6  ;;  %v7037_v21 = vadd.f32 %v7033_v63, %v7018_v34 }
 0xf84   : > { %v7038_v13 = vadd.f32 %v7029_v26, %v7020_v23  ;;  %v7022_v15 = vadd.f32 %v7021_v16, %v6979_v14  ;;  %v16460_v23 = vmov 65535  }
 0xf85   : > { %v7767_v14 = vsel %vm7765_vm6, 4294967295, %v16460_v23 }
 0xf86   : > { %v7626_v28 = vsel %vm7225_vm5, %v7038_v13, 0.0  ;;  %v7039_v31 = vadd.f32 %v7033_v63, %v7022_v15  ;;  %v7040_v18 = vpack.c.bf16 %v7038_v13, %v7036_v45 }
 0xf87   : > { %v7627_v32 = vadd.f32 %v7626_v28, %v7036_v45  ;;  %v17472_v28 = vsel %vm7766_vm7, %v7767_v14, 0 }
 0xf88   : > { %v7634_v33 = vsel %vm7225_vm5, %v7039_v31, 0.0  ;;  %v7041_v22 = vpack.c.bf16 %v7039_v31, %v7037_v21 }
 0xf89   : > { %v7628_v29 = vrot.slane %v7627_v32, 4  ;;  %v7635_v27 = vadd.f32 %v7634_v33, %v7037_v21 }
 0xf8a   : > { %7209 = vmatprep.mubr.bf16.mxu0 %v7041_v22 }
 0xf8b   : > { %v7629_v53 = vadd.f32 %v7628_v29, %v7627_v32  ;;  %v7636_v36 = vrot.slane %v7635_v27, 4  ;;  %7210 = vmatmul.mubr.bf16.vlgmr.msra.gmra.mxu0 %v7040_v18 }
 0xf8d   : > { %v7630_v35 = vrot.slane %v7629_v53, 2  ;;  %v7637_v42 = vadd.f32 %v7636_v36, %v7635_v27 }
 0xf8f   : > { %v7631_v51 = vadd.f32 %v7630_v35, %v7629_v53  ;;  %v7638_v39 = vrot.slane %v7637_v42, 2  ;;  %v13490_v53 = vld [vmem:[%s18288_s28] ss:$0 sm:$0xff]  ;;  %s18290_s28 = sld [smem:[#allocation25_spill]] }
 0xf91   : > { %v7632_v41 = vrot.slane %v7631_v51, 1  ;;  %v7639_v43 = vadd.f32 %v7638_v39, %v7637_v42 }
 0xf93   : > { %v7633_v44 = vadd.f32 %v7632_v41, %v7631_v51  ;;  %v7640_v46 = vrot.slane %v7639_v43, 1 }
 0xf95   : > { %v7643_v47 = vmul.f32 0.11111111, %v7633_v44  ;;  %v7641_v24 = vadd.f32 %v7640_v46, %v7639_v43 }
 0xf97   : > { %v7647_v25 = vsub.f32 %v7038_v13, %v7643_v47  ;;  %v7644_v48 = vmul.f32 0.11111111, %v7641_v24  ;;  %v7645_v50 = vsub.f32 %v7036_v45, %v7643_v47 }
 0xf99   : > { %v7651_v55 = vmul.f32 %v7647_v25, %v7647_v25  ;;  %v7648_v57 = vsub.f32 %v7039_v31, %v7644_v48  ;;  %v7646_v58 = vsub.f32 %v7037_v21, %v7644_v48  ;;  %v7649_v59 = vmul.f32 %v7645_v50, %v7645_v50 }
 0xf9b   : > { %v7653_v61 = vsel %vm7225_vm5, %v7651_v55, 0.0  ;;  %v7652_v9 = vmul.f32 %v7648_v57, %v7648_v57  ;;  %v7650_v11 = vmul.f32 %v7646_v58, %v7646_v58 }
 0xf9c   : > { %v7654_v12 = vadd.f32 %v7653_v61, %v7649_v59 }
 0xf9d   : > { %v7661_v54 = vsel %vm7225_vm5, %v7652_v9, 0.0 }
 0xf9e   : > { %v7655_v38 = vrot.slane %v7654_v12, 4  ;;  %v7662_v0 = vadd.f32 %v7661_v54, %v7650_v11 }
 0xfa0   : > { %v7656_v20 = vadd.f32 %v7655_v38, %v7654_v12  ;;  %v7663_v1 = vrot.slane %v7662_v0, 4 }
 0xfa2   : > { %v7657_v2 = vrot.slane %v7656_v20, 2  ;;  %v7664_v3 = vadd.f32 %v7663_v1, %v7662_v0 }
 0xfa4   : > { %v7658_v4 = vadd.f32 %v7657_v2, %v7656_v20  ;;  %v7665_v10 = vrot.slane %v7664_v3, 2  ;;  %v7259_v20 = vld [vmem:[%s18289_s1] sm:$0xff] }
 0xfa5   : > { %15162 = vmatprep.mubr.msk.f32.mxu1 %vm7261_vm9, %v7259_v20  ;;  %v7498_v20 = vld [vmem:[%s16593_s27 + $0x8] sm:$0xff] }
 0xfa6   : > { %v7659_v19 = vrot.slane %v7658_v4, 1  ;;  %v7666_v49 = vadd.f32 %v7665_v10, %v7664_v3 }
 0xfa8   : > { %v7660_v62 = vadd.f32 %v7659_v19, %v7658_v4  ;;  %v7667_v30 = vrot.slane %v7666_v49, 1 }
 0xfaa   : > { %v7668_v56 = vadd.f32 %v7667_v30, %v7666_v49  ;;  %v7669_v40 = vmul.f32 0.11111111, %v7660_v62 }
 0xfac   : > { %v7670_v6 = vmul.f32 0.11111111, %v7668_v56  ;;  %v7671_v7 = vadd.f32 1e-05, %v7669_v40 }
 0xfae   : > { %v7672_v26 = vadd.f32 1e-05, %v7670_v6  ;;  %16279 = vrsqrt.f32 %v7671_v7 }
 0xfb0   : > { %16281 = vrsqrt.f32 %v7672_v26 }
 0xfbb   : > { %v16280_v60 = vpop.eup %16279 }
 0xfbc   : > { %v7675_v34 = vmul.f32 %v16280_v60, %v7645_v50  ;;  %v7677_v63 = vmul.f32 %v16280_v60, %v7647_v25 }
 0xfbd   : > { %v16282_v16 = vpop.eup %16281 }
 0xfbe   : > { %v7676_v13 = vmul.f32 %v16282_v16, %v7646_v58  ;;  %v7678_v15 = vmul.f32 %v16282_v16, %v7648_v57  ;;  %v7679_v45 = vmax.f32 %v7675_v34, 0.0  ;;  %v7681_v21 = vmax.f32 %v7677_v63, 0.0  ;;  %v7260_v34 = vld [vmem:[%s18289_s1 + $0x8] sm:$0xff]  ;;  %s18291_s1 = sld [smem:[#allocation24_spill]] }
 0xfc0   : > { %v7680_v31 = vmax.f32 %v7676_v13, 0.0  ;;  %v7682_v32 = vmax.f32 %v7678_v15, 0.0  ;;  %v17474_v33 = vpack.c.bf16 %v7681_v21, %v7679_v45 }
 0xfc2   : > { %v17476_v22 = vpack.c.bf16 %v7682_v32, %v7680_v31  ;;  %v7770_v29 = vand.u32 %v17472_v28, %v17474_v33  ;;  %v16008_v33 = vld [vmem:[%s18290_s28 + $0xe8] sm:$0xff]  }
0x104b   : > { %v14506_v27 = vpop.f32.mrf.mxu0 }
0x104d   : > { %v14507_v18 = vpop.f32.mrf.mxu0 }
0x104e   : > { %v14508_v36 = vadd.f32 %v14507_v18, %v14506_v27 }
0x104f   : > { %v14509_v35 = vpop.f32.mrf.mxu0 }
0x1050   : > { %v7212_v42 = vadd.f32 %v14508_v36, %v13490_v53 }
0x1051   : > { %v14510_v51 = vpop.f32.mrf.mxu0 }
0x1052   : > { %v14511_v39 = vadd.f32 %v14510_v51, %v14509_v35  ;;  %v7218_v41 = vsel %vm1552_vm1, %v7212_v42, 0.0 }
0x1053   : > { %7219 = vadd.xlane.f32.xlu1 %v7218_v41 }
0x1054   : > { %v7215_v43 = vadd.f32 %v14511_v39, %v13490_v53 }
0x1056   : > { %v7222_v44 = vsel %vm7221_vm8, %v7215_v43, 0.0 }
0x1057   : > { %7223 = vadd.xlane.f32.xlu0 %v7222_v44 }
0x10dc   : > { %v7220_v47 = vpop.xlane.xlu1 %7219 }
0x10e0   : > { %v7224_v46 = vpop.xlane.xlu0 %7223 }
0x10e1   : > { %v7226_v24 = vsel %vm7225_vm5, %v7224_v46, 0.0 }
0x10e2   : > { %v7227_v25 = vadd.f32 %v7226_v24, %v7220_v47 }
0x10e4   : > { %v7228_v48 = vrot.slane %v7227_v25, 4 }
0x10e6   : > { %v7229_v50 = vadd.f32 %v7228_v48, %v7227_v25 }
0x10e8   : > { %v7230_v55 = vrot.slane %v7229_v50, 2 }
0x10ea   : > { %v7231_v57 = vadd.f32 %v7230_v55, %v7229_v50 }
0x10ec   : > { %v7232_v58 = vrot.slane %v7231_v57, 1 }
0x10ee   : > { %v7233_v59 = vadd.f32 %v7232_v58, %v7231_v57 }
0x10f0   : > { %v7235_v61 = vmul.f32 0.0069444445, %v7233_v59 }
0x10f2   : > { %v7237_v9 = vsub.f32 %v7215_v43, %v7235_v61  ;;  %v7236_v11 = vsub.f32 %v7212_v42, %v7235_v61 }
0x10f4   : > { %v7239_v12 = vmul.f32 %v7237_v9, %v7237_v9  ;;  %v7238_v38 = vmul.f32 %v7236_v11, %v7236_v11 }
0x10f6   : > { %v7243_v54 = vsel %vm7221_vm8, %v7239_v12, 0.0  ;;  %v7240_v0 = vsel %vm1552_vm1, %v7238_v38, 0.0  ;;  %v7500_v12 = vld [vmem:[%s16593_s27 + $0x18] sm:$0xff]  ;;  %v7499_v38 = vld [vmem:[%s16593_s27 + $0x10] sm:$0xff] }
0x10f7   : > { %7244 = vadd.xlane.f32.xlu0 %v7243_v54 }
0x10fb   : > { %7241 = vadd.xlane.f32.xlu0 %v7240_v0 }
0x1180   : > { %v7245_v1 = vpop.xlane.xlu0 %7244 }
0x1181   : > { %v7246_v2 = vsel %vm7225_vm5, %v7245_v1, 0.0  ;;  %v7497_v1 = vld [vmem:[%s16593_s27] sm:$0xff] }
0x1184   : > { %v7242_v3 = vpop.xlane.xlu0 %7241 }
0x1185   : > { %v7247_v4 = vadd.f32 %v7246_v2, %v7242_v3  ;;  %v7773_v2 = vand.u32 %v17472_v28, %v17476_v22  ;;  %v16010_v3 = vld [vmem:[%s18290_s28 + $0x78] sm:$0xff]   ;;  %v16021_v22 = vld [vmem:[%s18290_s28 + $0x20] sm:$0xff]   ;;  %v16006_v28 = vld [vmem:[%s18290_s28 + $0xb0] sm:$0xff]  }
0x1186   : > { %14520 = vmatprep.subr.bf16.mxu0 %v16010_v3 }
0x1187   : > { %v7248_v10 = vrot.slane %v7247_v4, 4 }
0x1189   : > { %v7249_v19 = vadd.f32 %v7248_v10, %v7247_v4  ;;  %v16011_v4 = vld [vmem:[%s18290_s28 + $0x38] sm:$0xff]   ;;  %v16013_v10 = vld [vmem:[%s18290_s28 + $0x70] sm:$0xff]  }
0x118a   : > { %14521 = vmatpush3.bf16.msra.mxu0 %v16011_v4 }
0x118b   : > { %v7250_v49 = vrot.slane %v7249_v19, 2  ;;  %14522 = vmatprep.subr.bf16.mxu0 %v16013_v10 }
0x118d   : > { %v7251_v62 = vadd.f32 %v7250_v49, %v7249_v19  ;;  %v16015_v19 = vld [vmem:[%s18290_s28 + $0x30] sm:$0xff]   ;;  %v16016_v49 = vld [vmem:[%s18290_s28 + $0x68] sm:$0xff]  }
0x118e   : > { %14523 = vmatpush3.bf16.msra.mxu0 %v16015_v19 }
0x118f   : > { %v7252_v30 = vrot.slane %v7251_v62, 1  ;;  %14524 = vmatprep.subr.bf16.mxu0 %v16016_v49 }
0x1191   : > { %v7253_v56 = vadd.f32 %v7252_v30, %v7251_v62  ;;  %v16017_v62 = vld [vmem:[%s18290_s28 + $0x28] sm:$0xff]   ;;  %v16019_v30 = vld [vmem:[%s18290_s28 + $0x60] sm:$0xff]  }
0x1192   : > { %14525 = vmatpush3.bf16.msra.mxu0 %v16017_v62 }
0x1193   : > { %v7254_v40 = vmul.f32 0.0069444445, %v7253_v56  ;;  %14526 = vmatprep.subr.bf16.mxu0 %v16019_v30  ;;  %v16023_v56 = vld [vmem:[%s18290_s28 + $0x58] sm:$0xff]  }
0x1195   : > { %v7255_v6 = vadd.f32 1e-05, %v7254_v40  ;;  %v16024_v40 = vld [vmem:[%s18290_s28 + $0x18] sm:$0xff]  }
0x1196   : > { %14527 = vmatpush3.bf16.msra.mxu0 %v16021_v22 }
0x1197   : > { %16283 = vrsqrt.f32 %v7255_v6  ;;  %14528 = vmatprep.subr.bf16.mxu0 %v16023_v56  ;;  %v16039_v56 = vld [vmem:[%s18290_s28 + $0x138] sm:$0xff]  }
0x119a   : > { %14529 = vmatpush3.bf16.msra.mxu0 %v16024_v40 }
0x11a4   : > { %v16284_v7 = vpop.eup %16283 }
0x11a5   : > { %v7258_v26 = vmul.f32 %v16284_v7, %v7237_v9  ;;  %v7257_v60 = vmul.f32 %v16284_v7, %v7236_v11 }
0x11a7   : > { %15158 = vmatprep.subr.msk.mxu1 %vm7225_vm5, %v7258_v26 }
0x11a8   : > { %15159 = vmatpush3.msk.msra.mxu1 %vm7225_vm5, %v7258_v26 }
0x11a9   : > { %15160 = vmatprep.subr.mxu1 %v7257_v60 }
0x11aa   : > { %15161 = vmatpush3.msra.mxu1 %v7257_v60  ;;  %v16003_v60 = vld [vmem:[%s18290_s28 + $0xf8] sm:$0xff]  }
0x11ab   : > { %15163 = vmatmul.mubr.msk.f32.vlgmr.msra.gmra.mxu1 %vm7261_vm9, %v7260_v34 }
0x126b   : > { %v15164_v63 = vpop.f32.mrf.mxu1 }
0x126c   : > { %v7349_v16 = vsel %vm1552_vm1, %v15164_v63, 0.0 }
0x126d   : > { %v7337_v23 = vpop.f32.mrf.mxu1 }
0x126e   : > { %v7346_v14 = vsel %vm1552_vm1, %v7337_v23, 0.0 }
0x126f   : > { %7347 = vadd.xlane.f32.xlu0 %v7346_v14  ;;  %v16004_v14 = vld [vmem:[%s18290_s28 + $0xb8] sm:$0xff]  }
0x1273   : > { %7350 = vadd.xlane.f32.xlu0 %v7349_v16  ;;  %v16005_v16 = vld [vmem:[%s18290_s28 + $0xf0] sm:$0xff]  }
0x12f8   : > { %v7348_v13 = vpop.xlane.xlu0 %7347 }
0x12fc   : > { %v7351_v15 = vpop.xlane.xlu0 %7350 }
0x12fd   : > { %v7352_v45 = vadd.f32 %v7351_v15, %v7348_v13  ;;  %v16009_v13 = vld [vmem:[%s18290_s28 + $0xa8] sm:$0xff]   ;;  %v16012_v15 = vld [vmem:[%s18290_s28 + $0xe0] sm:$0xff]  }
0x12ff   : > { %v7353_v21 = vrot.slane %v7352_v45, 4 }
0x1301   : > { %v7354_v31 = vadd.f32 %v7353_v21, %v7352_v45  ;;  %v16014_v45 = vld [vmem:[%s18290_s28 + $0xa0] sm:$0xff]   ;;  %v16018_v21 = vld [vmem:[%s18290_s28 + $0xd8] sm:$0xff]  }
0x1303   : > { %v7355_v32 = vrot.slane %v7354_v31, 2 }
0x1305   : > { %v7356_v27 = vadd.f32 %v7355_v32, %v7354_v31  ;;  %v16000_v31 = vld [vmem:[%s18291_s1 + $0x10] sm:$0xff]   ;;  %v16020_v32 = vld [vmem:[%s18290_s28 + $0x98] sm:$0xff]  }
0x1307   : > { %v7357_v18 = vrot.slane %v7356_v27, 1 }
0x1309   : > { %v7358_v53 = vadd.f32 %v7357_v18, %v7356_v27  ;;  %v16001_v27 = vld [vmem:[%s18291_s1 + $0x18] sm:$0xff]   ;;  %v16002_v18 = vld [vmem:[%s18291_s1 + $0x20] sm:$0xff]  }
0x130b   : > { %v7359_v36 = vmul.f32 0.00390625, %v7358_v53  ;;  %v16007_v53 = vld [vmem:[%s18291_s1 + $0x28] sm:$0xff]  }
0x130d   : > { %v7360_v35 = vsub.f32 %v7337_v23, %v7359_v36  ;;  %v7361_v42 = vsub.f32 %v15164_v63, %v7359_v36  ;;  %v15998_v63 = vld [vmem:[%s18291_s1] sm:$0xff]   ;;  %v16461_v23 = vmov 0   ;;  %v16022_v36 = vld [vmem:[%s18291_s1 + $0x30] sm:$0xff]  }
0x130f   : > { %v7362_v51 = vmul.f32 %v7360_v35, %v7360_v35  ;;  %v7363_v41 = vmul.f32 %v7361_v42, %v7361_v42 }
0x1311   : > { %v7364_v39 = vsel %vm1552_vm1, %v7362_v51, 0.0  ;;  %v7367_v43 = vsel %vm1552_vm1, %v7363_v41, 0.0  ;;  %v16027_v51 = vld [vmem:[%s18290_s28 + $0x90] sm:$0xff]   ;;  %v16029_v41 = vld [vmem:[%s18291_s1 + $0x38] sm:$0xff]  }
0x1312   : > { %7365 = vadd.xlane.f32.xlu0 %v7364_v39  ;;  %v16028_v39 = vld [vmem:[%s18290_s28 + $0x10] sm:$0xff]  }
0x1316   : > { %7368 = vadd.xlane.f32.xlu0 %v7367_v43  ;;  %v16030_v43 = vld [vmem:[%s18290_s28 + $0x48] sm:$0xff]  }
0x139b   : > { %v7366_v44 = vpop.xlane.xlu0 %7365 }
0x139f   : > { %v7369_v46 = vpop.xlane.xlu0 %7368 }
0x13a0   : > { %v7370_v47 = vadd.f32 %v7369_v46, %v7366_v44  ;;  %v16031_v44 = vld [vmem:[%s18290_s28 + $0x8] sm:$0xff]  }
0x13a1   : > { %v16032_v46 = vld [vmem:[%s18290_s28 + $0xc8] sm:$0xff]  }
0x13a2   : > { %v7371_v24 = vrot.slane %v7370_v47, 4 }
0x13a4   : > { %v7372_v25 = vadd.f32 %v7371_v24, %v7370_v47  ;;  %v16033_v47 = vld [vmem:[%s18290_s28 + $0x40] sm:$0xff]   ;;  %v16034_v24 = vld [vmem:[%s18290_s28 + $0x88] sm:$0xff]  }
0x13a6   : > { %v7373_v48 = vrot.slane %v7372_v25, 2 }
0x13a8   : > { %v7374_v50 = vadd.f32 %v7373_v48, %v7372_v25  ;;  %v16035_v25 = vld [vmem:[%s18290_s28] sm:$0xff]  }
0x13a9   : > { %v16036_v48 = vld [vmem:[%s18290_s28 + $0xc0] sm:$0xff]  }
0x13aa   : > { %v7375_v55 = vrot.slane %v7374_v50, 1 }
0x13ac   : > { %v7376_v57 = vadd.f32 %v7375_v55, %v7374_v50  ;;  %v16037_v50 = vld [vmem:[%s18290_s28 + $0x178] sm:$0xff]   ;;  %v16038_v55 = vld [vmem:[%s18290_s28 + $0x80] sm:$0xff]  }
0x13ae   : > { %v7377_v58 = vmul.f32 0.00390625, %v7376_v57  ;;  %v16041_v57 = vld [vmem:[%s18290_s28 + $0x1f8] sm:$0xff]  }
0x13b0   : > { %v7378_v59 = vadd.f32 1e-05, %v7377_v58 }
0x13b2   : > { %16285 = vrsqrt.f32 %v7378_v59  ;;  %v7584_v59 = vld [vmem:[%s18274_s4] sm:$0xff] }
0x13bf   : > { %v16286_v61 = vpop.eup %16285 }
0x13c0   : > { %v7381_v9 = vmul.f32 %v16286_v61, %v7361_v42  ;;  %v7380_v11 = vmul.f32 %v16286_v61, %v7360_v35  ;;  %v16026_v35 = vld [vmem:[%s18290_s28 + $0x50] sm:$0xff]  }
0x13c1   : > { %v16025_v42 = vld [vmem:[%s18290_s28 + $0xd0] sm:$0xff]   ;;  %14530 = vmatprep.subr.bf16.mxu0 %v16026_v35  ;;  %v16049_v35 = vld [vmem:[%s18290_s28 + $0x1e8] sm:$0xff]  }
0x13c2   : > { %15165 = vmatprep.subr.mxu1 %v7381_v9  ;;  %7382 = vxpose.xlu0.b32.start [1/2] (short) (narrow) %v7380_v11, 16 }
0x13c3   : > { %15166 = vmatpush3.msra.mxu1 %v7381_v9  ;;  %14531 = vmatpush3.bf16.msra.mxu0 %v16028_v39 }
0x13c4   : > { %15167 = vmatprep.subr.mxu1 %v7380_v11  ;;  %14532 = vmatprep.subr.bf16.mxu0 %v16030_v43 }
0x13c5   : > { %15168 = vmatpush3.msra.mxu1 %v7380_v11  ;;  %v7585_v11 = vld [vmem:[%s18274_s4 + $0x8] sm:$0xff] }
0x13c6   : > { %7383 = vxpose.xlu0.b32.end [2/2] (short) (narrow) %v7381_v9, 16  ;;  %7535 = vmatprep.subr.mxu1 %v7500_v12  ;;  %v7586_v9 = vld [vmem:[%s18274_s4 + $0x10] sm:$0xff] }
0x13c7   : > { %14533 = vmatpush3.bf16.msra.mxu0 %v16031_v44  ;;  %v16050_v44 = vld [vmem:[%s18290_s28 + $0x120] sm:$0xff]  }
0x13c8   : > { %14534 = vmatprep.subr.bf16.mxu0 %v16033_v47 }
0x13cb   : > { %14535 = vmatpush3.bf16.msra.mxu0 %v16035_v25  ;;  %v16053_v25 = vld [vmem:[%s18290_s28 + $0x1e0] sm:$0xff]  }
0x13cc   : > { %14564 = vmatprep.subr.bf16.mxu0 %v16037_v50 }
0x143e   : > { %v7398_v54 = vpop.trf.xlu0 }
0x143f   : > { %15169 = vmatprep.mubr.msk.f32.mxu1 %vm1552_vm1, %v7398_v54  ;;  %v7587_v54 = vld [vmem:[%s18274_s4 + $0x18] sm:$0xff] }
0x1442   : > { %v7399_v0 = vpop.trf.xlu0 }
0x1443   : > { %15170 = vmatmul.mubr.msk.f32.vlgmr.msra.gmra.mxu1 %vm1552_vm1, %v7399_v0 }
0x1444   : > { %7536 = vmatpush1.msra.mxu1 %v7499_v38  ;;  %7571 = vmatprep.mubr.f32.mxu1 %v16457_v8 }
0x1445   : > { %7537 = vmatprep.subr.mxu1 %v7498_v20 }
0x1446   : > { %7538 = vmatpush1.msra.mxu1 %v7497_v1 }
0x1447   : > { %7789 = vmatprep.subr.bf16.mxu1 %v7773_v2 }
0x1503   : > { %v15171_v6 = vpop.f32.mrf.mxu1 }
0x1504   : > { %v7496_v34 = vmul.f32 0.062499996, %v15171_v6 }
0x1505   : > { %v7486_v7 = vpop.f32.mrf.mxu1 }
0x1506   : > { %v7495_v26 = vmul.f32 0.062499996, %v7486_v7  ;;  %v16040_v7 = vld [vmem:[%s18290_s28 + $0x170] sm:$0xff]  }
0x1508   : > { %13512 = vmatmul.mubr.msk.f32.vlgmr.msra.gmra.mxu1 %vm1552_vm1, %v7495_v26 }
0x1509   : > { %7790 = vmatpush1.bf16.msra.mxu1 %v7770_v29  ;;  %7577 = vmatprep.mubr.f32.mxu1 %v16457_v8  ;;  %v15999_v29 = vld [vmem:[%s18291_s1 + $0x8] sm:$0xff]   ;;  %s18292_s1 = sld [smem:[#allocation27_spill]] }
0x150a   : > { %14542 = vmatprep.subr.bf16.mxu1 %v16003_v60 }
0x150c   : > { %13513 = vmatmul.mubr.msk.f32.gmra.mxu1 %vm1552_vm1, %v7496_v34 }
0x150d   : > { %7807 = vmatprep.mubr.bf16.mxu1 %v16461_v23 }
0x1510   : > { %13522 = vmatmul.mubr.msk.bf16.vlgmr.msra.gmra.mxu1 %vm7261_vm9, %v15998_v63 }
0x1511   : > { %7817 = vmatprep.mubr.bf16.mxu1 %v16461_v23  ;;  %14543 = vmatpush3.bf16.msra.mxu1 %v16004_v14 }
0x1512   : > { %14544 = vmatprep.subr.bf16.mxu1 %v16005_v16  ;;  %v16042_v16 = vld [vmem:[%s18290_s28 + $0x130] sm:$0xff]  }
0x1515   : > { %14545 = vmatpush3.bf16.msra.mxu1 %v16006_v28  ;;  %v16043_v28 = vld [vmem:[%s18290_s28 + $0x1b8] sm:$0xff]  }
0x1516   : > { %14546 = vmatprep.subr.bf16.mxu1 %v16008_v33 }
0x1518   : > { %13523 = vmatmul.mubr.msk.bf16.gmra.mxu1 %vm7261_vm9, %v15999_v29  ;;  %v16044_v29 = vld [vmem:[%s18290_s28 + $0x168] sm:$0xff]  }
0x1519   : > { %7827 = vmatprep.mubr.bf16.mxu1 %v16461_v23  ;;  %14547 = vmatpush3.bf16.msra.mxu1 %v16009_v13  ;;  %v16045_v13 = vld [vmem:[%s18290_s28 + $0x1f0] sm:$0xff]  }
0x151a   : > { %14548 = vmatprep.subr.bf16.mxu1 %v16012_v15 }
0x151d   : > { %14549 = vmatpush3.bf16.msra.mxu1 %v16014_v45 }
0x151e   : > { %14550 = vmatprep.subr.bf16.mxu1 %v16018_v21 }
0x1520   : > { %13524 = vmatmul.mubr.msk.bf16.gmra.mxu1 %vm7261_vm9, %v16000_v31 }
0x1521   : > { %7837 = vmatprep.mubr.bf16.mxu1 %v16461_v23  ;;  %14551 = vmatpush3.bf16.msra.mxu1 %v16020_v32 }
0x1522   : > { %14552 = vmatprep.subr.bf16.mxu1 %v16025_v42 }
0x1525   : > { %14553 = vmatpush3.bf16.msra.mxu1 %v16027_v51 }
0x1526   : > { %14554 = vmatprep.subr.bf16.mxu1 %v16032_v46  ;;  %v16051_v46 = vld [vmem:[%s18290_s28 + $0x1a8] sm:$0xff]  }
0x1528   : > { %13525 = vmatmul.mubr.msk.bf16.gmra.mxu1 %vm7261_vm9, %v16001_v27  ;;  %v16046_v27 = vld [vmem:[%s18290_s28 + $0x128] sm:$0xff]  }
0x1529   : > { %7847 = vmatprep.mubr.bf16.mxu1 %v16461_v23  ;;  %14555 = vmatpush3.bf16.msra.mxu1 %v16034_v24  ;;  %v16052_v24 = vld [vmem:[%s18290_s28 + $0x158] sm:$0xff]  }
0x152a   : > { %14556 = vmatprep.subr.bf16.mxu1 %v16036_v48 }
0x152d   : > { %14557 = vmatpush3.bf16.msra.mxu1 %v16038_v55  ;;  %v16054_v55 = vld [vmem:[%s18290_s28 + $0x118] sm:$0xff]  }
0x152e   : > { %14586 = vmatprep.subr.bf16.mxu1 %v16041_v57  ;;  %v16055_v57 = vld [vmem:[%s18290_s28 + $0x1a0] sm:$0xff]  }
0x1530   : > { %13526 = vmatmul.mubr.msk.bf16.gmra.mxu1 %vm7261_vm9, %v16002_v18  ;;  %v16047_v18 = vld [vmem:[%s18290_s28 + $0x1b0] sm:$0xff]  }
0x1531   : > { %7857 = vmatprep.mubr.bf16.mxu1 %v16461_v23 }
0x1538   : > { %13527 = vmatmul.mubr.msk.bf16.gmra.mxu1 %vm7261_vm9, %v16007_v53 }
0x1539   : > { %7867 = vmatprep.mubr.bf16.mxu1 %v16461_v23 }
0x1540   : > { %13528 = vmatmul.mubr.msk.bf16.gmra.mxu1 %vm7261_vm9, %v16022_v36  ;;  %v16048_v36 = vld [vmem:[%s18290_s28 + $0x160] sm:$0xff]  }
0x1541   : > { %7877 = vmatprep.mubr.bf16.mxu1 %v16461_v23 }
0x1548   : > { %13529 = vmatmul.mubr.msk.bf16.gmra.mxu1 %vm7261_vm9, %v16029_v41 }
0x15c8   : > { %v7573_v58 = vpop.f32.mrf.mxu1 }
0x15c9   : > { %v7588_v38 = vmul.f32 %v7584_v59, %v7573_v58  ;;  %v16056_v58 = vld [vmem:[%s18290_s28 + $0x150] sm:$0xff]   ;;  %v16057_v59 = vld [vmem:[%s18290_s28 + $0x1d8] sm:$0xff]  }
0x15ca   : > { %v7575_v61 = vpop.f32.mrf.mxu1 }
0x15cb   : > { %v7589_v1 = vmul.f32 %v7585_v11, %v7575_v61  ;;  %v16058_v61 = vld [vmem:[%s18290_s28 + $0x110] sm:$0xff]   ;;  %v16060_v11 = vld [vmem:[%s18290_s28 + $0x148] sm:$0xff]  }
0x15cc   : > { %v7579_v12 = vpop.f32.mrf.mxu1 }
0x15cd   : > { %v7590_v0 = vmul.f32 %v7586_v9, %v7579_v12  ;;  %v16059_v9 = vld [vmem:[%s18290_s28 + $0x198] sm:$0xff]   ;;  %v16061_v12 = vld [vmem:[%s18290_s28 + $0x1d0] sm:$0xff]  }
0x15ce   : > { %v7581_v20 = vpop.f32.mrf.mxu1 }
0x15cf   : > { %v7592_v2 = vadd.f32 %v7590_v0, %v7588_v38  ;;  %v7591_v3 = vmul.f32 %v7587_v54, %v7581_v20  ;;  %v16062_v38 = vld [vmem:[%s18290_s28 + $0x108] sm:$0xff]   ;;  %v16063_v0 = vld [vmem:[%s18290_s28 + $0x190] sm:$0xff]   ;;  %v16064_v20 = vld [vmem:[%s18290_s28 + $0x140] sm:$0xff]  }
0x15d0   : > { %v7809_v4 = vpop.f32.mrf.mxu1 }
0x15d1   : > { %v7593_v10 = vrot.slane %v7592_v2, 4  ;;  %v7599_v19 = vadd.f32 %v7591_v3, %v7589_v1  ;;  %v14195_v40 = vpack.c.bf16 %v7809_v4, %v7809_v4  ;;  %v16065_v1 = vld [vmem:[%s18290_s28 + $0x1c8] sm:$0xff]   ;;  %v16066_v3 = vld [vmem:[%s18290_s28 + $0x100] sm:$0xff]  }
0x15d2   : > { %v7811_v49 = vpop.f32.mrf.mxu1  ;;  %v16067_v4 = vld [vmem:[%s18290_s28 + $0x188] sm:$0xff]  }
0x15d3   : > { %v7594_v62 = vadd.f32 %v7593_v10, %v7592_v2  ;;  %v7600_v30 = vrot.slane %v7599_v19, 4  ;;  %v14196_v22 = vpack.c.bf16 %v7811_v49, %v7811_v49  ;;  %v16068_v10 = vld [vmem:[%s18290_s28 + $0x1c0] sm:$0xff]  }
0x15d4   : > { %v7813_v6 = vpop.f32.mrf.mxu1 }
0x15d5   : > { %v7595_v26 = vrot.slane %v7594_v62, 2  ;;  %v7601_v60 = vadd.f32 %v7600_v30, %v7599_v19  ;;  %10208 = vmatprep.mubr.bf16.mxu0 %v14196_v22  ;;  %v14197_v33 = vpack.c.bf16 %v7813_v6, %v7813_v6  ;;  %v16069_v19 = vld [vmem:[%s18290_s28 + $0x278] sm:$0xff]  }
0x15d6   : > { %v7815_v34 = vpop.f32.mrf.mxu1  ;;  %10209 = vmatmul.mubr.bf16.vlgmr.msra.gmra.mxu0 %v14195_v40  ;;  %v16071_v30 = vld [vmem:[%s18290_s28 + $0x238] sm:$0xff]  }
0x15d7   : > { %v7596_v63 = vadd.f32 %v7595_v26, %v7594_v62  ;;  %v7602_v23 = vrot.slane %v7601_v60, 2  ;;  %v14198_v14 = vpack.c.bf16 %v7815_v34, %v7815_v34  ;;  %14565 = vmatpush3.bf16.msra.mxu0 %v16039_v56  ;;  %v16070_v62 = vld [vmem:[%s18290_s28 + $0x180] sm:$0xff]   ;;  %v16072_v56 = vld [vmem:[%s18290_s28 + $0x270] sm:$0xff]   ;;  %v16073_v40 = vld [vmem:[%s18290_s28 + $0x2f8] sm:$0xff]  }
0x15d8   : > { %14566 = vmatprep.subr.bf16.mxu0 %v16040_v7  ;;  %v17572_v15 = vpop.f32.mrf.mxu1  ;;  %v16074_v26 = vld [vmem:[%s18290_s28 + $0x230] sm:$0xff]  }
0x15d9   : > { %v7597_v45 = vrot.slane %v7596_v63, 1  ;;  %v7603_v21 = vadd.f32 %v7602_v23, %v7601_v60  ;;  %10248 = vmatprep.mubr.bf16.mxu1 %v14198_v14  ;;  %v14199_v22 = vpack.c.bf16 %v17572_v15, %v17572_v15  ;;  %v16075_v60 = vld [vmem:[%s18290_s28 + $0x2b8] sm:$0xff]   ;;  %v16077_v23 = vld [vmem:[%s18290_s28 + $0x2f0] sm:$0xff]   ;;  %v16083_v15 = vld [vmem:[%s18290_s28 + $0x2a8] sm:$0xff]  }
0x15da   : > { %10249 = vmatmul.mubr.bf16.vlgmr.msra.gmra.mxu1 %v14197_v33  ;;  %v7821_v31 = vpop.f32.mrf.mxu1  ;;  %v16080_v33 = vld [vmem:[%s18290_s28 + $0x260] sm:$0xff]  }
0x15db   : > { %v7604_v32 = vrot.slane %v7603_v21, 1  ;;  %14567 = vmatpush3.bf16.msra.mxu0 %v16042_v16  ;;  %14587 = vmatpush3.bf16.msra.mxu1 %v16043_v28  ;;  %v14200_v53 = vpack.c.bf16 %v7821_v31, %v7821_v31  ;;  %v7598_v51 = vadd.f32 %v7597_v45, %v7596_v63  ;;  %v16076_v63 = vld [vmem:[%s18290_s28 + $0x268] sm:$0xff]   ;;  %v16079_v28 = vld [vmem:[%s18290_s28 + $0x2b0] sm:$0xff]   ;;  %v16084_v45 = vld [vmem:[%s18290_s28 + $0x258] sm:$0xff]  }
0x15dc   : > { %14568 = vmatprep.subr.bf16.mxu0 %v16044_v29  ;;  %14588 = vmatprep.subr.bf16.mxu1 %v16045_v13  ;;  %v17578_v42 = vpop.f32.mrf.mxu1  ;;  %v16078_v16 = vld [vmem:[%s18290_s28 + $0x228] sm:$0xff]   ;;  %v16082_v13 = vld [vmem:[%s18290_s28 + $0x220] sm:$0xff]   ;;  %v16086_v31 = vld [vmem:[%s18290_s28 + $0x218] sm:$0xff]  }
0x15dd   : > { %v7605_v39 = vadd.f32 %v7604_v32, %v7603_v21  ;;  %10288 = vmatprep.mubr.bf16.mxu0 %v14200_v53  ;;  %v14201_v34 = vpack.c.bf16 %v17578_v42, %v17578_v42  ;;  %v16081_v29 = vld [vmem:[%s18290_s28 + $0x2e8] sm:$0xff]   ;;  %v16085_v21 = vld [vmem:[%s18290_s28 + $0x2e0] sm:$0xff]   ;;  %v16090_v53 = vld [vmem:[%s18290_s28 + $0x210] sm:$0xff]  }
0x15de   : > { %v7825_v41 = vpop.f32.mrf.mxu1  ;;  %v16087_v32 = vld [vmem:[%s18290_s28 + $0x2a0] sm:$0xff]   ;;  %v16093_v42 = vld [vmem:[%s18290_s28 + $0x2d0] sm:$0xff]  }
0x15df   : > { %v7608_v43 = vcombine.low %v7598_v51, %v7605_v39  ;;  %14569 = vmatpush3.bf16.msra.mxu0 %v16046_v27  ;;  %14589 = vmatpush3.bf16.msra.mxu1 %v16047_v18  ;;  %v14202_v47 = vpack.c.bf16 %v7825_v41, %v7825_v41  ;;  %v16088_v27 = vld [vmem:[%s18290_s28 + $0x250] sm:$0xff]   ;;  %v16089_v18 = vld [vmem:[%s18290_s28 + $0x2d8] sm:$0xff]   ;;  %v16094_v39 = vld [vmem:[%s18290_s28 + $0x208] sm:$0xff]  }
0x15e0   : > { %14570 = vmatprep.subr.bf16.mxu0 %v16048_v36  ;;  %14590 = vmatprep.subr.bf16.mxu1 %v16049_v35  ;;  %v17596_v54 = vpop.f32.mrf.mxu1  ;;  %v16091_v36 = vld [vmem:[%s18290_s28 + $0x298] sm:$0xff]   ;;  %v16092_v35 = vld [vmem:[%s18290_s28 + $0x248] sm:$0xff]   ;;  %v16095_v41 = vld [vmem:[%s18290_s28 + $0x290] sm:$0xff]  }
0x15e1   : > { %v7615_v48 = vrot.slane %v7608_v43, %v17040_v17  ;;  %10328 = vmatprep.mubr.bf16.mxu1 %v14202_v47  ;;  %v16096_v43 = vld [vmem:[%s18290_s28 + $0x240] sm:$0xff]  }
0x15e2   : > { %v7831_v2 = vpop.f32.mrf.mxu1  ;;  %v16098_v47 = vld [vmem:[%s18290_s28 + $0x200] sm:$0xff]  }
0x15e3   : > { %v7622_v50 = vrot.slane %v7615_v48, %v17040_v17  ;;  %14571 = vmatpush3.bf16.msra.mxu0 %v16050_v44  ;;  %14591 = vmatpush3.bf16.msra.mxu1 %v16051_v46  ;;  %v14204_v6 = vpack.c.bf16 %v7831_v2, %v7831_v2  ;;  %v16097_v44 = vld [vmem:[%s18290_s28 + $0x2c8] sm:$0xff]   ;;  %v16101_v48 = vld [vmem:[%s18290_s28 + $0x378] sm:$0xff]  }
0x15e4   : > { %14572 = vmatprep.subr.bf16.mxu0 %v16052_v24  ;;  %14592 = vmatprep.subr.bf16.mxu1 %v16053_v25  ;;  %v17606_v49 = vpop.f32.mrf.mxu1  ;;  %v16099_v24 = vld [vmem:[%s18290_s28 + $0x288] sm:$0xff]   ;;  %v16100_v25 = vld [vmem:[%s18290_s28 + $0x2c0] sm:$0xff]  }
0x15e5   : > { %7625 = vst.msk [vmem:[#allocation3 + $0x2] ss:$4 sm:$0x3] %vm17046_vm3, %v7622_v50  ;;  %v16110_v2 = vld [vmem:[%s18290_s28 + $0x328] sm:$0xff]  }
0x15e6   : > { %v7835_v7 = vpop.f32.mrf.mxu1 }
0x15e7   : > { %14573 = vmatpush3.bf16.msra.mxu0 %v16054_v55  ;;  %14593 = vmatpush3.bf16.msra.mxu1 %v16055_v57  ;;  %v14206_v14 = vpack.c.bf16 %v7835_v7, %v7835_v7  ;;  %v16102_v55 = vld [vmem:[%s18290_s28 + $0x280] sm:$0xff]   ;;  %v16103_v57 = vld [vmem:[%s18290_s28 + $0x338] sm:$0xff]   ;;  %v16122_v7 = vld [vmem:[%s18290_s28 + $0x310] sm:$0xff]  }
0x15e8   : > { %14574 = vmatprep.subr.bf16.mxu0 %v16056_v58  ;;  %14594 = vmatprep.subr.bf16.mxu1 %v16057_v59  ;;  %v17636_v51 = vpop.f32.mrf.mxu1  ;;  %v14203_v58 = vpack.c.bf16 %v17596_v54, %v17596_v54  ;;  %v16104_v59 = vld [vmem:[%s18290_s28 + $0x370] sm:$0xff]   ;;  %v16108_v54 = vld [vmem:[%s18290_s28 + $0x368] sm:$0xff]  }
0x15ea   : > { %v7841_v46 = vpop.f32.mrf.mxu1 }
0x15eb   : > { %14575 = vmatpush3.bf16.msra.mxu0 %v16058_v61  ;;  %14595 = vmatpush3.bf16.msra.mxu1 %v16059_v9  ;;  %v16105_v61 = vld [vmem:[%s18290_s28 + $0x3f8] sm:$0xff]   ;;  %v14208_v9 = vpack.c.bf16 %v7841_v46, %v7841_v46  ;;  %v16142_v46 = vld [vmem:[%s18290_s28 + $0x428] sm:$0xff]  }
0x15ec   : > { %14576 = vmatprep.subr.bf16.mxu0 %v16060_v11  ;;  %14596 = vmatprep.subr.bf16.mxu1 %v16061_v12  ;;  %v17646_v50 = vpop.f32.mrf.mxu1  ;;  %v16106_v12 = vld [vmem:[%s18290_s28 + $0x330] sm:$0xff]  }
0x15ee   : > { %v7845_v11 = vpop.f32.mrf.mxu1 }
0x15ef   : > { %14577 = vmatpush3.bf16.msra.mxu0 %v16062_v38  ;;  %14597 = vmatpush3.bf16.msra.mxu1 %v16063_v0  ;;  %v16107_v38 = vld [vmem:[%s18290_s28 + $0x3b8] sm:$0xff]   ;;  %v14205_v0 = vpack.c.bf16 %v17606_v49, %v17606_v49  ;;  %v16115_v49 = vld [vmem:[%s18290_s28 + $0x3a8] sm:$0xff]  }
0x15f0   : > { %14578 = vmatprep.subr.bf16.mxu0 %v16064_v20  ;;  %14598 = vmatprep.subr.bf16.mxu1 %v16065_v1  ;;  %v16109_v20 = vld [vmem:[%s18290_s28 + $0x3f0] sm:$0xff]   ;;  %v14210_v1 = vpack.c.bf16 %v7845_v11, %v7845_v11 }
0x15f1   : > { %v16154_v11 = vld [vmem:[%s18290_s28 + $0x410] sm:$0xff]  }
0x15f3   : > { %14579 = vmatpush3.bf16.msra.mxu0 %v16066_v3  ;;  %14599 = vmatpush3.bf16.msra.mxu1 %v16067_v4  ;;  %v16111_v3 = vld [vmem:[%s18290_s28 + $0x3b0] sm:$0xff]   ;;  %v16112_v4 = vld [vmem:[%s18290_s28 + $0x360] sm:$0xff]  }
0x15f4   : > { %14600 = vmatprep.subr.bf16.mxu1 %v16068_v10  ;;  %14608 = vmatprep.subr.bf16.mxu0 %v16069_v19  ;;  %v16113_v10 = vld [vmem:[%s18290_s28 + $0x3e8] sm:$0xff]   ;;  %v16114_v19 = vld [vmem:[%s18290_s28 + $0x320] sm:$0xff]  }
0x15f6   : > { %10289 = vmatmul.mubr.bf16.vlgmr.msra.gmra.mxu0 %v14199_v22  ;;  %v16118_v22 = vld [vmem:[%s18290_s28 + $0x318] sm:$0xff]  }
0x15f7   : > { %14601 = vmatpush3.bf16.msra.mxu1 %v16070_v62  ;;  %14609 = vmatpush3.bf16.msra.mxu0 %v16071_v30  ;;  %v16116_v62 = vld [vmem:[%s18290_s28 + $0x358] sm:$0xff]   ;;  %v16117_v30 = vld [vmem:[%s18290_s28 + $0x3e0] sm:$0xff]  }
0x15f8   : > { %14610 = vmatprep.subr.bf16.mxu0 %v16072_v56  ;;  %14630 = vmatprep.subr.bf16.mxu1 %v16073_v40  ;;  %v16119_v56 = vld [vmem:[%s18290_s28 + $0x3a0] sm:$0xff]   ;;  %v16120_v40 = vld [vmem:[%s18290_s28 + $0x350] sm:$0xff]  }
0x15f9   : > { %10368 = vmatprep.mubr.bf16.mxu0 %v14204_v6  ;;  %v16121_v6 = vld [vmem:[%s18290_s28 + $0x3d8] sm:$0xff]  }
0x15fa   : > { %10329 = vmatmul.mubr.bf16.vlgmr.msra.gmra.mxu1 %v14201_v34  ;;  %v16125_v34 = vld [vmem:[%s18290_s28 + $0x3d0] sm:$0xff]  }
0x15fb   : > { %14611 = vmatpush3.bf16.msra.mxu0 %v16074_v26  ;;  %14631 = vmatpush3.bf16.msra.mxu1 %v16075_v60  ;;  %v16123_v26 = vld [vmem:[%s18290_s28 + $0x398] sm:$0xff]   ;;  %v16124_v60 = vld [vmem:[%s18290_s28 + $0x348] sm:$0xff]  }
0x15fc   : > { %14612 = vmatprep.subr.bf16.mxu0 %v16076_v63  ;;  %14632 = vmatprep.subr.bf16.mxu1 %v16077_v23  ;;  %v17676_v63 = vpop.f32.mrf.mxu1  ;;  %v16126_v23 = vld [vmem:[%s18290_s28 + $0x308] sm:$0xff]  }
0x15fd   : > { %10408 = vmatprep.mubr.bf16.mxu1 %v14206_v14  ;;  %v16127_v14 = vld [vmem:[%s18290_s28 + $0x390] sm:$0xff]  }
0x15ff   : > { %14613 = vmatpush3.bf16.msra.mxu0 %v16078_v16  ;;  %14633 = vmatpush3.bf16.msra.mxu1 %v16079_v28  ;;  %v16128_v16 = vld [vmem:[%s18290_s28 + $0x340] sm:$0xff]   ;;  %v16129_v28 = vld [vmem:[%s18290_s28 + $0x3c8] sm:$0xff]  }
0x1600   : > { %14614 = vmatprep.subr.bf16.mxu0 %v16080_v33  ;;  %14634 = vmatprep.subr.bf16.mxu1 %v16081_v29  ;;  %v7851_v33 = vpop.f32.mrf.mxu1  ;;  %v16130_v29 = vld [vmem:[%s18290_s28 + $0x300] sm:$0xff]  }
0x1603   : > { %14615 = vmatpush3.bf16.msra.mxu0 %v16082_v13  ;;  %14635 = vmatpush3.bf16.msra.mxu1 %v16083_v15  ;;  %v16131_v13 = vld [vmem:[%s18290_s28 + $0x388] sm:$0xff]   ;;  %v16132_v15 = vld [vmem:[%s18290_s28 + $0x3c0] sm:$0xff]  }
0x1604   : > { %14616 = vmatprep.subr.bf16.mxu0 %v16084_v45  ;;  %14636 = vmatprep.subr.bf16.mxu1 %v16085_v21  ;;  %v16133_v45 = vld [vmem:[%s18290_s28 + $0x478] sm:$0xff]   ;;  %v17686_v21 = vpop.f32.mrf.mxu1 }
0x1607   : > { %14617 = vmatpush3.bf16.msra.mxu0 %v16086_v31  ;;  %14637 = vmatpush3.bf16.msra.mxu1 %v16087_v32  ;;  %v16134_v31 = vld [vmem:[%s18290_s28 + $0x380] sm:$0xff]   ;;  %v16135_v32 = vld [vmem:[%s18290_s28 + $0x438] sm:$0xff]  }
0x1608   : > { %14618 = vmatprep.subr.bf16.mxu0 %v16088_v27  ;;  %14638 = vmatprep.subr.bf16.mxu1 %v16089_v18  ;;  %v14207_v27 = vpack.c.bf16 %v17636_v51, %v17636_v51  ;;  %v16136_v18 = vld [vmem:[%s18290_s28 + $0x470] sm:$0xff]   ;;  %v16140_v51 = vld [vmem:[%s18290_s28 + $0x468] sm:$0xff]  }
0x160b   : > { %14619 = vmatpush3.bf16.msra.mxu0 %v16090_v53  ;;  %14639 = vmatpush3.bf16.msra.mxu1 %v16091_v36  ;;  %v16137_v53 = vld [vmem:[%s18290_s28 + $0x4f8] sm:$0xff]   ;;  %v14212_v36 = vpack.c.bf16 %v7851_v33, %v7851_v33  ;;  %v16174_v33 = vld [vmem:[%s18290_s28 + $0x528] sm:$0xff]  }
0x160c   : > { %14620 = vmatprep.subr.bf16.mxu0 %v16092_v35  ;;  %14640 = vmatprep.subr.bf16.mxu1 %v16093_v42  ;;  %v7855_v35 = vpop.f32.mrf.mxu1  ;;  %v16138_v42 = vld [vmem:[%s18290_s28 + $0x430] sm:$0xff]  }
0x160f   : > { %14621 = vmatpush3.bf16.msra.mxu0 %v16094_v39  ;;  %14641 = vmatpush3.bf16.msra.mxu1 %v16095_v41  ;;  %v16139_v39 = vld [vmem:[%s18290_s28 + $0x4b8] sm:$0xff]   ;;  %v14209_v41 = vpack.c.bf16 %v17646_v50, %v17646_v50  ;;  %v16147_v50 = vld [vmem:[%s18290_s28 + $0x4a8] sm:$0xff]  }
0x1610   : > { %14622 = vmatprep.subr.bf16.mxu0 %v16096_v43  ;;  %14642 = vmatprep.subr.bf16.mxu1 %v16097_v44  ;;  %v16141_v43 = vld [vmem:[%s18290_s28 + $0x4f0] sm:$0xff]   ;;  %v14214_v44 = vpack.c.bf16 %v7855_v35, %v7855_v35 }
0x1611   : > { %v16186_v35 = vld [vmem:[%s18290_s28 + $0x510] sm:$0xff]  }
0x1613   : > { %14623 = vmatpush3.bf16.msra.mxu0 %v16098_v47  ;;  %14643 = vmatpush3.bf16.msra.mxu1 %v16099_v24  ;;  %v16143_v47 = vld [vmem:[%s18290_s28 + $0x4b0] sm:$0xff]   ;;  %v16144_v24 = vld [vmem:[%s18290_s28 + $0x460] sm:$0xff]  }
0x1614   : > { %14644 = vmatprep.subr.bf16.mxu1 %v16100_v25  ;;  %14652 = vmatprep.subr.bf16.mxu0 %v16101_v48  ;;  %v16145_v25 = vld [vmem:[%s18290_s28 + $0x4e8] sm:$0xff]   ;;  %v16146_v48 = vld [vmem:[%s18290_s28 + $0x420] sm:$0xff]  }
0x1616   : > { %10369 = vmatmul.mubr.bf16.vlgmr.msra.gmra.mxu0 %v14203_v58  ;;  %v16150_v58 = vld [vmem:[%s18290_s28 + $0x418] sm:$0xff]  }
0x1617   : > { %14645 = vmatpush3.bf16.msra.mxu1 %v16102_v55  ;;  %14653 = vmatpush3.bf16.msra.mxu0 %v16103_v57  ;;  %v16148_v55 = vld [vmem:[%s18290_s28 + $0x458] sm:$0xff]   ;;  %v16149_v57 = vld [vmem:[%s18290_s28 + $0x4e0] sm:$0xff]  }
0x1618   : > { %14654 = vmatprep.subr.bf16.mxu0 %v16104_v59  ;;  %14674 = vmatprep.subr.bf16.mxu1 %v16105_v61  ;;  %v16151_v59 = vld [vmem:[%s18290_s28 + $0x4a0] sm:$0xff]   ;;  %v16152_v61 = vld [vmem:[%s18290_s28 + $0x450] sm:$0xff]  }
0x1619   : > { %10448 = vmatprep.mubr.bf16.mxu0 %v14208_v9  ;;  %v16153_v9 = vld [vmem:[%s18290_s28 + $0x4d8] sm:$0xff]  }
0x161a   : > { %10409 = vmatmul.mubr.bf16.vlgmr.msra.gmra.mxu1 %v14205_v0  ;;  %v16157_v0 = vld [vmem:[%s18290_s28 + $0x4d0] sm:$0xff]  }
0x161b   : > { %14655 = vmatpush3.bf16.msra.mxu0 %v16106_v12  ;;  %14675 = vmatpush3.bf16.msra.mxu1 %v16107_v38  ;;  %v16155_v12 = vld [vmem:[%s18290_s28 + $0x498] sm:$0xff]   ;;  %v16156_v38 = vld [vmem:[%s18290_s28 + $0x448] sm:$0xff]  }
0x161c   : > { %14656 = vmatprep.subr.bf16.mxu0 %v16108_v54  ;;  %14676 = vmatprep.subr.bf16.mxu1 %v16109_v20  ;;  %v17716_v54 = vpop.f32.mrf.mxu1  ;;  %v16158_v20 = vld [vmem:[%s18290_s28 + $0x408] sm:$0xff]  }
0x161d   : > { %10488 = vmatprep.mubr.bf16.mxu1 %v14210_v1  ;;  %v16159_v1 = vld [vmem:[%s18290_s28 + $0x490] sm:$0xff]  }
0x161f   : > { %14657 = vmatpush3.bf16.msra.mxu0 %v16110_v2  ;;  %14677 = vmatpush3.bf16.msra.mxu1 %v16111_v3  ;;  %v16160_v2 = vld [vmem:[%s18290_s28 + $0x440] sm:$0xff]   ;;  %v16161_v3 = vld [vmem:[%s18290_s28 + $0x4c8] sm:$0xff]  }
0x1620   : > { %14658 = vmatprep.subr.bf16.mxu0 %v16112_v4  ;;  %14678 = vmatprep.subr.bf16.mxu1 %v16113_v10  ;;  %v7861_v4 = vpop.f32.mrf.mxu1  ;;  %v16162_v10 = vld [vmem:[%s18290_s28 + $0x400] sm:$0xff]  }
0x1623   : > { %14659 = vmatpush3.bf16.msra.mxu0 %v16114_v19  ;;  %14679 = vmatpush3.bf16.msra.mxu1 %v16115_v49  ;;  %v16163_v19 = vld [vmem:[%s18290_s28 + $0x488] sm:$0xff]   ;;  %v16164_v49 = vld [vmem:[%s18290_s28 + $0x4c0] sm:$0xff]  }
0x1624   : > { %14660 = vmatprep.subr.bf16.mxu0 %v16116_v62  ;;  %14680 = vmatprep.subr.bf16.mxu1 %v16117_v30  ;;  %v16165_v62 = vld [vmem:[%s18290_s28 + $0x578] sm:$0xff]   ;;  %v17726_v30 = vpop.f32.mrf.mxu1 }
0x1627   : > { %14661 = vmatpush3.bf16.msra.mxu0 %v16118_v22  ;;  %14681 = vmatpush3.bf16.msra.mxu1 %v16119_v56  ;;  %v16166_v22 = vld [vmem:[%s18290_s28 + $0x480] sm:$0xff]   ;;  %v16167_v56 = vld [vmem:[%s18290_s28 + $0x538] sm:$0xff]  }
0x1628   : > { %14662 = vmatprep.subr.bf16.mxu0 %v16120_v40  ;;  %14682 = vmatprep.subr.bf16.mxu1 %v16121_v6  ;;  %v14211_v40 = vpack.c.bf16 %v17676_v63, %v17676_v63  ;;  %v16168_v6 = vld [vmem:[%s18290_s28 + $0x570] sm:$0xff]   ;;  %v16172_v63 = vld [vmem:[%s18290_s28 + $0x568] sm:$0xff]  }
0x162b   : > { %14663 = vmatpush3.bf16.msra.mxu0 %v16122_v7  ;;  %14683 = vmatpush3.bf16.msra.mxu1 %v16123_v26  ;;  %v16169_v7 = vld [vmem:[%s18290_s28 + $0x5f8] sm:$0xff]   ;;  %v14216_v26 = vpack.c.bf16 %v7861_v4, %v7861_v4  ;;  %v16206_v4 = vld [vmem:[%s18290_s28 + $0x628] sm:$0xff]  }
0x162c   : > { %14664 = vmatprep.subr.bf16.mxu0 %v16124_v60  ;;  %14684 = vmatprep.subr.bf16.mxu1 %v16125_v34  ;;  %v7865_v60 = vpop.f32.mrf.mxu1  ;;  %v16170_v34 = vld [vmem:[%s18290_s28 + $0x530] sm:$0xff]  }
0x162f   : > { %14665 = vmatpush3.bf16.msra.mxu0 %v16126_v23  ;;  %14685 = vmatpush3.bf16.msra.mxu1 %v16127_v14  ;;  %v16171_v23 = vld [vmem:[%s18290_s28 + $0x5b8] sm:$0xff]   ;;  %v14213_v14 = vpack.c.bf16 %v17686_v21, %v17686_v21  ;;  %v16179_v21 = vld [vmem:[%s18290_s28 + $0x5a8] sm:$0xff]  }
0x1630   : > { %14666 = vmatprep.subr.bf16.mxu0 %v16128_v16  ;;  %14686 = vmatprep.subr.bf16.mxu1 %v16129_v28  ;;  %v16173_v16 = vld [vmem:[%s18290_s28 + $0x5f0] sm:$0xff]   ;;  %v14218_v28 = vpack.c.bf16 %v7865_v60, %v7865_v60 }
0x1631   : > { %v16218_v60 = vld [vmem:[%s18290_s28 + $0x610] sm:$0xff]  }
0x1633   : > { %14667 = vmatpush3.bf16.msra.mxu0 %v16130_v29  ;;  %14687 = vmatpush3.bf16.msra.mxu1 %v16131_v13  ;;  %v16175_v29 = vld [vmem:[%s18290_s28 + $0x5b0] sm:$0xff]   ;;  %v16176_v13 = vld [vmem:[%s18290_s28 + $0x560] sm:$0xff]  }
0x1634   : > { %14688 = vmatprep.subr.bf16.mxu1 %v16132_v15  ;;  %14696 = vmatprep.subr.bf16.mxu0 %v16133_v45  ;;  %v16177_v15 = vld [vmem:[%s18290_s28 + $0x5e8] sm:$0xff]   ;;  %v16178_v45 = vld [vmem:[%s18290_s28 + $0x520] sm:$0xff]  }
0x1636   : > { %10449 = vmatmul.mubr.bf16.vlgmr.msra.gmra.mxu0 %v14207_v27  ;;  %v16182_v27 = vld [vmem:[%s18290_s28 + $0x518] sm:$0xff]  }
0x1637   : > { %14689 = vmatpush3.bf16.msra.mxu1 %v16134_v31  ;;  %14697 = vmatpush3.bf16.msra.mxu0 %v16135_v32  ;;  %v16180_v31 = vld [vmem:[%s18290_s28 + $0x558] sm:$0xff]   ;;  %v16181_v32 = vld [vmem:[%s18290_s28 + $0x5e0] sm:$0xff]  }
0x1638   : > { %14698 = vmatprep.subr.bf16.mxu0 %v16136_v18  ;;  %14718 = vmatprep.subr.bf16.mxu1 %v16137_v53  ;;  %v16183_v18 = vld [vmem:[%s18290_s28 + $0x5a0] sm:$0xff]   ;;  %v16184_v53 = vld [vmem:[%s18290_s28 + $0x550] sm:$0xff]  }
0x1639   : > { %10528 = vmatprep.mubr.bf16.mxu0 %v14212_v36  ;;  %v16185_v36 = vld [vmem:[%s18290_s28 + $0x5d8] sm:$0xff]  }
0x163a   : > { %10489 = vmatmul.mubr.bf16.vlgmr.msra.gmra.mxu1 %v14209_v41  ;;  %v16189_v41 = vld [vmem:[%s18290_s28 + $0x5d0] sm:$0xff]  }
0x163b   : > { %14699 = vmatpush3.bf16.msra.mxu0 %v16138_v42  ;;  %14719 = vmatpush3.bf16.msra.mxu1 %v16139_v39  ;;  %v16187_v42 = vld [vmem:[%s18290_s28 + $0x598] sm:$0xff]   ;;  %v16188_v39 = vld [vmem:[%s18290_s28 + $0x548] sm:$0xff]  }
0x163c   : > { %14700 = vmatprep.subr.bf16.mxu0 %v16140_v51  ;;  %14720 = vmatprep.subr.bf16.mxu1 %v16141_v43  ;;  %v17756_v51 = vpop.f32.mrf.mxu1  ;;  %v16190_v43 = vld [vmem:[%s18290_s28 + $0x508] sm:$0xff]  }
0x163d   : > { %10568 = vmatprep.mubr.bf16.mxu1 %v14214_v44  ;;  %v16191_v44 = vld [vmem:[%s18290_s28 + $0x590] sm:$0xff]  }
0x163f   : > { %14701 = vmatpush3.bf16.msra.mxu0 %v16142_v46  ;;  %14721 = vmatpush3.bf16.msra.mxu1 %v16143_v47  ;;  %v16192_v46 = vld [vmem:[%s18290_s28 + $0x540] sm:$0xff]   ;;  %v16193_v47 = vld [vmem:[%s18290_s28 + $0x5c8] sm:$0xff]  }
0x1640   : > { %14702 = vmatprep.subr.bf16.mxu0 %v16144_v24  ;;  %14722 = vmatprep.subr.bf16.mxu1 %v16145_v25  ;;  %v7871_v24 = vpop.f32.mrf.mxu1  ;;  %v16194_v25 = vld [vmem:[%s18290_s28 + $0x500] sm:$0xff]  }
0x1643   : > { %14703 = vmatpush3.bf16.msra.mxu0 %v16146_v48  ;;  %14723 = vmatpush3.bf16.msra.mxu1 %v16147_v50  ;;  %v16195_v48 = vld [vmem:[%s18290_s28 + $0x588] sm:$0xff]   ;;  %v16196_v50 = vld [vmem:[%s18290_s28 + $0x5c0] sm:$0xff]  }
0x1644   : > { %14704 = vmatprep.subr.bf16.mxu0 %v16148_v55  ;;  %14724 = vmatprep.subr.bf16.mxu1 %v16149_v57  ;;  %v16197_v55 = vld [vmem:[%s18290_s28 + $0x678] sm:$0xff]   ;;  %v17766_v57 = vpop.f32.mrf.mxu1 }
0x1647   : > { %14705 = vmatpush3.bf16.msra.mxu0 %v16150_v58  ;;  %14725 = vmatpush3.bf16.msra.mxu1 %v16151_v59  ;;  %v16198_v58 = vld [vmem:[%s18290_s28 + $0x580] sm:$0xff]   ;;  %v16199_v59 = vld [vmem:[%s18290_s28 + $0x638] sm:$0xff]  }
0x1648   : > { %14706 = vmatprep.subr.bf16.mxu0 %v16152_v61  ;;  %14726 = vmatprep.subr.bf16.mxu1 %v16153_v9  ;;  %v14215_v61 = vpack.c.bf16 %v17716_v54, %v17716_v54  ;;  %v16200_v9 = vld [vmem:[%s18290_s28 + $0x670] sm:$0xff]   ;;  %v16204_v54 = vld [vmem:[%s18290_s28 + $0x668] sm:$0xff]  }
0x164b   : > { %14707 = vmatpush3.bf16.msra.mxu0 %v16154_v11  ;;  %14727 = vmatpush3.bf16.msra.mxu1 %v16155_v12  ;;  %v16201_v11 = vld [vmem:[%s18290_s28 + $0x6f8] sm:$0xff]   ;;  %v14220_v12 = vpack.c.bf16 %v7871_v24, %v7871_v24 }
0x164c   : > { %14708 = vmatprep.subr.bf16.mxu0 %v16156_v38  ;;  %14728 = vmatprep.subr.bf16.mxu1 %v16157_v0  ;;  %v7875_v38 = vpop.f32.mrf.mxu1  ;;  %v16202_v0 = vld [vmem:[%s18290_s28 + $0x630] sm:$0xff]  }
0x164f   : > { %14709 = vmatpush3.bf16.msra.mxu0 %v16158_v20  ;;  %14729 = vmatpush3.bf16.msra.mxu1 %v16159_v1  ;;  %v16203_v20 = vld [vmem:[%s18290_s28 + $0x6b8] sm:$0xff]   ;;  %v14217_v1 = vpack.c.bf16 %v17726_v30, %v17726_v30  ;;  %v16211_v30 = vld [vmem:[%s18290_s28 + $0x6a8] sm:$0xff]  }
0x1650   : > { %14710 = vmatprep.subr.bf16.mxu0 %v16160_v2  ;;  %14730 = vmatprep.subr.bf16.mxu1 %v16161_v3  ;;  %v16205_v2 = vld [vmem:[%s18290_s28 + $0x6f0] sm:$0xff]   ;;  %v14222_v3 = vpack.c.bf16 %v7875_v38, %v7875_v38 }
0x1653   : > { %14711 = vmatpush3.bf16.msra.mxu0 %v16162_v10  ;;  %14731 = vmatpush3.bf16.msra.mxu1 %v16163_v19  ;;  %v16207_v10 = vld [vmem:[%s18290_s28 + $0x6b0] sm:$0xff]   ;;  %v16208_v19 = vld [vmem:[%s18290_s28 + $0x660] sm:$0xff]  }
0x1654   : > { %14732 = vmatprep.subr.bf16.mxu1 %v16164_v49  ;;  %14740 = vmatprep.subr.bf16.mxu0 %v16165_v62  ;;  %v16209_v49 = vld [vmem:[%s18290_s28 + $0x6e8] sm:$0xff]   ;;  %v16210_v62 = vld [vmem:[%s18290_s28 + $0x620] sm:$0xff]  }
0x1656   : > { %10529 = vmatmul.mubr.bf16.vlgmr.msra.gmra.mxu0 %v14211_v40  ;;  %v16214_v40 = vld [vmem:[%s18290_s28 + $0x618] sm:$0xff]  }
0x1657   : > { %14733 = vmatpush3.bf16.msra.mxu1 %v16166_v22  ;;  %14741 = vmatpush3.bf16.msra.mxu0 %v16167_v56  ;;  %v16212_v22 = vld [vmem:[%s18290_s28 + $0x658] sm:$0xff]   ;;  %v16213_v56 = vld [vmem:[%s18290_s28 + $0x6e0] sm:$0xff]  }
0x1658   : > { %14742 = vmatprep.subr.bf16.mxu0 %v16168_v6  ;;  %14762 = vmatprep.subr.bf16.mxu1 %v16169_v7  ;;  %v16215_v6 = vld [vmem:[%s18290_s28 + $0x6a0] sm:$0xff]   ;;  %v16216_v7 = vld [vmem:[%s18290_s28 + $0x650] sm:$0xff]  }
0x1659   : > { %10608 = vmatprep.mubr.bf16.mxu0 %v14216_v26  ;;  %v16217_v26 = vld [vmem:[%s18290_s28 + $0x6d8] sm:$0xff]  }
0x165a   : > { %10569 = vmatmul.mubr.bf16.vlgmr.msra.gmra.mxu1 %v14213_v14  ;;  %v16221_v14 = vld [vmem:[%s18290_s28 + $0x6d0] sm:$0xff]  }
0x165b   : > { %14743 = vmatpush3.bf16.msra.mxu0 %v16170_v34  ;;  %14763 = vmatpush3.bf16.msra.mxu1 %v16171_v23  ;;  %v16219_v34 = vld [vmem:[%s18290_s28 + $0x698] sm:$0xff]   ;;  %v16220_v23 = vld [vmem:[%s18290_s28 + $0x648] sm:$0xff]  }
0x165c   : > { %14744 = vmatprep.subr.bf16.mxu0 %v16172_v63  ;;  %14764 = vmatprep.subr.bf16.mxu1 %v16173_v16  ;;  %v17796_v63 = vpop.f32.mrf.mxu1  ;;  %v16222_v16 = vld [vmem:[%s18290_s28 + $0x608] sm:$0xff]  }
0x165d   : > { %10648 = vmatprep.mubr.bf16.mxu1 %v14218_v28  ;;  %v16223_v28 = vld [vmem:[%s18290_s28 + $0x690] sm:$0xff]  }
0x165f   : > { %14745 = vmatpush3.bf16.msra.mxu0 %v16174_v33  ;;  %14765 = vmatpush3.bf16.msra.mxu1 %v16175_v29  ;;  %v16224_v33 = vld [vmem:[%s18290_s28 + $0x640] sm:$0xff]   ;;  %v16225_v29 = vld [vmem:[%s18290_s28 + $0x6c8] sm:$0xff]  }
0x1660   : > { %14746 = vmatprep.subr.bf16.mxu0 %v16176_v13  ;;  %14766 = vmatprep.subr.bf16.mxu1 %v16177_v15  ;;  %v7881_v13 = vpop.f32.mrf.mxu1  ;;  %v16226_v15 = vld [vmem:[%s18290_s28 + $0x600] sm:$0xff]  }
0x1663   : > { %14747 = vmatpush3.bf16.msra.mxu0 %v16178_v45  ;;  %14767 = vmatpush3.bf16.msra.mxu1 %v16179_v21  ;;  %v16227_v45 = vld [vmem:[%s18290_s28 + $0x688] sm:$0xff]   ;;  %v16228_v21 = vld [vmem:[%s18290_s28 + $0x6c0] sm:$0xff]  }
0x1664   : > { %14748 = vmatprep.subr.bf16.mxu0 %v16180_v31  ;;  %14768 = vmatprep.subr.bf16.mxu1 %v16181_v32  ;;  %v16229_v31 = vld [vmem:[%s18290_s28 + $0x778] sm:$0xff]   ;;  %v17806_v32 = vpop.f32.mrf.mxu1 }
0x1667   : > { %14749 = vmatpush3.bf16.msra.mxu0 %v16182_v27  ;;  %14769 = vmatpush3.bf16.msra.mxu1 %v16183_v18  ;;  %v16230_v27 = vld [vmem:[%s18290_s28 + $0x680] sm:$0xff]   ;;  %v16231_v18 = vld [vmem:[%s18290_s28 + $0x738] sm:$0xff]  }
0x1668   : > { %14750 = vmatprep.subr.bf16.mxu0 %v16184_v53  ;;  %14770 = vmatprep.subr.bf16.mxu1 %v16185_v36  ;;  %v14219_v53 = vpack.c.bf16 %v17756_v51, %v17756_v51  ;;  %v14224_v36 = vpack.c.bf16 %v7881_v13, %v7881_v13 }
0x166b   : > { %14751 = vmatpush3.bf16.msra.mxu0 %v16186_v35  ;;  %14771 = vmatpush3.bf16.msra.mxu1 %v16187_v42  ;;  %v16232_v35 = vld [vmem:[%s18290_s28 + $0x770] sm:$0xff]   ;;  %v16233_v42 = vld [vmem:[%s18290_s28 + $0x7f8] sm:$0xff]  }
0x166c   : > { %14752 = vmatprep.subr.bf16.mxu0 %v16188_v39  ;;  %14772 = vmatprep.subr.bf16.mxu1 %v16189_v41  ;;  %v7885_v41 = vpop.f32.mrf.mxu1 }
0x166f   : > { %14753 = vmatpush3.bf16.msra.mxu0 %v16190_v43  ;;  %14773 = vmatpush3.bf16.msra.mxu1 %v16191_v44  ;;  %v16234_v43 = vld [vmem:[%s18290_s28 + $0x730] sm:$0xff]   ;;  %v16235_v44 = vld [vmem:[%s18290_s28 + $0x7b8] sm:$0xff]  }
0x1670   : > { %14754 = vmatprep.subr.bf16.mxu0 %v16192_v46  ;;  %14774 = vmatprep.subr.bf16.mxu1 %v16193_v47  ;;  %v14221_v46 = vpack.c.bf16 %v17766_v57, %v17766_v57  ;;  %v16236_v47 = vld [vmem:[%s18290_s28 + $0x768] sm:$0xff]  }
0x1673   : > { %14755 = vmatpush3.bf16.msra.mxu0 %v16194_v25  ;;  %14775 = vmatpush3.bf16.msra.mxu1 %v16195_v48  ;;  %v16237_v25 = vld [vmem:[%s18290_s28 + $0x7f0] sm:$0xff]   ;;  %v14226_v48 = vpack.c.bf16 %v7885_v41, %v7885_v41 }
0x1674   : > { %14776 = vmatprep.subr.bf16.mxu1 %v16196_v50  ;;  %14784 = vmatprep.subr.bf16.mxu0 %v16197_v55 }
0x1676   : > { %10609 = vmatmul.mubr.bf16.vlgmr.msra.gmra.mxu0 %v14215_v61 }
0x1677   : > { %14777 = vmatpush3.bf16.msra.mxu1 %v16198_v58  ;;  %14785 = vmatpush3.bf16.msra.mxu0 %v16199_v59  ;;  %v16238_v58 = vld [vmem:[%s18290_s28 + $0x728] sm:$0xff]   ;;  %v16239_v59 = vld [vmem:[%s18290_s28 + $0x7b0] sm:$0xff]  }
0x1678   : > { %14786 = vmatprep.subr.bf16.mxu0 %v16200_v9  ;;  %14806 = vmatprep.subr.bf16.mxu1 %v16201_v11  ;;  %v16240_v9 = vld [vmem:[%s18290_s28 + $0x760] sm:$0xff]   ;;  %v16241_v11 = vld [vmem:[%s18290_s28 + $0x7e8] sm:$0xff]  }
0x1679   : > { %10688 = vmatprep.mubr.bf16.mxu0 %v14220_v12 }
0x167a   : > { %10649 = vmatmul.mubr.bf16.vlgmr.msra.gmra.mxu1 %v14217_v1  ;;  %v16243_v1 = vld [vmem:[%s18290_s28 + $0x7a8] sm:$0xff]  }
0x167b   : > { %14787 = vmatpush3.bf16.msra.mxu0 %v16202_v0  ;;  %14807 = vmatpush3.bf16.msra.mxu1 %v16203_v20  ;;  %v16242_v20 = vld [vmem:[%s18290_s28 + $0x720] sm:$0xff]  }
0x167c   : > { %14788 = vmatprep.subr.bf16.mxu0 %v16204_v54  ;;  %14808 = vmatprep.subr.bf16.mxu1 %v16205_v2  ;;  %v16244_v2 = vld [vmem:[%s18290_s28 + $0x758] sm:$0xff]  }
0x167d   : > { %10728 = vmatprep.mubr.bf16.mxu1 %v14222_v3  ;;  %v16245_v3 = vld [vmem:[%s18290_s28 + $0x7e0] sm:$0xff]  }
0x167f   : > { %14789 = vmatpush3.bf16.msra.mxu0 %v16206_v4  ;;  %14809 = vmatpush3.bf16.msra.mxu1 %v16207_v10  ;;  %v16246_v4 = vld [vmem:[%s18290_s28 + $0x718] sm:$0xff]   ;;  %v16247_v10 = vld [vmem:[%s18290_s28 + $0x7a0] sm:$0xff]  }
0x1680   : > { %14790 = vmatprep.subr.bf16.mxu0 %v16208_v19  ;;  %14810 = vmatprep.subr.bf16.mxu1 %v16209_v49  ;;  %v16248_v19 = vld [vmem:[%s18290_s28 + $0x750] sm:$0xff]   ;;  %v16249_v49 = vld [vmem:[%s18290_s28 + $0x7d8] sm:$0xff]  }
0x1683   : > { %14791 = vmatpush3.bf16.msra.mxu0 %v16210_v62  ;;  %14811 = vmatpush3.bf16.msra.mxu1 %v16211_v30  ;;  %v16250_v62 = vld [vmem:[%s18290_s28 + $0x710] sm:$0xff]   ;;  %v16251_v30 = vld [vmem:[%s18290_s28 + $0x798] sm:$0xff]  }
0x1684   : > { %14792 = vmatprep.subr.bf16.mxu0 %v16212_v22  ;;  %14812 = vmatprep.subr.bf16.mxu1 %v16213_v56  ;;  %v16252_v22 = vld [vmem:[%s18290_s28 + $0x748] sm:$0xff]   ;;  %v16253_v56 = vld [vmem:[%s18290_s28 + $0x7d0] sm:$0xff]  }
0x1687   : > { %14793 = vmatpush3.bf16.msra.mxu0 %v16214_v40  ;;  %14813 = vmatpush3.bf16.msra.mxu1 %v16215_v6  ;;  %v16254_v40 = vld [vmem:[%s18290_s28 + $0x708] sm:$0xff]   ;;  %v16255_v6 = vld [vmem:[%s18290_s28 + $0x790] sm:$0xff]  }
0x1688   : > { %14794 = vmatprep.subr.bf16.mxu0 %v16216_v7  ;;  %14814 = vmatprep.subr.bf16.mxu1 %v16217_v26  ;;  %v16256_v7 = vld [vmem:[%s18290_s28 + $0x740] sm:$0xff]   ;;  %v16257_v26 = vld [vmem:[%s18290_s28 + $0x7c8] sm:$0xff]  }
0x168b   : > { %14795 = vmatpush3.bf16.msra.mxu0 %v16218_v60  ;;  %14815 = vmatpush3.bf16.msra.mxu1 %v16219_v34  ;;  %v16258_v60 = vld [vmem:[%s18290_s28 + $0x700] sm:$0xff]   ;;  %v16259_v34 = vld [vmem:[%s18290_s28 + $0x788] sm:$0xff]  }
0x168c   : > { %14796 = vmatprep.subr.bf16.mxu0 %v16220_v23  ;;  %14816 = vmatprep.subr.bf16.mxu1 %v16221_v14  ;;  %v16260_v23 = vld [vmem:[%s18290_s28 + $0x7c0] sm:$0xff]  }
0x168d   : > { %v16261_v14 = vld [vmem:[%s18290_s28 + $0x780] sm:$0xff]  }
0x168f   : > { %14797 = vmatpush3.bf16.msra.mxu0 %v16222_v16  ;;  %14817 = vmatpush3.bf16.msra.mxu1 %v16223_v28  ;;  %v14223_v16 = vpack.c.bf16 %v17796_v63, %v17796_v63 }
0x1690   : > { %14798 = vmatprep.subr.bf16.mxu0 %v16224_v33  ;;  %14818 = vmatprep.subr.bf16.mxu1 %v16225_v29  ;;  %v14225_v33 = vpack.c.bf16 %v17806_v32, %v17806_v32 }
0x1693   : > { %14799 = vmatpush3.bf16.msra.mxu0 %v16226_v15  ;;  %14819 = vmatpush3.bf16.msra.mxu1 %v16227_v45 }
0x1694   : > { %14820 = vmatprep.subr.bf16.mxu1 %v16228_v21  ;;  %14828 = vmatprep.subr.bf16.mxu0 %v16229_v31 }
0x1696   : > { %10689 = vmatmul.mubr.bf16.vlgmr.msra.gmra.mxu0 %v14219_v53  ;;  %v14536_v39 = vpop.f32.mrf.mxu0 }
0x1697   : > { %14821 = vmatpush3.bf16.msra.mxu1 %v16230_v27  ;;  %14829 = vmatpush3.bf16.msra.mxu0 %v16231_v18 }
0x1698   : > { %10768 = vmatprep.mubr.bf16.mxu0 %v14224_v36  ;;  %v14537_v51 = vpop.f32.mrf.mxu0  ;;  %14830 = vmatprep.subr.bf16.mxu0 %v16232_v35 }
0x1699   : > { %v14538_v24 = vadd.f32 %v14537_v51, %v14536_v39  ;;  %14850 = vmatprep.subr.bf16.mxu1 %v16233_v42 }
0x169a   : > { %10729 = vmatmul.mubr.bf16.vlgmr.msra.gmra.mxu1 %v14221_v46  ;;  %v14539_v50 = vpop.f32.mrf.mxu0  ;;  %v14558_v55 = vpop.f32.mrf.mxu1 }
0x169b   : > { %14831 = vmatpush3.bf16.msra.mxu0 %v16234_v43  ;;  %14851 = vmatpush3.bf16.msra.mxu1 %v16235_v44 }
0x169c   : > { %10808 = vmatprep.mubr.bf16.mxu1 %v14226_v48  ;;  %v14540_v57 = vpop.f32.mrf.mxu0  ;;  %v14559_v61 = vpop.f32.mrf.mxu1  ;;  %14832 = vmatprep.subr.bf16.mxu0 %v16236_v47  ;;  %v16262_v48 = vld [vmem:[%s18292_s1 + $0x18] sm:$0xff]  }
0x169d   : > { %v14560_v12 = vadd.f32 %v14559_v61, %v14558_v55  ;;  %14852 = vmatprep.subr.bf16.mxu1 %v16237_v25 }
0x169e   : > { %v14561_v38 = vpop.f32.mrf.mxu1 }
0x169f   : > { %v10251_v0 = vadd.f32 %v14560_v12, %v14538_v24  ;;  %14833 = vmatpush3.bf16.msra.mxu0 %v16238_v58  ;;  %14853 = vmatpush3.bf16.msra.mxu1 %v16239_v59  ;;  %v16263_v59 = vld [vmem:[%s18292_s1 + $0x10] sm:$0xff]  }
0x16a0   : > { %v14562_v54 = vpop.f32.mrf.mxu1  ;;  %14834 = vmatprep.subr.bf16.mxu0 %v16240_v9  ;;  %14854 = vmatprep.subr.bf16.mxu1 %v16241_v11 }
0x16a3   : > { %14835 = vmatpush3.bf16.msra.mxu0 %v16242_v20  ;;  %14855 = vmatpush3.bf16.msra.mxu1 %v16243_v1 }
0x16a4   : > { %14836 = vmatprep.subr.bf16.mxu0 %v16244_v2  ;;  %14856 = vmatprep.subr.bf16.mxu1 %v16245_v3  ;;  %v16265_v2 = vld [vmem:[%s18292_s1] sm:$0xff]  }
0x16a7   : > { %14837 = vmatpush3.bf16.msra.mxu0 %v16246_v4  ;;  %14857 = vmatpush3.bf16.msra.mxu1 %v16247_v10 }
0x16a8   : > { %14838 = vmatprep.subr.bf16.mxu0 %v16248_v19  ;;  %14858 = vmatprep.subr.bf16.mxu1 %v16249_v49 }
0x16ab   : > { %14839 = vmatpush3.bf16.msra.mxu0 %v16250_v62  ;;  %14859 = vmatpush3.bf16.msra.mxu1 %v16251_v30 }
0x16ac   : > { %14840 = vmatprep.subr.bf16.mxu0 %v16252_v22  ;;  %14860 = vmatprep.subr.bf16.mxu1 %v16253_v56 }
0x16af   : > { %14841 = vmatpush3.bf16.msra.mxu0 %v16254_v40  ;;  %14861 = vmatpush3.bf16.msra.mxu1 %v16255_v6 }
0x16b0   : > { %14842 = vmatprep.subr.bf16.mxu0 %v16256_v7  ;;  %14862 = vmatprep.subr.bf16.mxu1 %v16257_v26 }
0x16b3   : > { %14843 = vmatpush3.bf16.msra.mxu0 %v16258_v60  ;;  %14863 = vmatpush3.bf16.msra.mxu1 %v16259_v34 }
0x16b4   : > { %14864 = vmatprep.subr.bf16.mxu1 %v16260_v23  ;;  %15172 = vmatprep.subr.bf16.mxu0 %v16457_v8 }
0x16b6   : > { %v14580_v28 = vpop.f32.mrf.mxu0  ;;  %10769 = vmatmul.mubr.bf16.vlgmr.msra.gmra.mxu0 %v14223_v16 }
0x16b7   : > { %14865 = vmatpush3.bf16.msra.mxu1 %v16261_v14  ;;  %15180 = vmatprep.mubr.msk.bf16.mxu0 %vm16459_vm4, %v16457_v8 }
0x16b8   : > { %v14581_v29 = vpop.f32.mrf.mxu0  ;;  %15173 = vmatpush3.bf16.msra.mxu0 %v16262_v48 }
0x16b9   : > { %v14582_v13 = vadd.f32 %v14581_v29, %v14580_v28  ;;  %15174 = vmatprep.subr.bf16.mxu0 %v16457_v8 }
0x16ba   : > { %v14583_v15 = vpop.f32.mrf.mxu0  ;;  %v14602_v45 = vpop.f32.mrf.mxu1  ;;  %10809 = vmatmul.mubr.bf16.vlgmr.msra.gmra.mxu1 %v14225_v33 }
0x16bb   : > { %v10291_v21 = vadd.f32 %v14582_v13, %v10251_v0  ;;  %v16264_v0 = vld [vmem:[%s18292_s1 + $0x8] sm:$0xff]   ;;  %s18293_s1 = sld [smem:[#allocation26_spill]] }
0x16bc   : > { %v14584_v31 = vpop.f32.mrf.mxu0  ;;  %v14603_v63 = vpop.f32.mrf.mxu1  ;;  %15175 = vmatpush3.bf16.msra.mxu0 %v16263_v59 }
0x16bd   : > { %v14604_v27 = vadd.f32 %v14603_v63, %v14602_v45  ;;  %15176 = vmatprep.subr.bf16.mxu0 %v16457_v8 }
0x16be   : > { %v14605_v18 = vpop.f32.mrf.mxu1 }
0x16bf   : > { %v10331_v53 = vadd.f32 %v14604_v27, %v10291_v21 }
0x16c0   : > { %v14606_v36 = vpop.f32.mrf.mxu1  ;;  %15177 = vmatpush3.bf16.msra.mxu0 %v16264_v0 }
0x16c1   : > { %15178 = vmatprep.subr.bf16.mxu0 %v16457_v8 }
0x16c4   : > { %15179 = vmatpush3.bf16.msra.mxu0 %v16265_v2 }
0x16d6   : > { %v14624_v35 = vpop.f32.mrf.mxu0 }
0x16d8   : > { %v14625_v42 = vpop.f32.mrf.mxu0 }
0x16d9   : > { %v14626_v39 = vadd.f32 %v14625_v42, %v14624_v35 }
0x16da   : > { %v14627_v41 = vpop.f32.mrf.mxu0  ;;  %v14646_v43 = vpop.f32.mrf.mxu1 }
0x16db   : > { %v10371_v32 = vadd.f32 %v14626_v39, %v10331_v53 }
0x16dc   : > { %v14628_v44 = vpop.f32.mrf.mxu0  ;;  %v14647_v46 = vpop.f32.mrf.mxu1 }
0x16dd   : > { %v14648_v51 = vadd.f32 %v14647_v46, %v14646_v43 }
0x16de   : > { %v14649_v47 = vpop.f32.mrf.mxu1 }
0x16df   : > { %v10411_v24 = vadd.f32 %v14648_v51, %v10371_v32 }
0x16e0   : > { %v14650_v25 = vpop.f32.mrf.mxu1 }
0x16f6   : > { %v14668_v50 = vpop.f32.mrf.mxu0 }
0x16f8   : > { %v14669_v55 = vpop.f32.mrf.mxu0 }
0x16f9   : > { %v14670_v58 = vadd.f32 %v14669_v55, %v14668_v50  ;;  %v13834_v55 = vld [vmem:[%s18293_s1] ss:$0 sm:$0xff]  ;;  %s18297_s1 = sld [smem:[#allocation36_spill]] }
0x16fa   : > { %v14671_v57 = vpop.f32.mrf.mxu0  ;;  %v14690_v61 = vpop.f32.mrf.mxu1 }
0x16fb   : > { %v10451_v9 = vadd.f32 %v14670_v58, %v10411_v24 }
0x16fc   : > { %v14672_v11 = vpop.f32.mrf.mxu0  ;;  %v14691_v12 = vpop.f32.mrf.mxu1 }
0x16fd   : > { %v14692_v38 = vadd.f32 %v14691_v12, %v14690_v61  ;;  %v13835_v11 = vld [vmem:[%s18294_s3] ss:$0 sm:$0xff]  ;;  %s18296_s3 = sld [smem:[#allocation34_spill]] }
0x16fe   : > { %v14693_v20 = vpop.f32.mrf.mxu1 }
0x16ff   : > { %v10491_v1 = vadd.f32 %v14692_v38, %v10451_v9  ;;  %v11425_v52 = vld [vmem:[%s18297_s1 + $0x8] sm:$0xff] }
0x1700   : > { %v14694_v54 = vpop.f32.mrf.mxu1 }
0x1716   : > { %v14712_v3 = vpop.f32.mrf.mxu0 }
0x1718   : > { %v14713_v4 = vpop.f32.mrf.mxu0 }
0x1719   : > { %v14714_v10 = vadd.f32 %v14713_v4, %v14712_v3 }
0x171a   : > { %v14715_v19 = vpop.f32.mrf.mxu0  ;;  %v14734_v49 = vpop.f32.mrf.mxu1 }
0x171b   : > { %v10531_v62 = vadd.f32 %v14714_v10, %v10491_v1 }
0x171c   : > { %v14716_v30 = vpop.f32.mrf.mxu0  ;;  %v14735_v22 = vpop.f32.mrf.mxu1 }
0x171d   : > { %v14736_v56 = vadd.f32 %v14735_v22, %v14734_v49 }
0x171e   : > { %v14737_v40 = vpop.f32.mrf.mxu1 }
0x171f   : > { %v10571_v6 = vadd.f32 %v14736_v56, %v10531_v62 }
0x1720   : > { %v14738_v7 = vpop.f32.mrf.mxu1 }
0x1721   : > { %v10935_v7 = vld [vmem:[%s18295_s5] sm:$0xff] }
0x1736   : > { %v14756_v26 = vpop.f32.mrf.mxu0 }
0x1738   : > { %v14757_v60 = vpop.f32.mrf.mxu0 }
0x1739   : > { %v14758_v18 = vadd.f32 %v14757_v60, %v14756_v26 }
0x173a   : > { %v14759_v34 = vpop.f32.mrf.mxu0  ;;  %v14778_v23 = vpop.f32.mrf.mxu1 }
0x173b   : > { %v10611_v36 = vadd.f32 %v14758_v18, %v10571_v6 }
0x173c   : > { %v14760_v14 = vpop.f32.mrf.mxu0  ;;  %v14779_v16 = vpop.f32.mrf.mxu1 }
0x173d   : > { %v14780_v53 = vadd.f32 %v14779_v16, %v14778_v23 }
0x173e   : > { %v14781_v28 = vpop.f32.mrf.mxu1 }
0x173f   : > { %v10651_v39 = vadd.f32 %v14780_v53, %v10611_v36 }
0x1740   : > { %v14782_v33 = vpop.f32.mrf.mxu1 }
0x1756   : > { %v14800_v29 = vpop.f32.mrf.mxu0 }
0x1758   : > { %v14801_v13 = vpop.f32.mrf.mxu0 }
0x1759   : > { %v14802_v35 = vadd.f32 %v14801_v13, %v14800_v29 }
0x175a   : > { %v14803_v15 = vpop.f32.mrf.mxu0  ;;  %v14822_v45 = vpop.f32.mrf.mxu1 }
0x175b   : > { %v10691_v32 = vadd.f32 %v14802_v35, %v10651_v39 }
0x175c   : > { %v14804_v21 = vpop.f32.mrf.mxu0  ;;  %v14823_v31 = vpop.f32.mrf.mxu1 }
0x175d   : > { %v14824_v41 = vadd.f32 %v14823_v31, %v14822_v45  ;;  %v10936_v21 = vld [vmem:[%s18295_s5 + $0x8] sm:$0xff]  ;;  %s18300_s5 = sld [smem:[#allocation37_spill]] }
0x175e   : > { %v14825_v63 = vpop.f32.mrf.mxu1 }
0x175f   : > { %v10731_v47 = vadd.f32 %v14824_v41, %v10691_v32 }
0x1760   : > { %v14826_v27 = vpop.f32.mrf.mxu1 }
0x1776   : > { %v14844_v42 = vpop.f32.mrf.mxu0 }
0x1778   : > { %v14845_v43 = vpop.f32.mrf.mxu0 }
0x1779   : > { %v14846_v44 = vadd.f32 %v14845_v43, %v14844_v42 }
0x177a   : > { %v14847_v46 = vpop.f32.mrf.mxu0  ;;  %v14866_v51 = vpop.f32.mrf.mxu1 }
0x177b   : > { %v10771_v48 = vadd.f32 %v14846_v44, %v10731_v47 }
0x177c   : > { %v14848_v24 = vpop.f32.mrf.mxu0  ;;  %v14867_v25 = vpop.f32.mrf.mxu1 }
0x177d   : > { %v14868_v50 = vadd.f32 %v14867_v25, %v14866_v51 }
0x177e   : > { %v14869_v58 = vpop.f32.mrf.mxu1 }
0x177f   : > { %v10811_v59 = vadd.f32 %v14868_v50, %v10771_v48 }
0x1780   : > { %v14870_v57 = vpop.f32.mrf.mxu1 }
0x1781   : > { %v10823_v61 = vadd.f32 %v13834_v55, %v10811_v59 }
0x1783   : > { %v10824_v9 = vpack.c.bf16 %v10823_v61, %v10823_v61 }
0x1785   : > { %15181 = vmatmul.mubr.msk.bf16.vlgmr.msra.gmra.mxu0 %vm1658_vm2, %v10824_v9 }
0x1786   : > { %15186 = vmatprep.mubr.msk.f32.mxu0 %vm10937_vm11, %v10935_v7  ;;  %v11318_v7 = vld [vmem:[%s18296_s3 + $0x78] sm:$0xff] }
0x1845   : > { %v10901_v12 = vpop.f32.mrf.mxu0 }
0x1846   : > { %v10902_v38 = vadd.f32 %v13835_v11, %v10901_v12 }
0x1847   : > { %v15182_v0 = vpop.f32.mrf.mxu0 }
0x1848   : > { %v10908_v20 = vsel %vm10907_vm10, %v10902_v38, 0.0 }
0x1849   : > { %10909 = vadd.xlane.f32.xlu1 %v10908_v20  ;;  %v10904_v1 = vpop.f32.mrf.mxu0 }
0x184b   : > { %v15183_v54 = vpop.f32.mrf.mxu0 }
0x18d2   : > { %v10910_v2 = vpop.xlane.xlu1 %10909 }
0x18d3   : > { %v10911_v3 = vsel %vm7765_vm6, %v10910_v2, 0.0 }
0x18d4   : > { %v10912_v4 = vrot.slane %v10911_v3, 4 }
0x18d6   : > { %v10913_v10 = vadd.f32 %v10912_v4, %v10911_v3 }
0x18d8   : > { %v10914_v19 = vrot.slane %v10913_v10, 2 }
0x18da   : > { %v10915_v49 = vadd.f32 %v10914_v19, %v10913_v10  ;;  %v11176_v10 = vld [vmem:[%s16593_s27 + $0x18] sm:$0xff]  ;;  %v11175_v19 = vld [vmem:[%s16593_s27 + $0x10] sm:$0xff] }
0x18dc   : > { %v10916_v62 = vrot.slane %v10915_v49, 1 }
0x18de   : > { %v10917_v30 = vadd.f32 %v10916_v62, %v10915_v49  ;;  %v11174_v49 = vld [vmem:[%s16593_s27 + $0x8] sm:$0xff]  ;;  %v11173_v62 = vld [vmem:[%s16593_s27] sm:$0xff] }
0x18e0   : > { %v10918_v22 = vmul.f32 0.015625, %v10917_v30 }
0x18e2   : > { %v10919_v56 = vsub.f32 %v10902_v38, %v10918_v22 }
0x18e4   : > { %v10920_v40 = vmul.f32 %v10919_v56, %v10919_v56 }
0x18e6   : > { %v10921_v6 = vsel %vm10907_vm10, %v10920_v40, 0.0 }
0x18e7   : > { %10922 = vadd.xlane.f32.xlu1 %v10921_v6  ;;  %v11334_v6 = vld [vmem:[%s18296_s3 + $0xf8] sm:$0xff] }
0x18e8   : > { %14884 = vmatprep.subr.mxu1 %v11334_v6 }
0x18e9   : > { %14885 = vmatpush3.msra.mxu1 %v11318_v7 }
0x1970   : > { %v10923_v26 = vpop.xlane.xlu1 %10922 }
0x1971   : > { %v10924_v60 = vsel %vm7765_vm6, %v10923_v26, 0.0  ;;  %v11333_v26 = vld [vmem:[%s18296_s3 + $0xf0] sm:$0xff] }
0x1972   : > { %v10925_v34 = vrot.slane %v10924_v60, 4  ;;  %14886 = vmatprep.subr.mxu1 %v11333_v26 }
0x1974   : > { %v10926_v23 = vadd.f32 %v10925_v34, %v10924_v60  ;;  %v11317_v60 = vld [vmem:[%s18296_s3 + $0x70] sm:$0xff]  ;;  %v11332_v34 = vld [vmem:[%s18296_s3 + $0xe8] sm:$0xff] }
0x1975   : > { %14887 = vmatpush3.msra.mxu1 %v11317_v60 }
0x1976   : > { %v10927_v14 = vrot.slane %v10926_v23, 2  ;;  %14888 = vmatprep.subr.mxu1 %v11332_v34 }
0x1978   : > { %v10928_v16 = vadd.f32 %v10927_v14, %v10926_v23  ;;  %v11316_v23 = vld [vmem:[%s18296_s3 + $0x68] sm:$0xff]  ;;  %v11331_v14 = vld [vmem:[%s18296_s3 + $0xe0] sm:$0xff] }
0x1979   : > { %14889 = vmatpush3.msra.mxu1 %v11316_v23 }
0x197a   : > { %v10929_v28 = vrot.slane %v10928_v16, 1  ;;  %14890 = vmatprep.subr.mxu1 %v11331_v14 }
0x197c   : > { %v10930_v33 = vadd.f32 %v10929_v28, %v10928_v16  ;;  %v11315_v16 = vld [vmem:[%s18296_s3 + $0x60] sm:$0xff]  ;;  %v11330_v28 = vld [vmem:[%s18296_s3 + $0xd8] sm:$0xff] }
0x197d   : > { %14891 = vmatpush3.msra.mxu1 %v11315_v16 }
0x197e   : > { %v10931_v29 = vmul.f32 0.015625, %v10930_v33  ;;  %14892 = vmatprep.subr.mxu1 %v11330_v28  ;;  %v11314_v33 = vld [vmem:[%s18296_s3 + $0x58] sm:$0xff] }
0x197f   : > { %14893 = vmatpush3.msra.mxu1 %v11314_v33 }
0x1980   : > { %v10932_v13 = vadd.f32 1e-05, %v10931_v29  ;;  %v11329_v29 = vld [vmem:[%s18296_s3 + $0xd0] sm:$0xff] }
0x1981   : > { %14894 = vmatprep.subr.mxu1 %v11329_v29 }
0x1982   : > { %16287 = vrsqrt.f32 %v10932_v13  ;;  %v11313_v13 = vld [vmem:[%s18296_s3 + $0x50] sm:$0xff] }
0x1983   : > { %14895 = vmatpush3.msra.mxu1 %v11313_v13 }
0x198f   : > { %v16288_v15 = vpop.eup %16287 }
0x1990   : > { %v10934_v45 = vmul.f32 %v16288_v15, %v10919_v56  ;;  %v11328_v15 = vld [vmem:[%s18296_s3 + $0xc8] sm:$0xff] }
0x1991   : > { %14896 = vmatprep.subr.mxu1 %v11328_v15 }
0x1992   : > { %15184 = vmatprep.subr.msk.mxu0 %vm7765_vm6, %v10934_v45 }
0x1993   : > { %15185 = vmatpush3.msk.msra.mxu0 %vm7765_vm6, %v10934_v45  ;;  %v11312_v45 = vld [vmem:[%s18296_s3 + $0x48] sm:$0xff] }
0x1994   : > { %15187 = vmatmul.mubr.msk.f32.vlgmr.msra.gmra.mxu0 %vm10937_vm11, %v10936_v21  ;;  %14897 = vmatpush3.msra.mxu1 %v11312_v45  ;;  %v11327_v21 = vld [vmem:[%s18296_s3 + $0xc0] sm:$0xff]  ;;  %v11430_v45 = vld [vmem:[%s18297_s1 + $0x30] sm:$0xff] }
0x1995   : > { %14898 = vmatprep.subr.mxu1 %v11327_v21  ;;  %v11429_v21 = vld [vmem:[%s18297_s1 + $0x28] sm:$0xff] }
0x1a54   : > { %v15188_v31 = vpop.f32.mrf.mxu0 }
0x1a55   : > { %v11025_v18 = vsel %vm1552_vm1, %v15188_v31, 0.0 }
0x1a56   : > { %v11013_v63 = vpop.f32.mrf.mxu0 }
0x1a57   : > { %v11022_v27 = vsel %vm1552_vm1, %v11013_v63, 0.0 }
0x1a58   : > { %11023 = vadd.xlane.f32.xlu1 %v11022_v27  ;;  %v11310_v27 = vld [vmem:[%s18296_s3 + $0x38] sm:$0xff] }
0x1a5c   : > { %11026 = vadd.xlane.f32.xlu1 %v11025_v18  ;;  %v11325_v18 = vld [vmem:[%s18296_s3 + $0xb0] sm:$0xff] }
0x1ae1   : > { %v11024_v53 = vpop.xlane.xlu1 %11023 }
0x1ae5   : > { %v11027_v36 = vpop.xlane.xlu1 %11026 }
0x1ae6   : > { %v11028_v35 = vadd.f32 %v11027_v36, %v11024_v53  ;;  %v11309_v53 = vld [vmem:[%s18296_s3 + $0x30] sm:$0xff]  ;;  %v11324_v36 = vld [vmem:[%s18296_s3 + $0xa8] sm:$0xff] }
0x1ae8   : > { %v11029_v42 = vrot.slane %v11028_v35, 4 }
0x1aea   : > { %v11030_v39 = vadd.f32 %v11029_v42, %v11028_v35  ;;  %v11308_v35 = vld [vmem:[%s18296_s3 + $0x28] sm:$0xff]  ;;  %v11323_v42 = vld [vmem:[%s18296_s3 + $0xa0] sm:$0xff] }
0x1aec   : > { %v11031_v41 = vrot.slane %v11030_v39, 2 }
0x1aee   : > { %v11032_v43 = vadd.f32 %v11031_v41, %v11030_v39  ;;  %v11307_v39 = vld [vmem:[%s18296_s3 + $0x20] sm:$0xff]  ;;  %v11322_v41 = vld [vmem:[%s18296_s3 + $0x98] sm:$0xff] }
0x1af0   : > { %v11033_v32 = vrot.slane %v11032_v43, 1 }
0x1af2   : > { %v11034_v44 = vadd.f32 %v11033_v32, %v11032_v43  ;;  %v11306_v43 = vld [vmem:[%s18296_s3 + $0x18] sm:$0xff]  ;;  %v11321_v32 = vld [vmem:[%s18296_s3 + $0x90] sm:$0xff] }
0x1af4   : > { %v11035_v46 = vmul.f32 0.00390625, %v11034_v44  ;;  %v11305_v44 = vld [vmem:[%s18296_s3 + $0x10] sm:$0xff] }
0x1af6   : > { %v11036_v51 = vsub.f32 %v11013_v63, %v11035_v46  ;;  %v11037_v47 = vsub.f32 %v15188_v31, %v11035_v46  ;;  %v11311_v31 = vld [vmem:[%s18296_s3 + $0x40] sm:$0xff]  ;;  %v11326_v63 = vld [vmem:[%s18296_s3 + $0xb8] sm:$0xff]  ;;  %v11320_v46 = vld [vmem:[%s18296_s3 + $0x88] sm:$0xff] }
0x1af7   : > { %14899 = vmatpush3.msra.mxu1 %v11311_v31  ;;  %v11428_v31 = vld [vmem:[%s18297_s1 + $0x20] sm:$0xff] }
0x1af8   : > { %v11038_v24 = vmul.f32 %v11036_v51, %v11036_v51  ;;  %v11039_v48 = vmul.f32 %v11037_v47, %v11037_v47  ;;  %14900 = vmatprep.subr.mxu1 %v11326_v63  ;;  %v11427_v63 = vld [vmem:[%s18297_s1 + $0x18] sm:$0xff] }
0x1af9   : > { %14901 = vmatpush3.msra.mxu1 %v11310_v27  ;;  %v11424_v27 = vld [vmem:[%s18297_s1] sm:$0xff] }
0x1afa   : > { %v11040_v25 = vsel %vm1552_vm1, %v11038_v24, 0.0  ;;  %v11043_v50 = vsel %vm1552_vm1, %v11039_v48, 0.0  ;;  %14902 = vmatprep.subr.mxu1 %v11325_v18  ;;  %v11303_v24 = vld [vmem:[%s18296_s3] sm:$0xff]  ;;  %v11438_v48 = vld [vmem:[%s18297_s1 + $0x70] sm:$0xff] }
0x1afb   : > { %11041 = vadd.xlane.f32.xlu1 %v11040_v25  ;;  %14903 = vmatpush3.msra.mxu1 %v11309_v53  ;;  %v11439_v25 = vld [vmem:[%s18297_s1 + $0x78] sm:$0xff] }
0x1afc   : > { %14904 = vmatprep.subr.mxu1 %v11324_v36 }
0x1afd   : > { %14905 = vmatpush3.msra.mxu1 %v11308_v35 }
0x1afe   : > { %14906 = vmatprep.subr.mxu1 %v11323_v42 }
0x1aff   : > { %11044 = vadd.xlane.f32.xlu1 %v11043_v50  ;;  %14907 = vmatpush3.msra.mxu1 %v11307_v39  ;;  %v11437_v50 = vld [vmem:[%s18297_s1 + $0x68] sm:$0xff] }
0x1b00   : > { %14908 = vmatprep.subr.mxu1 %v11322_v41  ;;  %v11440_v41 = vld [vmem:[%s18300_s5] sm:$0x3]  ;;  %s18302_s5 = sld [smem:[#allocation38_spill]] }
0x1b01   : > { %14909 = vmatpush3.msra.mxu1 %v11306_v43  ;;  %v11445_v43 = vrot.slane %v11440_v41, %v17459_v5 }
0x1b02   : > { %14910 = vmatprep.subr.mxu1 %v11321_v32  ;;  %v11449_v32 = vrot.slane %v11440_v41, %v17463_v37 }
0x1b03   : > { %14911 = vmatpush3.msra.mxu1 %v11305_v44 }
0x1b04   : > { %14912 = vmatprep.subr.mxu1 %v11320_v46 }
0x1b84   : > { %v11042_v55 = vpop.xlane.xlu1 %11041 }
0x1b88   : > { %v11045_v58 = vpop.xlane.xlu1 %11044 }
0x1b89   : > { %v11046_v59 = vadd.f32 %v11045_v58, %v11042_v55  ;;  %v11436_v55 = vld [vmem:[%s18297_s1 + $0x60] sm:$0xff]  ;;  %v11435_v58 = vld [vmem:[%s18297_s1 + $0x58] sm:$0xff] }
0x1b8b   : > { %v11047_v57 = vrot.slane %v11046_v59, 4 }
0x1b8d   : > { %v11048_v61 = vadd.f32 %v11047_v57, %v11046_v59  ;;  %v11434_v59 = vld [vmem:[%s18297_s1 + $0x50] sm:$0xff]  ;;  %v11433_v57 = vld [vmem:[%s18297_s1 + $0x48] sm:$0xff] }
0x1b8f   : > { %v11049_v9 = vrot.slane %v11048_v61, 2 }
0x1b91   : > { %v11050_v11 = vadd.f32 %v11049_v9, %v11048_v61  ;;  %v11432_v61 = vld [vmem:[%s18297_s1 + $0x40] sm:$0xff]  ;;  %v11431_v9 = vld [vmem:[%s18297_s1 + $0x38] sm:$0xff] }
0x1b93   : > { %v11051_v12 = vrot.slane %v11050_v11, 1 }
0x1b95   : > { %v11052_v38 = vadd.f32 %v11051_v12, %v11050_v11  ;;  %v11260_v12 = vld [vmem:[%s18274_s4] sm:$0xff] }
0x1b97   : > { %v11053_v0 = vmul.f32 0.00390625, %v11052_v38 }
0x1b99   : > { %v11054_v20 = vadd.f32 1e-05, %v11053_v0  ;;  %v11262_v0 = vld [vmem:[%s18274_s4 + $0x10] sm:$0xff] }
0x1b9b   : > { %16289 = vrsqrt.f32 %v11054_v20  ;;  %v11261_v20 = vld [vmem:[%s18274_s4 + $0x8] sm:$0xff] }
0x1ba8   : > { %v16290_v1 = vpop.eup %16289 }
0x1ba9   : > { %v11057_v54 = vmul.f32 %v16290_v1, %v11037_v47  ;;  %v11056_v2 = vmul.f32 %v16290_v1, %v11036_v51  ;;  %v11304_v51 = vld [vmem:[%s18296_s3 + $0x8] sm:$0xff]  ;;  %v11319_v47 = vld [vmem:[%s18296_s3 + $0x80] sm:$0xff]  ;;  %s18298_s3 = sld [smem:[#allocation35_spill]] }
0x1baa   : > { %14913 = vmatpush3.msra.mxu1 %v11304_v51 }
0x1bab   : > { %15189 = vmatprep.subr.mxu0 %v11057_v54  ;;  %11058 = vxpose.xlu1.b32.start [1/2] (short) (narrow) %v11056_v2, 16 }
0x1bac   : > { %15190 = vmatpush3.msra.mxu0 %v11057_v54  ;;  %14914 = vmatprep.subr.mxu1 %v11319_v47 }
0x1bad   : > { %15191 = vmatprep.subr.mxu0 %v11056_v2  ;;  %14915 = vmatpush3.msra.mxu1 %v11303_v24 }
0x1bae   : > { %15192 = vmatpush3.msra.mxu0 %v11056_v2 }
0x1baf   : > { %11059 = vxpose.xlu1.b32.end [2/2] (short) (narrow) %v11057_v54, 16  ;;  %11211 = vmatprep.subr.mxu0 %v11176_v10  ;;  %v11263_v54 = vld [vmem:[%s18274_s4 + $0x18] sm:$0xff]  ;;  %s18299_s4 = sld [smem:[#allocation32_spill]]  ;;  %v13848_v53 = vld [vmem:[%s18298_s3] ss:$0 sm:$0xff]  ;;  %s18227_s3 = smov 64  }
0x1bb5   : > { %v17945_v39 = vld [vmem:[%s18299_s4] sm:$0xff] }
0x1c27   : > { %v11074_v3 = vpop.trf.xlu1 }
0x1c28   : > { %15193 = vmatprep.mubr.msk.f32.mxu0 %vm1552_vm1, %v11074_v3 }
0x1c2b   : > { %v11075_v4 = vpop.trf.xlu1 }
0x1c2c   : > { %15194 = vmatmul.mubr.msk.f32.vlgmr.msra.gmra.mxu0 %vm1552_vm1, %v11075_v4 }
0x1c2d   : > { %11247 = vmatprep.mubr.f32.mxu0 %v16457_v8  ;;  %11212 = vmatpush1.msra.mxu0 %v11175_v19 }
0x1c2e   : > { %11213 = vmatprep.subr.mxu0 %v11174_v49 }
0x1c2f   : > { %11214 = vmatpush1.msra.mxu0 %v11173_v62 }
0x1c30   : > { %11471 = vmatprep.subr.mxu0 %v11439_v25  ;;  %v17954_v25 = vld [vmem:[%s18299_s4 + $0x8] sm:$0xff] }
0x1cec   : > { %v15195_v30 = vpop.f32.mrf.mxu0 }
0x1ced   : > { %v11172_v40 = vmul.f32 0.062499996, %v15195_v30 }
0x1cee   : > { %v11162_v22 = vpop.f32.mrf.mxu0 }
0x1cef   : > { %v11171_v56 = vmul.f32 0.062499996, %v11162_v22 }
0x1cf1   : > { %13846 = vmatmul.mubr.msk.f32.vlgmr.msra.gmra.mxu0 %vm1552_vm1, %v11171_v56 }
0x1cf2   : > { %11253 = vmatprep.mubr.f32.mxu0 %v16457_v8  ;;  %11472 = vmatpush1.msra.mxu0 %v11438_v48  ;;  %v17959_v48 = vld [vmem:[%s18299_s4 + $0x10] sm:$0xff] }
0x1cf3   : > { %11473 = vmatprep.subr.mxu0 %v11437_v50  ;;  %v17969_v50 = vld [vmem:[%s18299_s4 + $0x18] sm:$0xff]  ;;  %s18306_s4 = sld [smem:[#allocation41_spill]] }
0x1cf4   : > { %11474 = vmatpush1.msra.mxu0 %v11436_v55 }
0x1cf5   : > { %13847 = vmatmul.mubr.msk.f32.gmra.mxu0 %vm1552_vm1, %v11172_v40  ;;  %11475 = vmatprep.subr.mxu0 %v11435_v58 }
0x1cf6   : > { %11519 = vmatprep.mubr.f32.mxu0 %v16457_v8  ;;  %11476 = vmatpush1.msra.mxu0 %v11434_v59 }
0x1cf7   : > { %11477 = vmatprep.subr.mxu0 %v11433_v57 }
0x1cf8   : > { %11478 = vmatpush1.msra.mxu0 %v11432_v61 }
0x1cf9   : > { %11479 = vmatprep.subr.mxu0 %v11431_v9 }
0x1cfa   : > { %11480 = vmatpush1.msra.mxu0 %v11430_v45 }
0x1cfb   : > { %11481 = vmatprep.subr.mxu0 %v11429_v21 }
0x1cfc   : > { %11482 = vmatpush1.msra.mxu0 %v11428_v31 }
0x1cfd   : > { %11483 = vmatprep.subr.mxu0 %v11427_v63 }
0x1db1   : > { %v11249_v11 = vpop.f32.mrf.mxu0 }
0x1db2   : > { %v11264_v2 = vmul.f32 %v11260_v12, %v11249_v11 }
0x1db3   : > { %v11251_v38 = vpop.f32.mrf.mxu0 }
0x1db4   : > { %v11265_v10 = vmul.f32 %v11261_v20, %v11251_v38 }
0x1db5   : > { %v11255_v1 = vpop.f32.mrf.mxu0 }
0x1db6   : > { %v11266_v3 = vmul.f32 %v11262_v0, %v11255_v1 }
0x1db7   : > { %v11257_v4 = vpop.f32.mrf.mxu0 }
0x1db8   : > { %v11268_v19 = vadd.f32 %v11266_v3, %v11264_v2  ;;  %v11267_v49 = vmul.f32 %v11263_v54, %v11257_v4 }
0x1dba   : > { %v11269_v62 = vrot.slane %v11268_v19, 4  ;;  %v11275_v30 = vadd.f32 %v11267_v49, %v11265_v10 }
0x1dbc   : > { %v11270_v22 = vadd.f32 %v11269_v62, %v11268_v19  ;;  %v11276_v56 = vrot.slane %v11275_v30, 4 }
0x1dbe   : > { %v11271_v40 = vrot.slane %v11270_v22, 2  ;;  %v11277_v6 = vadd.f32 %v11276_v56, %v11275_v30 }
0x1dc0   : > { %v11272_v7 = vadd.f32 %v11271_v40, %v11270_v22  ;;  %v11278_v26 = vrot.slane %v11277_v6, 2 }
0x1dc2   : > { %v11273_v60 = vrot.slane %v11272_v7, 1  ;;  %v11279_v34 = vadd.f32 %v11278_v26, %v11277_v6 }
0x1dc4   : > { %v11280_v23 = vrot.slane %v11279_v34, 1  ;;  %v11274_v14 = vadd.f32 %v11273_v60, %v11272_v7 }
0x1dc6   : > { %v11281_v16 = vadd.f32 %v11280_v23, %v11279_v34 }
0x1dc8   : > { %v11284_v28 = vcombine.low %v11274_v14, %v11281_v16 }
0x1dca   : > { %v11291_v33 = vrot.slane %v11284_v28, %v17040_v17 }
0x1dcc   : > { %v11298_v29 = vrot.slane %v11291_v33, %v17040_v17  ;;  %v11426_v17 = vld [vmem:[%s18297_s1 + $0x10] sm:$0xff]  ;;  %s18301_s1 = sld [smem:[#allocation31_spill]] }
0x1dcd   : > { %11484 = vmatpush1.msra.mxu0 %v11426_v17 }
0x1dce   : > { %11301 = vst.msk [vmem:[#allocation3 + $0x3] ss:$4 sm:$0x3] %vm17046_vm3, %v11298_v29  ;;  %11485 = vmatprep.subr.mxu0 %v11425_v52 }
0x1dcf   : > { %11486 = vmatpush1.msra.mxu0 %v11424_v27 }
0x1dd2   : > { %v17977_v59 = vld [vmem:[%s18301_s1] sm:$0xff]  ;;  %v17980_v57 = vld [vmem:[%s18301_s1 + $0x8] sm:$0xff]  ;;  %v17985_v38 = vld [vmem:[%s18301_s1 + $0x10] sm:$0xff] }
0x1dd3   : > { %v17988_v0 = vld [vmem:[%s18301_s1 + $0x18] sm:$0xff]  ;;  %s18304_s1 = sld [smem:[#allocation40_spill]] }
0x1dd5   : > { %v11302_v13 = vld [vmem:[#allocation3] sm:$0xff] }
0x1dd6   : > { %v11343_v15 = vcombine.high %v11302_v13, %v11302_v13 }
0x1dd8   : > { %11409 = vmatprep.mubr.f32.mxu1 %v11343_v15 }
0x1dd9   : > { %11410 = vmatmul.mubr.f32.vlgmr.msra.gmra.mxu1 %v11302_v13 }
0x1e99   : > { %v14916_v18 = vpop.f32.mrf.mxu1 }
0x1e9b   : > { %v14917_v36 = vpop.f32.mrf.mxu1 }
0x1e9c   : > { %v14918_v35 = vadd.f32 %v14917_v36, %v14916_v18 }
0x1e9e   : > { %v11412_v42 = vadd.f32 %v14918_v35, %v13848_v53 }
0x1ea0   : > { %13849 = vmatmul.mubr.msk.f32.vlgmr.msra.gmra.mxu0 %vm1658_vm2, %v11412_v42 }
0x1ea1   : > { %15198 = vmatprep.mubr.msk.f32.mxu0 %vm10937_vm11, %v17945_v39 }
0x1f60   : > { %v11521_v44 = vpop.f32.mrf.mxu0 }
0x1f61   : > { %v11522_v46 = vadd.f32 %v11521_v44, %v11445_v43 }
0x1f62   : > { %v11523_v51 = vpop.f32.mrf.mxu0 }
0x1f63   : > { %v11526_v47 = vmul.f32 0.35355338, %v11522_v46  ;;  %v11524_v24 = vadd.f32 %v11523_v51, %v11449_v32  ;;  %11632 = vrot.lane.b32.xlu0 %v11522_v46, %s18227_s3  ;;  %v11962_v46 = vld [vmem:[%s18302_s5 + $0x38] sm:$0xff]  ;;  %v11961_v51 = vld [vmem:[%s18302_s5 + $0x30] sm:$0xff]  ;;  %s18303_s3 = sld [smem:[#allocation33_spill]] }
0x1f65   : > { %15196 = vmatprep.subr.msk.mxu0 %vm7765_vm6, %v11526_v47  ;;  %15212 = vmatprep.subr.msk.mxu1 %vm7765_vm6, %v11524_v24 }
0x1f66   : > { %15197 = vmatpush3.msk.msra.mxu0 %vm7765_vm6, %v11526_v47  ;;  %15213 = vmatpush3.msk.msra.mxu1 %vm7765_vm6, %v11524_v24  ;;  %v11960_v47 = vld [vmem:[%s18302_s5 + $0x28] sm:$0xff]  ;;  %v11959_v24 = vld [vmem:[%s18302_s5 + $0x20] sm:$0xff] }
0x1f67   : > { %15199 = vmatmul.mubr.msk.f32.vlgmr.msra.gmra.mxu0 %vm10937_vm11, %v17954_v25  ;;  %15231 = vmatprep.subr.mxu1 %v16457_v8 }
0x1f68   : > { %15201 = vmatprep.mubr.msk.f32.mxu0 %vm10937_vm11, %v17959_v48 }
0x1f6b   : > { %15202 = vmatmul.mubr.msk.f32.gmra.mxu0 %vm10937_vm11, %v17969_v50 }
0x1fd5   : > { %v11633_v55 = vpop.permute.xlu0 %11632 }
0x1fd6   : > { %15204 = vmatprep.subr.msk.mxu0 %vm1658_vm2, %v11633_v55 }
0x1fd7   : > { %15205 = vmatpush3.xpose.msk.msra.mxu0 %vm1658_vm2, %v11633_v55  ;;  %v11958_v55 = vld [vmem:[%s18302_s5 + $0x18] sm:$0xff] }
0x1fd8   : > { %15220 = vmatprep.subr.mxu0 %v16457_v8 }
0x2027   : > { %v15200_v58 = vpop.f32.mrf.mxu0 }
0x2028   : > { %v11628_v11 = vmul.f32 %v15200_v58, %v17980_v57  ;;  %v11957_v58 = vld [vmem:[%s18302_s5 + $0x10] sm:$0xff] }
0x2029   : > { %v11608_v61 = vpop.f32.mrf.mxu0 }
0x202a   : > { %v11627_v9 = vmul.f32 %v11608_v61, %v17977_v59  ;;  %v11956_v61 = vld [vmem:[%s18302_s5 + $0x8] sm:$0xff] }
0x202b   : > { %v15203_v12 = vpop.f32.mrf.mxu0 }
0x202c   : > { %15206 = vmatprep.mubr.msk.f32.mxu0 %vm1658_vm2, %v11627_v9  ;;  %v11630_v54 = vmul.f32 %v15203_v12, %v17988_v0 }
0x202d   : > { %v11618_v20 = vpop.f32.mrf.mxu0  ;;  %15207 = vmatmul.mubr.msk.f32.vlgmr.msra.gmra.mxu0 %vm1658_vm2, %v11628_v11 }
0x202e   : > { %v11629_v1 = vmul.f32 %v11618_v20, %v17985_v38 }
0x2030   : > { %15209 = vmatprep.mubr.msk.f32.mxu0 %vm1658_vm2, %v11629_v1 }
0x2031   : > { %15210 = vmatmul.mubr.msk.f32.gmra.mxu0 %vm1658_vm2, %v11630_v54 }
0x2032   : > { %15228 = vmatprep.mubr.msk.f32.mxu0 %vm16459_vm4, %v16457_v8 }
0x20ed   : > { %v15208_v2 = vpop.f32.mrf.mxu0 }
0x20ee   : > { %v11736_v3 = vsel %vm10937_vm11, %v15208_v2, -inf }
0x20ef   : > { %11737 = vmax.xlane.f32.xlu0 %v11736_v3  ;;  %v11714_v4 = vpop.f32.mrf.mxu0 }
0x20f0   : > { %v11733_v10 = vsel %vm10937_vm11, %v11714_v4, -inf }
0x20f1   : > { %11734 = vmax.xlane.f32.xlu1 %v11733_v10  ;;  %v15211_v19 = vpop.f32.mrf.mxu0  ;;  %v11955_v10 = vld [vmem:[%s18302_s5] sm:$0xff]  ;;  %s18307_s5 = smov 64  }
0x20f2   : > { %v11742_v30 = vsel %vm10937_vm11, %v15211_v19, -inf }
0x20f3   : > { %v11724_v49 = vpop.f32.mrf.mxu0 }
0x20f4   : > { %v11739_v62 = vsel %vm10937_vm11, %v11724_v49, -inf }
0x20f5   : > { %11740 = vmax.xlane.f32.xlu0 %v11739_v62  ;;  %v12056_v62 = vld [vmem:[%s18304_s1 + $0x68] sm:$0xff] }
0x20f9   : > { %11743 = vmax.xlane.f32.xlu0 %v11742_v30  ;;  %v12055_v30 = vld [vmem:[%s18304_s1 + $0x60] sm:$0xff] }
0x2178   : > { %v11738_v22 = vpop.xlane.xlu0 %11737 }
0x2179   : > { %v11746_v56 = vsub.f32 %v15208_v2, %v11738_v22  ;;  %v12054_v22 = vld [vmem:[%s18304_s1 + $0x58] sm:$0xff] }
0x217a   : > { %v11735_v40 = vpop.xlane.xlu1 %11734 }
0x217b   : > { %v11751_v6 = vmul.f32 1.442695, %v11746_v56  ;;  %v11745_v7 = vsub.f32 %v11714_v4, %v11735_v40  ;;  %v18033_v4 = vld [vmem:[%s18303_s3] sm:$0xf]  ;;  %v12053_v56 = vld [vmem:[%s18304_s1 + $0x50] sm:$0xff]  ;;  %v12052_v40 = vld [vmem:[%s18304_s1 + $0x48] sm:$0xff] }
0x217c   : > { %s18305_s3 = sld [smem:[#allocation39_spill]] }
0x217d   : > { %16291 = vpow2.f32 %v11751_v6  ;;  %v11749_v26 = vmul.f32 1.442695, %v11745_v7  ;;  %v12051_v6 = vld [vmem:[%s18304_s1 + $0x40] sm:$0xff]  ;;  %v12050_v7 = vld [vmem:[%s18304_s1 + $0x38] sm:$0xff] }
0x217e   : > { %v11741_v60 = vpop.xlane.xlu0 %11740 }
0x217f   : > { %16293 = vpow2.f32 %v11749_v26  ;;  %v11747_v34 = vsub.f32 %v11724_v49, %v11741_v60  ;;  %v12057_v49 = vld [vmem:[%s18304_s1 + $0x70] sm:$0xff]  ;;  %v12048_v60 = vld [vmem:[%s18304_s1 + $0x28] sm:$0xff] }
0x2180   : > { %v12049_v26 = vld [vmem:[%s18304_s1 + $0x30] sm:$0xff] }
0x2181   : > { %v11753_v23 = vmul.f32 1.442695, %v11747_v34  ;;  %v12047_v34 = vld [vmem:[%s18304_s1 + $0x20] sm:$0xff] }
0x2182   : > { %v11744_v14 = vpop.xlane.xlu0 %11743 }
0x2183   : > { %16295 = vpow2.f32 %v11753_v23  ;;  %v11748_v16 = vsub.f32 %v15211_v19, %v11744_v14  ;;  %v12058_v19 = vld [vmem:[%s18304_s1 + $0x78] sm:$0xff] }
0x2184   : > { %v12046_v23 = vld [vmem:[%s18304_s1 + $0x18] sm:$0xff] }
0x2185   : > { %v11755_v28 = vmul.f32 1.442695, %v11748_v16 }
0x2187   : > { %16297 = vpow2.f32 %v11755_v28  ;;  %v12045_v28 = vld [vmem:[%s18304_s1 + $0x10] sm:$0xff] }
0x218a   : > { %v16292_v33 = vpop.eup %16291 }
0x218b   : > { %v11760_v29 = vsel %vm10937_vm11, %v16292_v33, 0.0 }
0x218c   : > { %v16294_v13 = vpop.eup %16293  ;;  %11761 = vadd.xlane.f32.xlu0 %v11760_v29  ;;  %v12043_v29 = vld [vmem:[%s18304_s1] sm:$0xff] }
0x218d   : > { %v11757_v15 = vsel %vm10937_vm11, %v16294_v13, 0.0 }
0x218e   : > { %11758 = vadd.xlane.f32.xlu1 %v11757_v15 }
0x2190   : > { %v16296_v45 = vpop.eup %16295 }
0x2191   : > { %v11763_v21 = vsel %vm10937_vm11, %v16296_v45, 0.0 }
0x2192   : > { %11764 = vadd.xlane.f32.xlu1 %v11763_v21 }
0x2194   : > { %v16298_v31 = vpop.eup %16297 }
0x2195   : > { %v11766_v63 = vsel %vm10937_vm11, %v16298_v31, 0.0 }
0x2196   : > { %11767 = vadd.xlane.f32.xlu0 %v11766_v63 }
0x2215   : > { %v11762_v17 = vpop.xlane.xlu0 %11761 }
0x2216   : > { %16299 = vrcp.f32 %v11762_v17 }
0x2217   : > { %v11759_v52 = vpop.xlane.xlu1 %11758 }
0x2218   : > { %16301 = vrcp.f32 %v11759_v52 }
0x221b   : > { %v11765_v27 = vpop.xlane.xlu1 %11764 }
0x221c   : > { %16303 = vrcp.f32 %v11765_v27 }
0x221f   : > { %v11768_v18 = vpop.xlane.xlu0 %11767 }
0x2220   : > { %16305 = vrcp.f32 %v11768_v18 }
0x2223   : > { %v16300_v53 = vpop.eup %16299 }
0x2224   : > { %v11772_v42 = vmul.f32 %v16300_v53, %v16292_v33  ;;  %v12044_v33 = vld [vmem:[%s18304_s1 + $0x8] sm:$0xff]  ;;  %s13888_s1 = sshll.u32 %s16706_s0, 4 }
0x2225   : > { %v16302_v36 = vpop.eup %16301 }
0x2226   : > { %v11770_v35 = vmul.f32 %v16302_v36, %v16294_v13  ;;  %v13866_v13 = vld [vmem:[%s18305_s3] ss:$0 sm:$0xff]  ;;  %s18148_s3 = sand.u32 1, %s16405_s16  }
0x2227   : > { %s12743_s9 = scalar_lea.sflag [#allocation5], %s18148_s3 }
0x2228   : > { %15214 = vmatprep.mubr.msk.f32.mxu1 %vm10937_vm11, %v11770_v35 }
0x2229   : > { %v16304_v41 = vpop.eup %16303  ;;  %15215 = vmatmul.mubr.msk.f32.vlgmr.msra.gmra.mxu1 %vm10937_vm11, %v11772_v42 }
0x222a   : > { %v11774_v43 = vmul.f32 %v16304_v41, %v16296_v45  ;;  %15232 = vmatpush3.msra.mxu1 %v11962_v46 }
0x222b   : > { %15233 = vmatprep.subr.mxu1 %v16457_v8 }
0x222c   : > { %15217 = vmatprep.mubr.msk.f32.mxu1 %vm10937_vm11, %v11774_v43  ;;  %15234 = vmatpush3.msra.mxu1 %v11961_v51 }
0x222d   : > { %v16306_v32 = vpop.eup %16305  ;;  %15235 = vmatprep.subr.mxu1 %v16457_v8 }
0x222e   : > { %v11776_v44 = vmul.f32 %v16306_v32, %v16298_v31  ;;  %15236 = vmatpush3.msra.mxu1 %v11960_v47  ;;  %v12059_v31 = vld [vmem:[%s18306_s4] sm:$0x3]  ;;  %s18308_s4 = sld [smem:[#allocation42_spill]] }
0x222f   : > { %15237 = vmatprep.subr.mxu1 %v16457_v8  ;;  %v12064_v63 = vrot.slane %v12059_v31, %v17459_v5  ;;  %v12068_v27 = vrot.slane %v12059_v31, %v17463_v37 }
0x2230   : > { %15218 = vmatmul.mubr.msk.f32.gmra.mxu1 %vm10937_vm11, %v11776_v44 }
0x2231   : > { %15247 = vmatprep.mubr.msk.f32.mxu1 %vm16459_vm4, %v16457_v8  ;;  %15238 = vmatpush3.msra.mxu1 %v11959_v24 }
0x2232   : > { %15239 = vmatprep.subr.mxu1 %v16457_v8 }
0x2233   : > { %15240 = vmatpush3.msra.mxu1 %v11958_v55 }
0x2234   : > { %15241 = vmatprep.subr.mxu1 %v16457_v8  ;;  %v12564_v31 = vld [vmem:[%s18308_s4 + $0x30] sm:$0xff] }
0x2235   : > { %15242 = vmatpush3.msra.mxu1 %v11957_v58 }
0x2236   : > { %15243 = vmatprep.subr.mxu1 %v16457_v8 }
0x2237   : > { %15244 = vmatpush3.msra.mxu1 %v11956_v61 }
0x2238   : > { %15245 = vmatprep.subr.mxu1 %v16457_v8 }
0x2239   : > { %15246 = vmatpush3.msra.mxu1 %v11955_v10 }
0x22e9   : > { %v15216_v9 = vpop.f32.mrf.mxu1 }
0x22ea   : > { %v11878_v2 = vmul.f32 %v15216_v9, %v17980_v57 }
0x22eb   : > { %v11858_v11 = vpop.f32.mrf.mxu1 }
0x22ec   : > { %v11877_v3 = vmul.f32 %v11858_v11, %v17977_v59 }
0x22f0   : > { %v15219_v12 = vpop.f32.mrf.mxu1 }
0x22f1   : > { %v11880_v20 = vmul.f32 %v15219_v12, %v17988_v0 }
0x22f2   : > { %v11868_v1 = vpop.f32.mrf.mxu1 }
0x22f3   : > { %v11879_v54 = vmul.f32 %v11868_v1, %v17985_v38  ;;  %15221 = vmatpush3.msra.mxu0 %v11880_v20 }
0x22f4   : > { %15222 = vmatprep.subr.mxu0 %v16457_v8 }
0x22f5   : > { %15223 = vmatpush3.msra.mxu0 %v11879_v54 }
0x22f6   : > { %15224 = vmatprep.subr.mxu0 %v16457_v8 }
0x22f7   : > { %15225 = vmatpush3.msra.mxu0 %v11878_v2 }
0x22f8   : > { %15226 = vmatprep.subr.mxu0 %v16457_v8 }
0x22f9   : > { %15227 = vmatpush3.msra.mxu0 %v11877_v3 }
0x22fa   : > { %15229 = vmatmul.mubr.msk.f32.vlgmr.msra.gmra.mxu0 %vm11881_vm12, %v18033_v4  ;;  %12090 = vmatprep.subr.mxu0 %v12058_v19 }
0x22fb   : > { %12138 = vmatprep.mubr.f32.mxu0 %v16457_v8  ;;  %12091 = vmatpush1.msra.mxu0 %v12057_v49 }
0x22fc   : > { %12092 = vmatprep.subr.mxu0 %v12056_v62 }
0x22fd   : > { %12093 = vmatpush1.msra.mxu0 %v12055_v30 }
0x22fe   : > { %12094 = vmatprep.subr.mxu0 %v12054_v22 }
0x22ff   : > { %12095 = vmatpush1.msra.mxu0 %v12053_v56 }
0x2300   : > { %12096 = vmatprep.subr.mxu0 %v12052_v40 }
0x2301   : > { %12097 = vmatpush1.msra.mxu0 %v12051_v6 }
0x2302   : > { %12098 = vmatprep.subr.mxu0 %v12050_v7 }
0x2303   : > { %12099 = vmatpush1.msra.mxu0 %v12049_v26 }
0x2304   : > { %12100 = vmatprep.subr.mxu0 %v12048_v60 }
0x2305   : > { %12101 = vmatpush1.msra.mxu0 %v12047_v34 }
0x2306   : > { %12102 = vmatprep.subr.mxu0 %v12046_v23 }
0x2307   : > { %12103 = vmatpush1.msra.mxu0 %v12045_v28 }
0x2308   : > { %12104 = vmatprep.subr.mxu0 %v12044_v33 }
0x2309   : > { %12105 = vmatpush1.msra.mxu0 %v12043_v29 }
0x23ba   : > { %v11951_v14 = vpop.f32.mrf.mxu0 }
0x23bb   : > { %15248 = vmatmul.mubr.msk.f32.vlgmr.msra.gmra.mxu1 %vm1658_vm2, %v11951_v14 }
0x23bc   : > { %v15230_v16 = vpop.f32.mrf.mxu0  ;;  %15252 = vmatprep.mubr.msk.f32.mxu1 %vm10937_vm11, %v17945_v39 }
0x247b   : > { %v12039_v15 = vpop.f32.mrf.mxu1 }
0x247c   : > { %v12040_v45 = vadd.f32 %v13866_v13, %v12039_v15 }
0x247d   : > { %v15249_v21 = vpop.f32.mrf.mxu1 }
0x247e   : > { %13868 = vmatmul.mubr.msk.f32.vlgmr.msra.gmra.mxu0 %vm1658_vm2, %v12040_v45  ;;  %v12565_v21 = vld [vmem:[%s18308_s4 + $0x38] sm:$0xff] }
0x253e   : > { %v12140_v17 = vpop.f32.mrf.mxu0 }
0x253f   : > { %v12141_v52 = vadd.f32 %v12140_v17, %v12064_v63  ;;  %v12563_v63 = vld [vmem:[%s18308_s4 + $0x28] sm:$0xff]  ;;  %v12562_v17 = vld [vmem:[%s18308_s4 + $0x20] sm:$0xff] }
0x2540   : > { %v12142_v39 = vpop.f32.mrf.mxu0 }
0x2541   : > { %v12145_v18 = vmul.f32 0.35355338, %v12141_v52  ;;  %12239 = vrot.lane.b32.xlu1 %v12141_v52, %s18307_s5  ;;  %v12143_v53 = vadd.f32 %v12142_v39, %v12068_v27  ;;  %v12561_v52 = vld [vmem:[%s18308_s4 + $0x18] sm:$0xff]  ;;  %v12560_v27 = vld [vmem:[%s18308_s4 + $0x10] sm:$0xff]  ;;  %v12559_v39 = vld [vmem:[%s18308_s4 + $0x8] sm:$0xff]  ;;  %s18309_s5 = sld [smem:[#allocation43_spill]] }
0x2543   : > { %15250 = vmatprep.subr.msk.mxu1 %vm7765_vm6, %v12145_v18 }
0x2544   : > { %15251 = vmatpush3.msk.msra.mxu1 %vm7765_vm6, %v12145_v18 }
0x2545   : > { %15253 = vmatmul.mubr.msk.f32.vlgmr.msra.gmra.mxu1 %vm10937_vm11, %v17954_v25  ;;  %15266 = vmatprep.subr.msk.mxu1 %vm7765_vm6, %v12143_v53 }
0x2546   : > { %15267 = vmatpush3.msk.msra.mxu1 %vm7765_vm6, %v12143_v53  ;;  %15255 = vmatprep.mubr.msk.f32.mxu1 %vm10937_vm11, %v17959_v48 }
0x2547   : > { %15285 = vmatprep.subr.mxu1 %v16457_v8 }
0x2549   : > { %15256 = vmatmul.mubr.msk.f32.gmra.mxu1 %vm10937_vm11, %v17969_v50 }
0x25b3   : > { %v12240_v5 = vpop.permute.xlu1 %12239 }
0x25b4   : > { %15258 = vmatprep.subr.msk.mxu0 %vm1658_vm2, %v12240_v5 }
0x25b5   : > { %15259 = vmatpush3.xpose.msk.msra.mxu0 %vm1658_vm2, %v12240_v5 }
0x25b6   : > { %15274 = vmatprep.subr.mxu0 %v16457_v8 }
0x2605   : > { %v15254_v37 = vpop.f32.mrf.mxu1 }
0x2606   : > { %v12235_v35 = vmul.f32 %v15254_v37, %v17980_v57 }
0x2607   : > { %v12215_v25 = vpop.f32.mrf.mxu1 }
0x2608   : > { %v12234_v36 = vmul.f32 %v12215_v25, %v17977_v59 }
0x2609   : > { %v15257_v42 = vpop.f32.mrf.mxu1 }
0x260a   : > { %15260 = vmatprep.mubr.msk.f32.mxu0 %vm1658_vm2, %v12234_v36  ;;  %v12237_v48 = vmul.f32 %v15257_v42, %v17988_v0 }
0x260b   : > { %15261 = vmatmul.mubr.msk.f32.vlgmr.msra.gmra.mxu0 %vm1658_vm2, %v12235_v35  ;;  %v12225_v50 = vpop.f32.mrf.mxu1 }
0x260c   : > { %v12236_v41 = vmul.f32 %v12225_v50, %v17985_v38  ;;  %v12662_v50 = vld [vmem:[%s16668_s20 + $0x20] sm:$0xff] }
0x260e   : > { %15263 = vmatprep.mubr.msk.f32.mxu0 %vm1658_vm2, %v12236_v41  ;;  %v12661_v41 = vld [vmem:[%s16668_s20 + $0x18] sm:$0xff] }
0x260f   : > { %15264 = vmatmul.mubr.msk.f32.gmra.mxu0 %vm1658_vm2, %v12237_v48  ;;  %v12663_v48 = vld [vmem:[%s16668_s20 + $0x28] sm:$0xff] }
0x2610   : > { %15282 = vmatprep.mubr.msk.f32.mxu0 %vm16459_vm4, %v16457_v8 }
0x26cb   : > { %v15262_v43 = vpop.f32.mrf.mxu0 }
0x26cc   : > { %v12343_v32 = vsel %vm10937_vm11, %v15262_v43, -inf }
0x26cd   : > { %12344 = vmax.xlane.f32.xlu0 %v12343_v32  ;;  %v12321_v44 = vpop.f32.mrf.mxu0  ;;  %v12659_v32 = vld [vmem:[%s16668_s20 + $0x8] sm:$0xff] }
0x26ce   : > { %v12340_v51 = vsel %vm10937_vm11, %v12321_v44, -inf }
0x26cf   : > { %v15265_v46 = vpop.f32.mrf.mxu0 }
0x26d0   : > { %v12349_v55 = vsel %vm10937_vm11, %v15265_v46, -inf }
0x26d1   : > { %12341 = vmax.xlane.f32.xlu0 %v12340_v51  ;;  %v12331_v47 = vpop.f32.mrf.mxu0 }
0x26d2   : > { %v12346_v24 = vsel %vm10937_vm11, %v12331_v47, -inf }
0x26d5   : > { %12347 = vmax.xlane.f32.xlu0 %v12346_v24 }
0x26d9   : > { %12350 = vmax.xlane.f32.xlu0 %v12349_v55 }
0x2756   : > { %v12345_v58 = vpop.xlane.xlu0 %12344 }
0x2757   : > { %v12353_v61 = vsub.f32 %v15262_v43, %v12345_v58  ;;  %v12660_v43 = vld [vmem:[%s16668_s20 + $0x10] sm:$0xff] }
0x2759   : > { %v12358_v9 = vmul.f32 1.442695, %v12353_v61 }
0x275a   : > { %v12342_v11 = vpop.xlane.xlu0 %12341 }
0x275b   : > { %16307 = vpow2.f32 %v12358_v9  ;;  %v12352_v12 = vsub.f32 %v12321_v44, %v12342_v11  ;;  %v12658_v44 = vld [vmem:[%s16668_s20] sm:$0xff] }
0x275d   : > { %v12356_v20 = vmul.f32 1.442695, %v12352_v12 }
0x275e   : > { %v12348_v1 = vpop.xlane.xlu0 %12347 }
0x275f   : > { %16309 = vpow2.f32 %v12356_v20  ;;  %v12354_v54 = vsub.f32 %v12331_v47, %v12348_v1 }
0x2761   : > { %v12360_v2 = vmul.f32 1.442695, %v12354_v54 }
0x2762   : > { %v12351_v3 = vpop.xlane.xlu0 %12350 }
0x2763   : > { %16311 = vpow2.f32 %v12360_v2  ;;  %v12355_v10 = vsub.f32 %v15265_v46, %v12351_v3  ;;  %v13885_v46 = vld [vmem:[%s18309_s5] ss:$0 sm:$0xff]  ;;  %s1262_s5 = scalar_lea.vmem [#allocation4], %s18148_s3 }
0x2764   : > { %s12759_s8 = sshll.u32 %s1262_s5, 4  ;;  %s12760_s8 = int_to_ptr.vmem [resolvable:$true] %s12759_s8 }
0x2765   : > { %v12362_v19 = vmul.f32 1.442695, %v12355_v10  ;;  %s16323_s11 = scalar_lea.vmem %s12760_s8, 16  ;;  %p16330_p0 = scmp.lt.s32.totalorder %s12760_s8, %s16328_s14 }
0x2766   : > { %p16324_p11 = scmp.ne.s32.totalorder %s12760_s8, %s16323_s11  ;;  %p16331_p1 = scmp.lt.s32.totalorder %s16329_s17, %s16323_s11 }
0x2767   : > { %16313 = vpow2.f32 %v12362_v19 }
0x2768   : > { %v16308_v49 = vpop.eup %16307  ;;  %p16325_p12 = pnand %p16324_p11, %p16723_p5  ;;  %p16332_p2 = por %p16331_p1, %p16330_p0 }
0x2769   : > { %v12367_v62 = vsel %vm10937_vm11, %v16308_v49, 0.0 }
0x276a   : > { %12368 = vadd.xlane.f32.xlu0 %v12367_v62  ;;  %p16326_p13 = pneg %p16325_p12 }
0x276c   : > { %v16310_v30 = vpop.eup %16309  ;;  %p16333_p3 = pnand %p16332_p2, %p16326_p13 }
0x276d   : > { %v12364_v22 = vsel %vm10937_vm11, %v16310_v30, 0.0 }
0x276e   : > { %12365 = vadd.xlane.f32.xlu1 %v12364_v22 }
0x2770   : > { %v16312_v56 = vpop.eup %16311 }
0x2771   : > { %v12370_v40 = vsel %vm10937_vm11, %v16312_v56, 0.0 }
0x2772   : > { %12371 = vadd.xlane.f32.xlu0 %v12370_v40 }
0x2774   : > { %v16314_v6 = vpop.eup %16313 }
0x2775   : > { %v12373_v7 = vsel %vm10937_vm11, %v16314_v6, 0.0 }
0x2776   : > { %12374 = vadd.xlane.f32.xlu0 %v12373_v7 }
0x27f3   : > { %v12369_v26 = vpop.xlane.xlu0 %12368 }
0x27f4   : > { %16315 = vrcp.f32 %v12369_v26 }
0x27f7   : > { %v12366_v60 = vpop.xlane.xlu1 %12365 }
0x27f8   : > { %16317 = vrcp.f32 %v12366_v60 }
0x27fb   : > { %v12372_v34 = vpop.xlane.xlu0 %12371 }
0x27fc   : > { %16319 = vrcp.f32 %v12372_v34 }
0x27ff   : > { %v12375_v23 = vpop.xlane.xlu0 %12374 }
0x2800   : > { %16321 = vrcp.f32 %v12375_v23 }
0x2801   : > { %v16316_v14 = vpop.eup %16315 }
0x2802   : > { %v12379_v33 = vmul.f32 %v16316_v14, %v16308_v49 }
0x2805   : > { %v16318_v16 = vpop.eup %16317 }
0x2806   : > { %v12377_v28 = vmul.f32 %v16318_v16, %v16310_v30 }
0x2808   : > { %15268 = vmatprep.mubr.msk.f32.mxu1 %vm10937_vm11, %v12377_v28 }
0x2809   : > { %v16320_v29 = vpop.eup %16319  ;;  %15269 = vmatmul.mubr.msk.f32.vlgmr.msra.gmra.mxu1 %vm10937_vm11, %v12379_v33 }
0x280a   : > { %v12381_v13 = vmul.f32 %v16320_v29, %v16312_v56  ;;  %15286 = vmatpush3.msra.mxu1 %v12565_v21 }
0x280b   : > { %15287 = vmatprep.subr.mxu1 %v16457_v8 }
0x280c   : > { %15271 = vmatprep.mubr.msk.f32.mxu1 %vm10937_vm11, %v12381_v13  ;;  %15288 = vmatpush3.msra.mxu1 %v12564_v31 }
0x280d   : > { %v16322_v15 = vpop.eup %16321  ;;  %15289 = vmatprep.subr.mxu1 %v16457_v8 }
0x280e   : > { %v12383_v45 = vmul.f32 %v16322_v15, %v16314_v6  ;;  %15290 = vmatpush3.msra.mxu1 %v12563_v63 }
0x280f   : > { %15291 = vmatprep.subr.mxu1 %v16457_v8 }
0x2810   : > { %15272 = vmatmul.mubr.msk.f32.gmra.mxu1 %vm10937_vm11, %v12383_v45 }
0x2811   : > { %15301 = vmatprep.mubr.msk.f32.mxu1 %vm16459_vm4, %v16457_v8  ;;  %15292 = vmatpush3.msra.mxu1 %v12562_v17 }
0x2812   : > { %15293 = vmatprep.subr.mxu1 %v16457_v8 }
0x2813   : > { %15294 = vmatpush3.msra.mxu1 %v12561_v52 }
0x2814   : > { %15295 = vmatprep.subr.mxu1 %v16457_v8 }
0x2815   : > { %15296 = vmatpush3.msra.mxu1 %v12560_v27 }
0x2816   : > { %15297 = vmatprep.subr.mxu1 %v16457_v8 }
0x2817   : > { %15298 = vmatpush3.msra.mxu1 %v12559_v39 }
0x2818   : > { %15299 = vmatprep.subr.mxu1 %v16457_v8 }
0x28c9   : > { %v15270_v18 = vpop.f32.mrf.mxu1 }
0x28ca   : > { %v12485_v35 = vmul.f32 %v15270_v18, %v17980_v57  ;;  %v12558_v57 = vld [vmem:[%s18308_s4] sm:$0xff]  ;;  %s12757_s4 = scalar_lea.hbm %s16678_s30, %s13888_s1 }
0x28cb   : > { %v12465_v53 = vpop.f32.mrf.mxu1  ;;  %15300 = vmatpush3.msra.mxu1 %v12558_v57 }
0x28cc   : > { %v12484_v42 = vmul.f32 %v12465_v53, %v17977_v59 }
0x28d0   : > { %v15273_v5 = vpop.f32.mrf.mxu1 }
0x28d1   : > { %v12487_v37 = vmul.f32 %v15273_v5, %v17988_v0  ;;  %v12665_v0 = vld [vmem:[%s16668_s20 + $0x38] sm:$0xff] }
0x28d2   : > { %v12475_v25 = vpop.f32.mrf.mxu1 }
0x28d3   : > { %v12486_v36 = vmul.f32 %v12475_v25, %v17985_v38  ;;  %15275 = vmatpush3.msra.mxu0 %v12487_v37 }
0x28d4   : > { %15276 = vmatprep.subr.mxu0 %v16457_v8 }
0x28d5   : > { %15277 = vmatpush3.msra.mxu0 %v12486_v36 }
0x28d6   : > { %15278 = vmatprep.subr.mxu0 %v16457_v8 }
0x28d7   : > { %15279 = vmatpush3.msra.mxu0 %v12485_v35 }
0x28d8   : > { %15280 = vmatprep.subr.mxu0 %v16457_v8 }
0x28d9   : > { %15281 = vmatpush3.msra.mxu0 %v12484_v42 }
0x28da   : > { %15283 = vmatmul.mubr.msk.f32.vlgmr.msra.gmra.mxu0 %vm11881_vm12, %v18033_v4  ;;  %15304 = vmatprep.subr.mxu0 %v16457_v8  ;;  %v12664_v4 = vld [vmem:[%s16668_s20 + $0x30] sm:$0xff] }
0x28db   : > { %15320 = vmatprep.mubr.msk.f32.mxu0 %vm16459_vm4, %v16457_v8  ;;  %15305 = vmatpush3.msra.mxu0 %v12665_v0 }
0x28dc   : > { %15306 = vmatprep.subr.mxu0 %v16457_v8 }
0x28dd   : > { %15307 = vmatpush3.msra.mxu0 %v12664_v4 }
0x28de   : > { %15308 = vmatprep.subr.mxu0 %v16457_v8 }
0x28df   : > { %15309 = vmatpush3.msra.mxu0 %v12663_v48 }
0x28e0   : > { %15310 = vmatprep.subr.mxu0 %v16457_v8 }
0x28e1   : > { %15311 = vmatpush3.msra.mxu0 %v12662_v50 }
0x28e2   : > { %15312 = vmatprep.subr.mxu0 %v16457_v8 }
0x28e3   : > { %15313 = vmatpush3.msra.mxu0 %v12661_v41 }
0x28e4   : > { %15314 = vmatprep.subr.mxu0 %v16457_v8 }
0x28e5   : > { %15315 = vmatpush3.msra.mxu0 %v12660_v43 }
0x28e6   : > { %15316 = vmatprep.subr.mxu0 %v16457_v8 }
0x28e7   : > { %15317 = vmatpush3.msra.mxu0 %v12659_v32 }
0x28e8   : > { %15318 = vmatprep.subr.mxu0 %v16457_v8 }
0x28e9   : > { %15319 = vmatpush3.msra.mxu0 %v12658_v44 }
0x299a   : > { %v12554_v38 = vpop.f32.mrf.mxu0 }
0x299b   : > { %15302 = vmatmul.mubr.msk.f32.vlgmr.msra.gmra.mxu1 %vm1658_vm2, %v12554_v38 }
0x299c   : > { %v15284_v59 = vpop.f32.mrf.mxu0 }
0x2a5b   : > { %v12642_v51 = vpop.f32.mrf.mxu1 }
0x2a5c   : > { %v12643_v47 = vadd.f32 %v13885_v46, %v12642_v51 }
0x2a5d   : > { %v15303_v24 = vpop.f32.mrf.mxu1 }
0x2a5e   : > { %v12647_v55 = vsel %vm12646_vm13, %v12643_v47, 0.0 }
0x2a5f   : > { %v12648_v58 = vrot.slane %v12647_v55, 4 }
0x2a61   : > { %v12649_v61 = vadd.f32 %v12648_v58, %v12647_v55 }
0x2a63   : > { %v12650_v9 = vrot.slane %v12649_v61, 2 }
0x2a65   : > { %v12651_v11 = vadd.f32 %v12650_v9, %v12649_v61 }
0x2a67   : > { %v12652_v12 = vrot.slane %v12651_v11, 1 }
0x2a69   : > { %v12653_v8 = vadd.f32 %v12652_v12, %v12651_v11 }
0x2a6b   : > { %v12655_v20 = vmul.f32 0.25, %v12653_v8 }
0x2a6d   : > { %15321 = vmatmul.mubr.msk.f32.vlgmr.msra.gmra.mxu0 %vm1658_vm2, %v12655_v20  ;;  %12657 = vst.msk [vmem:[%s1262_s5] sm:$0x1] %vm12656_vm14, %v12655_v20 }
0x2a6e   : > { %16336 = shalt.err (!%p16333_p3)
}
0x2a6f   : > { %s16337_s19 = scalar_lea.hbm %s12757_s4, 16  ;;  %s16341_s5 = scalar_lea.hbm %s16678_s30, 32 }
0x2a70   : > { %p16338_p4 = scmp.ne.s32.totalorder %s12757_s4, %s16337_s19  ;;  %p16342_p9 = scmp.lt.s32.totalorder %s12757_s4, %s16678_s30 }
0x2a71   : > { %p16343_p10 = scmp.lt.s32.totalorder %s16341_s5, %s16337_s19 }
0x2a72   : > { %p16339_p7 = pnand %p16338_p4, %p16723_p5 }
0x2a73   : > { %p16344_p11 = por %p16343_p10, %p16342_p9 }
0x2a74   : > { %p16340_p8 = pneg %p16339_p7 }
0x2a76   : > { %p16345_p12 = pnand %p16344_p11, %p16340_p8 }
0x2a78   : > { %16348 = shalt.err (!%p16345_p12)
}
0x2a79   : > { %15323 = dma.vmem_to_hbm [thread:$0]  (%p16723_p5), %s12760_s8, 16, %s12757_s4, %s12743_s9   ;;  %v12666_v1 = vld [vmem:[%s16673_s6] sm:$0x1]  ;;  %vm12740_vm15 = vcmask 73728  }
0x2a7a   : > { %s1268_s13 = scalar_lea.vmem [#allocation6], %s18148_s3  ;;  %s18170_s14 = scalar_lea.hbm %s16683_s12, %s13888_s1 }
0x2a7b   : > { %s12772_s17 = sshll.u32 %s1268_s13, 4  ;;  %s12747_s19 = scalar_lea.sflag [#allocation7], %s18148_s3  ;;  %s12773_s17 = int_to_ptr.vmem [resolvable:$true] %s12772_s17 }
0x2a7c   : > { %s16349_s11 = scalar_lea.vmem %s12773_s17, 16  ;;  %s16464_s5 = smov [#allocation6]  }
0x2a7d   : > { %p16350_p13 = scmp.ne.s32.totalorder %s12773_s17, %s16349_s11  ;;  %s16353_s9 = sshll.u32 %s16464_s5, 4  ;;  %s16354_s9 = int_to_ptr.vmem [resolvable:$false] %s16353_s9 }
0x2a7e   : > { %s16355_s8 = scalar_lea.vmem %s16354_s9, 32  ;;  %p16356_p2 = scmp.lt.s32.totalorder %s12773_s17, %s16354_s9 }
0x2a7f   : > { %p16351_p0 = pnand %p16350_p13, %p16723_p5  ;;  %p16357_p3 = scmp.lt.s32.totalorder %s16355_s8, %s16349_s11 }
0x2a81   : > { %p16352_p1 = pneg %p16351_p0  ;;  %p16358_p4 = por %p16357_p3, %p16356_p2 }
0x2a83   : > { %p16359_p7 = pnand %p16358_p4, %p16352_p1 }
0x2b2d   : > { %v12736_v54 = vpop.f32.mrf.mxu0 }
0x2b2e   : > { %v12737_v2 = vadd.f32 %v12736_v54, %v12666_v1 }
0x2b2f   : > { %v15322_v3 = vpop.f32.mrf.mxu0 }
0x2b30   : > { %12741 = vst.msk [vmem:[%s1268_s13] sm:$0x1] %vm12740_vm15, %v12737_v2 }
0x2b31   : > { %16362 = shalt.err (!%p16359_p7)
}
0x2b32   : > { %s16363_s0 = scalar_lea.hbm %s18170_s14, 16  ;;  %s16367_s1 = scalar_lea.hbm %s16683_s12, 32 }
0x2b33   : > { %p16364_p8 = scmp.ne.s32.totalorder %s18170_s14, %s16363_s0  ;;  %p16368_p11 = scmp.lt.s32.totalorder %s18170_s14, %s16683_s12 }
0x2b34   : > { %p16369_p12 = scmp.lt.s32.totalorder %s16367_s1, %s16363_s0 }
0x2b35   : > { %p16365_p9 = pnand %p16364_p8, %p16723_p5 }
0x2b36   : > { %p16370_p13 = por %p16369_p12, %p16368_p11 }
0x2b37   : > { %p16366_p10 = pneg %p16365_p9 }
0x2b39   : > { %p16371_p0 = pnand %p16370_p13, %p16366_p10 }
0x2b3b   : > { %16374 = shalt.err (!%p16371_p0)
}
0x2b3c   : > { %15324 = dma.vmem_to_hbm [thread:$0]  (%p16723_p5), %s12773_s17, 16, %s18170_s14, %s12747_s19  }
0x2b3d PF: > { %p15334_p1 = scmp.ge.s32.totalorder %s16413_s22, 2  ;;  %s12784_s4 = sand.u32 1, %s16401_s15  }
0x2b3e   : > { %s12785_s3 = scalar_lea.sflag [#allocation5], %s12784_s4 }
0x2b3f   : > { %p15328_p2 = pnand %p15334_p1, %p16727_p6 }
0x2b41   : > { %p15329_p3 = pneg %p15328_p2 }
0x2b43   : > { %16392 = dma.done.wait (%p15329_p3), %s12785_s3, 16  }
0x2b44   : > { %16394 = vsyncadd (%p15329_p3), %s12785_s3, 4294967280  ;;  %s12793_s13 = scalar_lea.sflag [#allocation7], %s12784_s4 }
0x2b45   : > { %16396 = dma.done.wait (%p15329_p3), %s12793_s13, 16  }
0x2b46   : > { %16398 = vsyncadd (%p15329_p3), %s12793_s13, 4294967280  ;;  %p99_p5 = scmp.ge.s32.totalorder %s16710_s26, 4   ;;  %s18310_s15 = smov %s16405_s16 }
0x2b47   : > { %s18311_s16 = smov %s16409_s18  ;;  %s18312_s18 = smov %s16721_s2 }
0x2b48   : > { %s18313_s22 = smov %s16710_s26  ;;  %101 = sbr.rel (!%p99_p5) target bundleno = 86 (0x56), region = 281 }
0x2b4d   :  { %12797 = vsyncpa [#allocation5], 1 }
0x2b4e   :  { %12799 = vsyncpa [#allocation5 + $0x1], 1 }
0x2b4f   :  { %12800 = vsyncpa [#allocation7], 1 }
0x2b50   :  { %12802 = vsyncpa [#allocation7 + $0x1], 1 }

</bundles_post_ra>
